<compile_context>
chip_gen: v7x
topology: tpu7x:2x2x1
jax: 0.10.0
libtpu: 0.0.40
codegen_flags: <defaults>
</compile_context>

<pallas_src>
import functools

import jax
import jax.numpy as jnp
from jax.experimental import pallas as pl
from jax.experimental.pallas import tpu as pltpu

SMEM = pltpu.MemorySpace.SMEM


def _round_up(x, m):
    return ((x + m - 1) // m) * m


# ------------------------------------------------------------------ fused tiled matmul

def _fused_mm_kernel(a_ref, b_ref, asc_ref, ash_ref, osc_ref, osh_ref, o_ref, acc_ref,
                     *, a_affine, a_relu, o_affine, o_relu):
    k = pl.program_id(2)

    @pl.when(k == 0)
    def _():
        acc_ref[...] = jnp.zeros_like(acc_ref)

    a = a_ref[...]
    if a_affine or a_relu:                       # BN(+ReLU) prologue, f32 on the VPU
        af = a.astype(jnp.float32)
        if a_affine:
            af = af * asc_ref[...] + ash_ref[...]
        if a_relu:
            af = jnp.maximum(af, 0.0)
        a = af.astype(jnp.bfloat16)

    acc_ref[...] += jnp.dot(a, b_ref[...], preferred_element_type=jnp.float32)

    @pl.when(k == pl.num_programs(2) - 1)
    def _():
        y = acc_ref[...]
        if o_affine:                             # BN / bias epilogue, f32
            y = y * osc_ref[...] + osh_ref[...]
        if o_relu:
            y = jnp.maximum(y, 0.0)
        o_ref[...] = y.astype(o_ref.dtype)


def fused_matmul(a, b, *, a_scale=None, a_shift=None, a_relu=False,
                 o_scale=None, o_shift=None, o_relu=False,
                 out_dtype=jnp.bfloat16, tm=256, tn=256, tk=512):
    """(M,K) @ (K,N) with optional fused per-column prologue on A and epilogue on out.

    Operands are cast to bf16 (f32 accumulation) and padded to tile multiples so
    every store is lane-dense; the result is sliced back to (M, N).
    Tile sizes are sized well under the v7x 64 MiB VMEM budget.
    """
    M, K = a.shape
    Kb, N = b.shape
    assert K == Kb
    a_affine = a_scale is not None
    o_affine = o_scale is not None

    tm_e = min(tm, _round_up(M, 16))
    tk_e = min(tk, _round_up(K, 128))
    tn_e = min(tn, _round_up(N, 128))
    Mp, Kp, Np = _round_up(M, tm_e), _round_up(K, tk_e), _round_up(N, tn_e)

    a_p = jnp.pad(a.astype(jnp.bfloat16), ((0, Mp - M), (0, Kp - K)))
    b_p = jnp.pad(b.astype(jnp.bfloat16), ((0, Kp - K), (0, Np - N)))

    def _vec(v, n, n_pad, default):
        if v is None:
            v = jnp.full((n,), default, jnp.float32)
        return jnp.pad(v.astype(jnp.float32), (0, n_pad - n)).reshape(1, n_pad)

    asc = _vec(a_scale, K, Kp, 1.0)
    ash = _vec(a_shift, K, Kp, 0.0)
    osc = _vec(o_scale, N, Np, 1.0)
    osh = _vec(o_shift, N, Np, 0.0)

    grid = (Mp // tm_e, Np // tn_e, Kp // tk_e)
    kernel = functools.partial(_fused_mm_kernel, a_affine=a_affine, a_relu=a_relu,
                               o_affine=o_affine, o_relu=o_relu)
    out = pl.pallas_call(
        kernel,
        out_shape=jax.ShapeDtypeStruct((Mp, Np), out_dtype),
        grid=grid,
        in_specs=[
            pl.BlockSpec((tm_e, tk_e), lambda i, j, k: (i, k)),
            pl.BlockSpec((tk_e, tn_e), lambda i, j, k: (k, j)),
            pl.BlockSpec((1, tk_e), lambda i, j, k: (0, k)),
            pl.BlockSpec((1, tk_e), lambda i, j, k: (0, k)),
            pl.BlockSpec((1, tn_e), lambda i, j, k: (0, j)),
            pl.BlockSpec((1, tn_e), lambda i, j, k: (0, j)),
        ],
        out_specs=pl.BlockSpec((tm_e, tn_e), lambda i, j, k: (i, j)),
        scratch_shapes=[pltpu.VMEM((tm_e, tn_e), jnp.float32)],
        compiler_params=pltpu.CompilerParams(
            dimension_semantics=("parallel", "parallel", "arbitrary"),
            vmem_limit_bytes=48 * 1024 * 1024),
        cost_estimate=pl.CostEstimate(
            flops=2 * Mp * Np * Kp,
            transcendentals=0,
            bytes_accessed=2 * (Mp * Kp + Kp * Np)
            + Mp * Np * jnp.dtype(out_dtype).itemsize),
    )(a_p, b_p, asc, ash, osc, osh)
    return out[:M, :N]


# ------------------------------------------------------------------ pooling kernels

def _pool_kernel(x_ref, o_ref, *, op):
    x = x_ref[...].astype(jnp.float32)
    r = jnp.max(x, axis=1) if op == "max" else jnp.mean(x, axis=1)
    o_ref[...] = r.astype(o_ref.dtype)


def pallas_pool_reduce(patches, op, tile=512):
    # patches: (M, K, C) -> (M, C); tiled over M so it scales past VMEM.
    M, K, C = patches.shape
    t = min(tile, _round_up(M, 16))
    Mp = _round_up(M, t)
    pad_val = -jnp.inf if op == "max" else 0.0
    xp = jnp.pad(patches, ((0, Mp - M), (0, 0), (0, 0)), constant_values=pad_val)
    out = pl.pallas_call(
        functools.partial(_pool_kernel, op=op),
        out_shape=jax.ShapeDtypeStruct((Mp, C), patches.dtype),
        grid=(Mp // t,),
        in_specs=[pl.BlockSpec((t, K, C), lambda i: (i, 0, 0))],
        out_specs=pl.BlockSpec((t, C), lambda i: (i, 0)),
        compiler_params=pltpu.CompilerParams(dimension_semantics=("parallel",)),
    )(xp)
    return out[:M]


def _gem_kernel(x_ref, sc_ref, sh_ref, p_ref, o_ref, *, eps):
    # norm5 (no relu) fused as a prologue, then GeM pooling over the full spatial extent.
    x = x_ref[...].astype(jnp.float32) * sc_ref[...] + sh_ref[...]
    x = jnp.maximum(x, eps)                                   # clamp(min=eps)
    # TODO(synk): elementwise pow specialized to the p=3 init value (x*x*x on the VPU);
    # the learnable exponent p is still applied for the final 1/p root on the reduced map.
    m = jnp.mean(x * x * x, axis=1, keepdims=True)            # (1, 1, C)
    o_ref[...] = jnp.exp(jnp.log(m) / p_ref[0])               # (...) ** (1/p)


def pallas_gem(x3d, scale, shift, p, eps=1e-6):
    # x3d: (N, H*W, C) bf16 -> (N, C) f32, one image per grid step.
    N, HW, C = x3d.shape
    out = pl.pallas_call(
        functools.partial(_gem_kernel, eps=eps),
        out_shape=jax.ShapeDtypeStruct((N, 1, C), jnp.float32),
        grid=(N,),
        in_specs=[pl.BlockSpec((1, HW, C), lambda b: (b, 0, 0)),
                  pl.BlockSpec((1, C), lambda b: (0, 0)),
                  pl.BlockSpec((1, C), lambda b: (0, 0)),
                  pl.BlockSpec(memory_space=SMEM)],
        out_specs=pl.BlockSpec((1, 1, C), lambda b: (b, 0, 0)),
        compiler_params=pltpu.CompilerParams(dimension_semantics=("parallel",)),
    )(x3d, scale.reshape(1, C).astype(jnp.float32),
      shift.reshape(1, C).astype(jnp.float32),
      p.reshape(1).astype(jnp.float32))
    return out.reshape(N, C)


# ------------------------------------------------------------------ JAX glue (layout / im2col)

def im2col(x, kh, kw, stride, pad, pad_value=0.0):
    # x: (N, H, W, C) NHWC -> patches (N, Ho, Wo, kh*kw, C)
    # TODO(synk): patches are still materialized in HBM (bf16); a fully streamed conv
    # would fold the kh*kw expansion into the matmul K-grid via shifted-window index_maps.
    N, H, W, C = x.shape
    xp = jnp.pad(x, ((0, 0), (pad, pad), (pad, pad), (0, 0)), constant_values=pad_value)
    Ho = (H + 2 * pad - kh) // stride + 1
    Wo = (W + 2 * pad - kw) // stride + 1
    cols = []
    for i in range(kh):
        for j in range(kw):
            cols.append(xp[:, i:i + stride * Ho:stride, j:j + stride * Wo:stride, :])
    patches = jnp.stack(cols, axis=3)
    return patches, (N, Ho, Wo)


def conv1x1(x, w, **mm_kw):
    # 1x1 conv fast path: no im2col, just reshape NHWC -> (N*H*W, C) and matmul.
    O, I, _, _ = w.shape
    N, H, W, C = x.shape
    wm = jnp.transpose(w, (2, 3, 1, 0)).reshape(I, O)
    y = fused_matmul(x.reshape(N * H * W, C), wm, **mm_kw)
    return y.reshape(N, H, W, O)


def conv2d(x, w, stride=1, pad=0, **mm_kw):
    # x: NHWC bf16; w: (O, I, kh, kw) (PyTorch layout), bias-free.
    O, I, kh, kw = w.shape
    if kh == 1 and kw == 1 and pad == 0 and stride == 1:
        return conv1x1(x, w, **mm_kw)
    patches, (N, Ho, Wo) = im2col(x, kh, kw, stride, pad)
    a = patches.reshape(N * Ho * Wo, kh * kw * I)
    wm = jnp.transpose(w, (2, 3, 1, 0)).reshape(kh * kw * I, O)
    y = fused_matmul(a, wm, **mm_kw)
    return y.reshape(N, Ho, Wo, O)


def maxpool2d(x, k, stride, pad):
    patches, (N, Ho, Wo) = im2col(x, k, k, stride, pad, pad_value=-jnp.inf)
    C = x.shape[-1]
    y = pallas_pool_reduce(patches.reshape(N * Ho * Wo, k * k, C), "max")
    return y.reshape(N, Ho, Wo, C)


def avgpool2d(x, k, stride):
    patches, (N, Ho, Wo) = im2col(x, k, k, stride, 0)
    C = x.shape[-1]
    y = pallas_pool_reduce(patches.reshape(N * Ho * Wo, k * k, C), "mean")
    return y.reshape(N, Ho, Wo, C)


def fold_bn(bn, eps=1e-5):
    # inference-mode batchnorm folded to per-channel scale/shift (f32)
    scale = bn["gamma"] / jnp.sqrt(bn["var"] + eps)
    shift = bn["beta"] - bn["mean"] * scale
    return scale, shift


# ------------------------------------------------------------------ parameters

def init_params(key, input_channel=3, num_init_features=64, growth_rate=8,
                bn_size=4, block_config=(2, 2), gr_size=8, vd_size=8, cd_size=8):
    keys = iter(jax.random.split(key, 256))

    def conv_w(k, o, i, kh, kw):
        return jax.random.normal(k, (o, i, kh, kw), jnp.float32) * ((i * kh * kw) ** -0.5)

    def bn_p(k, c):
        k1, k2, k3 = jax.random.split(k, 3)
        return {"gamma": 1.0 + 0.1 * jax.random.normal(k1, (c,), jnp.float32),
                "beta": 0.1 * jax.random.normal(k2, (c,), jnp.float32),
                "mean": 0.1 * jax.random.normal(k3, (c,), jnp.float32),
                "var": jnp.ones((c,), jnp.float32)}

    p = {}
    # features.conv0 replaced per the module: Conv2d(input_channel, 64, 7, s=2, p=3, bias=False)
    p["conv0"] = conv_w(next(keys), num_init_features, input_channel, 7, 7)
    p["norm0"] = bn_p(next(keys), num_init_features)

    blocks = []
    ch = num_init_features
    for bi, nlayers in enumerate(block_config):
        layers = []
        for _ in range(nlayers):
            layers.append({
                "norm1": bn_p(next(keys), ch),
                "conv1": conv_w(next(keys), bn_size * growth_rate, ch, 1, 1),
                "norm2": bn_p(next(keys), bn_size * growth_rate),
                "conv2": conv_w(next(keys), growth_rate, bn_size * growth_rate, 3, 3),
            })
            ch += growth_rate
        block = {"layers": layers}
        if bi != len(block_config) - 1:
            block["trans"] = {"norm": bn_p(next(keys), ch),
                              "conv": conv_w(next(keys), ch // 2, ch, 1, 1)}
            ch = ch // 2
        blocks.append(block)
    p["blocks"] = blocks
    p["norm5"] = bn_p(next(keys), ch)

    p["gem_p"] = jnp.array([3.0], jnp.float32)   # GeM p parameter (ones(1) * 3)

    dim_feats = ch

    def head(k, out):
        k1, k2 = jax.random.split(k)
        return {"w": jax.random.normal(k1, (dim_feats, out), jnp.float32) * (dim_feats ** -0.5),
                "b": 0.01 * jax.random.normal(k2, (out,), jnp.float32)}

    # TODO(synk): `Head` class not provided in the source; implemented as a Linear layer.
    p["fc_gr"] = head(next(keys), gr_size)
    p["fc_vd"] = head(next(keys), vd_size)
    p["fc_cd"] = head(next(keys), cd_size)
    return p, dim_feats


# ------------------------------------------------------------------ forward

def densenet_forward(params, data_nchw):
    # data: (N, C, H, W) like PyTorch; converted to NHWC bf16 once at the boundary.
    x = jnp.transpose(data_nchw, (0, 2, 3, 1)).astype(jnp.bfloat16)

    # --- base_model.features ---
    # conv0 (7x7 / s2) with norm0 + relu0 fused as the matmul epilogue
    s0, h0 = fold_bn(params["norm0"])
    x = conv2d(x, params["conv0"], stride=2, pad=3, o_scale=s0, o_shift=h0, o_relu=True)
    x = maxpool2d(x, 3, 2, 1)                                 # pool0

    for block in params["blocks"]:
        for layer in block["layers"]:                         # _DenseLayer
            s1, h1 = fold_bn(layer["norm1"])
            s2, h2 = fold_bn(layer["norm2"])
            # norm1+relu1 fused as prologue, 1x1 bottleneck, norm2+relu2 fused as epilogue
            y = conv1x1(x, layer["conv1"], a_scale=s1, a_shift=h1, a_relu=True,
                        o_scale=s2, o_shift=h2, o_relu=True)
            y = conv2d(y, layer["conv2"], stride=1, pad=1)    # 3x3
            # TODO(synk): per-layer concat still copies the growing map each layer; an
            # in-place channel slab (offset out BlockSpec + input_output_aliases) would
            # remove this traffic at real resolutions.
            x = jnp.concatenate([x, y], axis=-1)              # dense connectivity
        if "trans" in block:                                  # _Transition
            st, ht = fold_bn(block["trans"]["norm"])
            x = conv1x1(x, block["trans"]["conv"], a_scale=st, a_shift=ht, a_relu=True)
            x = avgpool2d(x, 2, 2)

    # --- norm5 (no relu) fused into GeM; GeM pooling + view(-1, dim_feats) ---
    s5, h5 = fold_bn(params["norm5"])
    N, H, W, C = x.shape
    feats = pallas_gem(x.reshape(N, H * W, C), s5, h5, params["gem_p"], eps=1e-6)

    # --- heads: merged into a single lane-dense matmul, split afterwards ---
    w_heads = jnp.concatenate([params["fc_gr"]["w"], params["fc_vd"]["w"],
                               params["fc_cd"]["w"]], axis=1)
    b_heads = jnp.concatenate([params["fc_gr"]["b"], params["fc_vd"]["b"],
                               params["fc_cd"]["b"]])
    heads = fused_matmul(feats, w_heads,
                         o_scale=jnp.ones_like(b_heads), o_shift=b_heads,
                         out_dtype=jnp.float32)
    g = params["fc_gr"]["w"].shape[1]
    v = params["fc_vd"]["w"].shape[1]
    gr = heads[:, :g]
    vd = heads[:, g:g + v]
    cd = heads[:, g + v:]

    # mirrors `return np.array([gr, vd, cd])`
    return jnp.stack([gr, vd, cd], axis=0)


if __name__ == "__main__":
    key = jax.random.PRNGKey(0)
    kp, kx = jax.random.split(key)

    params, dim_feats = init_params(kp)
    data = jax.random.normal(kx, (2, 3, 32, 32), jnp.float32)   # NCHW input (small)

    fwd = jax.jit(densenet_forward)
    out = fwd(params, data)
    jax.block_until_ready(out)

    assert out.shape == (3, 2, 8), out.shape
    assert jnp.all(jnp.isfinite(out))
    print("KERNEL_OK")
</pallas_src>

<mosaic_0001>
module attributes {stable_mosaic.version = 11 : i64} {
  func.func @_fused_mm_kernel(%arg0: i32, %arg1: i32, %arg2: i32, %arg3: memref<256x256xbf16, #tpu.memory_space<vmem>>, %arg4: memref<256x128xbf16, #tpu.memory_space<vmem>>, %arg5: memref<1x256xf32, #tpu.memory_space<vmem>>, %arg6: memref<1x256xf32, #tpu.memory_space<vmem>>, %arg7: memref<1x128xf32, #tpu.memory_space<vmem>>, %arg8: memref<1x128xf32, #tpu.memory_space<vmem>>, %arg9: memref<256x128xbf16, #tpu.memory_space<vmem>>, %arg10: memref<256x128xf32, #tpu.memory_space<vmem>>) attributes {dimension_semantics = [#tpu.dimension_semantics<parallel>, #tpu.dimension_semantics<parallel>, #tpu.dimension_semantics<arbitrary>], iteration_bounds = array<i64: 2, 1, 1>, scalar_prefetch = 0 : i64, scratch_operands = 1 : i64, tpu.core_type = #tpu.core_type<tc>, window_params = [{transform_indices = @transform_0, window_bounds = array<i64: 256, 256>}, {transform_indices = @transform_1, window_bounds = array<i64: 256, 128>}, {transform_indices = @transform_2, window_bounds = array<i64: 1, 256>}, {transform_indices = @transform_3, window_bounds = array<i64: 1, 256>}, {transform_indices = @transform_4, window_bounds = array<i64: 1, 128>}, {transform_indices = @transform_5, window_bounds = array<i64: 1, 128>}, {transform_indices = @transform_6, window_bounds = array<i64: 256, 128>}]} {
    %c0_i32 = arith.constant 0 : i32
    %0 = arith.cmpi eq, %arg2, %c0_i32 : i32
    %1 = arith.extui %0 : i1 to i32
    %c0_i32_0 = arith.constant 0 : i32
    %2 = arith.cmpi ne, %1, %c0_i32_0 : i32
    scf.if %2 {
      %cst_10 = arith.constant 0.000000e+00 : f32
      %12 = vector.broadcast %cst_10 : f32 to vector<256x128xf32>
      %c0_11 = arith.constant 0 : index
      %c0_12 = arith.constant 0 : index
      %13 = vector.load %arg10[%c0_11, %c0_12] : memref<256x128xf32, #tpu.memory_space<vmem>>, vector<256x128xf32>
      tpu.vector_store %arg10[%c0_11, %c0_12], %12 {strides = array<i32>} : memref<256x128xf32, #tpu.memory_space<vmem>>, vector<256x128xf32>,
    } else {
    }
    %c0 = arith.constant 0 : index
    %c0_1 = arith.constant 0 : index
    %3 = vector.load %arg3[%c0, %c0_1] : memref<256x256xbf16, #tpu.memory_space<vmem>>, vector<256x256xbf16>
    %c0_2 = arith.constant 0 : index
    %c0_3 = arith.constant 0 : index
    %4 = vector.load %arg10[%c0_2, %c0_3] : memref<256x128xf32, #tpu.memory_space<vmem>>, vector<256x128xf32>
    %c0_4 = arith.constant 0 : index
    %c0_5 = arith.constant 0 : index
    %5 = vector.load %arg4[%c0_4, %c0_5] : memref<256x128xbf16, #tpu.memory_space<vmem>>, vector<256x128xbf16>
    %cst = arith.constant dense<0.000000e+00> : vector<256x128xf32>
    %6 = tpu.matmul %3, %5, %cst {dimension_numbers = #tpu.dot_dimension_numbers<[1], [0], [0], [1], [0, 0, 1, 1], [], []>} : vector<256x256xbf16>, vector<256x128xbf16>, vector<256x128xf32> -> vector<256x128xf32>
    %7 = arith.addf %4, %6 : vector<256x128xf32>
    %c0_6 = arith.constant 0 : index
    %c0_7 = arith.constant 0 : index
    %8 = vector.load %arg10[%c0_6, %c0_7] : memref<256x128xf32, #tpu.memory_space<vmem>>, vector<256x128xf32>
    tpu.vector_store %arg10[%c0_6, %c0_7], %7 {strides = array<i32>} : memref<256x128xf32, #tpu.memory_space<vmem>>, vector<256x128xf32>,
    %c0_i32_8 = arith.constant 0 : i32
    %9 = arith.cmpi eq, %arg2, %c0_i32_8 : i32
    %10 = arith.extui %9 : i1 to i32
    %c0_i32_9 = arith.constant 0 : i32
    %11 = arith.cmpi ne, %10, %c0_i32_9 : i32
    scf.if %11 {
      %c0_10 = arith.constant 0 : index
      %c0_11 = arith.constant 0 : index
      %12 = vector.load %arg10[%c0_10, %c0_11] : memref<256x128xf32, #tpu.memory_space<vmem>>, vector<256x128xf32>
      %c0_12 = arith.constant 0 : index
      %c0_13 = arith.constant 0 : index
      %13 = vector.load %arg7[%c0_12, %c0_13] : memref<1x128xf32, #tpu.memory_space<vmem>>, vector<1x128xf32>
      %14 = vector.broadcast %13 : vector<1x128xf32> to vector<256x128xf32>
      %15 = arith.mulf %12, %14 : vector<256x128xf32>
      %c0_14 = arith.constant 0 : index
      %c0_15 = arith.constant 0 : index
      %16 = vector.load %arg8[%c0_14, %c0_15] : memref<1x128xf32, #tpu.memory_space<vmem>>, vector<1x128xf32>
      %17 = vector.broadcast %16 : vector<1x128xf32> to vector<256x128xf32>
      %18 = arith.addf %15, %17 : vector<256x128xf32>
      %cst_16 = arith.constant 0.000000e+00 : f32
      %19 = vector.broadcast %cst_16 : f32 to vector<256x128xf32>
      %20 = arith.maximumf %18, %19 : vector<256x128xf32>
      %21 = arith.truncf %20 : vector<256x128xf32> to vector<256x128xbf16>
      %c0_17 = arith.constant 0 : index
      %c0_18 = arith.constant 0 : index
      %22 = vector.load %arg9[%c0_17, %c0_18] : memref<256x128xbf16, #tpu.memory_space<vmem>>, vector<256x128xbf16>
      tpu.vector_store %arg9[%c0_17, %c0_18], %21 {strides = array<i32>} : memref<256x128xbf16, #tpu.memory_space<vmem>>, vector<256x128xbf16>,
    } else {
    }
    return
  }
  func.func @transform_0(%arg0: i32, %arg1: i32, %arg2: i32) -> (i32, i32) {
    %c0_i32 = arith.constant 0 : i32
    return %arg0, %arg2 : i32, i32
  }
  func.func @transform_1(%arg0: i32, %arg1: i32, %arg2: i32) -> (i32, i32) {
    %c0_i32 = arith.constant 0 : i32
    return %arg2, %arg1 : i32, i32
  }
  func.func @transform_2(%arg0: i32, %arg1: i32, %arg2: i32) -> (i32, i32) {
    %c0_i32 = arith.constant 0 : i32
    %c0_i32_0 = arith.constant 0 : i32
    return %c0_i32, %arg2 : i32, i32
  }
  func.func @transform_3(%arg0: i32, %arg1: i32, %arg2: i32) -> (i32, i32) {
    %c0_i32 = arith.constant 0 : i32
    %c0_i32_0 = arith.constant 0 : i32
    return %c0_i32, %arg2 : i32, i32
  }
  func.func @transform_4(%arg0: i32, %arg1: i32, %arg2: i32) -> (i32, i32) {
    %c0_i32 = arith.constant 0 : i32
    %c0_i32_0 = arith.constant 0 : i32
    return %c0_i32, %arg1 : i32, i32
  }
  func.func @transform_5(%arg0: i32, %arg1: i32, %arg2: i32) -> (i32, i32) {
    %c0_i32 = arith.constant 0 : i32
    %c0_i32_0 = arith.constant 0 : i32
    return %c0_i32, %arg1 : i32, i32
  }
  func.func @transform_6(%arg0: i32, %arg1: i32, %arg2: i32) -> (i32, i32) {
    %c0_i32 = arith.constant 0 : i32
    return %arg0, %arg1 : i32, i32
  }
}

module attributes {stable_mosaic.version = 11 : i64} {
  func.func @_pool_kernel(%arg0: i32, %arg1: memref<128x9x64xbf16, #tpu.memory_space<vmem>>, %arg2: memref<128x64xbf16, #tpu.memory_space<vmem>>) attributes {dimension_semantics = [#tpu.dimension_semantics<parallel>], iteration_bounds = array<i64: 1>, scalar_prefetch = 0 : i64, scratch_operands = 0 : i64, tpu.core_type = #tpu.core_type<tc>, window_params = [{transform_indices = @transform_0, window_bounds = array<i64: 128, 9, 64>}, {transform_indices = @transform_1, window_bounds = array<i64: 128, 64>}]} {
    %c0 = arith.constant 0 : index
    %c0_0 = arith.constant 0 : index
    %c0_1 = arith.constant 0 : index
    %0 = vector.load %arg1[%c0, %c0_0, %c0_1] : memref<128x9x64xbf16, #tpu.memory_space<vmem>>, vector<128x9x64xbf16>
    %1 = arith.extf %0 : vector<128x9x64xbf16> to vector<128x9x64xf32>
    %cst = arith.constant dense<0xFF800000> : vector<128x64xf32>
    %2 = vector.multi_reduction <maximumf>, %1, %cst [1] : vector<128x9x64xf32> to vector<128x64xf32>
    %3 = arith.truncf %2 : vector<128x64xf32> to vector<128x64xbf16>
    %c0_2 = arith.constant 0 : index
    %c0_3 = arith.constant 0 : index
    %4 = vector.load %arg2[%c0_2, %c0_3] : memref<128x64xbf16, #tpu.memory_space<vmem>>, vector<128x64xbf16>
    tpu.vector_store %arg2[%c0_2, %c0_3], %3 {strides = array<i32>} : memref<128x64xbf16, #tpu.memory_space<vmem>>, vector<128x64xbf16>,
    return
  }
  func.func @transform_0(%arg0: i32) -> (i32, i32, i32) {
    %c0_i32 = arith.constant 0 : i32
    %c0_i32_0 = arith.constant 0 : i32
    %c0_i32_1 = arith.constant 0 : i32
    return %arg0, %c0_i32, %c0_i32_0 : i32, i32, i32
  }
  func.func @transform_1(%arg0: i32) -> (i32, i32) {
    %c0_i32 = arith.constant 0 : i32
    %c0_i32_0 = arith.constant 0 : i32
    return %arg0, %c0_i32 : i32, i32
  }
}

module attributes {stable_mosaic.version = 11 : i64} {
  func.func @_fused_mm_kernel(%arg0: i32, %arg1: i32, %arg2: i32, %arg3: memref<128x128xbf16, #tpu.memory_space<vmem>>, %arg4: memref<128x128xbf16, #tpu.memory_space<vmem>>, %arg5: memref<1x128xf32, #tpu.memory_space<vmem>>, %arg6: memref<1x128xf32, #tpu.memory_space<vmem>>, %arg7: memref<1x128xf32, #tpu.memory_space<vmem>>, %arg8: memref<1x128xf32, #tpu.memory_space<vmem>>, %arg9: memref<128x128xbf16, #tpu.memory_space<vmem>>, %arg10: memref<128x128xf32, #tpu.memory_space<vmem>>) attributes {dimension_semantics = [#tpu.dimension_semantics<parallel>, #tpu.dimension_semantics<parallel>, #tpu.dimension_semantics<arbitrary>], iteration_bounds = array<i64: 1, 1, 1>, scalar_prefetch = 0 : i64, scratch_operands = 1 : i64, tpu.core_type = #tpu.core_type<tc>, window_params = [{transform_indices = @transform_0, window_bounds = array<i64: 128, 128>}, {transform_indices = @transform_1, window_bounds = array<i64: 128, 128>}, {transform_indices = @transform_2, window_bounds = array<i64: 1, 128>}, {transform_indices = @transform_3, window_bounds = array<i64: 1, 128>}, {transform_indices = @transform_4, window_bounds = array<i64: 1, 128>}, {transform_indices = @transform_5, window_bounds = array<i64: 1, 128>}, {transform_indices = @transform_6, window_bounds = array<i64: 128, 128>}]} {
    %c0_i32 = arith.constant 0 : i32
    %0 = arith.cmpi eq, %arg2, %c0_i32 : i32
    %1 = arith.extui %0 : i1 to i32
    %c0_i32_0 = arith.constant 0 : i32
    %2 = arith.cmpi ne, %1, %c0_i32_0 : i32
    scf.if %2 {
      %cst_15 = arith.constant 0.000000e+00 : f32
      %22 = vector.broadcast %cst_15 : f32 to vector<128x128xf32>
      %c0_16 = arith.constant 0 : index
      %c0_17 = arith.constant 0 : index
      %23 = vector.load %arg10[%c0_16, %c0_17] : memref<128x128xf32, #tpu.memory_space<vmem>>, vector<128x128xf32>
      tpu.vector_store %arg10[%c0_16, %c0_17], %22 {strides = array<i32>} : memref<128x128xf32, #tpu.memory_space<vmem>>, vector<128x128xf32>,
    } else {
    }
    %c0 = arith.constant 0 : index
    %c0_1 = arith.constant 0 : index
    %3 = vector.load %arg3[%c0, %c0_1] : memref<128x128xbf16, #tpu.memory_space<vmem>>, vector<128x128xbf16>
    %4 = arith.extf %3 : vector<128x128xbf16> to vector<128x128xf32>
    %c0_2 = arith.constant 0 : index
    %c0_3 = arith.constant 0 : index
    %5 = vector.load %arg5[%c0_2, %c0_3] : memref<1x128xf32, #tpu.memory_space<vmem>>, vector<1x128xf32>
    %6 = vector.broadcast %5 : vector<1x128xf32> to vector<128x128xf32>
    %7 = arith.mulf %4, %6 : vector<128x128xf32>
    %c0_4 = arith.constant 0 : index
    %c0_5 = arith.constant 0 : index
    %8 = vector.load %arg6[%c0_4, %c0_5] : memref<1x128xf32, #tpu.memory_space<vmem>>, vector<1x128xf32>
    %9 = vector.broadcast %8 : vector<1x128xf32> to vector<128x128xf32>
    %10 = arith.addf %7, %9 : vector<128x128xf32>
    %cst = arith.constant 0.000000e+00 : f32
    %11 = vector.broadcast %cst : f32 to vector<128x128xf32>
    %12 = arith.maximumf %10, %11 : vector<128x128xf32>
    %13 = arith.truncf %12 : vector<128x128xf32> to vector<128x128xbf16>
    %c0_6 = arith.constant 0 : index
    %c0_7 = arith.constant 0 : index
    %14 = vector.load %arg10[%c0_6, %c0_7] : memref<128x128xf32, #tpu.memory_space<vmem>>, vector<128x128xf32>
    %c0_8 = arith.constant 0 : index
    %c0_9 = arith.constant 0 : index
    %15 = vector.load %arg4[%c0_8, %c0_9] : memref<128x128xbf16, #tpu.memory_space<vmem>>, vector<128x128xbf16>
    %cst_10 = arith.constant dense<0.000000e+00> : vector<128x128xf32>
    %16 = tpu.matmul %13, %15, %cst_10 {dimension_numbers = #tpu.dot_dimension_numbers<[1], [0], [0], [1], [0, 0, 1, 1], [], []>} : vector<128x128xbf16>, vector<128x128xbf16>, vector<128x128xf32> -> vector<128x128xf32>
    %17 = arith.addf %14, %16 : vector<128x128xf32>
    %c0_11 = arith.constant 0 : index
    %c0_12 = arith.constant 0 : index
    %18 = vector.load %arg10[%c0_11, %c0_12] : memref<128x128xf32, #tpu.memory_space<vmem>>, vector<128x128xf32>
    tpu.vector_store %arg10[%c0_11, %c0_12], %17 {strides = array<i32>} : memref<128x128xf32, #tpu.memory_space<vmem>>, vector<128x128xf32>,
    %c0_i32_13 = arith.constant 0 : i32
    %19 = arith.cmpi eq, %arg2, %c0_i32_13 : i32
    %20 = arith.extui %19 : i1 to i32
    %c0_i32_14 = arith.constant 0 : i32
    %21 = arith.cmpi ne, %20, %c0_i32_14 : i32
    scf.if %21 {
      %c0_15 = arith.constant 0 : index
      %c0_16 = arith.constant 0 : index
      %22 = vector.load %arg10[%c0_15, %c0_16] : memref<128x128xf32, #tpu.memory_space<vmem>>, vector<128x128xf32>
      %c0_17 = arith.constant 0 : index
      %c0_18 = arith.constant 0 : index
      %23 = vector.load %arg7[%c0_17, %c0_18] : memref<1x128xf32, #tpu.memory_space<vmem>>, vector<1x128xf32>
      %24 = vector.broadcast %23 : vector<1x128xf32> to vector<128x128xf32>
      %25 = arith.mulf %22, %24 : vector<128x128xf32>
      %c0_19 = arith.constant 0 : index
      %c0_20 = arith.constant 0 : index
      %26 = vector.load %arg8[%c0_19, %c0_20] : memref<1x128xf32, #tpu.memory_space<vmem>>, vector<1x128xf32>
      %27 = vector.broadcast %26 : vector<1x128xf32> to vector<128x128xf32>
      %28 = arith.addf %25, %27 : vector<128x128xf32>
      %cst_21 = arith.constant 0.000000e+00 : f32
      %29 = vector.broadcast %cst_21 : f32 to vector<128x128xf32>
      %30 = arith.maximumf %28, %29 : vector<128x128xf32>
      %31 = arith.truncf %30 : vector<128x128xf32> to vector<128x128xbf16>
      %c0_22 = arith.constant 0 : index
      %c0_23 = arith.constant 0 : index
      %32 = vector.load %arg9[%c0_22, %c0_23] : memref<128x128xbf16, #tpu.memory_space<vmem>>, vector<128x128xbf16>
      tpu.vector_store %arg9[%c0_22, %c0_23], %31 {strides = array<i32>} : memref<128x128xbf16, #tpu.memory_space<vmem>>, vector<128x128xbf16>,
    } else {
    }
    return
  }
  func.func @transform_0(%arg0: i32, %arg1: i32, %arg2: i32) -> (i32, i32) {
    %c0_i32 = arith.constant 0 : i32
    return %arg0, %arg2 : i32, i32
  }
  func.func @transform_1(%arg0: i32, %arg1: i32, %arg2: i32) -> (i32, i32) {
    %c0_i32 = arith.constant 0 : i32
    return %arg2, %arg1 : i32, i32
  }
  func.func @transform_2(%arg0: i32, %arg1: i32, %arg2: i32) -> (i32, i32) {
    %c0_i32 = arith.constant 0 : i32
    %c0_i32_0 = arith.constant 0 : i32
    return %c0_i32, %arg2 : i32, i32
  }
  func.func @transform_3(%arg0: i32, %arg1: i32, %arg2: i32) -> (i32, i32) {
    %c0_i32 = arith.constant 0 : i32
    %c0_i32_0 = arith.constant 0 : i32
    return %c0_i32, %arg2 : i32, i32
  }
  func.func @transform_4(%arg0: i32, %arg1: i32, %arg2: i32) -> (i32, i32) {
    %c0_i32 = arith.constant 0 : i32
    %c0_i32_0 = arith.constant 0 : i32
    return %c0_i32, %arg1 : i32, i32
  }
  func.func @transform_5(%arg0: i32, %arg1: i32, %arg2: i32) -> (i32, i32) {
    %c0_i32 = arith.constant 0 : i32
    %c0_i32_0 = arith.constant 0 : i32
    return %c0_i32, %arg1 : i32, i32
  }
  func.func @transform_6(%arg0: i32, %arg1: i32, %arg2: i32) -> (i32, i32) {
    %c0_i32 = arith.constant 0 : i32
    return %arg0, %arg1 : i32, i32
  }
}

module attributes {stable_mosaic.version = 11 : i64} {
  func.func @_fused_mm_kernel(%arg0: i32, %arg1: i32, %arg2: i32, %arg3: memref<128x384xbf16, #tpu.memory_space<vmem>>, %arg4: memref<384x128xbf16, #tpu.memory_space<vmem>>, %arg5: memref<1x384xf32, #tpu.memory_space<vmem>>, %arg6: memref<1x384xf32, #tpu.memory_space<vmem>>, %arg7: memref<1x128xf32, #tpu.memory_space<vmem>>, %arg8: memref<1x128xf32, #tpu.memory_space<vmem>>, %arg9: memref<128x128xbf16, #tpu.memory_space<vmem>>, %arg10: memref<128x128xf32, #tpu.memory_space<vmem>>) attributes {dimension_semantics = [#tpu.dimension_semantics<parallel>, #tpu.dimension_semantics<parallel>, #tpu.dimension_semantics<arbitrary>], iteration_bounds = array<i64: 1, 1, 1>, scalar_prefetch = 0 : i64, scratch_operands = 1 : i64, tpu.core_type = #tpu.core_type<tc>, window_params = [{transform_indices = @transform_0, window_bounds = array<i64: 128, 384>}, {transform_indices = @transform_1, window_bounds = array<i64: 384, 128>}, {transform_indices = @transform_2, window_bounds = array<i64: 1, 384>}, {transform_indices = @transform_3, window_bounds = array<i64: 1, 384>}, {transform_indices = @transform_4, window_bounds = array<i64: 1, 128>}, {transform_indices = @transform_5, window_bounds = array<i64: 1, 128>}, {transform_indices = @transform_6, window_bounds = array<i64: 128, 128>}]} {
    %c0_i32 = arith.constant 0 : i32
    %0 = arith.cmpi eq, %arg2, %c0_i32 : i32
    %1 = arith.extui %0 : i1 to i32
    %c0_i32_0 = arith.constant 0 : i32
    %2 = arith.cmpi ne, %1, %c0_i32_0 : i32
    scf.if %2 {
      %cst_10 = arith.constant 0.000000e+00 : f32
      %12 = vector.broadcast %cst_10 : f32 to vector<128x128xf32>
      %c0_11 = arith.constant 0 : index
      %c0_12 = arith.constant 0 : index
      %13 = vector.load %arg10[%c0_11, %c0_12] : memref<128x128xf32, #tpu.memory_space<vmem>>, vector<128x128xf32>
      tpu.vector_store %arg10[%c0_11, %c0_12], %12 {strides = array<i32>} : memref<128x128xf32, #tpu.memory_space<vmem>>, vector<128x128xf32>,
    } else {
    }
    %c0 = arith.constant 0 : index
    %c0_1 = arith.constant 0 : index
    %3 = vector.load %arg3[%c0, %c0_1] : memref<128x384xbf16, #tpu.memory_space<vmem>>, vector<128x384xbf16>
    %c0_2 = arith.constant 0 : index
    %c0_3 = arith.constant 0 : index
    %4 = vector.load %arg10[%c0_2, %c0_3] : memref<128x128xf32, #tpu.memory_space<vmem>>, vector<128x128xf32>
    %c0_4 = arith.constant 0 : index
    %c0_5 = arith.constant 0 : index
    %5 = vector.load %arg4[%c0_4, %c0_5] : memref<384x128xbf16, #tpu.memory_space<vmem>>, vector<384x128xbf16>
    %cst = arith.constant dense<0.000000e+00> : vector<128x128xf32>
    %6 = tpu.matmul %3, %5, %cst {dimension_numbers = #tpu.dot_dimension_numbers<[1], [0], [0], [1], [0, 0, 1, 1], [], []>} : vector<128x384xbf16>, vector<384x128xbf16>, vector<128x128xf32> -> vector<128x128xf32>
    %7 = arith.addf %4, %6 : vector<128x128xf32>
    %c0_6 = arith.constant 0 : index
    %c0_7 = arith.constant 0 : index
    %8 = vector.load %arg10[%c0_6, %c0_7] : memref<128x128xf32, #tpu.memory_space<vmem>>, vector<128x128xf32>
    tpu.vector_store %arg10[%c0_6, %c0_7], %7 {strides = array<i32>} : memref<128x128xf32, #tpu.memory_space<vmem>>, vector<128x128xf32>,
    %c0_i32_8 = arith.constant 0 : i32
    %9 = arith.cmpi eq, %arg2, %c0_i32_8 : i32
    %10 = arith.extui %9 : i1 to i32
    %c0_i32_9 = arith.constant 0 : i32
    %11 = arith.cmpi ne, %10, %c0_i32_9 : i32
    scf.if %11 {
      %c0_10 = arith.constant 0 : index
      %c0_11 = arith.constant 0 : index
      %12 = vector.load %arg10[%c0_10, %c0_11] : memref<128x128xf32, #tpu.memory_space<vmem>>, vector<128x128xf32>
      %13 = arith.truncf %12 : vector<128x128xf32> to vector<128x128xbf16>
      %c0_12 = arith.constant 0 : index
      %c0_13 = arith.constant 0 : index
      %14 = vector.load %arg9[%c0_12, %c0_13] : memref<128x128xbf16, #tpu.memory_space<vmem>>, vector<128x128xbf16>
      tpu.vector_store %arg9[%c0_12, %c0_13], %13 {strides = array<i32>} : memref<128x128xbf16, #tpu.memory_space<vmem>>, vector<128x128xbf16>,
    } else {
    }
    return
  }
  func.func @transform_0(%arg0: i32, %arg1: i32, %arg2: i32) -> (i32, i32) {
    %c0_i32 = arith.constant 0 : i32
    return %arg0, %arg2 : i32, i32
  }
  func.func @transform_1(%arg0: i32, %arg1: i32, %arg2: i32) -> (i32, i32) {
    %c0_i32 = arith.constant 0 : i32
    return %arg2, %arg1 : i32, i32
  }
  func.func @transform_2(%arg0: i32, %arg1: i32, %arg2: i32) -> (i32, i32) {
    %c0_i32 = arith.constant 0 : i32
    %c0_i32_0 = arith.constant 0 : i32
    return %c0_i32, %arg2 : i32, i32
  }
  func.func @transform_3(%arg0: i32, %arg1: i32, %arg2: i32) -> (i32, i32) {
    %c0_i32 = arith.constant 0 : i32
    %c0_i32_0 = arith.constant 0 : i32
    return %c0_i32, %arg2 : i32, i32
  }
  func.func @transform_4(%arg0: i32, %arg1: i32, %arg2: i32) -> (i32, i32) {
    %c0_i32 = arith.constant 0 : i32
    %c0_i32_0 = arith.constant 0 : i32
    return %c0_i32, %arg1 : i32, i32
  }
  func.func @transform_5(%arg0: i32, %arg1: i32, %arg2: i32) -> (i32, i32) {
    %c0_i32 = arith.constant 0 : i32
    %c0_i32_0 = arith.constant 0 : i32
    return %c0_i32, %arg1 : i32, i32
  }
  func.func @transform_6(%arg0: i32, %arg1: i32, %arg2: i32) -> (i32, i32) {
    %c0_i32 = arith.constant 0 : i32
    return %arg0, %arg1 : i32, i32
  }
}

module attributes {stable_mosaic.version = 11 : i64} {
  func.func @_fused_mm_kernel(%arg0: i32, %arg1: i32, %arg2: i32, %arg3: memref<128x128xbf16, #tpu.memory_space<vmem>>, %arg4: memref<128x128xbf16, #tpu.memory_space<vmem>>, %arg5: memref<1x128xf32, #tpu.memory_space<vmem>>, %arg6: memref<1x128xf32, #tpu.memory_space<vmem>>, %arg7: memref<1x128xf32, #tpu.memory_space<vmem>>, %arg8: memref<1x128xf32, #tpu.memory_space<vmem>>, %arg9: memref<128x128xbf16, #tpu.memory_space<vmem>>, %arg10: memref<128x128xf32, #tpu.memory_space<vmem>>) attributes {dimension_semantics = [#tpu.dimension_semantics<parallel>, #tpu.dimension_semantics<parallel>, #tpu.dimension_semantics<arbitrary>], iteration_bounds = array<i64: 1, 1, 1>, scalar_prefetch = 0 : i64, scratch_operands = 1 : i64, tpu.core_type = #tpu.core_type<tc>, window_params = [{transform_indices = @transform_0, window_bounds = array<i64: 128, 128>}, {transform_indices = @transform_1, window_bounds = array<i64: 128, 128>}, {transform_indices = @transform_2, window_bounds = array<i64: 1, 128>}, {transform_indices = @transform_3, window_bounds = array<i64: 1, 128>}, {transform_indices = @transform_4, window_bounds = array<i64: 1, 128>}, {transform_indices = @transform_5, window_bounds = array<i64: 1, 128>}, {transform_indices = @transform_6, window_bounds = array<i64: 128, 128>}]} {
    %c0_i32 = arith.constant 0 : i32
    %0 = arith.cmpi eq, %arg2, %c0_i32 : i32
    %1 = arith.extui %0 : i1 to i32
    %c0_i32_0 = arith.constant 0 : i32
    %2 = arith.cmpi ne, %1, %c0_i32_0 : i32
    scf.if %2 {
      %cst_15 = arith.constant 0.000000e+00 : f32
      %22 = vector.broadcast %cst_15 : f32 to vector<128x128xf32>
      %c0_16 = arith.constant 0 : index
      %c0_17 = arith.constant 0 : index
      %23 = vector.load %arg10[%c0_16, %c0_17] : memref<128x128xf32, #tpu.memory_space<vmem>>, vector<128x128xf32>
      tpu.vector_store %arg10[%c0_16, %c0_17], %22 {strides = array<i32>} : memref<128x128xf32, #tpu.memory_space<vmem>>, vector<128x128xf32>,
    } else {
    }
    %c0 = arith.constant 0 : index
    %c0_1 = arith.constant 0 : index
    %3 = vector.load %arg3[%c0, %c0_1] : memref<128x128xbf16, #tpu.memory_space<vmem>>, vector<128x128xbf16>
    %4 = arith.extf %3 : vector<128x128xbf16> to vector<128x128xf32>
    %c0_2 = arith.constant 0 : index
    %c0_3 = arith.constant 0 : index
    %5 = vector.load %arg5[%c0_2, %c0_3] : memref<1x128xf32, #tpu.memory_space<vmem>>, vector<1x128xf32>
    %6 = vector.broadcast %5 : vector<1x128xf32> to vector<128x128xf32>
    %7 = arith.mulf %4, %6 : vector<128x128xf32>
    %c0_4 = arith.constant 0 : index
    %c0_5 = arith.constant 0 : index
    %8 = vector.load %arg6[%c0_4, %c0_5] : memref<1x128xf32, #tpu.memory_space<vmem>>, vector<1x128xf32>
    %9 = vector.broadcast %8 : vector<1x128xf32> to vector<128x128xf32>
    %10 = arith.addf %7, %9 : vector<128x128xf32>
    %cst = arith.constant 0.000000e+00 : f32
    %11 = vector.broadcast %cst : f32 to vector<128x128xf32>
    %12 = arith.maximumf %10, %11 : vector<128x128xf32>
    %13 = arith.truncf %12 : vector<128x128xf32> to vector<128x128xbf16>
    %c0_6 = arith.constant 0 : index
    %c0_7 = arith.constant 0 : index
    %14 = vector.load %arg10[%c0_6, %c0_7] : memref<128x128xf32, #tpu.memory_space<vmem>>, vector<128x128xf32>
    %c0_8 = arith.constant 0 : index
    %c0_9 = arith.constant 0 : index
    %15 = vector.load %arg4[%c0_8, %c0_9] : memref<128x128xbf16, #tpu.memory_space<vmem>>, vector<128x128xbf16>
    %cst_10 = arith.constant dense<0.000000e+00> : vector<128x128xf32>
    %16 = tpu.matmul %13, %15, %cst_10 {dimension_numbers = #tpu.dot_dimension_numbers<[1], [0], [0], [1], [0, 0, 1, 1], [], []>} : vector<128x128xbf16>, vector<128x128xbf16>, vector<128x128xf32> -> vector<128x128xf32>
    %17 = arith.addf %14, %16 : vector<128x128xf32>
    %c0_11 = arith.constant 0 : index
    %c0_12 = arith.constant 0 : index
    %18 = vector.load %arg10[%c0_11, %c0_12] : memref<128x128xf32, #tpu.memory_space<vmem>>, vector<128x128xf32>
    tpu.vector_store %arg10[%c0_11, %c0_12], %17 {strides = array<i32>} : memref<128x128xf32, #tpu.memory_space<vmem>>, vector<128x128xf32>,
    %c0_i32_13 = arith.constant 0 : i32
    %19 = arith.cmpi eq, %arg2, %c0_i32_13 : i32
    %20 = arith.extui %19 : i1 to i32
    %c0_i32_14 = arith.constant 0 : i32
    %21 = arith.cmpi ne, %20, %c0_i32_14 : i32
    scf.if %21 {
      %c0_15 = arith.constant 0 : index
      %c0_16 = arith.constant 0 : index
      %22 = vector.load %arg10[%c0_15, %c0_16] : memref<128x128xf32, #tpu.memory_space<vmem>>, vector<128x128xf32>
      %23 = arith.truncf %22 : vector<128x128xf32> to vector<128x128xbf16>
      %c0_17 = arith.constant 0 : index
      %c0_18 = arith.constant 0 : index
      %24 = vector.load %arg9[%c0_17, %c0_18] : memref<128x128xbf16, #tpu.memory_space<vmem>>, vector<128x128xbf16>
      tpu.vector_store %arg9[%c0_17, %c0_18], %23 {strides = array<i32>} : memref<128x128xbf16, #tpu.memory_space<vmem>>, vector<128x128xbf16>,
    } else {
    }
    return
  }
  func.func @transform_0(%arg0: i32, %arg1: i32, %arg2: i32) -> (i32, i32) {
    %c0_i32 = arith.constant 0 : i32
    return %arg0, %arg2 : i32, i32
  }
  func.func @transform_1(%arg0: i32, %arg1: i32, %arg2: i32) -> (i32, i32) {
    %c0_i32 = arith.constant 0 : i32
    return %arg2, %arg1 : i32, i32
  }
  func.func @transform_2(%arg0: i32, %arg1: i32, %arg2: i32) -> (i32, i32) {
    %c0_i32 = arith.constant 0 : i32
    %c0_i32_0 = arith.constant 0 : i32
    return %c0_i32, %arg2 : i32, i32
  }
  func.func @transform_3(%arg0: i32, %arg1: i32, %arg2: i32) -> (i32, i32) {
    %c0_i32 = arith.constant 0 : i32
    %c0_i32_0 = arith.constant 0 : i32
    return %c0_i32, %arg2 : i32, i32
  }
  func.func @transform_4(%arg0: i32, %arg1: i32, %arg2: i32) -> (i32, i32) {
    %c0_i32 = arith.constant 0 : i32
    %c0_i32_0 = arith.constant 0 : i32
    return %c0_i32, %arg1 : i32, i32
  }
  func.func @transform_5(%arg0: i32, %arg1: i32, %arg2: i32) -> (i32, i32) {
    %c0_i32 = arith.constant 0 : i32
    %c0_i32_0 = arith.constant 0 : i32
    return %c0_i32, %arg1 : i32, i32
  }
  func.func @transform_6(%arg0: i32, %arg1: i32, %arg2: i32) -> (i32, i32) {
    %c0_i32 = arith.constant 0 : i32
    return %arg0, %arg1 : i32, i32
  }
}

module attributes {stable_mosaic.version = 11 : i64} {
  func.func @_pool_kernel(%arg0: i32, %arg1: memref<32x4x40xbf16, #tpu.memory_space<vmem>>, %arg2: memref<32x40xbf16, #tpu.memory_space<vmem>>) attributes {dimension_semantics = [#tpu.dimension_semantics<parallel>], iteration_bounds = array<i64: 1>, scalar_prefetch = 0 : i64, scratch_operands = 0 : i64, tpu.core_type = #tpu.core_type<tc>, window_params = [{transform_indices = @transform_0, window_bounds = array<i64: 32, 4, 40>}, {transform_indices = @transform_1, window_bounds = array<i64: 32, 40>}]} {
    %c0 = arith.constant 0 : index
    %c0_0 = arith.constant 0 : index
    %c0_1 = arith.constant 0 : index
    %0 = vector.load %arg1[%c0, %c0_0, %c0_1] : memref<32x4x40xbf16, #tpu.memory_space<vmem>>, vector<32x4x40xbf16>
    %1 = arith.extf %0 : vector<32x4x40xbf16> to vector<32x4x40xf32>
    %cst = arith.constant dense<0.000000e+00> : vector<32x40xf32>
    %2 = vector.multi_reduction <add>, %1, %cst [1] : vector<32x4x40xf32> to vector<32x40xf32>
    %cst_2 = arith.constant 4.000000e+00 : f32
    %3 = vector.broadcast %cst_2 : f32 to vector<32x40xf32>
    %4 = arith.divf %2, %3 : vector<32x40xf32>
    %5 = arith.truncf %4 : vector<32x40xf32> to vector<32x40xbf16>
    %c0_3 = arith.constant 0 : index
    %c0_4 = arith.constant 0 : index
    %6 = vector.load %arg2[%c0_3, %c0_4] : memref<32x40xbf16, #tpu.memory_space<vmem>>, vector<32x40xbf16>
    tpu.vector_store %arg2[%c0_3, %c0_4], %5 {strides = array<i32>} : memref<32x40xbf16, #tpu.memory_space<vmem>>, vector<32x40xbf16>,
    return
  }
  func.func @transform_0(%arg0: i32) -> (i32, i32, i32) {
    %c0_i32 = arith.constant 0 : i32
    %c0_i32_0 = arith.constant 0 : i32
    %c0_i32_1 = arith.constant 0 : i32
    return %arg0, %c0_i32, %c0_i32_0 : i32, i32, i32
  }
  func.func @transform_1(%arg0: i32) -> (i32, i32) {
    %c0_i32 = arith.constant 0 : i32
    %c0_i32_0 = arith.constant 0 : i32
    return %arg0, %c0_i32 : i32, i32
  }
}

module attributes {stable_mosaic.version = 11 : i64} {
  func.func @_fused_mm_kernel(%arg0: i32, %arg1: i32, %arg2: i32, %arg3: memref<32x128xbf16, #tpu.memory_space<vmem>>, %arg4: memref<128x128xbf16, #tpu.memory_space<vmem>>, %arg5: memref<1x128xf32, #tpu.memory_space<vmem>>, %arg6: memref<1x128xf32, #tpu.memory_space<vmem>>, %arg7: memref<1x128xf32, #tpu.memory_space<vmem>>, %arg8: memref<1x128xf32, #tpu.memory_space<vmem>>, %arg9: memref<32x128xbf16, #tpu.memory_space<vmem>>, %arg10: memref<32x128xf32, #tpu.memory_space<vmem>>) attributes {dimension_semantics = [#tpu.dimension_semantics<parallel>, #tpu.dimension_semantics<parallel>, #tpu.dimension_semantics<arbitrary>], iteration_bounds = array<i64: 1, 1, 1>, scalar_prefetch = 0 : i64, scratch_operands = 1 : i64, tpu.core_type = #tpu.core_type<tc>, window_params = [{transform_indices = @transform_0, window_bounds = array<i64: 32, 128>}, {transform_indices = @transform_1, window_bounds = array<i64: 128, 128>}, {transform_indices = @transform_2, window_bounds = array<i64: 1, 128>}, {transform_indices = @transform_3, window_bounds = array<i64: 1, 128>}, {transform_indices = @transform_4, window_bounds = array<i64: 1, 128>}, {transform_indices = @transform_5, window_bounds = array<i64: 1, 128>}, {transform_indices = @transform_6, window_bounds = array<i64: 32, 128>}]} {
    %c0_i32 = arith.constant 0 : i32
    %0 = arith.cmpi eq, %arg2, %c0_i32 : i32
    %1 = arith.extui %0 : i1 to i32
    %c0_i32_0 = arith.constant 0 : i32
    %2 = arith.cmpi ne, %1, %c0_i32_0 : i32
    scf.if %2 {
      %cst_15 = arith.constant 0.000000e+00 : f32
      %22 = vector.broadcast %cst_15 : f32 to vector<32x128xf32>
      %c0_16 = arith.constant 0 : index
      %c0_17 = arith.constant 0 : index
      %23 = vector.load %arg10[%c0_16, %c0_17] : memref<32x128xf32, #tpu.memory_space<vmem>>, vector<32x128xf32>
      tpu.vector_store %arg10[%c0_16, %c0_17], %22 {strides = array<i32>} : memref<32x128xf32, #tpu.memory_space<vmem>>, vector<32x128xf32>,
    } else {
    }
    %c0 = arith.constant 0 : index
    %c0_1 = arith.constant 0 : index
    %3 = vector.load %arg3[%c0, %c0_1] : memref<32x128xbf16, #tpu.memory_space<vmem>>, vector<32x128xbf16>
    %4 = arith.extf %3 : vector<32x128xbf16> to vector<32x128xf32>
    %c0_2 = arith.constant 0 : index
    %c0_3 = arith.constant 0 : index
    %5 = vector.load %arg5[%c0_2, %c0_3] : memref<1x128xf32, #tpu.memory_space<vmem>>, vector<1x128xf32>
    %6 = vector.broadcast %5 : vector<1x128xf32> to vector<32x128xf32>
    %7 = arith.mulf %4, %6 : vector<32x128xf32>
    %c0_4 = arith.constant 0 : index
    %c0_5 = arith.constant 0 : index
    %8 = vector.load %arg6[%c0_4, %c0_5] : memref<1x128xf32, #tpu.memory_space<vmem>>, vector<1x128xf32>
    %9 = vector.broadcast %8 : vector<1x128xf32> to vector<32x128xf32>
    %10 = arith.addf %7, %9 : vector<32x128xf32>
    %cst = arith.constant 0.000000e+00 : f32
    %11 = vector.broadcast %cst : f32 to vector<32x128xf32>
    %12 = arith.maximumf %10, %11 : vector<32x128xf32>
    %13 = arith.truncf %12 : vector<32x128xf32> to vector<32x128xbf16>
    %c0_6 = arith.constant 0 : index
    %c0_7 = arith.constant 0 : index
    %14 = vector.load %arg10[%c0_6, %c0_7] : memref<32x128xf32, #tpu.memory_space<vmem>>, vector<32x128xf32>
    %c0_8 = arith.constant 0 : index
    %c0_9 = arith.constant 0 : index
    %15 = vector.load %arg4[%c0_8, %c0_9] : memref<128x128xbf16, #tpu.memory_space<vmem>>, vector<128x128xbf16>
    %cst_10 = arith.constant dense<0.000000e+00> : vector<32x128xf32>
    %16 = tpu.matmul %13, %15, %cst_10 {dimension_numbers = #tpu.dot_dimension_numbers<[1], [0], [0], [1], [0, 0, 1, 1], [], []>} : vector<32x128xbf16>, vector<128x128xbf16>, vector<32x128xf32> -> vector<32x128xf32>
    %17 = arith.addf %14, %16 : vector<32x128xf32>
    %c0_11 = arith.constant 0 : index
    %c0_12 = arith.constant 0 : index
    %18 = vector.load %arg10[%c0_11, %c0_12] : memref<32x128xf32, #tpu.memory_space<vmem>>, vector<32x128xf32>
    tpu.vector_store %arg10[%c0_11, %c0_12], %17 {strides = array<i32>} : memref<32x128xf32, #tpu.memory_space<vmem>>, vector<32x128xf32>,
    %c0_i32_13 = arith.constant 0 : i32
    %19 = arith.cmpi eq, %arg2, %c0_i32_13 : i32
    %20 = arith.extui %19 : i1 to i32
    %c0_i32_14 = arith.constant 0 : i32
    %21 = arith.cmpi ne, %20, %c0_i32_14 : i32
    scf.if %21 {
      %c0_15 = arith.constant 0 : index
      %c0_16 = arith.constant 0 : index
      %22 = vector.load %arg10[%c0_15, %c0_16] : memref<32x128xf32, #tpu.memory_space<vmem>>, vector<32x128xf32>
      %c0_17 = arith.constant 0 : index
      %c0_18 = arith.constant 0 : index
      %23 = vector.load %arg7[%c0_17, %c0_18] : memref<1x128xf32, #tpu.memory_space<vmem>>, vector<1x128xf32>
      %24 = vector.broadcast %23 : vector<1x128xf32> to vector<32x128xf32>
      %25 = arith.mulf %22, %24 : vector<32x128xf32>
      %c0_19 = arith.constant 0 : index
      %c0_20 = arith.constant 0 : index
      %26 = vector.load %arg8[%c0_19, %c0_20] : memref<1x128xf32, #tpu.memory_space<vmem>>, vector<1x128xf32>
      %27 = vector.broadcast %26 : vector<1x128xf32> to vector<32x128xf32>
      %28 = arith.addf %25, %27 : vector<32x128xf32>
      %cst_21 = arith.constant 0.000000e+00 : f32
      %29 = vector.broadcast %cst_21 : f32 to vector<32x128xf32>
      %30 = arith.maximumf %28, %29 : vector<32x128xf32>
      %31 = arith.truncf %30 : vector<32x128xf32> to vector<32x128xbf16>
      %c0_22 = arith.constant 0 : index
      %c0_23 = arith.constant 0 : index
      %32 = vector.load %arg9[%c0_22, %c0_23] : memref<32x128xbf16, #tpu.memory_space<vmem>>, vector<32x128xbf16>
      tpu.vector_store %arg9[%c0_22, %c0_23], %31 {strides = array<i32>} : memref<32x128xbf16, #tpu.memory_space<vmem>>, vector<32x128xbf16>,
    } else {
    }
    return
  }
  func.func @transform_0(%arg0: i32, %arg1: i32, %arg2: i32) -> (i32, i32) {
    %c0_i32 = arith.constant 0 : i32
    return %arg0, %arg2 : i32, i32
  }
  func.func @transform_1(%arg0: i32, %arg1: i32, %arg2: i32) -> (i32, i32) {
    %c0_i32 = arith.constant 0 : i32
    return %arg2, %arg1 : i32, i32
  }
  func.func @transform_2(%arg0: i32, %arg1: i32, %arg2: i32) -> (i32, i32) {
    %c0_i32 = arith.constant 0 : i32
    %c0_i32_0 = arith.constant 0 : i32
    return %c0_i32, %arg2 : i32, i32
  }
  func.func @transform_3(%arg0: i32, %arg1: i32, %arg2: i32) -> (i32, i32) {
    %c0_i32 = arith.constant 0 : i32
    %c0_i32_0 = arith.constant 0 : i32
    return %c0_i32, %arg2 : i32, i32
  }
  func.func @transform_4(%arg0: i32, %arg1: i32, %arg2: i32) -> (i32, i32) {
    %c0_i32 = arith.constant 0 : i32
    %c0_i32_0 = arith.constant 0 : i32
    return %c0_i32, %arg1 : i32, i32
  }
  func.func @transform_5(%arg0: i32, %arg1: i32, %arg2: i32) -> (i32, i32) {
    %c0_i32 = arith.constant 0 : i32
    %c0_i32_0 = arith.constant 0 : i32
    return %c0_i32, %arg1 : i32, i32
  }
  func.func @transform_6(%arg0: i32, %arg1: i32, %arg2: i32) -> (i32, i32) {
    %c0_i32 = arith.constant 0 : i32
    return %arg0, %arg1 : i32, i32
  }
}

module attributes {stable_mosaic.version = 11 : i64} {
  func.func @_fused_mm_kernel(%arg0: i32, %arg1: i32, %arg2: i32, %arg3: memref<32x384xbf16, #tpu.memory_space<vmem>>, %arg4: memref<384x128xbf16, #tpu.memory_space<vmem>>, %arg5: memref<1x384xf32, #tpu.memory_space<vmem>>, %arg6: memref<1x384xf32, #tpu.memory_space<vmem>>, %arg7: memref<1x128xf32, #tpu.memory_space<vmem>>, %arg8: memref<1x128xf32, #tpu.memory_space<vmem>>, %arg9: memref<32x128xbf16, #tpu.memory_space<vmem>>, %arg10: memref<32x128xf32, #tpu.memory_space<vmem>>) attributes {dimension_semantics = [#tpu.dimension_semantics<parallel>, #tpu.dimension_semantics<parallel>, #tpu.dimension_semantics<arbitrary>], iteration_bounds = array<i64: 1, 1, 1>, scalar_prefetch = 0 : i64, scratch_operands = 1 : i64, tpu.core_type = #tpu.core_type<tc>, window_params = [{transform_indices = @transform_0, window_bounds = array<i64: 32, 384>}, {transform_indices = @transform_1, window_bounds = array<i64: 384, 128>}, {transform_indices = @transform_2, window_bounds = array<i64: 1, 384>}, {transform_indices = @transform_3, window_bounds = array<i64: 1, 384>}, {transform_indices = @transform_4, window_bounds = array<i64: 1, 128>}, {transform_indices = @transform_5, window_bounds = array<i64: 1, 128>}, {transform_indices = @transform_6, window_bounds = array<i64: 32, 128>}]} {
    %c0_i32 = arith.constant 0 : i32
    %0 = arith.cmpi eq, %arg2, %c0_i32 : i32
    %1 = arith.extui %0 : i1 to i32
    %c0_i32_0 = arith.constant 0 : i32
    %2 = arith.cmpi ne, %1, %c0_i32_0 : i32
    scf.if %2 {
      %cst_10 = arith.constant 0.000000e+00 : f32
      %12 = vector.broadcast %cst_10 : f32 to vector<32x128xf32>
      %c0_11 = arith.constant 0 : index
      %c0_12 = arith.constant 0 : index
      %13 = vector.load %arg10[%c0_11, %c0_12] : memref<32x128xf32, #tpu.memory_space<vmem>>, vector<32x128xf32>
      tpu.vector_store %arg10[%c0_11, %c0_12], %12 {strides = array<i32>} : memref<32x128xf32, #tpu.memory_space<vmem>>, vector<32x128xf32>,
    } else {
    }
    %c0 = arith.constant 0 : index
    %c0_1 = arith.constant 0 : index
    %3 = vector.load %arg3[%c0, %c0_1] : memref<32x384xbf16, #tpu.memory_space<vmem>>, vector<32x384xbf16>
    %c0_2 = arith.constant 0 : index
    %c0_3 = arith.constant 0 : index
    %4 = vector.load %arg10[%c0_2, %c0_3] : memref<32x128xf32, #tpu.memory_space<vmem>>, vector<32x128xf32>
    %c0_4 = arith.constant 0 : index
    %c0_5 = arith.constant 0 : index
    %5 = vector.load %arg4[%c0_4, %c0_5] : memref<384x128xbf16, #tpu.memory_space<vmem>>, vector<384x128xbf16>
    %cst = arith.constant dense<0.000000e+00> : vector<32x128xf32>
    %6 = tpu.matmul %3, %5, %cst {dimension_numbers = #tpu.dot_dimension_numbers<[1], [0], [0], [1], [0, 0, 1, 1], [], []>} : vector<32x384xbf16>, vector<384x128xbf16>, vector<32x128xf32> -> vector<32x128xf32>
    %7 = arith.addf %4, %6 : vector<32x128xf32>
    %c0_6 = arith.constant 0 : index
    %c0_7 = arith.constant 0 : index
    %8 = vector.load %arg10[%c0_6, %c0_7] : memref<32x128xf32, #tpu.memory_space<vmem>>, vector<32x128xf32>
    tpu.vector_store %arg10[%c0_6, %c0_7], %7 {strides = array<i32>} : memref<32x128xf32, #tpu.memory_space<vmem>>, vector<32x128xf32>,
    %c0_i32_8 = arith.constant 0 : i32
    %9 = arith.cmpi eq, %arg2, %c0_i32_8 : i32
    %10 = arith.extui %9 : i1 to i32
    %c0_i32_9 = arith.constant 0 : i32
    %11 = arith.cmpi ne, %10, %c0_i32_9 : i32
    scf.if %11 {
      %c0_10 = arith.constant 0 : index
      %c0_11 = arith.constant 0 : index
      %12 = vector.load %arg10[%c0_10, %c0_11] : memref<32x128xf32, #tpu.memory_space<vmem>>, vector<32x128xf32>
      %13 = arith.truncf %12 : vector<32x128xf32> to vector<32x128xbf16>
      %c0_12 = arith.constant 0 : index
      %c0_13 = arith.constant 0 : index
      %14 = vector.load %arg9[%c0_12, %c0_13] : memref<32x128xbf16, #tpu.memory_space<vmem>>, vector<32x128xbf16>
      tpu.vector_store %arg9[%c0_12, %c0_13], %13 {strides = array<i32>} : memref<32x128xbf16, #tpu.memory_space<vmem>>, vector<32x128xbf16>,
    } else {
    }
    return
  }
  func.func @transform_0(%arg0: i32, %arg1: i32, %arg2: i32) -> (i32, i32) {
    %c0_i32 = arith.constant 0 : i32
    return %arg0, %arg2 : i32, i32
  }
  func.func @transform_1(%arg0: i32, %arg1: i32, %arg2: i32) -> (i32, i32) {
    %c0_i32 = arith.constant 0 : i32
    return %arg2, %arg1 : i32, i32
  }
  func.func @transform_2(%arg0: i32, %arg1: i32, %arg2: i32) -> (i32, i32) {
    %c0_i32 = arith.constant 0 : i32
    %c0_i32_0 = arith.constant 0 : i32
    return %c0_i32, %arg2 : i32, i32
  }
  func.func @transform_3(%arg0: i32, %arg1: i32, %arg2: i32) -> (i32, i32) {
    %c0_i32 = arith.constant 0 : i32
    %c0_i32_0 = arith.constant 0 : i32
    return %c0_i32, %arg2 : i32, i32
  }
  func.func @transform_4(%arg0: i32, %arg1: i32, %arg2: i32) -> (i32, i32) {
    %c0_i32 = arith.constant 0 : i32
    %c0_i32_0 = arith.constant 0 : i32
    return %c0_i32, %arg1 : i32, i32
  }
  func.func @transform_5(%arg0: i32, %arg1: i32, %arg2: i32) -> (i32, i32) {
    %c0_i32 = arith.constant 0 : i32
    %c0_i32_0 = arith.constant 0 : i32
    return %c0_i32, %arg1 : i32, i32
  }
  func.func @transform_6(%arg0: i32, %arg1: i32, %arg2: i32) -> (i32, i32) {
    %c0_i32 = arith.constant 0 : i32
    return %arg0, %arg1 : i32, i32
  }
}

module attributes {stable_mosaic.version = 11 : i64} {
  func.func @_gem_kernel(%arg0: i32, %arg1: memref<1x16x56xbf16, #tpu.memory_space<vmem>>, %arg2: memref<1x56xf32, #tpu.memory_space<vmem>>, %arg3: memref<1x56xf32, #tpu.memory_space<vmem>>, %arg4: memref<1xf32, #tpu.memory_space<smem>>, %arg5: memref<1x1x56xf32, #tpu.memory_space<vmem>>) attributes {dimension_semantics = [#tpu.dimension_semantics<parallel>], iteration_bounds = array<i64: 2>, scalar_prefetch = 0 : i64, scratch_operands = 0 : i64, tpu.core_type = #tpu.core_type<tc>, window_params = [{transform_indices = @transform_0, window_bounds = array<i64: 1, 16, 56>}, {pipeline_mode = #tpu.pipeline_mode<synchronous>, transform_indices = @transform_1, window_bounds = array<i64: 1, 56>}, {pipeline_mode = #tpu.pipeline_mode<synchronous>, transform_indices = @transform_2, window_bounds = array<i64: 1, 56>}, {transform_indices = @transform_3, window_bounds = array<i64: 1>}, {transform_indices = @transform_4, window_bounds = array<i64: 1, 1, 56>}]} {
    %c0 = arith.constant 0 : index
    %c0_0 = arith.constant 0 : index
    %c0_1 = arith.constant 0 : index
    %0 = vector.load %arg1[%c0, %c0_0, %c0_1] : memref<1x16x56xbf16, #tpu.memory_space<vmem>>, vector<1x16x56xbf16>
    %1 = arith.extf %0 : vector<1x16x56xbf16> to vector<1x16x56xf32>
    %c0_2 = arith.constant 0 : index
    %c0_3 = arith.constant 0 : index
    %2 = vector.load %arg2[%c0_2, %c0_3] : memref<1x56xf32, #tpu.memory_space<vmem>>, vector<1x56xf32>
    %3 = vector.shape_cast %2 : vector<1x56xf32> to vector<1x1x56xf32>
    %4 = vector.broadcast %3 : vector<1x1x56xf32> to vector<1x16x56xf32>
    %5 = arith.mulf %1, %4 : vector<1x16x56xf32>
    %c0_4 = arith.constant 0 : index
    %c0_5 = arith.constant 0 : index
    %6 = vector.load %arg3[%c0_4, %c0_5] : memref<1x56xf32, #tpu.memory_space<vmem>>, vector<1x56xf32>
    %7 = vector.shape_cast %6 : vector<1x56xf32> to vector<1x1x56xf32>
    %8 = vector.broadcast %7 : vector<1x1x56xf32> to vector<1x16x56xf32>
    %9 = arith.addf %5, %8 : vector<1x16x56xf32>
    %cst = arith.constant 9.99999997E-7 : f32
    %10 = vector.broadcast %cst : f32 to vector<1x16x56xf32>
    %11 = arith.maximumf %9, %10 : vector<1x16x56xf32>
    %12 = arith.mulf %11, %11 : vector<1x16x56xf32>
    %13 = arith.mulf %12, %11 : vector<1x16x56xf32>
    %cst_6 = arith.constant dense<0.000000e+00> : vector<1x56xf32>
    %14 = vector.multi_reduction <add>, %13, %cst_6 [1] : vector<1x16x56xf32> to vector<1x56xf32>
    %15 = vector.shape_cast %14 : vector<1x56xf32> to vector<1x1x56xf32>
    %cst_7 = arith.constant 1.600000e+01 : f32
    %16 = vector.broadcast %cst_7 : f32 to vector<1x1x56xf32>
    %17 = arith.divf %15, %16 : vector<1x1x56xf32>
    %18 = math.log %17 : vector<1x1x56xf32>
    %c0_8 = arith.constant 0 : index
    %19 = memref.load %arg4[%c0_8] : memref<1xf32, #tpu.memory_space<smem>>
    %20 = vector.broadcast %19 : f32 to vector<1x1x56xf32>
    %21 = arith.divf %18, %20 : vector<1x1x56xf32>
    %22 = math.exp %21 : vector<1x1x56xf32>
    %c0_9 = arith.constant 0 : index
    %c0_10 = arith.constant 0 : index
    %c0_11 = arith.constant 0 : index
    %23 = vector.load %arg5[%c0_9, %c0_10, %c0_11] : memref<1x1x56xf32, #tpu.memory_space<vmem>>, vector<1x1x56xf32>
    tpu.vector_store %arg5[%c0_9, %c0_10, %c0_11], %22 {strides = array<i32>} : memref<1x1x56xf32, #tpu.memory_space<vmem>>, vector<1x1x56xf32>,
    return
  }
  func.func @transform_0(%arg0: i32) -> (i32, i32, i32) {
    %c0_i32 = arith.constant 0 : i32
    %c0_i32_0 = arith.constant 0 : i32
    %c0_i32_1 = arith.constant 0 : i32
    return %arg0, %c0_i32, %c0_i32_0 : i32, i32, i32
  }
  func.func @transform_1(%arg0: i32) -> (i32, i32) {
    %c0_i32 = arith.constant 0 : i32
    %c0_i32_0 = arith.constant 0 : i32
    %c0_i32_1 = arith.constant 0 : i32
    return %c0_i32, %c0_i32_0 : i32, i32
  }
  func.func @transform_2(%arg0: i32) -> (i32, i32) {
    %c0_i32 = arith.constant 0 : i32
    %c0_i32_0 = arith.constant 0 : i32
    %c0_i32_1 = arith.constant 0 : i32
    return %c0_i32, %c0_i32_0 : i32, i32
  }
  func.func @transform_3(%arg0: i32) -> i32 {
    %c0_i32 = arith.constant 0 : i32
    %c0_i32_0 = arith.constant 0 : i32
    return %c0_i32 : i32
  }
  func.func @transform_4(%arg0: i32) -> (i32, i32, i32) {
    %c0_i32 = arith.constant 0 : i32
    %c0_i32_0 = arith.constant 0 : i32
    %c0_i32_1 = arith.constant 0 : i32
    return %arg0, %c0_i32, %c0_i32_0 : i32, i32, i32
  }
}

module attributes {stable_mosaic.version = 11 : i64} {
  func.func @_fused_mm_kernel(%arg0: i32, %arg1: i32, %arg2: i32, %arg3: memref<16x128xbf16, #tpu.memory_space<vmem>>, %arg4: memref<128x128xbf16, #tpu.memory_space<vmem>>, %arg5: memref<1x128xf32, #tpu.memory_space<vmem>>, %arg6: memref<1x128xf32, #tpu.memory_space<vmem>>, %arg7: memref<1x128xf32, #tpu.memory_space<vmem>>, %arg8: memref<1x128xf32, #tpu.memory_space<vmem>>, %arg9: memref<16x128xf32, #tpu.memory_space<vmem>>, %arg10: memref<16x128xf32, #tpu.memory_space<vmem>>) attributes {dimension_semantics = [#tpu.dimension_semantics<parallel>, #tpu.dimension_semantics<parallel>, #tpu.dimension_semantics<arbitrary>], iteration_bounds = array<i64: 1, 1, 1>, scalar_prefetch = 0 : i64, scratch_operands = 1 : i64, tpu.core_type = #tpu.core_type<tc>, window_params = [{transform_indices = @transform_0, window_bounds = array<i64: 16, 128>}, {transform_indices = @transform_1, window_bounds = array<i64: 128, 128>}, {transform_indices = @transform_2, window_bounds = array<i64: 1, 128>}, {transform_indices = @transform_3, window_bounds = array<i64: 1, 128>}, {transform_indices = @transform_4, window_bounds = array<i64: 1, 128>}, {transform_indices = @transform_5, window_bounds = array<i64: 1, 128>}, {transform_indices = @transform_6, window_bounds = array<i64: 16, 128>}]} {
    %c0_i32 = arith.constant 0 : i32
    %0 = arith.cmpi eq, %arg2, %c0_i32 : i32
    %1 = arith.extui %0 : i1 to i32
    %c0_i32_0 = arith.constant 0 : i32
    %2 = arith.cmpi ne, %1, %c0_i32_0 : i32
    scf.if %2 {
      %cst_10 = arith.constant 0.000000e+00 : f32
      %12 = vector.broadcast %cst_10 : f32 to vector<16x128xf32>
      %c0_11 = arith.constant 0 : index
      %c0_12 = arith.constant 0 : index
      %13 = vector.load %arg10[%c0_11, %c0_12] : memref<16x128xf32, #tpu.memory_space<vmem>>, vector<16x128xf32>
      tpu.vector_store %arg10[%c0_11, %c0_12], %12 {strides = array<i32>} : memref<16x128xf32, #tpu.memory_space<vmem>>, vector<16x128xf32>,
    } else {
    }
    %c0 = arith.constant 0 : index
    %c0_1 = arith.constant 0 : index
    %3 = vector.load %arg3[%c0, %c0_1] : memref<16x128xbf16, #tpu.memory_space<vmem>>, vector<16x128xbf16>
    %c0_2 = arith.constant 0 : index
    %c0_3 = arith.constant 0 : index
    %4 = vector.load %arg10[%c0_2, %c0_3] : memref<16x128xf32, #tpu.memory_space<vmem>>, vector<16x128xf32>
    %c0_4 = arith.constant 0 : index
    %c0_5 = arith.constant 0 : index
    %5 = vector.load %arg4[%c0_4, %c0_5] : memref<128x128xbf16, #tpu.memory_space<vmem>>, vector<128x128xbf16>
    %cst = arith.constant dense<0.000000e+00> : vector<16x128xf32>
    %6 = tpu.matmul %3, %5, %cst {dimension_numbers = #tpu.dot_dimension_numbers<[1], [0], [0], [1], [0, 0, 1, 1], [], []>} : vector<16x128xbf16>, vector<128x128xbf16>, vector<16x128xf32> -> vector<16x128xf32>
    %7 = arith.addf %4, %6 : vector<16x128xf32>
    %c0_6 = arith.constant 0 : index
    %c0_7 = arith.constant 0 : index
    %8 = vector.load %arg10[%c0_6, %c0_7] : memref<16x128xf32, #tpu.memory_space<vmem>>, vector<16x128xf32>
    tpu.vector_store %arg10[%c0_6, %c0_7], %7 {strides = array<i32>} : memref<16x128xf32, #tpu.memory_space<vmem>>, vector<16x128xf32>,
    %c0_i32_8 = arith.constant 0 : i32
    %9 = arith.cmpi eq, %arg2, %c0_i32_8 : i32
    %10 = arith.extui %9 : i1 to i32
    %c0_i32_9 = arith.constant 0 : i32
    %11 = arith.cmpi ne, %10, %c0_i32_9 : i32
    scf.if %11 {
      %c0_10 = arith.constant 0 : index
      %c0_11 = arith.constant 0 : index
      %12 = vector.load %arg10[%c0_10, %c0_11] : memref<16x128xf32, #tpu.memory_space<vmem>>, vector<16x128xf32>
      %c0_12 = arith.constant 0 : index
      %c0_13 = arith.constant 0 : index
      %13 = vector.load %arg7[%c0_12, %c0_13] : memref<1x128xf32, #tpu.memory_space<vmem>>, vector<1x128xf32>
      %14 = vector.broadcast %13 : vector<1x128xf32> to vector<16x128xf32>
      %15 = arith.mulf %12, %14 : vector<16x128xf32>
      %c0_14 = arith.constant 0 : index
      %c0_15 = arith.constant 0 : index
      %16 = vector.load %arg8[%c0_14, %c0_15] : memref<1x128xf32, #tpu.memory_space<vmem>>, vector<1x128xf32>
      %17 = vector.broadcast %16 : vector<1x128xf32> to vector<16x128xf32>
      %18 = arith.addf %15, %17 : vector<16x128xf32>
      %c0_16 = arith.constant 0 : index
      %c0_17 = arith.constant 0 : index
      %19 = vector.load %arg9[%c0_16, %c0_17] : memref<16x128xf32, #tpu.memory_space<vmem>>, vector<16x128xf32>
      tpu.vector_store %arg9[%c0_16, %c0_17], %18 {strides = array<i32>} : memref<16x128xf32, #tpu.memory_space<vmem>>, vector<16x128xf32>,
    } else {
    }
    return
  }
  func.func @transform_0(%arg0: i32, %arg1: i32, %arg2: i32) -> (i32, i32) {
    %c0_i32 = arith.constant 0 : i32
    return %arg0, %arg2 : i32, i32
  }
  func.func @transform_1(%arg0: i32, %arg1: i32, %arg2: i32) -> (i32, i32) {
    %c0_i32 = arith.constant 0 : i32
    return %arg2, %arg1 : i32, i32
  }
  func.func @transform_2(%arg0: i32, %arg1: i32, %arg2: i32) -> (i32, i32) {
    %c0_i32 = arith.constant 0 : i32
    %c0_i32_0 = arith.constant 0 : i32
    return %c0_i32, %arg2 : i32, i32
  }
  func.func @transform_3(%arg0: i32, %arg1: i32, %arg2: i32) -> (i32, i32) {
    %c0_i32 = arith.constant 0 : i32
    %c0_i32_0 = arith.constant 0 : i32
    return %c0_i32, %arg2 : i32, i32
  }
  func.func @transform_4(%arg0: i32, %arg1: i32, %arg2: i32) -> (i32, i32) {
    %c0_i32 = arith.constant 0 : i32
    %c0_i32_0 = arith.constant 0 : i32
    return %c0_i32, %arg1 : i32, i32
  }
  func.func @transform_5(%arg0: i32, %arg1: i32, %arg2: i32) -> (i32, i32) {
    %c0_i32 = arith.constant 0 : i32
    %c0_i32_0 = arith.constant 0 : i32
    return %c0_i32, %arg1 : i32, i32
  }
  func.func @transform_6(%arg0: i32, %arg1: i32, %arg2: i32) -> (i32, i32) {
    %c0_i32 = arith.constant 0 : i32
    return %arg0, %arg1 : i32, i32
  }
}

</mosaic_0001>

<bundles_post_ra>
// kernel: densenet_forward.14
= control target key start
LH: loop header
LB: loop body
LE: loop exit
PB: predicated region body
PF: predicated region fallthrough
CT: control target
= control target key end

     0   :  { %s1971_s21 = smov 0   ;;  %s1973_s22 = smov 0   ;;  %s2182_s0 = inlined_call_operand.vmem [shape: bf16[512,256], index: 0, kind: input, shape index: {}]   ;;  %s2183_s1 = inlined_call_operand.vmem [shape: bf16[256,128], index: 1, kind: input, shape index: {}]   ;;  %s2184_s2 = inlined_call_operand.vmem [shape: f32[1,256], index: 2, kind: input, shape index: {}]   ;;  %s2185_s3 = inlined_call_operand.vmem [shape: f32[1,256], index: 3, kind: input, shape index: {}]   ;;  %s2186_s4 = inlined_call_operand.vmem [shape: f32[1,128], index: 4, kind: input, shape index: {}]   ;;  %s2187_s5 = inlined_call_operand.vmem [shape: f32[1,128], index: 5, kind: input, shape index: {}]   ;;  %s2188_s6 = inlined_call_operand.vmem [shape: bf16[512,128], index: 6, kind: output, shape index: {}]  }
   0x1   :  { %s1975_s23 = smov 0  }
   0x2 LB: > { %s35_s2 = sadd.s32 1, %s1930_s22  ;;  %p1478_p0 = scmp.ge.s32.totalorder %s1934_s23, 1  ;;  %s1934_s23 = sphi %s1975_s23, %s16_s23   ;;  %s1930_s22 = sphi %s1973_s22, %s2190_s22   ;;  %s1926_s21 = sphi %s1971_s21, %s2189_s21  }
   0x3   : > { %p37_p1 = scmp.ge.s32.totalorder %s35_s2, 2  ;;  %p294_p2 = scmp.lt.s32.totalorder %s1934_s23, 3 }
   0x5   : > { %s2192_s2 = smov (%p37_p1, %s35_s2), 0  ;;  %p295_p3 = pnand %p1478_p0, %p294_p2 }
   0x6   : > { %v1848_v0 = vld [vmem:[%s2183_s1 + $0x40] sm:$0xff] (!%p295_p3)   ;;  %s1479_s25 = sshll.u32 (!%p295_p3), %s1926_s21, 5  ;;  %v1850_v2 = vld [vmem:[%s2183_s1 + $0x48] sm:$0xff] (!%p295_p3)   ;;  %v1852_v4 = vld [vmem:[%s2183_s1 + $0x50] sm:$0xff] (!%p295_p3)  }
   0x7   : > { %298 = sbr.rel (%p295_p3) target bundleno = 322 (0x142), region = 44  ;;  %v1849_v1 = vld [vmem:[%s2183_s1] sm:$0xff] (!%p295_p3)   ;;  %1696 = vmatprep.subr.bf16.mxu0 (!%p295_p3), %v1848_v0  ;;  %1808 = vmatprep.subr.bf16.mxu1 (!%p295_p3), %v1848_v0  ;;  %v1851_v3 = vld [vmem:[%s2183_s1 + $0x8] sm:$0xff] (!%p295_p3)   ;;  %p356_p4 = scmp.lt.s32.totalorder (!%p295_p3), %s1479_s25, 63  ;;  %v1853_v5 = vld [vmem:[%s2183_s1 + $0x10] sm:$0xff] (!%p295_p3)  }
   0x8   : > { %1697 = vmatpush3.bf16.msra.mxu0 (!%p295_p3), %v1849_v1  ;;  %1816 = vmatpush3.bf16.msra.mxu1 (!%p295_p3), %v1849_v1  ;;  %v1854_v6 = vld [vmem:[%s2183_s1 + $0x58] sm:$0xff] (!%p295_p3)   ;;  %v1856_v8 = vld [vmem:[%s2183_s1 + $0x60] sm:$0xff] (!%p295_p3)   ;;  %v1858_v10 = vld [vmem:[%s2183_s1 + $0x68] sm:$0xff] (!%p295_p3)  }
   0x9   : > { %1698 = vmatprep.subr.bf16.mxu0 (!%p295_p3), %v1850_v2  ;;  %1809 = vmatprep.subr.bf16.mxu1 (!%p295_p3), %v1850_v2  ;;  %v1855_v7 = vld [vmem:[%s2183_s1 + $0x18] sm:$0xff] (!%p295_p3)   ;;  %v1857_v9 = vld [vmem:[%s2183_s1 + $0x20] sm:$0xff] (!%p295_p3)   ;;  %v1859_v13 = vld [vmem:[%s2183_s1 + $0x28] sm:$0xff] (!%p295_p3)  }
   0xa   : > { %v1860_v14 = vld [vmem:[%s2183_s1 + $0x70] sm:$0xff] (!%p295_p3)   ;;  %v1862_v16 = vld [vmem:[%s2183_s1 + $0x78] sm:$0xff] (!%p295_p3)   ;;  %v2080_v51 = vld [vmem:[%s2186_s4] ss:$0 sm:$0xff] (!%p295_p3) }
   0xb   : > { %v1861_v15 = vld [vmem:[%s2183_s1 + $0x30] sm:$0xff] (!%p295_p3)   ;;  %v1863_v17 = vld [vmem:[%s2183_s1 + $0x38] sm:$0xff] (!%p295_p3)   ;;  %v2085_v57 = vld [vmem:[%s2187_s5] ss:$0 sm:$0xff] (!%p295_p3) }
   0xc   : > { %1699 = vmatpush3.bf16.msra.mxu0 (!%p295_p3), %v1851_v3  ;;  %1817 = vmatpush3.bf16.msra.mxu1 (!%p295_p3), %v1851_v3 }
   0xd   : > { %1700 = vmatprep.subr.bf16.mxu0 (!%p295_p3), %v1852_v4  ;;  %1810 = vmatprep.subr.bf16.mxu1 (!%p295_p3), %v1852_v4 }
   0xe   : > { %s2194_s25 = smov (!%p356_p4, %s1479_s25), 63 }
   0xf   : > { %s1568_s16 = sshll.u32 %s2194_s25, 3  ;;  %s1483_s18 = sshll.u32 %s2194_s25, 2 }
  0x10   : > { %1701 = vmatpush3.bf16.msra.mxu0 %v1853_v5  ;;  %1818 = vmatpush3.bf16.msra.mxu1 %v1853_v5  ;;  %s2022_s21 = scalar_lea.vmem %s2182_s0, %s1568_s16  ;;  %s2099_s25 = scalar_lea.vmem %s2188_s6, %s1483_s18 }
  0x11   : > { %1702 = vmatprep.subr.bf16.mxu0 %v1854_v6  ;;  %1811 = vmatprep.subr.bf16.mxu1 %v1854_v6  ;;  %v1866_v11 = vld [vmem:[%s2022_s21 + $0x4] ss:$8 sps:$4 sm:$0xff]   ;;  %v1864_v18 = vld [vmem:[%s2022_s21] ss:$8 sps:$4 sm:$0xff]   ;;  %v1870_v20 = vld [vmem:[%s2022_s21 + $0x14] ss:$8 sps:$4 sm:$0xff]  }
  0x12   : > { %v1869_v12 = vld [vmem:[%s2022_s21 + $0x84] ss:$8 sps:$4 sm:$0xff]   ;;  %821 = vmatprep.mubr.bf16.mxu0 %v1866_v11  ;;  %v1867_v19 = vld [vmem:[%s2022_s21 + $0x80] ss:$8 sps:$4 sm:$0xff]   ;;  %v1872_v21 = vld [vmem:[%s2022_s21 + $0x94] ss:$8 sps:$4 sm:$0xff]  }
  0x13   : > { %885 = vmatprep.mubr.bf16.mxu1 %v1869_v12  ;;  %v1874_v22 = vld [vmem:[%s2022_s21 + $0x10] ss:$8 sps:$4 sm:$0xff]   ;;  %v1876_v24 = vld [vmem:[%s2022_s21 + $0x24] ss:$8 sps:$4 sm:$0xff]   ;;  %v1880_v26 = vld [vmem:[%s2022_s21 + $0x20] ss:$8 sps:$4 sm:$0xff]  }
  0x14   : > { %1703 = vmatpush3.bf16.msra.mxu0 %v1855_v7  ;;  %1819 = vmatpush3.bf16.msra.mxu1 %v1855_v7  ;;  %v1875_v23 = vld [vmem:[%s2022_s21 + $0x90] ss:$8 sps:$4 sm:$0xff]   ;;  %v1878_v25 = vld [vmem:[%s2022_s21 + $0xa4] ss:$8 sps:$4 sm:$0xff]   ;;  %v1881_v27 = vld [vmem:[%s2022_s21 + $0xa0] ss:$8 sps:$4 sm:$0xff]  }
  0x15   : > { %1704 = vmatprep.subr.bf16.mxu0 %v1856_v8  ;;  %1812 = vmatprep.subr.bf16.mxu1 %v1856_v8  ;;  %v1882_v28 = vld [vmem:[%s2022_s21 + $0x34] ss:$8 sps:$4 sm:$0xff]   ;;  %v1886_v30 = vld [vmem:[%s2022_s21 + $0x30] ss:$8 sps:$4 sm:$0xff]   ;;  %v1888_v32 = vld [vmem:[%s2022_s21 + $0x44] ss:$8 sps:$4 sm:$0xff]  }
  0x16   : > { %v1884_v29 = vld [vmem:[%s2022_s21 + $0xb4] ss:$8 sps:$4 sm:$0xff]   ;;  %v1887_v31 = vld [vmem:[%s2022_s21 + $0xb0] ss:$8 sps:$4 sm:$0xff]   ;;  %v1890_v33 = vld [vmem:[%s2022_s21 + $0xc4] ss:$8 sps:$4 sm:$0xff]  }
  0x17   : > { %v1892_v34 = vld [vmem:[%s2022_s21 + $0x40] ss:$8 sps:$4 sm:$0xff]   ;;  %v1894_v36 = vld [vmem:[%s2022_s21 + $0x54] ss:$8 sps:$4 sm:$0xff]   ;;  %v1898_v38 = vld [vmem:[%s2022_s21 + $0x50] ss:$8 sps:$4 sm:$0xff]  }
  0x18   : > { %1705 = vmatpush3.bf16.msra.mxu0 %v1857_v9  ;;  %1820 = vmatpush3.bf16.msra.mxu1 %v1857_v9  ;;  %v1893_v35 = vld [vmem:[%s2022_s21 + $0xc0] ss:$8 sps:$4 sm:$0xff]   ;;  %v1896_v37 = vld [vmem:[%s2022_s21 + $0xd4] ss:$8 sps:$4 sm:$0xff]   ;;  %v1899_v39 = vld [vmem:[%s2022_s21 + $0xd0] ss:$8 sps:$4 sm:$0xff]  }
  0x19   : > { %1706 = vmatprep.subr.bf16.mxu0 %v1858_v10  ;;  %1813 = vmatprep.subr.bf16.mxu1 %v1858_v10  ;;  %v1900_v40 = vld [vmem:[%s2022_s21 + $0x64] ss:$8 sps:$4 sm:$0xff]   ;;  %v1904_v42 = vld [vmem:[%s2022_s21 + $0x60] ss:$8 sps:$4 sm:$0xff]   ;;  %v1906_v44 = vld [vmem:[%s2022_s21 + $0x74] ss:$8 sps:$4 sm:$0xff]  }
  0x1a   : > { %v1902_v41 = vld [vmem:[%s2022_s21 + $0xe4] ss:$8 sps:$4 sm:$0xff]   ;;  %v1905_v43 = vld [vmem:[%s2022_s21 + $0xe0] ss:$8 sps:$4 sm:$0xff]   ;;  %v1908_v45 = vld [vmem:[%s2022_s21 + $0xf4] ss:$8 sps:$4 sm:$0xff]  }
  0x1b   : > { %v1910_v46 = vld [vmem:[%s2022_s21 + $0x70] ss:$8 sps:$4 sm:$0xff]  }
  0x1c   : > { %1707 = vmatpush3.bf16.msra.mxu0 %v1859_v13  ;;  %1821 = vmatpush3.bf16.msra.mxu1 %v1859_v13  ;;  %v1911_v47 = vld [vmem:[%s2022_s21 + $0xf0] ss:$8 sps:$4 sm:$0xff]  }
  0x1d   : > { %1708 = vmatprep.subr.bf16.mxu0 %v1860_v14  ;;  %1814 = vmatprep.subr.bf16.mxu1 %v1860_v14 }
  0x20   : > { %1709 = vmatpush3.bf16.msra.mxu0 %v1861_v15  ;;  %1822 = vmatpush3.bf16.msra.mxu1 %v1861_v15 }
  0x21   : > { %1710 = vmatprep.subr.bf16.mxu0 %v1862_v16  ;;  %1815 = vmatprep.subr.bf16.mxu1 %v1862_v16 }
  0x24   : > { %1711 = vmatpush3.bf16.msra.mxu0 %v1863_v17  ;;  %1823 = vmatpush3.bf16.msra.mxu1 %v1863_v17 }
  0x27   : > { %822 = vmatmul.mubr.bf16.vlgmr.msra.gmra.mrb[0].mxu0 %v1864_v18  ;;  %886 = vmatmul.mubr.bf16.vlgmr.msra.gmra.mrb[0].mxu1 %v1867_v19 }
  0x28   : > { %829 = vmatprep.mubr.bf16.mxu0 %v1870_v20  ;;  %893 = vmatprep.mubr.bf16.mxu1 %v1872_v21 }
  0x2f   : > { %830 = vmatmul.mubr.bf16.gmra.mrb[4].mxu0 %v1874_v22  ;;  %894 = vmatmul.mubr.bf16.gmra.mrb[4].mxu1 %v1875_v23 }
  0x30   : > { %837 = vmatprep.mubr.bf16.mxu0 %v1876_v24  ;;  %901 = vmatprep.mubr.bf16.mxu1 %v1878_v25 }
  0x37   : > { %838 = vmatmul.mubr.bf16.gmra.mrb[8].mxu0 %v1880_v26  ;;  %902 = vmatmul.mubr.bf16.gmra.mrb[8].mxu1 %v1881_v27 }
  0x38   : > { %845 = vmatprep.mubr.bf16.mxu0 %v1882_v28  ;;  %909 = vmatprep.mubr.bf16.mxu1 %v1884_v29 }
  0x3f   : > { %846 = vmatmul.mubr.bf16.gmra.mrb[12].mxu0 %v1886_v30  ;;  %910 = vmatmul.mubr.bf16.gmra.mrb[12].mxu1 %v1887_v31 }
  0x40   : > { %853 = vmatprep.mubr.bf16.mxu0 %v1888_v32  ;;  %917 = vmatprep.mubr.bf16.mxu1 %v1890_v33 }
  0x47   : > { %854 = vmatmul.mubr.bf16.gmra.mrb[16].mxu0 %v1892_v34  ;;  %918 = vmatmul.mubr.bf16.gmra.mrb[16].mxu1 %v1893_v35 }
  0x48   : > { %861 = vmatprep.mubr.bf16.mxu0 %v1894_v36  ;;  %925 = vmatprep.mubr.bf16.mxu1 %v1896_v37 }
  0x4f   : > { %862 = vmatmul.mubr.bf16.gmra.mrb[20].mxu0 %v1898_v38  ;;  %926 = vmatmul.mubr.bf16.gmra.mrb[20].mxu1 %v1899_v39 }
  0x50   : > { %869 = vmatprep.mubr.bf16.mxu0 %v1900_v40  ;;  %933 = vmatprep.mubr.bf16.mxu1 %v1902_v41 }
  0x57   : > { %870 = vmatmul.mubr.bf16.gmra.mrb[24].mxu0 %v1904_v42  ;;  %934 = vmatmul.mubr.bf16.gmra.mrb[24].mxu1 %v1905_v43 }
  0x58   : > { %877 = vmatprep.mubr.bf16.mxu0 %v1906_v44  ;;  %941 = vmatprep.mubr.bf16.mxu1 %v1908_v45 }
  0x5f   : > { %878 = vmatmul.mubr.bf16.gmra.mrb[28].mxu0 %v1910_v46  ;;  %942 = vmatmul.mubr.bf16.gmra.mrb[28].mxu1 %v1911_v47 }
  0xfa   : > { %v1712_v48 = vpop.f32.mrb[0].mxu0  ;;  %v1760_v49 = vpop.f32.mrb[0].mxu1 }
  0xfb   : > { %v1713_v50 = vpop.f32.mrb[1].mxu0  ;;  %v1761_v52 = vpop.f32.mrb[1].mxu1 }
  0xfc   : > { %v1714_v53 = vadd.f32 %v1713_v50, %v1712_v48  ;;  %v1762_v54 = vadd.f32 %v1761_v52, %v1760_v49  ;;  %v1715_v55 = vpop.f32.mrb[2].mxu0  ;;  %v1763_v56 = vpop.f32.mrb[2].mxu1 }
  0xfd   : > { %v1716_v58 = vpop.f32.mrb[3].mxu0  ;;  %v1764_v59 = vpop.f32.mrb[3].mxu1 }
  0xfe   : > { %v1056_v60 = vmul.f32 %v1714_v53, %v2080_v51  ;;  %v1072_v61 = vmul.f32 %v1762_v54, %v2080_v51  ;;  %v1717_v62 = vadd.f32 %v1716_v58, %v1715_v55  ;;  %v1765_v63 = vadd.f32 %v1764_v59, %v1763_v56 }
 0x100   : > { %v1095_v0 = vadd.f32 %v2085_v57, %v1056_v60  ;;  %v1111_v1 = vadd.f32 %v2085_v57, %v1072_v61  ;;  %v1057_v2 = vmul.f32 %v1717_v62, %v2080_v51  ;;  %v1073_v3 = vmul.f32 %v1765_v63, %v2080_v51 }
 0x102   : > { %v1096_v4 = vadd.f32 %v2085_v57, %v1057_v2  ;;  %v1112_v5 = vadd.f32 %v2085_v57, %v1073_v3  ;;  %v1718_v6 = vpop.f32.mrb[4].mxu0  ;;  %v1766_v7 = vpop.f32.mrb[4].mxu1  ;;  %v1127_v8 = vmax.f32 %v1095_v0, 0.0  ;;  %v1143_v9 = vmax.f32 %v1111_v1, 0.0 }
 0x103   : > { %v1719_v10 = vpop.f32.mrb[5].mxu0  ;;  %v1767_v11 = vpop.f32.mrb[5].mxu1 }
 0x104   : > { %v1128_v12 = vmax.f32 %v1096_v4, 0.0  ;;  %v1144_v13 = vmax.f32 %v1112_v5, 0.0  ;;  %v1720_v14 = vadd.f32 %v1719_v10, %v1718_v6  ;;  %v1768_v15 = vadd.f32 %v1767_v11, %v1766_v7  ;;  %v1721_v16 = vpop.f32.mrb[6].mxu0  ;;  %v1769_v17 = vpop.f32.mrb[6].mxu1 }
 0x105   : > { %v1722_v18 = vpop.f32.mrb[7].mxu0  ;;  %v1770_v19 = vpop.f32.mrb[7].mxu1 }
 0x106   : > { %v1604_v20 = vpack.c.bf16 %v1128_v12, %v1127_v8  ;;  %v1644_v21 = vpack.c.bf16 %v1144_v13, %v1143_v9  ;;  %v1058_v22 = vmul.f32 %v1720_v14, %v2080_v51  ;;  %v1074_v23 = vmul.f32 %v1768_v15, %v2080_v51 }
 0x107   : > { %v1723_v24 = vadd.f32 %v1722_v18, %v1721_v16  ;;  %v1771_v25 = vadd.f32 %v1770_v19, %v1769_v17 }
 0x108   : > { %1605 = vst [vmem:[%s2099_s25] sm:$0xff] %v1604_v20   ;;  %1688 = vst [vmem:[%s2099_s25 + $0x40] sm:$0xff] %v1644_v21   ;;  %v1097_v26 = vadd.f32 %v2085_v57, %v1058_v22  ;;  %v1113_v27 = vadd.f32 %v2085_v57, %v1074_v23 }
 0x109   : > { %v1059_v28 = vmul.f32 %v1723_v24, %v2080_v51  ;;  %v1075_v29 = vmul.f32 %v1771_v25, %v2080_v51 }
 0x10a   : > { %v1724_v30 = vpop.f32.mrb[8].mxu0  ;;  %v1772_v31 = vpop.f32.mrb[8].mxu1  ;;  %v1129_v40 = vmax.f32 %v1097_v26, 0.0  ;;  %v1145_v41 = vmax.f32 %v1113_v27, 0.0 }
 0x10b   : > { %v1098_v32 = vadd.f32 %v2085_v57, %v1059_v28  ;;  %v1114_v33 = vadd.f32 %v2085_v57, %v1075_v29  ;;  %v1725_v34 = vpop.f32.mrb[9].mxu0  ;;  %v1773_v35 = vpop.f32.mrb[9].mxu1 }
 0x10c   : > { %v1726_v36 = vadd.f32 %v1725_v34, %v1724_v30  ;;  %v1774_v37 = vadd.f32 %v1773_v35, %v1772_v31  ;;  %v1727_v38 = vpop.f32.mrb[10].mxu0  ;;  %v1775_v39 = vpop.f32.mrb[10].mxu1 }
 0x10d   : > { %v1130_v42 = vmax.f32 %v1098_v32, 0.0  ;;  %v1146_v43 = vmax.f32 %v1114_v33, 0.0  ;;  %v1728_v44 = vpop.f32.mrb[11].mxu0  ;;  %v1776_v45 = vpop.f32.mrb[11].mxu1 }
 0x10e   : > { %v1060_v46 = vmul.f32 %v1726_v36, %v2080_v51  ;;  %v1076_v47 = vmul.f32 %v1774_v37, %v2080_v51  ;;  %v1729_v48 = vadd.f32 %v1728_v44, %v1727_v38  ;;  %v1777_v49 = vadd.f32 %v1776_v45, %v1775_v39 }
 0x10f   : > { %v1609_v50 = vpack.c.bf16 %v1130_v42, %v1129_v40  ;;  %v1649_v52 = vpack.c.bf16 %v1146_v43, %v1145_v41 }
 0x110   : > { %v1099_v53 = vadd.f32 %v2085_v57, %v1060_v46  ;;  %v1115_v54 = vadd.f32 %v2085_v57, %v1076_v47  ;;  %v1061_v55 = vmul.f32 %v1729_v48, %v2080_v51  ;;  %v1077_v56 = vmul.f32 %v1777_v49, %v2080_v51 }
 0x111   : > { %1681 = vst [vmem:[%s2099_s25 + $0x8] sm:$0xff] %v1609_v50   ;;  %1689 = vst [vmem:[%s2099_s25 + $0x48] sm:$0xff] %v1649_v52  }
 0x112   : > { %v1100_v58 = vadd.f32 %v2085_v57, %v1061_v55  ;;  %v1116_v59 = vadd.f32 %v2085_v57, %v1077_v56  ;;  %v1730_v60 = vpop.f32.mrb[12].mxu0  ;;  %v1778_v61 = vpop.f32.mrb[12].mxu1  ;;  %v1131_v62 = vmax.f32 %v1099_v53, 0.0  ;;  %v1147_v63 = vmax.f32 %v1115_v54, 0.0 }
 0x113   : > { %v1731_v0 = vpop.f32.mrb[13].mxu0  ;;  %v1779_v1 = vpop.f32.mrb[13].mxu1 }
 0x114   : > { %v1132_v2 = vmax.f32 %v1100_v58, 0.0  ;;  %v1148_v3 = vmax.f32 %v1116_v59, 0.0  ;;  %v1732_v4 = vadd.f32 %v1731_v0, %v1730_v60  ;;  %v1780_v5 = vadd.f32 %v1779_v1, %v1778_v61  ;;  %v1733_v6 = vpop.f32.mrb[14].mxu0  ;;  %v1781_v7 = vpop.f32.mrb[14].mxu1 }
 0x115   : > { %v1734_v8 = vpop.f32.mrb[15].mxu0  ;;  %v1782_v9 = vpop.f32.mrb[15].mxu1 }
 0x116   : > { %v1614_v10 = vpack.c.bf16 %v1132_v2, %v1131_v62  ;;  %v1654_v11 = vpack.c.bf16 %v1148_v3, %v1147_v63  ;;  %v1062_v12 = vmul.f32 %v1732_v4, %v2080_v51  ;;  %v1078_v13 = vmul.f32 %v1780_v5, %v2080_v51 }
 0x117   : > { %v1735_v14 = vadd.f32 %v1734_v8, %v1733_v6  ;;  %v1783_v15 = vadd.f32 %v1782_v9, %v1781_v7 }
 0x118   : > { %1682 = vst [vmem:[%s2099_s25 + $0x10] sm:$0xff] %v1614_v10   ;;  %1690 = vst [vmem:[%s2099_s25 + $0x50] sm:$0xff] %v1654_v11   ;;  %v1101_v16 = vadd.f32 %v2085_v57, %v1062_v12  ;;  %v1117_v17 = vadd.f32 %v2085_v57, %v1078_v13 }
 0x119   : > { %v1063_v18 = vmul.f32 %v1735_v14, %v2080_v51  ;;  %v1079_v19 = vmul.f32 %v1783_v15, %v2080_v51 }
 0x11a   : > { %v1736_v20 = vpop.f32.mrb[16].mxu0  ;;  %v1784_v21 = vpop.f32.mrb[16].mxu1  ;;  %v1133_v30 = vmax.f32 %v1101_v16, 0.0  ;;  %v1149_v31 = vmax.f32 %v1117_v17, 0.0 }
 0x11b   : > { %v1102_v22 = vadd.f32 %v2085_v57, %v1063_v18  ;;  %v1118_v23 = vadd.f32 %v2085_v57, %v1079_v19  ;;  %v1737_v24 = vpop.f32.mrb[17].mxu0  ;;  %v1785_v25 = vpop.f32.mrb[17].mxu1 }
 0x11c   : > { %v1738_v26 = vadd.f32 %v1737_v24, %v1736_v20  ;;  %v1786_v27 = vadd.f32 %v1785_v25, %v1784_v21  ;;  %v1739_v28 = vpop.f32.mrb[18].mxu0  ;;  %v1787_v29 = vpop.f32.mrb[18].mxu1 }
 0x11d   : > { %v1134_v32 = vmax.f32 %v1102_v22, 0.0  ;;  %v1150_v33 = vmax.f32 %v1118_v23, 0.0  ;;  %v1740_v34 = vpop.f32.mrb[19].mxu0  ;;  %v1788_v35 = vpop.f32.mrb[19].mxu1 }
 0x11e   : > { %v1064_v36 = vmul.f32 %v1738_v26, %v2080_v51  ;;  %v1080_v37 = vmul.f32 %v1786_v27, %v2080_v51  ;;  %v1741_v38 = vadd.f32 %v1740_v34, %v1739_v28  ;;  %v1789_v39 = vadd.f32 %v1788_v35, %v1787_v29 }
 0x11f   : > { %v1619_v40 = vpack.c.bf16 %v1134_v32, %v1133_v30  ;;  %v1659_v41 = vpack.c.bf16 %v1150_v33, %v1149_v31 }
 0x120   : > { %v1103_v42 = vadd.f32 %v2085_v57, %v1064_v36  ;;  %v1119_v43 = vadd.f32 %v2085_v57, %v1080_v37  ;;  %v1065_v44 = vmul.f32 %v1741_v38, %v2080_v51  ;;  %v1081_v45 = vmul.f32 %v1789_v39, %v2080_v51 }
 0x121   : > { %1683 = vst [vmem:[%s2099_s25 + $0x18] sm:$0xff] %v1619_v40   ;;  %1691 = vst [vmem:[%s2099_s25 + $0x58] sm:$0xff] %v1659_v41  }
 0x122   : > { %v1104_v46 = vadd.f32 %v2085_v57, %v1065_v44  ;;  %v1120_v47 = vadd.f32 %v2085_v57, %v1081_v45  ;;  %v1742_v48 = vpop.f32.mrb[20].mxu0  ;;  %v1790_v49 = vpop.f32.mrb[20].mxu1  ;;  %v1135_v50 = vmax.f32 %v1103_v42, 0.0  ;;  %v1151_v52 = vmax.f32 %v1119_v43, 0.0 }
 0x123   : > { %v1743_v53 = vpop.f32.mrb[21].mxu0  ;;  %v1791_v54 = vpop.f32.mrb[21].mxu1 }
 0x124   : > { %v1136_v55 = vmax.f32 %v1104_v46, 0.0  ;;  %v1152_v56 = vmax.f32 %v1120_v47, 0.0  ;;  %v1744_v58 = vadd.f32 %v1743_v53, %v1742_v48  ;;  %v1792_v59 = vadd.f32 %v1791_v54, %v1790_v49  ;;  %v1745_v60 = vpop.f32.mrb[22].mxu0  ;;  %v1793_v61 = vpop.f32.mrb[22].mxu1 }
 0x125   : > { %v1746_v62 = vpop.f32.mrb[23].mxu0  ;;  %v1794_v63 = vpop.f32.mrb[23].mxu1 }
 0x126   : > { %v1624_v0 = vpack.c.bf16 %v1136_v55, %v1135_v50  ;;  %v1664_v1 = vpack.c.bf16 %v1152_v56, %v1151_v52  ;;  %v1066_v2 = vmul.f32 %v1744_v58, %v2080_v51  ;;  %v1082_v3 = vmul.f32 %v1792_v59, %v2080_v51 }
 0x127   : > { %v1747_v4 = vadd.f32 %v1746_v62, %v1745_v60  ;;  %v1795_v5 = vadd.f32 %v1794_v63, %v1793_v61 }
 0x128   : > { %1684 = vst [vmem:[%s2099_s25 + $0x20] sm:$0xff] %v1624_v0   ;;  %1692 = vst [vmem:[%s2099_s25 + $0x60] sm:$0xff] %v1664_v1   ;;  %v1105_v6 = vadd.f32 %v2085_v57, %v1066_v2  ;;  %v1121_v7 = vadd.f32 %v2085_v57, %v1082_v3 }
 0x129   : > { %v1067_v8 = vmul.f32 %v1747_v4, %v2080_v51  ;;  %v1083_v9 = vmul.f32 %v1795_v5, %v2080_v51 }
 0x12a   : > { %v1748_v10 = vpop.f32.mrb[24].mxu0  ;;  %v1796_v11 = vpop.f32.mrb[24].mxu1  ;;  %v1137_v20 = vmax.f32 %v1105_v6, 0.0  ;;  %v1153_v21 = vmax.f32 %v1121_v7, 0.0 }
 0x12b   : > { %v1106_v12 = vadd.f32 %v2085_v57, %v1067_v8  ;;  %v1122_v13 = vadd.f32 %v2085_v57, %v1083_v9  ;;  %v1749_v14 = vpop.f32.mrb[25].mxu0  ;;  %v1797_v15 = vpop.f32.mrb[25].mxu1 }
 0x12c   : > { %v1750_v16 = vadd.f32 %v1749_v14, %v1748_v10  ;;  %v1798_v17 = vadd.f32 %v1797_v15, %v1796_v11  ;;  %v1751_v18 = vpop.f32.mrb[26].mxu0  ;;  %v1799_v19 = vpop.f32.mrb[26].mxu1 }
 0x12d   : > { %v1138_v22 = vmax.f32 %v1106_v12, 0.0  ;;  %v1154_v23 = vmax.f32 %v1122_v13, 0.0  ;;  %v1752_v24 = vpop.f32.mrb[27].mxu0  ;;  %v1800_v25 = vpop.f32.mrb[27].mxu1 }
 0x12e   : > { %v1068_v26 = vmul.f32 %v1750_v16, %v2080_v51  ;;  %v1084_v27 = vmul.f32 %v1798_v17, %v2080_v51  ;;  %v1753_v28 = vadd.f32 %v1752_v24, %v1751_v18  ;;  %v1801_v29 = vadd.f32 %v1800_v25, %v1799_v19 }
 0x12f   : > { %v1629_v30 = vpack.c.bf16 %v1138_v22, %v1137_v20  ;;  %v1669_v31 = vpack.c.bf16 %v1154_v23, %v1153_v21 }
 0x130   : > { %v1107_v32 = vadd.f32 %v2085_v57, %v1068_v26  ;;  %v1123_v33 = vadd.f32 %v2085_v57, %v1084_v27  ;;  %v1069_v34 = vmul.f32 %v1753_v28, %v2080_v51  ;;  %v1085_v35 = vmul.f32 %v1801_v29, %v2080_v51 }
 0x131   : > { %1685 = vst [vmem:[%s2099_s25 + $0x28] sm:$0xff] %v1629_v30   ;;  %1693 = vst [vmem:[%s2099_s25 + $0x68] sm:$0xff] %v1669_v31  }
 0x132   : > { %v1108_v36 = vadd.f32 %v2085_v57, %v1069_v34  ;;  %v1124_v37 = vadd.f32 %v2085_v57, %v1085_v35  ;;  %v1754_v38 = vpop.f32.mrb[28].mxu0  ;;  %v1802_v39 = vpop.f32.mrb[28].mxu1  ;;  %v1139_v40 = vmax.f32 %v1107_v32, 0.0  ;;  %v1155_v41 = vmax.f32 %v1123_v33, 0.0 }
 0x133   : > { %v1755_v42 = vpop.f32.mrb[29].mxu0  ;;  %v1803_v43 = vpop.f32.mrb[29].mxu1 }
 0x134   : > { %v1140_v44 = vmax.f32 %v1108_v36, 0.0  ;;  %v1156_v45 = vmax.f32 %v1124_v37, 0.0  ;;  %v1756_v46 = vadd.f32 %v1755_v42, %v1754_v38  ;;  %v1804_v47 = vadd.f32 %v1803_v43, %v1802_v39  ;;  %v1757_v48 = vpop.f32.mrb[30].mxu0  ;;  %v1805_v49 = vpop.f32.mrb[30].mxu1 }
 0x135   : > { %v1758_v50 = vpop.f32.mrb[31].mxu0  ;;  %v1806_v52 = vpop.f32.mrb[31].mxu1 }
 0x136   : > { %v1634_v53 = vpack.c.bf16 %v1140_v44, %v1139_v40  ;;  %v1674_v54 = vpack.c.bf16 %v1156_v45, %v1155_v41  ;;  %v1070_v55 = vmul.f32 %v1756_v46, %v2080_v51  ;;  %v1086_v56 = vmul.f32 %v1804_v47, %v2080_v51 }
 0x137   : > { %v1759_v58 = vadd.f32 %v1758_v50, %v1757_v48  ;;  %v1807_v59 = vadd.f32 %v1806_v52, %v1805_v49 }
 0x138   : > { %1686 = vst [vmem:[%s2099_s25 + $0x30] sm:$0xff] %v1634_v53   ;;  %1694 = vst [vmem:[%s2099_s25 + $0x70] sm:$0xff] %v1674_v54   ;;  %v1109_v60 = vadd.f32 %v2085_v57, %v1070_v55  ;;  %v1125_v61 = vadd.f32 %v2085_v57, %v1086_v56 }
 0x139   : > { %v1071_v62 = vmul.f32 %v1759_v58, %v2080_v51  ;;  %v1087_v63 = vmul.f32 %v1807_v59, %v2080_v51 }
 0x13a   : > { %v1141_v2 = vmax.f32 %v1109_v60, 0.0  ;;  %v1157_v3 = vmax.f32 %v1125_v61, 0.0 }
 0x13b   : > { %v1110_v0 = vadd.f32 %v2085_v57, %v1071_v62  ;;  %v1126_v1 = vadd.f32 %v2085_v57, %v1087_v63 }
 0x13d   : > { %v1142_v4 = vmax.f32 %v1110_v0, 0.0  ;;  %v1158_v5 = vmax.f32 %v1126_v1, 0.0 }
 0x13f   : > { %v1639_v6 = vpack.c.bf16 %v1142_v4, %v1141_v2  ;;  %v1679_v7 = vpack.c.bf16 %v1158_v5, %v1157_v3 }
 0x141   : > { %1687 = vst [vmem:[%s2099_s25 + $0x38] sm:$0xff] %v1639_v6   ;;  %1695 = vst [vmem:[%s2099_s25 + $0x78] sm:$0xff] %v1679_v7  }
 0x142 PF: > { %s16_s23 = sadd.s32 1, %s1934_s23   ;;  %s2189_s21 = smov %s1930_s22 }
 0x143   : > { %p13_p5 = scmp.ge.s32.totalorder %s16_s23, 4   ;;  %s2190_s22 = smov %s2192_s2 }
 0x145   :  { %15 = sbr.rel (!%p13_p5) target bundleno = 2 (0x2), region = 97 }

// kernel: densenet_forward.15
= control target key start
LH: loop header
LB: loop body
LE: loop exit
PB: predicated region body
PF: predicated region fallthrough
CT: control target
= control target key end

     0   :  { %vm520_vm0 = vcmask 523264   ;;  %vm522_vm1 = vcmask 516096   ;;  %vm2314_vm2 = vcmask 1041409   ;;  %vm2316_vm3 = vcmask 1042434   ;;  %s6224_s0 = inlined_call_operand.vmem [shape: bf16[128,9,64], index: 0, kind: input, shape index: {}]   ;;  %s6225_s1 = inlined_call_operand.vmem [shape: bf16[128,64], index: 1, kind: output, shape index: {}]  }
   0x1   :  { %v2755_v0 = vld [vmem:[%s6224_s0] ss:$8 sps:$4 sm:$0xff]   ;;  %v2760_v1 = vld [vmem:[%s6224_s0 + $0x4] sm:$0x1]  ;;  %v2765_v2 = vld [vmem:[%s6224_s0 + $0xc] sm:$0x1] }
   0x2   :  { %v2770_v3 = vld [vmem:[%s6224_s0 + $0x10] ss:$8 sps:$4 sm:$0xff]   ;;  %v2775_v4 = vld [vmem:[%s6224_s0 + $0x14] sm:$0x1]  ;;  %v2780_v5 = vld [vmem:[%s6224_s0 + $0x1c] sm:$0x1] }
   0x3   :  { %v2789_v10 = vld [vmem:[%s6224_s0 + $0x20] ss:$8 sps:$4 sm:$0xff]   ;;  %v2794_v11 = vld [vmem:[%s6224_s0 + $0x24] sm:$0x1]  ;;  %v2799_v12 = vld [vmem:[%s6224_s0 + $0x2c] sm:$0x1] }
   0x4   :  { %v2808_v17 = vld [vmem:[%s6224_s0 + $0x30] ss:$8 sps:$4 sm:$0xff]   ;;  %v2813_v18 = vld [vmem:[%s6224_s0 + $0x34] sm:$0x1]  ;;  %v2818_v19 = vld [vmem:[%s6224_s0 + $0x3c] sm:$0x1] }
   0x5   :  { %v2827_v24 = vld [vmem:[%s6224_s0 + $0x40] ss:$8 sps:$4 sm:$0xff]   ;;  %v2832_v25 = vld [vmem:[%s6224_s0 + $0x44] sm:$0x1]  ;;  %v2837_v26 = vld [vmem:[%s6224_s0 + $0x4c] sm:$0x1] }
   0x6   :  { %v2846_v31 = vld [vmem:[%s6224_s0 + $0x50] ss:$8 sps:$4 sm:$0xff]   ;;  %v2851_v32 = vld [vmem:[%s6224_s0 + $0x54] sm:$0x1]  ;;  %v2856_v33 = vld [vmem:[%s6224_s0 + $0x5c] sm:$0x1] }
   0x7   :  { %v2865_v38 = vld [vmem:[%s6224_s0 + $0x60] ss:$8 sps:$4 sm:$0xff]   ;;  %v2870_v39 = vld [vmem:[%s6224_s0 + $0x64] sm:$0x1]  ;;  %v2875_v40 = vld [vmem:[%s6224_s0 + $0x6c] sm:$0x1] }
   0x8   :  { %v2884_v45 = vld [vmem:[%s6224_s0 + $0x70] ss:$8 sps:$4 sm:$0xff]   ;;  %v2889_v46 = vld [vmem:[%s6224_s0 + $0x74] sm:$0x1]  ;;  %v2894_v47 = vld [vmem:[%s6224_s0 + $0x7c] sm:$0x1] }
   0x9   :  { %v2903_v52 = vld [vmem:[%s6224_s0 + $0x80] ss:$8 sps:$4 sm:$0xff]   ;;  %v2908_v53 = vld [vmem:[%s6224_s0 + $0x84] sm:$0x1]  ;;  %v2913_v54 = vld [vmem:[%s6224_s0 + $0x8c] sm:$0x1] }
   0xa   :  { %v2922_v59 = vld [vmem:[%s6224_s0 + $0x90] ss:$8 sps:$4 sm:$0xff]   ;;  %v2927_v60 = vld [vmem:[%s6224_s0 + $0x94] sm:$0x1]  ;;  %v2932_v61 = vld [vmem:[%s6224_s0 + $0x9c] sm:$0x1] }
   0xb   :  { %v2941_v56 = vld [vmem:[%s6224_s0 + $0xa0] ss:$8 sps:$4 sm:$0xff]   ;;  %v2946_v55 = vld [vmem:[%s6224_s0 + $0xa4] sm:$0x1]  ;;  %v2951_v62 = vld [vmem:[%s6224_s0 + $0xac] sm:$0x1] }
   0xc   :  { %v2960_v50 = vld [vmem:[%s6224_s0 + $0xb0] ss:$8 sps:$4 sm:$0xff]   ;;  %v2965_v49 = vld [vmem:[%s6224_s0 + $0xb4] sm:$0x1]  ;;  %v2970_v63 = vld [vmem:[%s6224_s0 + $0xbc] sm:$0x1] }
   0xd   :  { %v2979_v44 = vld [vmem:[%s6224_s0 + $0xc0] ss:$8 sps:$4 sm:$0xff]   ;;  %v2984_v43 = vld [vmem:[%s6224_s0 + $0xc4] sm:$0x1]  ;;  %v2989_v58 = vld [vmem:[%s6224_s0 + $0xcc] sm:$0x1] }
   0xe   :  { %v2998_v41 = vld [vmem:[%s6224_s0 + $0xd0] ss:$8 sps:$4 sm:$0xff]   ;;  %v3003_v37 = vld [vmem:[%s6224_s0 + $0xd4] sm:$0x1]  ;;  %v3008_v57 = vld [vmem:[%s6224_s0 + $0xdc] sm:$0x1] }
   0xf   :  { %v3017_v35 = vld [vmem:[%s6224_s0 + $0xe0] ss:$8 sps:$4 sm:$0xff]   ;;  %v3022_v34 = vld [vmem:[%s6224_s0 + $0xe4] sm:$0x1]  ;;  %v3027_v51 = vld [vmem:[%s6224_s0 + $0xec] sm:$0x1] }
  0x10   :  { %v3036_v29 = vld [vmem:[%s6224_s0 + $0xf0] ss:$8 sps:$4 sm:$0xff]   ;;  %v3041_v28 = vld [vmem:[%s6224_s0 + $0xf4] sm:$0x1]  ;;  %v3046_v48 = vld [vmem:[%s6224_s0 + $0xfc] sm:$0x1] }
  0x11   :  { %6510 = vst [vmem:[#allocation2_spill] sm:$0xff] %v3036_v29  ;;  %6511 = vst [vmem:[#allocation3_spill] sm:$0xff] %v3041_v28  ;;  %v3055_v23 = vld [vmem:[%s6224_s0 + $0x100] ss:$8 sps:$4 sm:$0xff]   ;;  %v3060_v22 = vld [vmem:[%s6224_s0 + $0x104] sm:$0x1] }
  0x12   :  { %6512 = vst [vmem:[#allocation4_spill] sm:$0xff] %v3046_v48  ;;  %6513 = vst [vmem:[#allocation5_spill] sm:$0xff] %v3055_v23  ;;  %v3065_v42 = vld [vmem:[%s6224_s0 + $0x10c] sm:$0x1]  ;;  %v3074_v20 = vld [vmem:[%s6224_s0 + $0x110] ss:$8 sps:$4 sm:$0xff]  }
  0x13   :  { %6514 = vst [vmem:[#allocation6_spill] sm:$0xff] %v3060_v22  ;;  %6515 = vst [vmem:[#allocation7_spill] sm:$0xff] %v3065_v42  ;;  %v3079_v16 = vld [vmem:[%s6224_s0 + $0x114] sm:$0x1]  ;;  %v3084_v36 = vld [vmem:[%s6224_s0 + $0x11c] sm:$0x1]  ;;  %v6657_v22 = vunpack.c.l.bf16 %v2755_v0  ;;  %v6661_v42 = vunpack.c.l.bf16 %v2770_v3 }
  0x14   :  { %6516 = vst [vmem:[#allocation8_spill] sm:$0xff] %v3074_v20  ;;  %6517 = vst [vmem:[#allocation9_spill] sm:$0xff] %v3079_v16  ;;  %v3093_v14 = vld [vmem:[%s6224_s0 + $0x120] ss:$8 sps:$4 sm:$0xff]   ;;  %v3098_v13 = vld [vmem:[%s6224_s0 + $0x124] sm:$0x1] }
  0x15   :  { %6518 = vst [vmem:[#allocation10_spill] sm:$0xff] %v3084_v36  ;;  %6519 = vst [vmem:[#allocation11_spill] sm:$0xff] %v3093_v14  ;;  %v3103_v30 = vld [vmem:[%s6224_s0 + $0x12c] sm:$0x1]  ;;  %v3112_v8 = vld [vmem:[%s6224_s0 + $0x130] ss:$8 sps:$4 sm:$0xff]  }
  0x16   :  { %6520 = vst [vmem:[#allocation12_spill] sm:$0xff] %v3098_v13  ;;  %6521 = vst [vmem:[#allocation13_spill] sm:$0xff] %v3103_v30  ;;  %v3117_v7 = vld [vmem:[%s6224_s0 + $0x134] sm:$0x1]  ;;  %v3122_v27 = vld [vmem:[%s6224_s0 + $0x13c] sm:$0x1] }
  0x17   :  { %6522 = vst [vmem:[#allocation14_spill] sm:$0xff] %v3112_v8  ;;  %6523 = vst [vmem:[#allocation15_spill] sm:$0xff] %v3117_v7  ;;  %v3131_v36 = vld [vmem:[%s6224_s0 + $0x140] ss:$8 sps:$4 sm:$0xff]   ;;  %v3136_v16 = vld [vmem:[%s6224_s0 + $0x144] sm:$0x1] }
  0x18   :  { %6524 = vst [vmem:[#allocation16_spill] sm:$0xff] %v3122_v27  ;;  %6525 = vst [vmem:[#allocation17_spill] sm:$0xff] %v3131_v36  ;;  %v3141_v21 = vld [vmem:[%s6224_s0 + $0x14c] sm:$0x1]  ;;  %v3150_v13 = vld [vmem:[%s6224_s0 + $0x150] ss:$8 sps:$4 sm:$0xff]  }
  0x19   :  { %6526 = vst [vmem:[#allocation18_spill] sm:$0xff] %v3136_v16  ;;  %6527 = vst [vmem:[#allocation19_spill] sm:$0xff] %v3141_v21  ;;  %v3155_v14 = vld [vmem:[%s6224_s0 + $0x154] sm:$0x1]  ;;  %v3160_v15 = vld [vmem:[%s6224_s0 + $0x15c] sm:$0x1] }
  0x1a   :  { %6528 = vst [vmem:[#allocation20_spill] sm:$0xff] %v3150_v13  ;;  %6529 = vst [vmem:[#allocation21_spill] sm:$0xff] %v3155_v14  ;;  %v3169_v7 = vld [vmem:[%s6224_s0 + $0x160] ss:$8 sps:$4 sm:$0xff]   ;;  %v3174_v8 = vld [vmem:[%s6224_s0 + $0x164] sm:$0x1] }
  0x1b   :  { %6530 = vst [vmem:[#allocation22_spill] sm:$0xff] %v3160_v15  ;;  %6531 = vst [vmem:[#allocation23_spill] sm:$0xff] %v3169_v7  ;;  %v3179_v9 = vld [vmem:[%s6224_s0 + $0x16c] sm:$0x1]  ;;  %v3188_v16 = vld [vmem:[%s6224_s0 + $0x170] ss:$8 sps:$4 sm:$0xff]  }
  0x1c   :  { %6532 = vst [vmem:[#allocation24_spill] sm:$0xff] %v3174_v8  ;;  %6533 = vst [vmem:[#allocation25_spill] sm:$0xff] %v3179_v9  ;;  %v3193_v36 = vld [vmem:[%s6224_s0 + $0x174] sm:$0x1]  ;;  %v3198_v6 = vld [vmem:[%s6224_s0 + $0x17c] sm:$0x1] }
  0x1d   :  { %6534 = vst [vmem:[#allocation26_spill] sm:$0xff] %v3188_v16  ;;  %6535 = vst [vmem:[#allocation27_spill] sm:$0xff] %v3193_v36  ;;  %v3207_v14 = vld [vmem:[%s6224_s0 + $0x180] ss:$8 sps:$4 sm:$0xff]   ;;  %v3212_v13 = vld [vmem:[%s6224_s0 + $0x184] sm:$0x1] }
  0x1e   :  { %6536 = vst [vmem:[#allocation28_spill] sm:$0xff] %v3198_v6  ;;  %6537 = vst [vmem:[#allocation29_spill] sm:$0xff] %v3207_v14  ;;  %v3217_v30 = vld [vmem:[%s6224_s0 + $0x18c] sm:$0x1]  ;;  %v3226_v8 = vld [vmem:[%s6224_s0 + $0x190] ss:$8 sps:$4 sm:$0xff]  }
  0x1f   :  { %6538 = vst [vmem:[#allocation30_spill] sm:$0xff] %v3212_v13  ;;  %6539 = vst [vmem:[#allocation31_spill] sm:$0xff] %v3217_v30  ;;  %v3231_v7 = vld [vmem:[%s6224_s0 + $0x194] sm:$0x1]  ;;  %v3236_v27 = vld [vmem:[%s6224_s0 + $0x19c] sm:$0x1] }
  0x20   :  { %6540 = vst [vmem:[#allocation32_spill] sm:$0xff] %v3226_v8  ;;  %6541 = vst [vmem:[#allocation33_spill] sm:$0xff] %v3231_v7  ;;  %v3245_v36 = vld [vmem:[%s6224_s0 + $0x1a0] ss:$8 sps:$4 sm:$0xff]   ;;  %v3250_v16 = vld [vmem:[%s6224_s0 + $0x1a4] sm:$0x1] }
  0x21   :  { %6542 = vst [vmem:[#allocation34_spill] sm:$0xff] %v3236_v27  ;;  %6543 = vst [vmem:[#allocation35_spill] sm:$0xff] %v3245_v36  ;;  %v3255_v21 = vld [vmem:[%s6224_s0 + $0x1ac] sm:$0x1]  ;;  %v3264_v13 = vld [vmem:[%s6224_s0 + $0x1b0] ss:$8 sps:$4 sm:$0xff]  }
  0x22   :  { %6544 = vst [vmem:[#allocation36_spill] sm:$0xff] %v3250_v16  ;;  %6545 = vst [vmem:[#allocation37_spill] sm:$0xff] %v3255_v21  ;;  %v3269_v14 = vld [vmem:[%s6224_s0 + $0x1b4] sm:$0x1]  ;;  %v3274_v15 = vld [vmem:[%s6224_s0 + $0x1bc] sm:$0x1] }
  0x23   :  { %6546 = vst [vmem:[#allocation38_spill] sm:$0xff] %v3264_v13  ;;  %6547 = vst [vmem:[#allocation39_spill] sm:$0xff] %v3269_v14  ;;  %v3283_v7 = vld [vmem:[%s6224_s0 + $0x1c0] ss:$8 sps:$4 sm:$0xff]   ;;  %v3288_v8 = vld [vmem:[%s6224_s0 + $0x1c4] sm:$0x1] }
  0x24   :  { %6548 = vst [vmem:[#allocation40_spill] sm:$0xff] %v3274_v15  ;;  %6549 = vst [vmem:[#allocation41_spill] sm:$0xff] %v3283_v7  ;;  %v3293_v9 = vld [vmem:[%s6224_s0 + $0x1cc] sm:$0x1]  ;;  %v3302_v16 = vld [vmem:[%s6224_s0 + $0x1d0] ss:$8 sps:$4 sm:$0xff]  }
  0x25   :  { %6550 = vst [vmem:[#allocation42_spill] sm:$0xff] %v3288_v8  ;;  %6551 = vst [vmem:[#allocation43_spill] sm:$0xff] %v3293_v9  ;;  %v3307_v36 = vld [vmem:[%s6224_s0 + $0x1d4] sm:$0x1]  ;;  %v3312_v6 = vld [vmem:[%s6224_s0 + $0x1dc] sm:$0x1] }
  0x26   :  { %6552 = vst [vmem:[#allocation44_spill] sm:$0xff] %v3302_v16  ;;  %6553 = vst [vmem:[#allocation45_spill] sm:$0xff] %v3307_v36  ;;  %v3321_v14 = vld [vmem:[%s6224_s0 + $0x1e0] ss:$8 sps:$4 sm:$0xff]   ;;  %v3326_v13 = vld [vmem:[%s6224_s0 + $0x1e4] sm:$0x1] }
  0x27   :  { %6554 = vst [vmem:[#allocation46_spill] sm:$0xff] %v3312_v6  ;;  %6555 = vst [vmem:[#allocation47_spill] sm:$0xff] %v3321_v14  ;;  %v3331_v30 = vld [vmem:[%s6224_s0 + $0x1ec] sm:$0x1]  ;;  %v3340_v8 = vld [vmem:[%s6224_s0 + $0x1f0] ss:$8 sps:$4 sm:$0xff]  }
  0x28   :  { %6556 = vst [vmem:[#allocation48_spill] sm:$0xff] %v3326_v13  ;;  %6557 = vst [vmem:[#allocation49_spill] sm:$0xff] %v3331_v30  ;;  %v3345_v7 = vld [vmem:[%s6224_s0 + $0x1f4] sm:$0x1]  ;;  %v3350_v27 = vld [vmem:[%s6224_s0 + $0x1fc] sm:$0x1] }
  0x29   :  { %6558 = vst [vmem:[#allocation50_spill] sm:$0xff] %v3340_v8  ;;  %6559 = vst [vmem:[#allocation51_spill] sm:$0xff] %v3345_v7  ;;  %v3359_v36 = vld [vmem:[%s6224_s0 + $0x200] ss:$8 sps:$4 sm:$0xff]   ;;  %v3364_v16 = vld [vmem:[%s6224_s0 + $0x204] sm:$0x1] }
  0x2a   :  { %6560 = vst [vmem:[#allocation52_spill] sm:$0xff] %v3350_v27  ;;  %6561 = vst [vmem:[#allocation53_spill] sm:$0xff] %v3359_v36  ;;  %v3369_v21 = vld [vmem:[%s6224_s0 + $0x20c] sm:$0x1]  ;;  %v3378_v13 = vld [vmem:[%s6224_s0 + $0x210] ss:$8 sps:$4 sm:$0xff]  }
  0x2b   :  { %6562 = vst [vmem:[#allocation54_spill] sm:$0xff] %v3364_v16  ;;  %6563 = vst [vmem:[#allocation55_spill] sm:$0xff] %v3369_v21  ;;  %v3383_v14 = vld [vmem:[%s6224_s0 + $0x214] sm:$0x1]  ;;  %v3388_v15 = vld [vmem:[%s6224_s0 + $0x21c] sm:$0x1] }
  0x2c   :  { %6564 = vst [vmem:[#allocation56_spill] sm:$0xff] %v3378_v13  ;;  %6565 = vst [vmem:[#allocation57_spill] sm:$0xff] %v3383_v14  ;;  %v3397_v7 = vld [vmem:[%s6224_s0 + $0x220] ss:$8 sps:$4 sm:$0xff]   ;;  %v3402_v8 = vld [vmem:[%s6224_s0 + $0x224] sm:$0x1] }
  0x2d   :  { %6566 = vst [vmem:[#allocation58_spill] sm:$0xff] %v3388_v15  ;;  %6567 = vst [vmem:[#allocation59_spill] sm:$0xff] %v3397_v7  ;;  %v3407_v9 = vld [vmem:[%s6224_s0 + $0x22c] sm:$0x1]  ;;  %v3416_v16 = vld [vmem:[%s6224_s0 + $0x230] ss:$8 sps:$4 sm:$0xff]  }
  0x2e   :  { %6568 = vst [vmem:[#allocation60_spill] sm:$0xff] %v3402_v8  ;;  %6569 = vst [vmem:[#allocation61_spill] sm:$0xff] %v3407_v9  ;;  %v3421_v36 = vld [vmem:[%s6224_s0 + $0x234] sm:$0x1]  ;;  %v3426_v6 = vld [vmem:[%s6224_s0 + $0x23c] sm:$0x1] }
  0x2f   :  { %6570 = vst [vmem:[#allocation62_spill] sm:$0xff] %v3416_v16  ;;  %6571 = vst [vmem:[#allocation63_spill] sm:$0xff] %v3421_v36  ;;  %v3435_v14 = vld [vmem:[%s6224_s0 + $0x240] ss:$8 sps:$4 sm:$0xff]   ;;  %v3440_v13 = vld [vmem:[%s6224_s0 + $0x244] sm:$0x1] }
  0x30   :  { %6572 = vst [vmem:[#allocation64_spill] sm:$0xff] %v3426_v6  ;;  %6573 = vst [vmem:[#allocation65_spill] sm:$0xff] %v3435_v14  ;;  %v3445_v30 = vld [vmem:[%s6224_s0 + $0x24c] sm:$0x1]  ;;  %v3454_v8 = vld [vmem:[%s6224_s0 + $0x250] ss:$8 sps:$4 sm:$0xff]  }
  0x31   :  { %6574 = vst [vmem:[#allocation66_spill] sm:$0xff] %v3440_v13  ;;  %6575 = vst [vmem:[#allocation67_spill] sm:$0xff] %v3445_v30  ;;  %v3459_v7 = vld [vmem:[%s6224_s0 + $0x254] sm:$0x1]  ;;  %v3464_v27 = vld [vmem:[%s6224_s0 + $0x25c] sm:$0x1] }
  0x32   :  { %6576 = vst [vmem:[#allocation68_spill] sm:$0xff] %v3454_v8  ;;  %6577 = vst [vmem:[#allocation69_spill] sm:$0xff] %v3459_v7  ;;  %v3473_v36 = vld [vmem:[%s6224_s0 + $0x260] ss:$8 sps:$4 sm:$0xff]   ;;  %v3478_v16 = vld [vmem:[%s6224_s0 + $0x264] sm:$0x1] }
  0x33   :  { %6578 = vst [vmem:[#allocation70_spill] sm:$0xff] %v3464_v27  ;;  %6579 = vst [vmem:[#allocation71_spill] sm:$0xff] %v3473_v36  ;;  %v3483_v21 = vld [vmem:[%s6224_s0 + $0x26c] sm:$0x1]  ;;  %v3492_v13 = vld [vmem:[%s6224_s0 + $0x270] ss:$8 sps:$4 sm:$0xff]  }
  0x34   :  { %6580 = vst [vmem:[#allocation72_spill] sm:$0xff] %v3478_v16  ;;  %6581 = vst [vmem:[#allocation73_spill] sm:$0xff] %v3483_v21  ;;  %v3497_v14 = vld [vmem:[%s6224_s0 + $0x274] sm:$0x1]  ;;  %v3502_v15 = vld [vmem:[%s6224_s0 + $0x27c] sm:$0x1] }
  0x35   :  { %6582 = vst [vmem:[#allocation74_spill] sm:$0xff] %v3492_v13  ;;  %6583 = vst [vmem:[#allocation75_spill] sm:$0xff] %v3497_v14  ;;  %v3511_v7 = vld [vmem:[%s6224_s0 + $0x280] ss:$8 sps:$4 sm:$0xff]   ;;  %v3516_v8 = vld [vmem:[%s6224_s0 + $0x284] sm:$0x1] }
  0x36   :  { %6584 = vst [vmem:[#allocation76_spill] sm:$0xff] %v3502_v15  ;;  %6585 = vst [vmem:[#allocation77_spill] sm:$0xff] %v3511_v7  ;;  %v3521_v9 = vld [vmem:[%s6224_s0 + $0x28c] sm:$0x1]  ;;  %v3530_v16 = vld [vmem:[%s6224_s0 + $0x290] ss:$8 sps:$4 sm:$0xff]  }
  0x37   :  { %6586 = vst [vmem:[#allocation78_spill] sm:$0xff] %v3516_v8  ;;  %6587 = vst [vmem:[#allocation79_spill] sm:$0xff] %v3521_v9  ;;  %v3535_v36 = vld [vmem:[%s6224_s0 + $0x294] sm:$0x1]  ;;  %v3540_v6 = vld [vmem:[%s6224_s0 + $0x29c] sm:$0x1] }
  0x38   :  { %6588 = vst [vmem:[#allocation80_spill] sm:$0xff] %v3530_v16  ;;  %6589 = vst [vmem:[#allocation81_spill] sm:$0xff] %v3535_v36  ;;  %v3549_v14 = vld [vmem:[%s6224_s0 + $0x2a0] ss:$8 sps:$4 sm:$0xff]   ;;  %v3554_v13 = vld [vmem:[%s6224_s0 + $0x2a4] sm:$0x1] }
  0x39   :  { %6590 = vst [vmem:[#allocation82_spill] sm:$0xff] %v3540_v6  ;;  %6591 = vst [vmem:[#allocation83_spill] sm:$0xff] %v3549_v14  ;;  %v3559_v30 = vld [vmem:[%s6224_s0 + $0x2ac] sm:$0x1]  ;;  %v3568_v8 = vld [vmem:[%s6224_s0 + $0x2b0] ss:$8 sps:$4 sm:$0xff]  }
  0x3a   :  { %6592 = vst [vmem:[#allocation84_spill] sm:$0xff] %v3554_v13  ;;  %6593 = vst [vmem:[#allocation85_spill] sm:$0xff] %v3559_v30  ;;  %v3573_v7 = vld [vmem:[%s6224_s0 + $0x2b4] sm:$0x1]  ;;  %v3578_v27 = vld [vmem:[%s6224_s0 + $0x2bc] sm:$0x1] }
  0x3b   :  { %6594 = vst [vmem:[#allocation86_spill] sm:$0xff] %v3568_v8  ;;  %6595 = vst [vmem:[#allocation87_spill] sm:$0xff] %v3573_v7  ;;  %v3587_v36 = vld [vmem:[%s6224_s0 + $0x2c0] ss:$8 sps:$4 sm:$0xff]   ;;  %v3592_v16 = vld [vmem:[%s6224_s0 + $0x2c4] sm:$0x1] }
  0x3c   :  { %6596 = vst [vmem:[#allocation88_spill] sm:$0xff] %v3578_v27  ;;  %6597 = vst [vmem:[#allocation89_spill] sm:$0xff] %v3587_v36  ;;  %v3597_v21 = vld [vmem:[%s6224_s0 + $0x2cc] sm:$0x1]  ;;  %v3606_v13 = vld [vmem:[%s6224_s0 + $0x2d0] ss:$8 sps:$4 sm:$0xff]  }
  0x3d   :  { %6598 = vst [vmem:[#allocation90_spill] sm:$0xff] %v3592_v16  ;;  %6599 = vst [vmem:[#allocation91_spill] sm:$0xff] %v3597_v21  ;;  %v3611_v14 = vld [vmem:[%s6224_s0 + $0x2d4] sm:$0x1]  ;;  %v3616_v15 = vld [vmem:[%s6224_s0 + $0x2dc] sm:$0x1] }
  0x3e   :  { %6600 = vst [vmem:[#allocation92_spill] sm:$0xff] %v3606_v13  ;;  %6601 = vst [vmem:[#allocation93_spill] sm:$0xff] %v3611_v14  ;;  %v3625_v7 = vld [vmem:[%s6224_s0 + $0x2e0] ss:$8 sps:$4 sm:$0xff]   ;;  %v3630_v8 = vld [vmem:[%s6224_s0 + $0x2e4] sm:$0x1] }
  0x3f   :  { %6602 = vst [vmem:[#allocation94_spill] sm:$0xff] %v3616_v15  ;;  %6603 = vst [vmem:[#allocation95_spill] sm:$0xff] %v3625_v7  ;;  %v3635_v9 = vld [vmem:[%s6224_s0 + $0x2ec] sm:$0x1]  ;;  %v3644_v16 = vld [vmem:[%s6224_s0 + $0x2f0] ss:$8 sps:$4 sm:$0xff]  }
  0x40   :  { %6604 = vst [vmem:[#allocation96_spill] sm:$0xff] %v3630_v8  ;;  %6605 = vst [vmem:[#allocation97_spill] sm:$0xff] %v3635_v9  ;;  %v3649_v36 = vld [vmem:[%s6224_s0 + $0x2f4] sm:$0x1]  ;;  %v3654_v6 = vld [vmem:[%s6224_s0 + $0x2fc] sm:$0x1] }
  0x41   :  { %6606 = vst [vmem:[#allocation98_spill] sm:$0xff] %v3644_v16  ;;  %6607 = vst [vmem:[#allocation99_spill] sm:$0xff] %v3649_v36  ;;  %v3663_v14 = vld [vmem:[%s6224_s0 + $0x300] ss:$8 sps:$4 sm:$0xff]   ;;  %v3668_v13 = vld [vmem:[%s6224_s0 + $0x304] sm:$0x1] }
  0x42   :  { %6608 = vst [vmem:[#allocation100_spill] sm:$0xff] %v3654_v6  ;;  %6609 = vst [vmem:[#allocation101_spill] sm:$0xff] %v3663_v14  ;;  %v3673_v30 = vld [vmem:[%s6224_s0 + $0x30c] sm:$0x1]  ;;  %v3682_v8 = vld [vmem:[%s6224_s0 + $0x310] ss:$8 sps:$4 sm:$0xff]  }
  0x43   :  { %6610 = vst [vmem:[#allocation102_spill] sm:$0xff] %v3668_v13  ;;  %6611 = vst [vmem:[#allocation103_spill] sm:$0xff] %v3673_v30  ;;  %v3687_v7 = vld [vmem:[%s6224_s0 + $0x314] sm:$0x1]  ;;  %v3692_v27 = vld [vmem:[%s6224_s0 + $0x31c] sm:$0x1] }
  0x44   :  { %6612 = vst [vmem:[#allocation104_spill] sm:$0xff] %v3682_v8  ;;  %6613 = vst [vmem:[#allocation105_spill] sm:$0xff] %v3687_v7  ;;  %v3701_v36 = vld [vmem:[%s6224_s0 + $0x320] ss:$8 sps:$4 sm:$0xff]   ;;  %v3706_v16 = vld [vmem:[%s6224_s0 + $0x324] sm:$0x1] }
  0x45   :  { %6614 = vst [vmem:[#allocation106_spill] sm:$0xff] %v3692_v27  ;;  %6615 = vst [vmem:[#allocation107_spill] sm:$0xff] %v3701_v36  ;;  %v3711_v21 = vld [vmem:[%s6224_s0 + $0x32c] sm:$0x1]  ;;  %v3720_v13 = vld [vmem:[%s6224_s0 + $0x330] ss:$8 sps:$4 sm:$0xff]  }
  0x46   :  { %6616 = vst [vmem:[#allocation108_spill] sm:$0xff] %v3706_v16  ;;  %6617 = vst [vmem:[#allocation109_spill] sm:$0xff] %v3711_v21  ;;  %v3725_v14 = vld [vmem:[%s6224_s0 + $0x334] sm:$0x1]  ;;  %v3730_v15 = vld [vmem:[%s6224_s0 + $0x33c] sm:$0x1] }
  0x47   :  { %6618 = vst [vmem:[#allocation110_spill] sm:$0xff] %v3720_v13  ;;  %6619 = vst [vmem:[#allocation111_spill] sm:$0xff] %v3725_v14  ;;  %v3739_v7 = vld [vmem:[%s6224_s0 + $0x340] ss:$8 sps:$4 sm:$0xff]   ;;  %v3744_v8 = vld [vmem:[%s6224_s0 + $0x344] sm:$0x1] }
  0x48   :  { %6620 = vst [vmem:[#allocation112_spill] sm:$0xff] %v3730_v15  ;;  %6621 = vst [vmem:[#allocation113_spill] sm:$0xff] %v3739_v7  ;;  %v3749_v9 = vld [vmem:[%s6224_s0 + $0x34c] sm:$0x1]  ;;  %v3758_v16 = vld [vmem:[%s6224_s0 + $0x350] ss:$8 sps:$4 sm:$0xff]  }
  0x49   :  { %6622 = vst [vmem:[#allocation114_spill] sm:$0xff] %v3744_v8  ;;  %6623 = vst [vmem:[#allocation115_spill] sm:$0xff] %v3749_v9  ;;  %v3763_v36 = vld [vmem:[%s6224_s0 + $0x354] sm:$0x1]  ;;  %v3768_v6 = vld [vmem:[%s6224_s0 + $0x35c] sm:$0x1] }
  0x4a   :  { %6624 = vst [vmem:[#allocation116_spill] sm:$0xff] %v3758_v16  ;;  %6625 = vst [vmem:[#allocation117_spill] sm:$0xff] %v3763_v36  ;;  %v3777_v14 = vld [vmem:[%s6224_s0 + $0x360] ss:$8 sps:$4 sm:$0xff]   ;;  %v3782_v13 = vld [vmem:[%s6224_s0 + $0x364] sm:$0x1] }
  0x4b   :  { %6626 = vst [vmem:[#allocation118_spill] sm:$0xff] %v3768_v6  ;;  %6627 = vst [vmem:[#allocation119_spill] sm:$0xff] %v3777_v14  ;;  %v3787_v30 = vld [vmem:[%s6224_s0 + $0x36c] sm:$0x1]  ;;  %v3796_v8 = vld [vmem:[%s6224_s0 + $0x370] ss:$8 sps:$4 sm:$0xff]  }
  0x4c   :  { %6628 = vst [vmem:[#allocation120_spill] sm:$0xff] %v3782_v13  ;;  %6629 = vst [vmem:[#allocation121_spill] sm:$0xff] %v3787_v30  ;;  %v3801_v7 = vld [vmem:[%s6224_s0 + $0x374] sm:$0x1]  ;;  %v3806_v21 = vld [vmem:[%s6224_s0 + $0x37c] sm:$0x1] }
  0x4d   :  { %6630 = vst [vmem:[#allocation122_spill] sm:$0xff] %v3796_v8  ;;  %6631 = vst [vmem:[#allocation123_spill] sm:$0xff] %v3801_v7  ;;  %v3815_v36 = vld [vmem:[%s6224_s0 + $0x380] ss:$8 sps:$4 sm:$0xff]   ;;  %v3820_v16 = vld [vmem:[%s6224_s0 + $0x384] sm:$0x1] }
  0x4e   :  { %6632 = vst [vmem:[#allocation124_spill] sm:$0xff] %v3806_v21  ;;  %6633 = vst [vmem:[#allocation125_spill] sm:$0xff] %v3815_v36  ;;  %v3825_v15 = vld [vmem:[%s6224_s0 + $0x38c] sm:$0x1]  ;;  %v3834_v13 = vld [vmem:[%s6224_s0 + $0x390] ss:$8 sps:$4 sm:$0xff]  }
  0x4f   :  { %6634 = vst [vmem:[#allocation126_spill] sm:$0xff] %v3820_v16  ;;  %6635 = vst [vmem:[#allocation127_spill] sm:$0xff] %v3825_v15  ;;  %v3839_v14 = vld [vmem:[%s6224_s0 + $0x394] sm:$0x1]  ;;  %v3844_v9 = vld [vmem:[%s6224_s0 + $0x39c] sm:$0x1] }
  0x50   :  { %6636 = vst [vmem:[#allocation128_spill] sm:$0xff] %v3834_v13  ;;  %6637 = vst [vmem:[#allocation129_spill] sm:$0xff] %v3839_v14  ;;  %v3853_v7 = vld [vmem:[%s6224_s0 + $0x3a0] ss:$8 sps:$4 sm:$0xff]   ;;  %v3858_v8 = vld [vmem:[%s6224_s0 + $0x3a4] sm:$0x1] }
  0x51   :  { %6638 = vst [vmem:[#allocation130_spill] sm:$0xff] %v3844_v9  ;;  %6639 = vst [vmem:[#allocation131_spill] sm:$0xff] %v3853_v7  ;;  %v3863_v27 = vld [vmem:[%s6224_s0 + $0x3ac] sm:$0x1]  ;;  %v3872_v16 = vld [vmem:[%s6224_s0 + $0x3b0] ss:$8 sps:$4 sm:$0xff]  }
  0x52   :  { %6640 = vst [vmem:[#allocation132_spill] sm:$0xff] %v3858_v8  ;;  %6641 = vst [vmem:[#allocation133_spill] sm:$0xff] %v3863_v27  ;;  %v3877_v36 = vld [vmem:[%s6224_s0 + $0x3b4] sm:$0x1]  ;;  %v3882_v6 = vld [vmem:[%s6224_s0 + $0x3bc] sm:$0x1]  ;;  %v6658_v27 = vunpack.c.l.bf16 %v2760_v1 }
  0x53   :  { %6642 = vst [vmem:[#allocation134_spill] sm:$0xff] %v3872_v16  ;;  %6643 = vst [vmem:[#allocation135_spill] sm:$0xff] %v3877_v36  ;;  %v3891_v14 = vld [vmem:[%s6224_s0 + $0x3c0] ss:$8 sps:$4 sm:$0xff]   ;;  %v3896_v13 = vld [vmem:[%s6224_s0 + $0x3c4] sm:$0x1] }
  0x54   :  { %6644 = vst [vmem:[#allocation136_spill] sm:$0xff] %v3882_v6  ;;  %6645 = vst [vmem:[#allocation137_spill] sm:$0xff] %v3891_v14  ;;  %v3901_v30 = vld [vmem:[%s6224_s0 + $0x3cc] sm:$0x1]  ;;  %v3910_v8 = vld [vmem:[%s6224_s0 + $0x3d0] ss:$8 sps:$4 sm:$0xff]  }
  0x55   :  { %6646 = vst [vmem:[#allocation138_spill] sm:$0xff] %v3896_v13  ;;  %6647 = vst [vmem:[#allocation139_spill] sm:$0xff] %v3901_v30  ;;  %v3915_v7 = vld [vmem:[%s6224_s0 + $0x3d4] sm:$0x1]  ;;  %v3920_v21 = vld [vmem:[%s6224_s0 + $0x3dc] sm:$0x1]  ;;  %v6659_v30 = vunpack.c.h.bf16 %v2755_v0 }
  0x56   :  { %6648 = vst [vmem:[#allocation140_spill] sm:$0xff] %v3910_v8  ;;  %6649 = vst [vmem:[#allocation141_spill] sm:$0xff] %v3915_v7  ;;  %v3929_v36 = vld [vmem:[%s6224_s0 + $0x3e0] ss:$8 sps:$4 sm:$0xff]   ;;  %v3934_v16 = vld [vmem:[%s6224_s0 + $0x3e4] sm:$0x1]  ;;  %v6660_v7 = vunpack.c.l.bf16 %v2765_v2 }
  0x57   :  { %6650 = vst [vmem:[#allocation142_spill] sm:$0xff] %v3920_v21  ;;  %6651 = vst [vmem:[#allocation143_spill] sm:$0xff] %v3929_v36  ;;  %v3939_v15 = vld [vmem:[%s6224_s0 + $0x3ec] sm:$0x1]  ;;  %v3948_v13 = vld [vmem:[%s6224_s0 + $0x3f0] ss:$8 sps:$4 sm:$0xff]  }
  0x58   :  { %6652 = vst [vmem:[#allocation144_spill] sm:$0xff] %v3934_v16  ;;  %6653 = vst [vmem:[#allocation145_spill] sm:$0xff] %v3939_v15  ;;  %v3953_v14 = vld [vmem:[%s6224_s0 + $0x3f4] sm:$0x1]  ;;  %v3958_v9 = vld [vmem:[%s6224_s0 + $0x3fc] sm:$0x1] }
  0x59   :  { %6654 = vst [vmem:[#allocation146_spill] sm:$0xff] %v3948_v13  ;;  %6655 = vst [vmem:[#allocation147_spill] sm:$0xff] %v3953_v14  ;;  %v521_v23 = vsel %vm520_vm0, %v6657_v22, -inf  ;;  %v523_v6 = vsel %vm522_vm1, %v6658_v27, -inf  ;;  %v531_v21 = vsel %vm520_vm0, %v6659_v30, -inf  ;;  %v532_v8 = vsel %vm522_vm1, %v6660_v7, -inf }
  0x5a   :  { %6656 = vst [vmem:[#allocation148_spill] sm:$0xff] %v3958_v9  ;;  %v524_v14 = vmax.f32 %v521_v23, %v523_v6  ;;  %v533_v20 = vmax.f32 %v531_v21, %v532_v8  ;;  %v540_v9 = vsel %vm520_vm0, %v6661_v42, -inf  ;;  %v6662_v22 = vunpack.c.l.bf16 %v2775_v4 }
  0x5b   :  { %v6663_v27 = vunpack.c.h.bf16 %v2770_v3  ;;  %v6664_v30 = vunpack.c.l.bf16 %v2780_v5  ;;  %v6665_v6 = vunpack.c.l.bf16 %v2789_v10  ;;  %v6666_v4 = vunpack.c.l.bf16 %v2794_v11 }
  0x5c   :  { %v541_v1 = vsel %vm522_vm1, %v6662_v22, -inf  ;;  %v525_v8 = vrot.slane %v524_v14, 4  ;;  %v534_v21 = vrot.slane %v533_v20, 4  ;;  %v6667_v3 = vunpack.c.h.bf16 %v2789_v10 }
  0x5d   :  { %v542_v13 = vmax.f32 %v540_v9, %v541_v1  ;;  %v549_v0 = vsel %vm520_vm0, %v6663_v27, -inf  ;;  %v550_v2 = vsel %vm522_vm1, %v6664_v30, -inf  ;;  %v558_v7 = vsel %vm520_vm0, %v6665_v6, -inf }
  0x5e   :  { %v551_v23 = vmax.f32 %v549_v0, %v550_v2  ;;  %v559_v42 = vsel %vm522_vm1, %v6666_v4, -inf  ;;  %v567_v1 = vsel %vm520_vm0, %v6667_v3, -inf  ;;  %v6668_v5 = vunpack.c.l.bf16 %v2799_v12 }
  0x5f   :  { %v543_v9 = vrot.slane %v542_v13, 4  ;;  %v560_v22 = vmax.f32 %v558_v7, %v559_v42  ;;  %v526_v30 = vmax.f32 %v524_v14, %v525_v8  ;;  %v535_v15 = vmax.f32 %v533_v20, %v534_v21 }
  0x60   :  { %v568_v27 = vsel %vm522_vm1, %v6668_v5, -inf  ;;  %v552_v6 = vrot.slane %v551_v23, 4  ;;  %v6669_v11 = vunpack.c.l.bf16 %v2808_v17  ;;  %v6670_v7 = vunpack.c.l.bf16 %v2813_v18 }
  0x61   :  { %v569_v16 = vmax.f32 %v567_v1, %v568_v27  ;;  %v544_v36 = vmax.f32 %v542_v13, %v543_v9  ;;  %v561_v0 = vrot.slane %v560_v22, 4  ;;  %v527_v4 = vrot.slane %v526_v30, 2 }
  0x62   :  { %v576_v2 = vsel %vm520_vm0, %v6669_v11, -inf  ;;  %v577_v10 = vsel %vm522_vm1, %v6670_v7, -inf  ;;  %v536_v42 = vrot.slane %v535_v15, 2  ;;  %v553_v3 = vmax.f32 %v551_v23, %v552_v6 }
  0x63   :  { %v570_v12 = vrot.slane %v569_v16, 4  ;;  %v545_v48 = vrot.slane %v544_v36, 2  ;;  %v562_v5 = vmax.f32 %v560_v22, %v561_v0  ;;  %v578_v14 = vmax.f32 %v576_v2, %v577_v10 }
  0x64   :  { %v6671_v20 = vunpack.c.h.bf16 %v2808_v17  ;;  %v528_v8 = vmax.f32 %v526_v30, %v527_v4  ;;  %v537_v21 = vmax.f32 %v535_v15, %v536_v42  ;;  %v554_v9 = vrot.slane %v553_v3, 2 }
  0x65   :  { %v571_v1 = vmax.f32 %v569_v16, %v570_v12  ;;  %v546_v27 = vmax.f32 %v544_v36, %v545_v48  ;;  %v563_v11 = vrot.slane %v562_v5, 2  ;;  %v579_v18 = vrot.slane %v578_v14, 4 }
  0x66   :  { %v585_v13 = vsel %vm520_vm0, %v6671_v20, -inf  ;;  %v6672_v7 = vunpack.c.l.bf16 %v2818_v19  ;;  %v529_v23 = vrot.slane %v528_v8, 1  ;;  %v538_v6 = vrot.slane %v537_v21, 1 }
  0x67   :  { %v555_v29 = vmax.f32 %v553_v3, %v554_v9  ;;  %v572_v22 = vrot.slane %v571_v1, 2  ;;  %v547_v0 = vrot.slane %v546_v27, 1  ;;  %v564_v2 = vmax.f32 %v562_v5, %v563_v11 }
  0x68   :  { %v586_v28 = vsel %vm522_vm1, %v6672_v7, -inf  ;;  %v580_v17 = vmax.f32 %v578_v14, %v579_v18  ;;  %v4016_v20 = vmax.f32 %v528_v8, %v529_v23  ;;  %v4018_v15 = vmax.f32 %v537_v21, %v538_v6 }
  0x69   :  { %v587_v10 = vmax.f32 %v585_v13, %v586_v28  ;;  %v556_v16 = vrot.slane %v555_v29, 1  ;;  %v573_v36 = vmax.f32 %v571_v1, %v572_v22  ;;  %v4020_v48 = vmax.f32 %v546_v27, %v547_v0 }
  0x6a   :  { %v565_v30 = vrot.slane %v564_v2, 1  ;;  %v581_v19 = vrot.slane %v580_v17, 2  ;;  %v6673_v3 = vunpack.c.l.bf16 %v2827_v24  ;;  %v6674_v28 = vunpack.c.l.bf16 %v2832_v25 }
  0x6b   :  { %v588_v4 = vrot.slane %v587_v10, 4  ;;  %v4022_v42 = vmax.f32 %v555_v29, %v556_v16  ;;  %v574_v12 = vrot.slane %v573_v36, 1  ;;  %v6675_v27 = vunpack.c.h.bf16 %v2827_v24 }
  0x6c   :  { %v594_v5 = vsel %vm520_vm0, %v6673_v3, -inf  ;;  %v595_v14 = vsel %vm522_vm1, %v6674_v28, -inf  ;;  %v4030_v13 = vmax.f32 %v564_v2, %v565_v30  ;;  %v582_v8 = vmax.f32 %v580_v17, %v581_v19 }
  0x6d   :  { %v589_v21 = vmax.f32 %v587_v10, %v588_v4  ;;  %v596_v9 = vmax.f32 %v594_v5, %v595_v14  ;;  %v4032_v1 = vmax.f32 %v573_v36, %v574_v12  ;;  %v603_v29 = vsel %vm520_vm0, %v6675_v27, -inf }
  0x6e   :  { %v6676_v11 = vunpack.c.l.bf16 %v2837_v26  ;;  %v6677_v7 = vunpack.c.l.bf16 %v2846_v31  ;;  %v583_v23 = vrot.slane %v582_v8, 1  ;;  %v6678_v2 = vunpack.c.l.bf16 %v2851_v32 }
  0x6f   :  { %v590_v6 = vrot.slane %v589_v21, 2  ;;  %v597_v22 = vrot.slane %v596_v9, 4  ;;  %v6679_v24 = vunpack.c.h.bf16 %v2846_v31  ;;  %v6680_v26 = vunpack.c.l.bf16 %v2856_v33 }
  0x70   :  { %v604_v18 = vsel %vm522_vm1, %v6676_v11, -inf  ;;  %v612_v25 = vsel %vm520_vm0, %v6677_v7, -inf  ;;  %v613_v17 = vsel %vm522_vm1, %v6678_v2, -inf  ;;  %v6681_v36 = vunpack.c.l.bf16 %v2865_v38 }
  0x71   :  { %v605_v0 = vmax.f32 %v603_v29, %v604_v18  ;;  %v621_v10 = vsel %vm520_vm0, %v6679_v24, -inf  ;;  %v622_v16 = vsel %vm522_vm1, %v6680_v26, -inf  ;;  %v4055_v19 = vmax.f32 %v582_v8, %v583_v23 }
  0x72   :  { %v630_v30 = vsel %vm520_vm0, %v6681_v36, -inf  ;;  %v591_v4 = vmax.f32 %v589_v21, %v590_v6  ;;  %v598_v12 = vmax.f32 %v596_v9, %v597_v22  ;;  %v614_v32 = vmax.f32 %v612_v25, %v613_v17 }
  0x73   :  { %v606_v3 = vrot.slane %v605_v0, 4  ;;  %v623_v5 = vmax.f32 %v621_v10, %v622_v16  ;;  %v6682_v28 = vunpack.c.l.bf16 %v2870_v39  ;;  %v6683_v14 = vunpack.c.h.bf16 %v2865_v38 }
  0x74   :  { %v592_v27 = vrot.slane %v591_v4, 1  ;;  %v599_v29 = vrot.slane %v598_v12, 2  ;;  %v615_v7 = vrot.slane %v614_v32, 4  ;;  %v6684_v21 = vunpack.c.l.bf16 %v2875_v40 }
  0x75   :  { %v631_v31 = vsel %vm522_vm1, %v6682_v28, -inf  ;;  %v639_v33 = vsel %vm520_vm0, %v6683_v14, -inf  ;;  %v607_v11 = vmax.f32 %v605_v0, %v606_v3  ;;  %v624_v8 = vrot.slane %v623_v5, 4 }
  0x76   :  { %v632_v18 = vmax.f32 %v630_v30, %v631_v31  ;;  %v640_v9 = vsel %vm522_vm1, %v6684_v21, -inf  ;;  %v6685_v25 = vunpack.c.l.bf16 %v2884_v45  ;;  %v4069_v23 = vmax.f32 %v591_v4, %v592_v27 }
  0x77   :  { %v600_v6 = vmax.f32 %v598_v12, %v599_v29  ;;  %v608_v38 = vrot.slane %v607_v11, 2  ;;  %v616_v2 = vmax.f32 %v614_v32, %v615_v7  ;;  %v625_v17 = vmax.f32 %v623_v5, %v624_v8 }
  0x78   :  { %v648_v39 = vsel %vm520_vm0, %v6685_v25, -inf  ;;  %v633_v22 = vrot.slane %v632_v18, 4  ;;  %v641_v24 = vmax.f32 %v639_v33, %v640_v9  ;;  %v6686_v0 = vunpack.c.l.bf16 %v2889_v46 }
  0x79   :  { %v601_v26 = vrot.slane %v600_v6, 1  ;;  %v609_v40 = vmax.f32 %v607_v11, %v608_v38  ;;  %v617_v30 = vrot.slane %v616_v2, 2  ;;  %v626_v3 = vrot.slane %v625_v17, 2 }
  0x7a   :  { %v649_v10 = vsel %vm522_vm1, %v6686_v0, -inf  ;;  %v634_v16 = vmax.f32 %v632_v18, %v633_v22  ;;  %v642_v28 = vrot.slane %v641_v24, 4  ;;  %v6687_v4 = vunpack.c.h.bf16 %v2884_v45 }
  0x7b   :  { %v650_v36 = vmax.f32 %v648_v39, %v649_v10  ;;  %v4077_v31 = vmax.f32 %v600_v6, %v601_v26  ;;  %v610_v32 = vrot.slane %v609_v40, 1  ;;  %v618_v33 = vmax.f32 %v616_v2, %v617_v30 }
  0x7c   :  { %v657_v12 = vsel %vm520_vm0, %v6687_v4, -inf  ;;  %v635_v5 = vrot.slane %v634_v16, 2  ;;  %v627_v46 = vmax.f32 %v625_v17, %v626_v3  ;;  %v643_v27 = vmax.f32 %v641_v24, %v642_v28 }
  0x7d   :  { %v651_v14 = vrot.slane %v650_v36, 4  ;;  %v6688_v29 = vunpack.c.l.bf16 %v2894_v47  ;;  %v4082_v18 = vmax.f32 %v609_v40, %v610_v32  ;;  %v619_v45 = vrot.slane %v618_v33, 1 }
  0x7e   :  { %v636_v7 = vmax.f32 %v634_v16, %v635_v5  ;;  %v628_v9 = vrot.slane %v627_v46, 1  ;;  %v644_v25 = vrot.slane %v643_v27, 2  ;;  %v6689_v39 = vunpack.c.l.bf16 %v2903_v52 }
  0x7f   :  { %v658_v11 = vsel %vm522_vm1, %v6688_v29, -inf  ;;  %v652_v8 = vmax.f32 %v650_v36, %v651_v14  ;;  %v6690_v17 = vunpack.c.l.bf16 %v2908_v53  ;;  %v4090_v24 = vmax.f32 %v618_v33, %v619_v45 }
  0x80   :  { %v659_v21 = vmax.f32 %v657_v12, %v658_v11  ;;  %v666_v6 = vsel %vm520_vm0, %v6689_v39, -inf  ;;  %v637_v38 = vrot.slane %v636_v7, 1  ;;  %v4092_v0 = vmax.f32 %v627_v46, %v628_v9 }
  0x81   :  { %v653_v22 = vrot.slane %v652_v8, 2  ;;  %v667_v47 = vsel %vm522_vm1, %v6690_v17, -inf  ;;  %v645_v10 = vmax.f32 %v643_v27, %v644_v25  ;;  %v6691_v30 = vunpack.c.h.bf16 %v2903_v52 }
  0x82   :  { %v660_v2 = vrot.slane %v659_v21, 4  ;;  %v668_v26 = vmax.f32 %v666_v6, %v667_v47  ;;  %v4094_v40 = vmax.f32 %v636_v7, %v637_v38  ;;  %v6692_v53 = vunpack.c.l.bf16 %v2913_v54 }
  0x83   :  { %v654_v16 = vmax.f32 %v652_v8, %v653_v22  ;;  %v675_v3 = vsel %vm520_vm0, %v6691_v30, -inf  ;;  %v646_v28 = vrot.slane %v645_v10, 1  ;;  %v6693_v32 = vunpack.c.l.bf16 %v2922_v59 }
  0x84   :  { %v661_v36 = vmax.f32 %v659_v21, %v660_v2  ;;  %v669_v4 = vrot.slane %v668_v26, 4  ;;  %v676_v12 = vsel %vm522_vm1, %v6692_v53, -inf  ;;  %v6694_v27 = vunpack.c.l.bf16 %v2927_v60 }
  0x85   :  { %v684_v5 = vsel %vm520_vm0, %v6693_v32, -inf  ;;  %v655_v14 = vrot.slane %v654_v16, 1  ;;  %v677_v46 = vmax.f32 %v675_v3, %v676_v12  ;;  %v4108_v52 = vmax.f32 %v645_v10, %v646_v28 }
  0x86   :  { %v662_v33 = vrot.slane %v661_v36, 2  ;;  %v685_v29 = vsel %vm522_vm1, %v6694_v27, -inf  ;;  %v670_v11 = vmax.f32 %v668_v26, %v669_v4  ;;  %v6695_v8 = vunpack.c.h.bf16 %v2922_v59 }
  0x87   :  { %v686_v7 = vmax.f32 %v684_v5, %v685_v29  ;;  %v4113_v21 = vmax.f32 %v654_v16, %v655_v14  ;;  %v678_v9 = vrot.slane %v677_v46, 4  ;;  %v6696_v25 = vunpack.c.l.bf16 %v2932_v61 }
  0x88   :  { %v693_v54 = vsel %vm520_vm0, %v6695_v8, -inf  ;;  %v663_v45 = vmax.f32 %v661_v36, %v662_v33  ;;  %v671_v6 = vrot.slane %v670_v11, 2  ;;  %v6697_v22 = vunpack.c.l.bf16 %v2941_v56 }
  0x89   :  { %v694_v39 = vsel %vm522_vm1, %v6696_v25, -inf  ;;  %v687_v60 = vrot.slane %v686_v7, 4  ;;  %v679_v47 = vmax.f32 %v677_v46, %v678_v9  ;;  %v6698_v59 = vunpack.c.l.bf16 %v2946_v55 }
  0x8a   :  { %v695_v38 = vmax.f32 %v693_v54, %v694_v39  ;;  %v702_v2 = vsel %vm520_vm0, %v6697_v22, -inf  ;;  %v664_v17 = vrot.slane %v663_v45, 1  ;;  %v6699_v26 = vunpack.c.h.bf16 %v2941_v56 }
  0x8b   :  { %v703_v10 = vsel %vm522_vm1, %v6698_v59, -inf  ;;  %v672_v61 = vmax.f32 %v670_v11, %v671_v6  ;;  %v688_v36 = vmax.f32 %v686_v7, %v687_v60  ;;  %v680_v4 = vrot.slane %v679_v47, 2 }
  0x8c   :  { %v711_v16 = vsel %vm520_vm0, %v6699_v26, -inf  ;;  %v696_v30 = vrot.slane %v695_v38, 4  ;;  %v704_v3 = vmax.f32 %v702_v2, %v703_v10  ;;  %v4127_v28 = vmax.f32 %v663_v45, %v664_v17 }
  0x8d   :  { %v6700_v53 = vunpack.c.l.bf16 %v2951_v62  ;;  %v6701_v32 = vunpack.c.l.bf16 %v2960_v50  ;;  %v673_v5 = vrot.slane %v672_v61, 1  ;;  %v689_v14 = vrot.slane %v688_v36, 2 }
  0x8e   :  { %v697_v56 = vmax.f32 %v695_v38, %v696_v30  ;;  %v705_v33 = vrot.slane %v704_v3, 4  ;;  %v681_v46 = vmax.f32 %v679_v47, %v680_v4  ;;  %v6702_v29 = vunpack.c.l.bf16 %v2965_v49 }
  0x8f   :  { %v712_v12 = vsel %vm522_vm1, %v6700_v53, -inf  ;;  %v720_v55 = vsel %vm520_vm0, %v6701_v32, -inf  ;;  %v6703_v7 = vunpack.c.h.bf16 %v2960_v50  ;;  %v4141_v8 = vmax.f32 %v672_v61, %v673_v5 }
  0x90   :  { %v713_v27 = vmax.f32 %v711_v16, %v712_v12  ;;  %v721_v11 = vsel %vm522_vm1, %v6702_v29, -inf  ;;  %v690_v54 = vmax.f32 %v688_v36, %v689_v14  ;;  %v698_v45 = vrot.slane %v697_v56, 2 }
  0x91   :  { %v729_v62 = vsel %vm520_vm0, %v6703_v7, -inf  ;;  %v706_v9 = vmax.f32 %v704_v3, %v705_v33  ;;  %v682_v25 = vrot.slane %v681_v46, 1  ;;  %v722_v6 = vmax.f32 %v720_v55, %v721_v11 }
  0x92   :  { %v714_v39 = vrot.slane %v713_v27, 4  ;;  %v6704_v60 = vunpack.c.l.bf16 %v2970_v63  ;;  %v691_v22 = vrot.slane %v690_v54, 1  ;;  %v699_v49 = vmax.f32 %v697_v56, %v698_v45 }
  0x93   :  { %v707_v2 = vrot.slane %v706_v9, 2  ;;  %v4146_v47 = vmax.f32 %v681_v46, %v682_v25  ;;  %v723_v59 = vrot.slane %v722_v6, 4  ;;  %v6705_v10 = vunpack.c.l.bf16 %v2979_v44 }
  0x94   :  { %v730_v38 = vsel %vm522_vm1, %v6704_v60, -inf  ;;  %v715_v50 = vmax.f32 %v713_v27, %v714_v39  ;;  %v4151_v16 = vmax.f32 %v690_v54, %v691_v22  ;;  %v700_v61 = vrot.slane %v699_v49, 1 }
  0x95   :  { %v731_v17 = vmax.f32 %v729_v62, %v730_v38  ;;  %v738_v26 = vsel %vm520_vm0, %v6705_v10, -inf  ;;  %v708_v36 = vmax.f32 %v706_v9, %v707_v2  ;;  %v724_v3 = vmax.f32 %v722_v6, %v723_v59 }
  0x96   :  { %v716_v63 = vrot.slane %v715_v50, 2  ;;  %v6706_v4 = vunpack.c.l.bf16 %v2984_v43  ;;  %v6707_v12 = vunpack.c.h.bf16 %v2979_v44  ;;  %v4159_v55 = vmax.f32 %v699_v49, %v700_v61 }
  0x97   :  { %v732_v30 = vrot.slane %v731_v17, 4  ;;  %v709_v5 = vrot.slane %v708_v36, 1  ;;  %v725_v46 = vrot.slane %v724_v3, 2  ;;  %v6708_v27 = vunpack.c.l.bf16 %v2989_v58 }
  0x98   :  { %v739_v53 = vsel %vm522_vm1, %v6706_v4, -inf  ;;  %v747_v32 = vsel %vm520_vm0, %v6707_v12, -inf  ;;  %v717_v33 = vmax.f32 %v715_v50, %v716_v63  ;;  %v6709_v11 = vunpack.c.l.bf16 %v2998_v41 }
  0x99   :  { %v733_v14 = vmax.f32 %v731_v17, %v732_v30  ;;  %v740_v56 = vmax.f32 %v738_v26, %v739_v53  ;;  %v748_v29 = vsel %vm522_vm1, %v6708_v27, -inf  ;;  %v4167_v7 = vmax.f32 %v708_v36, %v709_v5 }
  0x9a   :  { %v756_v43 = vsel %vm520_vm0, %v6709_v11, -inf  ;;  %v749_v54 = vmax.f32 %v747_v32, %v748_v29  ;;  %v718_v45 = vrot.slane %v717_v33, 1  ;;  %v726_v9 = vmax.f32 %v724_v3, %v725_v46  ;;  %v6717_v29 = vld [vmem:[#allocation2_spill] sm:$0xff] }
  0x9b   :  { %v734_v44 = vrot.slane %v733_v14, 2  ;;  %v741_v62 = vrot.slane %v740_v56, 4  ;;  %v6710_v25 = vunpack.c.l.bf16 %v3003_v37  ;;  %v6711_v6 = vunpack.c.h.bf16 %v2998_v41 }
  0x9c   :  { %v750_v22 = vrot.slane %v749_v54, 4  ;;  %v4175_v2 = vmax.f32 %v717_v33, %v718_v45  ;;  %v727_v17 = vrot.slane %v726_v9, 1  ;;  %v6712_v50 = vunpack.c.l.bf16 %v3008_v57 }
  0x9d   :  { %v757_v39 = vsel %vm522_vm1, %v6710_v25, -inf  ;;  %v765_v58 = vsel %vm520_vm0, %v6711_v6, -inf  ;;  %v735_v60 = vmax.f32 %v733_v14, %v734_v44  ;;  %v742_v38 = vmax.f32 %v740_v56, %v741_v62 }
  0x9e   :  { %v758_v49 = vmax.f32 %v756_v43, %v757_v39  ;;  %v766_v59 = vsel %vm522_vm1, %v6712_v50, -inf  ;;  %v6713_v10 = vunpack.c.l.bf16 %v3017_v35  ;;  %v751_v41 = vmax.f32 %v749_v54, %v750_v22 }
  0x9f   :  { %v736_v26 = vrot.slane %v735_v60, 1  ;;  %v743_v61 = vrot.slane %v742_v38, 2  ;;  %v4183_v30 = vmax.f32 %v726_v9, %v727_v17  ;;  %v767_v63 = vmax.f32 %v765_v58, %v766_v59  ;;  %v6719_v9 = vld [vmem:[#allocation3_spill] sm:$0xff]  ;;  %v6722_v59 = vld [vmem:[#allocation4_spill] sm:$0xff] }
  0xa0   :  { %v774_v37 = vsel %vm520_vm0, %v6713_v10, -inf  ;;  %v759_v36 = vrot.slane %v758_v49, 4  ;;  %v6714_v3 = vunpack.c.l.bf16 %v3022_v34  ;;  %v6715_v53 = vunpack.c.h.bf16 %v3017_v35 }
  0xa1   :  { %v4191_v12 = vmax.f32 %v735_v60, %v736_v26  ;;  %v744_v32 = vmax.f32 %v742_v38, %v743_v61  ;;  %v752_v5 = vrot.slane %v751_v41, 2  ;;  %v768_v56 = vrot.slane %v767_v63, 4 }
  0xa2   :  { %v775_v4 = vsel %vm522_vm1, %v6714_v3, -inf  ;;  %v783_v57 = vsel %vm520_vm0, %v6715_v53, -inf  ;;  %v760_v14 = vmax.f32 %v758_v49, %v759_v36  ;;  %v6716_v46 = vunpack.c.l.bf16 %v3027_v51  ;;  %v6724_v53 = vld [vmem:[#allocation5_spill] sm:$0xff] }
  0xa3   :  { %v776_v33 = vmax.f32 %v774_v37, %v775_v4  ;;  %v6718_v11 = vunpack.c.l.bf16 %v6717_v29  ;;  %v745_v43 = vrot.slane %v744_v32, 1  ;;  %v753_v44 = vmax.f32 %v751_v41, %v752_v5 }
  0xa4   :  { %v784_v27 = vsel %vm522_vm1, %v6716_v46, -inf  ;;  %v761_v35 = vrot.slane %v760_v14, 2  ;;  %v769_v54 = vmax.f32 %v767_v63, %v768_v56  ;;  %v6720_v25 = vunpack.c.l.bf16 %v6719_v9 }
  0xa5   :  { %v792_v34 = vsel %vm520_vm0, %v6718_v11, -inf  ;;  %v785_v62 = vmax.f32 %v783_v57, %v784_v27  ;;  %v777_v45 = vrot.slane %v776_v33, 4  ;;  %v6721_v6 = vunpack.c.h.bf16 %v6717_v29 }
  0xa6   :  { %v793_v39 = vsel %vm522_vm1, %v6720_v25, -inf  ;;  %v4205_v58 = vmax.f32 %v744_v32, %v745_v43  ;;  %v754_v60 = vrot.slane %v753_v44, 1  ;;  %v762_v38 = vmax.f32 %v760_v14, %v761_v35 }
  0xa7   :  { %v801_v51 = vsel %vm520_vm0, %v6721_v6, -inf  ;;  %v786_v22 = vrot.slane %v785_v62, 4  ;;  %v770_v49 = vrot.slane %v769_v54, 2  ;;  %v778_v17 = vmax.f32 %v776_v33, %v777_v45  ;;  %v6726_v33 = vld [vmem:[#allocation6_spill] sm:$0xff]  ;;  %v6729_v45 = vld [vmem:[#allocation7_spill] sm:$0xff] }
  0xa8   :  { %v794_v50 = vmax.f32 %v792_v34, %v793_v39  ;;  %v6723_v10 = vunpack.c.l.bf16 %v6722_v59  ;;  %v4210_v26 = vmax.f32 %v753_v44, %v754_v60  ;;  %v763_v61 = vrot.slane %v762_v38, 1 }
  0xa9   :  { %v787_v41 = vmax.f32 %v785_v62, %v786_v22  ;;  %v771_v63 = vmax.f32 %v769_v54, %v770_v49  ;;  %v779_v3 = vrot.slane %v778_v17, 2  ;;  %v6725_v57 = vunpack.c.l.bf16 %v6724_v53 }
  0xaa   :  { %v802_v37 = vsel %vm522_vm1, %v6723_v10, -inf  ;;  %v795_v4 = vrot.slane %v794_v50, 4  ;;  %v4215_v5 = vmax.f32 %v762_v38, %v763_v61  ;;  %v6727_v46 = vunpack.c.l.bf16 %v6726_v33 }
  0xab   :  { %v803_v36 = vmax.f32 %v801_v51, %v802_v37  ;;  %v810_v32 = vsel %vm520_vm0, %v6725_v57, -inf  ;;  %v788_v14 = vrot.slane %v787_v41, 2  ;;  %v772_v29 = vrot.slane %v771_v63, 1 }
  0xac   :  { %v811_v27 = vsel %vm522_vm1, %v6727_v46, -inf  ;;  %v780_v11 = vmax.f32 %v778_v17, %v779_v3  ;;  %v796_v34 = vmax.f32 %v794_v50, %v795_v4  ;;  %v6728_v62 = vunpack.c.h.bf16 %v6724_v53  ;;  %v6731_v17 = vld [vmem:[#allocation8_spill] sm:$0xff]  ;;  %v6736_v46 = vld [vmem:[#allocation10_spill] sm:$0xff] }
  0xad   :  { %v804_v56 = vrot.slane %v803_v36, 4  ;;  %v812_v43 = vmax.f32 %v810_v32, %v811_v27  ;;  %v789_v44 = vmax.f32 %v787_v41, %v788_v14  ;;  %v6730_v9 = vunpack.c.l.bf16 %v6729_v45  ;;  %v6733_v41 = vld [vmem:[#allocation9_spill] sm:$0xff] }
  0xae   :  { %v819_v54 = vsel %vm520_vm0, %v6728_v62, -inf  ;;  %v4226_v39 = vmax.f32 %v771_v63, %v772_v29  ;;  %v781_v6 = vrot.slane %v780_v11, 1  ;;  %v797_v51 = vrot.slane %v796_v34, 2 }
  0xaf   :  { %v805_v35 = vmax.f32 %v803_v36, %v804_v56  ;;  %v820_v25 = vsel %vm522_vm1, %v6730_v9, -inf  ;;  %v813_v60 = vrot.slane %v812_v43, 4  ;;  %v790_v38 = vrot.slane %v789_v44, 1 }
  0xb0   :  { %v821_v49 = vmax.f32 %v819_v54, %v820_v25  ;;  %v6732_v50 = vunpack.c.l.bf16 %v6731_v17  ;;  %v4231_v10 = vmax.f32 %v780_v11, %v781_v6  ;;  %v798_v37 = vmax.f32 %v796_v34, %v797_v51  ;;  %v6740_v25 = vld [vmem:[#allocation12_spill] sm:$0xff] }
  0xb1   :  { %v806_v22 = vrot.slane %v805_v35, 2  ;;  %v814_v61 = vmax.f32 %v812_v43, %v813_v60  ;;  %v6734_v36 = vunpack.c.l.bf16 %v6733_v41  ;;  %v4236_v63 = vmax.f32 %v789_v44, %v790_v38 }
  0xb2   :  { %v828_v59 = vsel %vm520_vm0, %v6732_v50, -inf  ;;  %v822_v53 = vrot.slane %v821_v49, 4  ;;  %v799_v32 = vrot.slane %v798_v37, 1  ;;  %v6735_v56 = vunpack.c.h.bf16 %v6731_v17 }
  0xb3   :  { %v829_v3 = vsel %vm522_vm1, %v6734_v36, -inf  ;;  %v807_v4 = vmax.f32 %v805_v35, %v806_v22  ;;  %v815_v14 = vrot.slane %v814_v61, 2  ;;  %v6737_v27 = vunpack.c.l.bf16 %v6736_v46  ;;  %v6738_v35 = vld [vmem:[#allocation11_spill] sm:$0xff] }
  0xb4   :  { %v830_v57 = vmax.f32 %v828_v59, %v829_v3  ;;  %v837_v33 = vsel %vm520_vm0, %v6735_v56, -inf  ;;  %v823_v34 = vmax.f32 %v821_v49, %v822_v53  ;;  %v4244_v54 = vmax.f32 %v798_v37, %v799_v32 }
  0xb5   :  { %v838_v29 = vsel %vm522_vm1, %v6737_v27, -inf  ;;  %v808_v11 = vrot.slane %v807_v4, 1  ;;  %v816_v44 = vmax.f32 %v814_v61, %v815_v14  ;;  %v6739_v45 = vunpack.c.l.bf16 %v6738_v35  ;;  %v6743_v61 = vld [vmem:[#allocation13_spill] sm:$0xff]  ;;  %v6747_v27 = vld [vmem:[#allocation15_spill] sm:$0xff] }
  0xb6   :  { %v831_v43 = vrot.slane %v830_v57, 4  ;;  %v839_v62 = vmax.f32 %v837_v33, %v838_v29  ;;  %v6741_v6 = vunpack.c.l.bf16 %v6740_v25  ;;  %v824_v38 = vrot.slane %v823_v34, 2  ;;  %v6745_v33 = vld [vmem:[#allocation14_spill] sm:$0xff] }
  0xb7   :  { %v846_v9 = vsel %vm520_vm0, %v6739_v45, -inf  ;;  %v4252_v60 = vmax.f32 %v807_v4, %v808_v11  ;;  %v817_v50 = vrot.slane %v816_v44, 1  ;;  %v6742_v59 = vunpack.c.h.bf16 %v6738_v35 }
  0xb8   :  { %v847_v51 = vsel %vm522_vm1, %v6741_v6, -inf  ;;  %v832_v22 = vmax.f32 %v830_v57, %v831_v43  ;;  %v840_v17 = vrot.slane %v839_v62, 4  ;;  %v6744_v41 = vunpack.c.l.bf16 %v6743_v61  ;;  %v6750_v6 = vld [vmem:[#allocation16_spill] sm:$0xff] }
  0xb9   :  { %v848_v49 = vmax.f32 %v846_v9, %v847_v51  ;;  %v855_v37 = vsel %vm520_vm0, %v6742_v59, -inf  ;;  %v825_v3 = vmax.f32 %v823_v34, %v824_v38  ;;  %v4260_v56 = vmax.f32 %v816_v44, %v817_v50 }
  0xba   :  { %v856_v36 = vsel %vm522_vm1, %v6744_v41, -inf  ;;  %v833_v53 = vrot.slane %v832_v22, 2  ;;  %v841_v32 = vmax.f32 %v839_v62, %v840_v17  ;;  %v6746_v57 = vunpack.c.l.bf16 %v6745_v33 }
  0xbb   :  { %v857_v14 = vmax.f32 %v855_v37, %v856_v36  ;;  %v849_v4 = vrot.slane %v848_v49, 4  ;;  %v6748_v29 = vunpack.c.l.bf16 %v6747_v27  ;;  %v826_v43 = vrot.slane %v825_v3, 1  ;;  %v6752_v36 = vld [vmem:[#allocation17_spill] sm:$0xff] }
  0xbc   :  { %v864_v46 = vsel %vm520_vm0, %v6746_v57, -inf  ;;  %v834_v35 = vmax.f32 %v832_v22, %v833_v53  ;;  %v842_v45 = vrot.slane %v841_v32, 2  ;;  %v6749_v62 = vunpack.c.h.bf16 %v6745_v33 }
  0xbd   :  { %v865_v11 = vsel %vm522_vm1, %v6748_v29, -inf  ;;  %v858_v9 = vrot.slane %v857_v14, 4  ;;  %v850_v25 = vmax.f32 %v848_v49, %v849_v4  ;;  %v6751_v51 = vunpack.c.l.bf16 %v6750_v6 }
  0xbe   :  { %v866_v34 = vmax.f32 %v864_v46, %v865_v11  ;;  %v873_v44 = vsel %vm520_vm0, %v6749_v62, -inf  ;;  %v4274_v17 = vmax.f32 %v825_v3, %v826_v43  ;;  %v835_v50 = vrot.slane %v834_v35, 1  ;;  %v6754_v46 = vld [vmem:[#allocation18_spill] sm:$0xff] }
  0xbf   :  { %v874_v38 = vsel %vm522_vm1, %v6751_v51, -inf  ;;  %v843_v59 = vmax.f32 %v841_v32, %v842_v45  ;;  %v859_v37 = vmax.f32 %v857_v14, %v858_v9  ;;  %v851_v61 = vrot.slane %v850_v25, 2 }
  0xc0   :  { %v867_v41 = vrot.slane %v866_v34, 4  ;;  %v875_v22 = vmax.f32 %v873_v44, %v874_v38  ;;  %v6753_v53 = vunpack.c.l.bf16 %v6752_v36  ;;  %v4279_v4 = vmax.f32 %v834_v35, %v835_v50  ;;  %v6757_v44 = vld [vmem:[#allocation19_spill] sm:$0xff] }
  0xc1   :  { %v844_v33 = vrot.slane %v843_v59, 1  ;;  %v860_v57 = vrot.slane %v859_v37, 2  ;;  %v6755_v27 = vunpack.c.l.bf16 %v6754_v46  ;;  %v852_v3 = vmax.f32 %v850_v25, %v851_v61 }
  0xc2   :  { %v882_v49 = vsel %vm520_vm0, %v6753_v53, -inf  ;;  %v868_v11 = vmax.f32 %v866_v34, %v867_v41  ;;  %v876_v43 = vrot.slane %v875_v22, 4  ;;  %v6756_v9 = vunpack.c.h.bf16 %v6752_v36  ;;  %v6759_v34 = vld [vmem:[#allocation20_spill] sm:$0xff]  ;;  %v6761_v41 = vld [vmem:[#allocation21_spill] sm:$0xff] }
  0xc3   :  { %v883_v29 = vsel %vm522_vm1, %v6755_v27, -inf  ;;  %v4284_v14 = vmax.f32 %v843_v59, %v844_v33  ;;  %v861_v45 = vmax.f32 %v859_v37, %v860_v57  ;;  %v6758_v35 = vunpack.c.l.bf16 %v6757_v44 }
  0xc4   :  { %v884_v32 = vmax.f32 %v882_v49, %v883_v29  ;;  %v891_v62 = vsel %vm520_vm0, %v6756_v9, -inf  ;;  %v853_v51 = vrot.slane %v852_v3, 1  ;;  %v869_v38 = vrot.slane %v868_v11, 2 }
  0xc5   :  { %v892_v6 = vsel %vm522_vm1, %v6758_v35, -inf  ;;  %v877_v50 = vmax.f32 %v875_v22, %v876_v43  ;;  %v862_v46 = vrot.slane %v861_v45, 1  ;;  %v6760_v61 = vunpack.c.l.bf16 %v6759_v34 }
  0xc6   :  { %v885_v53 = vrot.slane %v884_v32, 4  ;;  %v893_v25 = vmax.f32 %v891_v62, %v892_v6  ;;  %v6762_v37 = vunpack.c.l.bf16 %v6761_v41  ;;  %v4298_v49 = vmax.f32 %v852_v3, %v853_v51 }
  0xc7   :  { %v900_v59 = vsel %vm520_vm0, %v6760_v61, -inf  ;;  %v870_v33 = vmax.f32 %v868_v11, %v869_v38  ;;  %v878_v57 = vrot.slane %v877_v50, 2  ;;  %v4300_v29 = vmax.f32 %v861_v45, %v862_v46  ;;  %v6765_v61 = vld [vmem:[#allocation22_spill] sm:$0xff]  ;;  %v6767_v38 = vld [vmem:[#allocation23_spill] sm:$0xff] }
  0xc8   :  { %v901_v36 = vsel %vm522_vm1, %v6762_v37, -inf  ;;  %v886_v27 = vmax.f32 %v884_v32, %v885_v53  ;;  %v894_v9 = vrot.slane %v893_v25, 4  ;;  %v6764_v43 = vunpack.c.h.bf16 %v6759_v34 }
  0xc9   :  { %6763 = vst [vmem:[#allocation2_spill] sm:$0xff] %v4300_v29  ;;  %v902_v22 = vmax.f32 %v900_v59, %v901_v36  ;;  %v871_v44 = vrot.slane %v870_v33, 1  ;;  %v879_v35 = vmax.f32 %v877_v50, %v878_v57  ;;  %v6766_v41 = vunpack.c.l.bf16 %v6765_v61  ;;  %v6770_v59 = vld [vmem:[#allocation24_spill] sm:$0xff] }
  0xca   :  { %v909_v62 = vsel %vm520_vm0, %v6764_v43, -inf  ;;  %v887_v6 = vrot.slane %v886_v27, 2  ;;  %v895_v3 = vmax.f32 %v893_v25, %v894_v9  ;;  %v6768_v32 = vunpack.c.l.bf16 %v6767_v38 }
  0xcb   :  { %v910_v37 = vsel %vm522_vm1, %v6766_v41, -inf  ;;  %v903_v51 = vrot.slane %v902_v22, 4  ;;  %v4311_v53 = vmax.f32 %v870_v33, %v871_v44  ;;  %v880_v46 = vrot.slane %v879_v35, 1 }
  0xcc   :  { %v911_v11 = vmax.f32 %v909_v62, %v910_v37  ;;  %v918_v45 = vsel %vm520_vm0, %v6768_v32, -inf  ;;  %v888_v34 = vmax.f32 %v886_v27, %v887_v6  ;;  %v6771_v36 = vunpack.c.l.bf16 %v6770_v59  ;;  %v6774_v37 = vld [vmem:[#allocation25_spill] sm:$0xff] }
  0xcd   :  { %6769 = vst [vmem:[#allocation3_spill] sm:$0xff] %v4311_v53  ;;  %v896_v57 = vrot.slane %v895_v3, 2  ;;  %v904_v43 = vmax.f32 %v902_v22, %v903_v51  ;;  %v4316_v41 = vmax.f32 %v879_v35, %v880_v46  ;;  %v6773_v9 = vunpack.c.h.bf16 %v6767_v38  ;;  %v6777_v51 = vld [vmem:[#allocation26_spill] sm:$0xff]  ;;  %v6779_v46 = vld [vmem:[#allocation27_spill] sm:$0xff] }
  0xce   :  { %v919_v50 = vsel %vm522_vm1, %v6771_v36, -inf  ;;  %v912_v61 = vrot.slane %v911_v11, 4  ;;  %v889_v25 = vrot.slane %v888_v34, 1  ;;  %v6775_v33 = vunpack.c.l.bf16 %v6774_v37 }
  0xcf   :  { %v920_v29 = vmax.f32 %v918_v45, %v919_v50  ;;  %6772 = vst [vmem:[#allocation4_spill] sm:$0xff] %v4316_v41  ;;  %v927_v62 = vsel %vm520_vm0, %v6773_v9, -inf  ;;  %v897_v27 = vmax.f32 %v895_v3, %v896_v57  ;;  %v905_v6 = vrot.slane %v904_v43, 2  ;;  %v6782_v57 = vld [vmem:[#allocation28_spill] sm:$0xff] }
  0xd0   :  { %v928_v44 = vsel %vm522_vm1, %v6775_v33, -inf  ;;  %v913_v32 = vmax.f32 %v911_v11, %v912_v61  ;;  %v4324_v36 = vmax.f32 %v888_v34, %v889_v25  ;;  %v6778_v45 = vunpack.c.l.bf16 %v6777_v51 }
  0xd1   :  { %v921_v59 = vrot.slane %v920_v29, 4  ;;  %v929_v22 = vmax.f32 %v927_v62, %v928_v44  ;;  %v6780_v50 = vunpack.c.l.bf16 %v6779_v46  ;;  %v898_v9 = vrot.slane %v897_v27, 1 }
  0xd2   :  { %6776 = vst [vmem:[#allocation5_spill] sm:$0xff] %v4324_v36  ;;  %v936_v35 = vsel %vm520_vm0, %v6778_v45, -inf  ;;  %v906_v41 = vmax.f32 %v904_v43, %v905_v6  ;;  %v914_v37 = vrot.slane %v913_v32, 2  ;;  %v6781_v11 = vunpack.c.h.bf16 %v6777_v51  ;;  %v6785_v6 = vld [vmem:[#allocation29_spill] sm:$0xff] }
  0xd3   :  { %v937_v38 = vsel %vm522_vm1, %v6780_v50, -inf  ;;  %v922_v53 = vmax.f32 %v920_v29, %v921_v59  ;;  %v930_v33 = vrot.slane %v929_v22, 4  ;;  %v6783_v61 = vunpack.c.l.bf16 %v6782_v57 }
  0xd4   :  { %v938_v3 = vmax.f32 %v936_v35, %v937_v38  ;;  %v945_v34 = vsel %vm520_vm0, %v6781_v11, -inf  ;;  %v4338_v62 = vmax.f32 %v897_v27, %v898_v9  ;;  %v907_v44 = vrot.slane %v906_v41, 1  ;;  %v6788_v11 = vld [vmem:[#allocation30_spill] sm:$0xff] }
  0xd5   :  { %v946_v25 = vsel %vm522_vm1, %v6783_v61, -inf  ;;  %v915_v45 = vmax.f32 %v913_v32, %v914_v37  ;;  %v923_v46 = vrot.slane %v922_v53, 2  ;;  %v931_v50 = vmax.f32 %v929_v22, %v930_v33 }
  0xd6   :  { %6784 = vst [vmem:[#allocation6_spill] sm:$0xff] %v4338_v62  ;;  %v939_v36 = vrot.slane %v938_v3, 4  ;;  %v947_v43 = vmax.f32 %v945_v34, %v946_v25  ;;  %v6786_v29 = vunpack.c.l.bf16 %v6785_v6  ;;  %v4343_v35 = vmax.f32 %v906_v41, %v907_v44  ;;  %v6792_v25 = vld [vmem:[#allocation31_spill] sm:$0xff] }
  0xd7   :  { %v916_v51 = vrot.slane %v915_v45, 1  ;;  %v924_v38 = vmax.f32 %v922_v53, %v923_v46  ;;  %v6789_v57 = vunpack.c.l.bf16 %v6788_v11  ;;  %v932_v27 = vrot.slane %v931_v50, 2 }
  0xd8   :  { %v954_v59 = vsel %vm520_vm0, %v6786_v29, -inf  ;;  %6787 = vst [vmem:[#allocation7_spill] sm:$0xff] %v4343_v35  ;;  %v940_v9 = vmax.f32 %v938_v3, %v939_v36  ;;  %v948_v62 = vrot.slane %v947_v43, 4  ;;  %v6791_v33 = vunpack.c.h.bf16 %v6785_v6  ;;  %v6795_v3 = vld [vmem:[#allocation32_spill] sm:$0xff] }
  0xd9   :  { %v955_v61 = vsel %vm522_vm1, %v6789_v57, -inf  ;;  %v4348_v37 = vmax.f32 %v915_v45, %v916_v51  ;;  %v925_v22 = vrot.slane %v924_v38, 1  ;;  %v6793_v41 = vunpack.c.l.bf16 %v6792_v25  ;;  %v6797_v51 = vld [vmem:[#allocation33_spill] sm:$0xff] }
  0xda   :  { %v956_v32 = vmax.f32 %v954_v59, %v955_v61  ;;  %v963_v34 = vsel %vm520_vm0, %v6791_v33, -inf  ;;  %v933_v53 = vmax.f32 %v931_v50, %v932_v27  ;;  %v941_v46 = vrot.slane %v940_v9, 2 }
  0xdb   :  { %6790 = vst [vmem:[#allocation8_spill] sm:$0xff] %v4348_v37  ;;  %v964_v44 = vsel %vm522_vm1, %v6793_v41, -inf  ;;  %v949_v29 = vmax.f32 %v947_v43, %v948_v62  ;;  %v4356_v57 = vmax.f32 %v924_v38, %v925_v22  ;;  %v6796_v59 = vunpack.c.l.bf16 %v6795_v3  ;;  %v6800_v38 = vld [vmem:[#allocation34_spill] sm:$0xff] }
  0xdc   :  { %v957_v11 = vrot.slane %v956_v32, 4  ;;  %v965_v36 = vmax.f32 %v963_v34, %v964_v44  ;;  %v6798_v61 = vunpack.c.l.bf16 %v6797_v51  ;;  %v934_v33 = vrot.slane %v933_v53, 1 }
  0xdd   :  { %6794 = vst [vmem:[#allocation9_spill] sm:$0xff] %v4356_v57  ;;  %v972_v45 = vsel %vm520_vm0, %v6796_v59, -inf  ;;  %v942_v37 = vmax.f32 %v940_v9, %v941_v46  ;;  %v950_v25 = vrot.slane %v949_v29, 2  ;;  %v6799_v62 = vunpack.c.h.bf16 %v6795_v3  ;;  %v6803_v46 = vld [vmem:[#allocation35_spill] sm:$0xff] }
  0xde   :  { %v973_v6 = vsel %vm522_vm1, %v6798_v61, -inf  ;;  %v958_v35 = vmax.f32 %v956_v32, %v957_v11  ;;  %v966_v41 = vrot.slane %v965_v36, 4  ;;  %v6801_v27 = vunpack.c.l.bf16 %v6800_v38 }
  0xdf   :  { %v974_v50 = vmax.f32 %v972_v45, %v973_v6  ;;  %v981_v43 = vsel %vm520_vm0, %v6799_v62, -inf  ;;  %v4370_v34 = vmax.f32 %v933_v53, %v934_v33  ;;  %v943_v44 = vrot.slane %v942_v37, 1  ;;  %v6806_v62 = vld [vmem:[#allocation36_spill] sm:$0xff] }
  0xe0   :  { %v982_v22 = vsel %vm522_vm1, %v6801_v27, -inf  ;;  %v951_v59 = vmax.f32 %v949_v29, %v950_v25  ;;  %v959_v51 = vrot.slane %v958_v35, 2  ;;  %v967_v61 = vmax.f32 %v965_v36, %v966_v41 }
  0xe1   :  { %6802 = vst [vmem:[#allocation10_spill] sm:$0xff] %v4370_v34  ;;  %v975_v57 = vrot.slane %v974_v50, 4  ;;  %v983_v9 = vmax.f32 %v981_v43, %v982_v22  ;;  %v6804_v32 = vunpack.c.l.bf16 %v6803_v46  ;;  %v4375_v45 = vmax.f32 %v942_v37, %v943_v44  ;;  %v6810_v22 = vld [vmem:[#allocation37_spill] sm:$0xff] }
  0xe2   :  { %v952_v3 = vrot.slane %v951_v59, 1  ;;  %v960_v6 = vmax.f32 %v958_v35, %v959_v51  ;;  %v6807_v38 = vunpack.c.l.bf16 %v6806_v62  ;;  %v968_v53 = vrot.slane %v967_v61, 2 }
  0xe3   :  { %v990_v11 = vsel %vm520_vm0, %v6804_v32, -inf  ;;  %6805 = vst [vmem:[#allocation11_spill] sm:$0xff] %v4375_v45  ;;  %v976_v33 = vmax.f32 %v974_v50, %v975_v57  ;;  %v984_v34 = vrot.slane %v983_v9, 4  ;;  %v6809_v41 = vunpack.c.h.bf16 %v6803_v46  ;;  %v6813_v50 = vld [vmem:[#allocation38_spill] sm:$0xff] }
  0xe4   :  { %v991_v27 = vsel %vm522_vm1, %v6807_v38, -inf  ;;  %v4380_v25 = vmax.f32 %v951_v59, %v952_v3  ;;  %v961_v36 = vrot.slane %v960_v6, 1  ;;  %v6811_v37 = vunpack.c.l.bf16 %v6810_v22  ;;  %v6815_v3 = vld [vmem:[#allocation39_spill] sm:$0xff] }
  0xe5   :  { %v992_v29 = vmax.f32 %v990_v11, %v991_v27  ;;  %v999_v43 = vsel %vm520_vm0, %v6809_v41, -inf  ;;  %v969_v35 = vmax.f32 %v967_v61, %v968_v53  ;;  %v977_v51 = vrot.slane %v976_v33, 2 }
  0xe6   :  { %6808 = vst [vmem:[#allocation12_spill] sm:$0xff] %v4380_v25  ;;  %v1000_v44 = vsel %vm522_vm1, %v6811_v37, -inf  ;;  %v985_v32 = vmax.f32 %v983_v9, %v984_v34  ;;  %v4388_v38 = vmax.f32 %v960_v6, %v961_v36  ;;  %v6814_v11 = vunpack.c.l.bf16 %v6813_v50  ;;  %v6818_v6 = vld [vmem:[#allocation40_spill] sm:$0xff] }
  0xe7   :  { %v993_v62 = vrot.slane %v992_v29, 4  ;;  %v1001_v57 = vmax.f32 %v999_v43, %v1000_v44  ;;  %v6816_v27 = vunpack.c.l.bf16 %v6815_v3  ;;  %v970_v41 = vrot.slane %v969_v35, 1 }
  0xe8   :  { %6812 = vst [vmem:[#allocation13_spill] sm:$0xff] %v4388_v38  ;;  %v1008_v59 = vsel %vm520_vm0, %v6814_v11, -inf  ;;  %v978_v25 = vmax.f32 %v976_v33, %v977_v51  ;;  %v986_v22 = vrot.slane %v985_v32, 2  ;;  %v6817_v34 = vunpack.c.h.bf16 %v6813_v50  ;;  %v6821_v51 = vld [vmem:[#allocation41_spill] sm:$0xff] }
  0xe9   :  { %v1009_v46 = vsel %vm522_vm1, %v6816_v27, -inf  ;;  %v994_v45 = vmax.f32 %v992_v29, %v993_v62  ;;  %v1002_v37 = vrot.slane %v1001_v57, 4  ;;  %v6819_v53 = vunpack.c.l.bf16 %v6818_v6 }
  0xea   :  { %v1010_v61 = vmax.f32 %v1008_v59, %v1009_v46  ;;  %v1017_v9 = vsel %vm520_vm0, %v6817_v34, -inf  ;;  %v4402_v43 = vmax.f32 %v969_v35, %v970_v41  ;;  %v979_v44 = vrot.slane %v978_v25, 1  ;;  %v6824_v34 = vld [vmem:[#allocation42_spill] sm:$0xff] }
  0xeb   :  { %v1018_v36 = vsel %vm522_vm1, %v6819_v53, -inf  ;;  %v987_v11 = vmax.f32 %v985_v32, %v986_v22  ;;  %v995_v3 = vrot.slane %v994_v45, 2  ;;  %v1003_v27 = vmax.f32 %v1001_v57, %v1002_v37 }
  0xec   :  { %6820 = vst [vmem:[#allocation14_spill] sm:$0xff] %v4402_v43  ;;  %v1011_v38 = vrot.slane %v1010_v61, 4  ;;  %v1019_v33 = vmax.f32 %v1017_v9, %v1018_v36  ;;  %v6822_v29 = vunpack.c.l.bf16 %v6821_v51  ;;  %v4407_v59 = vmax.f32 %v978_v25, %v979_v44  ;;  %v6828_v36 = vld [vmem:[#allocation43_spill] sm:$0xff] }
  0xed   :  { %v988_v50 = vrot.slane %v987_v11, 1  ;;  %v996_v46 = vmax.f32 %v994_v45, %v995_v3  ;;  %v6825_v6 = vunpack.c.l.bf16 %v6824_v34  ;;  %v1004_v35 = vrot.slane %v1003_v27, 2 }
  0xee   :  { %v1026_v62 = vsel %vm520_vm0, %v6822_v29, -inf  ;;  %6823 = vst [vmem:[#allocation15_spill] sm:$0xff] %v4407_v59  ;;  %v1012_v41 = vmax.f32 %v1010_v61, %v1011_v38  ;;  %v1020_v43 = vrot.slane %v1019_v33, 4  ;;  %v6827_v37 = vunpack.c.h.bf16 %v6821_v51  ;;  %v6831_v61 = vld [vmem:[#allocation44_spill] sm:$0xff] }
  0xef   :  { %v1027_v53 = vsel %vm522_vm1, %v6825_v6, -inf  ;;  %v4412_v22 = vmax.f32 %v987_v11, %v988_v50  ;;  %v997_v57 = vrot.slane %v996_v46, 1  ;;  %v6829_v25 = vunpack.c.l.bf16 %v6828_v36  ;;  %v6833_v50 = vld [vmem:[#allocation45_spill] sm:$0xff] }
  0xf0   :  { %v1028_v32 = vmax.f32 %v1026_v62, %v1027_v53  ;;  %v1035_v9 = vsel %vm520_vm0, %v6827_v37, -inf  ;;  %v1005_v45 = vmax.f32 %v1003_v27, %v1004_v35  ;;  %v1013_v3 = vrot.slane %v1012_v41, 2 }
  0xf1   :  { %6826 = vst [vmem:[#allocation16_spill] sm:$0xff] %v4412_v22  ;;  %v1036_v44 = vsel %vm522_vm1, %v6829_v25, -inf  ;;  %v1021_v29 = vmax.f32 %v1019_v33, %v1020_v43  ;;  %v4420_v6 = vmax.f32 %v996_v46, %v997_v57  ;;  %v6832_v62 = vunpack.c.l.bf16 %v6831_v61  ;;  %v6836_v46 = vld [vmem:[#allocation46_spill] sm:$0xff] }
  0xf2   :  { %v1029_v34 = vrot.slane %v1028_v32, 4  ;;  %v1037_v38 = vmax.f32 %v1035_v9, %v1036_v44  ;;  %v6834_v53 = vunpack.c.l.bf16 %v6833_v50  ;;  %v1006_v37 = vrot.slane %v1005_v45, 1 }
  0xf3   :  { %6830 = vst [vmem:[#allocation17_spill] sm:$0xff] %v4420_v6  ;;  %v1044_v11 = vsel %vm520_vm0, %v6832_v62, -inf  ;;  %v1014_v22 = vmax.f32 %v1012_v41, %v1013_v3  ;;  %v1022_v36 = vrot.slane %v1021_v29, 2  ;;  %v6835_v43 = vunpack.c.h.bf16 %v6831_v61  ;;  %v6839_v3 = vld [vmem:[#allocation47_spill] sm:$0xff] }
  0xf4   :  { %v1045_v51 = vsel %vm522_vm1, %v6834_v53, -inf  ;;  %v1030_v59 = vmax.f32 %v1028_v32, %v1029_v34  ;;  %v1038_v25 = vrot.slane %v1037_v38, 4  ;;  %v6837_v35 = vunpack.c.l.bf16 %v6836_v46 }
  0xf5   :  { %v1046_v27 = vmax.f32 %v1044_v11, %v1045_v51  ;;  %v1053_v33 = vsel %vm520_vm0, %v6835_v43, -inf  ;;  %v4434_v9 = vmax.f32 %v1005_v45, %v1006_v37  ;;  %v1015_v44 = vrot.slane %v1014_v22, 1  ;;  %v6842_v43 = vld [vmem:[#allocation48_spill] sm:$0xff] }
  0xf6   :  { %v1054_v57 = vsel %vm522_vm1, %v6837_v35, -inf  ;;  %v1023_v62 = vmax.f32 %v1021_v29, %v1022_v36  ;;  %v1031_v50 = vrot.slane %v1030_v59, 2  ;;  %v1039_v53 = vmax.f32 %v1037_v38, %v1038_v25 }
  0xf7   :  { %6838 = vst [vmem:[#allocation18_spill] sm:$0xff] %v4434_v9  ;;  %v1047_v6 = vrot.slane %v1046_v27, 4  ;;  %v1055_v41 = vmax.f32 %v1053_v33, %v1054_v57  ;;  %v6840_v32 = vunpack.c.l.bf16 %v6839_v3  ;;  %v4439_v11 = vmax.f32 %v1014_v22, %v1015_v44  ;;  %v6846_v57 = vld [vmem:[#allocation49_spill] sm:$0xff] }
  0xf8   :  { %v1024_v61 = vrot.slane %v1023_v62, 1  ;;  %v1032_v51 = vmax.f32 %v1030_v59, %v1031_v50  ;;  %v6843_v46 = vunpack.c.l.bf16 %v6842_v43  ;;  %v1040_v45 = vrot.slane %v1039_v53, 2 }
  0xf9   :  { %v1062_v34 = vsel %vm520_vm0, %v6840_v32, -inf  ;;  %6841 = vst [vmem:[#allocation19_spill] sm:$0xff] %v4439_v11  ;;  %v1048_v37 = vmax.f32 %v1046_v27, %v1047_v6  ;;  %v1056_v9 = vrot.slane %v1055_v41, 4  ;;  %v6845_v25 = vunpack.c.h.bf16 %v6839_v3  ;;  %v6849_v27 = vld [vmem:[#allocation50_spill] sm:$0xff] }
  0xfa   :  { %v1063_v35 = vsel %vm522_vm1, %v6843_v46, -inf  ;;  %v4444_v36 = vmax.f32 %v1023_v62, %v1024_v61  ;;  %v1033_v38 = vrot.slane %v1032_v51, 1  ;;  %v6847_v22 = vunpack.c.l.bf16 %v6846_v57  ;;  %v6851_v61 = vld [vmem:[#allocation51_spill] sm:$0xff] }
  0xfb   :  { %v1064_v29 = vmax.f32 %v1062_v34, %v1063_v35  ;;  %v1071_v33 = vsel %vm520_vm0, %v6845_v25, -inf  ;;  %v1041_v59 = vmax.f32 %v1039_v53, %v1040_v45  ;;  %v1049_v50 = vrot.slane %v1048_v37, 2 }
  0xfc   :  { %6844 = vst [vmem:[#allocation20_spill] sm:$0xff] %v4444_v36  ;;  %v1072_v44 = vsel %vm522_vm1, %v6847_v22, -inf  ;;  %v1057_v32 = vmax.f32 %v1055_v41, %v1056_v9  ;;  %v4452_v46 = vmax.f32 %v1032_v51, %v1033_v38  ;;  %v6850_v34 = vunpack.c.l.bf16 %v6849_v27  ;;  %v6854_v51 = vld [vmem:[#allocation52_spill] sm:$0xff] }
  0xfd   :  { %v1065_v43 = vrot.slane %v1064_v29, 4  ;;  %v1073_v6 = vmax.f32 %v1071_v33, %v1072_v44  ;;  %v6852_v35 = vunpack.c.l.bf16 %v6851_v61  ;;  %v1042_v25 = vrot.slane %v1041_v59, 1 }
  0xfe   :  { %6848 = vst [vmem:[#allocation21_spill] sm:$0xff] %v4452_v46  ;;  %v1080_v62 = vsel %vm520_vm0, %v6850_v34, -inf  ;;  %v1050_v36 = vmax.f32 %v1048_v37, %v1049_v50  ;;  %v1058_v57 = vrot.slane %v1057_v32, 2  ;;  %v6853_v9 = vunpack.c.h.bf16 %v6849_v27  ;;  %v6857_v50 = vld [vmem:[#allocation53_spill] sm:$0xff] }
  0xff   :  { %v1081_v3 = vsel %vm522_vm1, %v6852_v35, -inf  ;;  %v1066_v11 = vmax.f32 %v1064_v29, %v1065_v43  ;;  %v1074_v22 = vrot.slane %v1073_v6, 4  ;;  %v6855_v45 = vunpack.c.l.bf16 %v6854_v51 }
 0x100   :  { %v1082_v53 = vmax.f32 %v1080_v62, %v1081_v3  ;;  %v1089_v41 = vsel %vm520_vm0, %v6853_v9, -inf  ;;  %v4466_v33 = vmax.f32 %v1041_v59, %v1042_v25  ;;  %v1051_v44 = vrot.slane %v1050_v36, 1  ;;  %v6860_v9 = vld [vmem:[#allocation54_spill] sm:$0xff] }
 0x101   :  { %v1090_v38 = vsel %vm522_vm1, %v6855_v45, -inf  ;;  %v1059_v34 = vmax.f32 %v1057_v32, %v1058_v57  ;;  %v1067_v61 = vrot.slane %v1066_v11, 2  ;;  %v1075_v35 = vmax.f32 %v1073_v6, %v1074_v22 }
 0x102   :  { %6856 = vst [vmem:[#allocation22_spill] sm:$0xff] %v4466_v33  ;;  %v1083_v46 = vrot.slane %v1082_v53, 4  ;;  %v1091_v37 = vmax.f32 %v1089_v41, %v1090_v38  ;;  %v6858_v29 = vunpack.c.l.bf16 %v6857_v50  ;;  %v4471_v62 = vmax.f32 %v1050_v36, %v1051_v44  ;;  %v6864_v38 = vld [vmem:[#allocation55_spill] sm:$0xff] }
 0x103   :  { %v1060_v27 = vrot.slane %v1059_v34, 1  ;;  %v1068_v3 = vmax.f32 %v1066_v11, %v1067_v61  ;;  %v6861_v51 = vunpack.c.l.bf16 %v6860_v9  ;;  %v1076_v59 = vrot.slane %v1075_v35, 2 }
 0x104   :  { %v1098_v43 = vsel %vm520_vm0, %v6858_v29, -inf  ;;  %6859 = vst [vmem:[#allocation23_spill] sm:$0xff] %v4471_v62  ;;  %v1084_v25 = vmax.f32 %v1082_v53, %v1083_v46  ;;  %v1092_v33 = vrot.slane %v1091_v37, 4  ;;  %v6863_v22 = vunpack.c.h.bf16 %v6857_v50  ;;  %v6867_v53 = vld [vmem:[#allocation56_spill] sm:$0xff] }
 0x105   :  { %v1099_v45 = vsel %vm522_vm1, %v6861_v51, -inf  ;;  %v4476_v57 = vmax.f32 %v1059_v34, %v1060_v27  ;;  %v1069_v6 = vrot.slane %v1068_v3, 1  ;;  %v6865_v36 = vunpack.c.l.bf16 %v6864_v38  ;;  %v6869_v27 = vld [vmem:[#allocation57_spill] sm:$0xff] }
 0x106   :  { %v1100_v32 = vmax.f32 %v1098_v43, %v1099_v45  ;;  %v1107_v41 = vsel %vm520_vm0, %v6863_v22, -inf  ;;  %v1077_v11 = vmax.f32 %v1075_v35, %v1076_v59  ;;  %v1085_v61 = vrot.slane %v1084_v25, 2 }
 0x107   :  { %6862 = vst [vmem:[#allocation24_spill] sm:$0xff] %v4476_v57  ;;  %v1108_v44 = vsel %vm522_vm1, %v6865_v36, -inf  ;;  %v1093_v29 = vmax.f32 %v1091_v37, %v1092_v33  ;;  %v4484_v51 = vmax.f32 %v1068_v3, %v1069_v6  ;;  %v6868_v43 = vunpack.c.l.bf16 %v6867_v53  ;;  %v6872_v3 = vld [vmem:[#allocation58_spill] sm:$0xff] }
 0x108   :  { %v1101_v9 = vrot.slane %v1100_v32, 4  ;;  %v1109_v46 = vmax.f32 %v1107_v41, %v1108_v44  ;;  %v6870_v45 = vunpack.c.l.bf16 %v6869_v27  ;;  %v1078_v22 = vrot.slane %v1077_v11, 1 }
 0x109   :  { %6866 = vst [vmem:[#allocation25_spill] sm:$0xff] %v4484_v51  ;;  %v1116_v34 = vsel %vm520_vm0, %v6868_v43, -inf  ;;  %v1086_v57 = vmax.f32 %v1084_v25, %v1085_v61  ;;  %v1094_v38 = vrot.slane %v1093_v29, 2  ;;  %v6871_v33 = vunpack.c.h.bf16 %v6867_v53  ;;  %v6875_v61 = vld [vmem:[#allocation59_spill] sm:$0xff] }
 0x10a   :  { %v1117_v50 = vsel %vm522_vm1, %v6870_v45, -inf  ;;  %v1102_v62 = vmax.f32 %v1100_v32, %v1101_v9  ;;  %v1110_v36 = vrot.slane %v1109_v46, 4  ;;  %v6873_v59 = vunpack.c.l.bf16 %v6872_v3 }
 0x10b   :  { %v1118_v35 = vmax.f32 %v1116_v34, %v1117_v50  ;;  %v1125_v37 = vsel %vm520_vm0, %v6871_v33, -inf  ;;  %v4498_v41 = vmax.f32 %v1077_v11, %v1078_v22  ;;  %v1087_v44 = vrot.slane %v1086_v57, 1  ;;  %v6878_v33 = vld [vmem:[#allocation60_spill] sm:$0xff] }
 0x10c   :  { %v1126_v6 = vsel %vm522_vm1, %v6873_v59, -inf  ;;  %v1095_v43 = vmax.f32 %v1093_v29, %v1094_v38  ;;  %v1103_v27 = vrot.slane %v1102_v62, 2  ;;  %v1111_v45 = vmax.f32 %v1109_v46, %v1110_v36 }
 0x10d   :  { %6874 = vst [vmem:[#allocation26_spill] sm:$0xff] %v4498_v41  ;;  %v1119_v51 = vrot.slane %v1118_v35, 4  ;;  %v1127_v25 = vmax.f32 %v1125_v37, %v1126_v6  ;;  %v6876_v32 = vunpack.c.l.bf16 %v6875_v61  ;;  %v4503_v34 = vmax.f32 %v1086_v57, %v1087_v44  ;;  %v6882_v6 = vld [vmem:[#allocation61_spill] sm:$0xff] }
 0x10e   :  { %v1096_v53 = vrot.slane %v1095_v43, 1  ;;  %v1104_v50 = vmax.f32 %v1102_v62, %v1103_v27  ;;  %v6879_v3 = vunpack.c.l.bf16 %v6878_v33  ;;  %v1112_v11 = vrot.slane %v1111_v45, 2 }
 0x10f   :  { %v1134_v9 = vsel %vm520_vm0, %v6876_v32, -inf  ;;  %6877 = vst [vmem:[#allocation27_spill] sm:$0xff] %v4503_v34  ;;  %v1120_v22 = vmax.f32 %v1118_v35, %v1119_v51  ;;  %v1128_v41 = vrot.slane %v1127_v25, 4  ;;  %v6881_v36 = vunpack.c.h.bf16 %v6875_v61  ;;  %v6885_v35 = vld [vmem:[#allocation62_spill] sm:$0xff] }
 0x110   :  { %v1135_v59 = vsel %vm522_vm1, %v6879_v3, -inf  ;;  %v4508_v38 = vmax.f32 %v1095_v43, %v1096_v53  ;;  %v1105_v46 = vrot.slane %v1104_v50, 1  ;;  %v6883_v57 = vunpack.c.l.bf16 %v6882_v6  ;;  %v6887_v53 = vld [vmem:[#allocation63_spill] sm:$0xff] }
 0x111   :  { %v1136_v29 = vmax.f32 %v1134_v9, %v1135_v59  ;;  %v1143_v37 = vsel %vm520_vm0, %v6881_v36, -inf  ;;  %v1113_v62 = vmax.f32 %v1111_v45, %v1112_v11  ;;  %v1121_v27 = vrot.slane %v1120_v22, 2 }
 0x112   :  { %6880 = vst [vmem:[#allocation28_spill] sm:$0xff] %v4508_v38  ;;  %v1144_v44 = vsel %vm522_vm1, %v6883_v57, -inf  ;;  %v1129_v32 = vmax.f32 %v1127_v25, %v1128_v41  ;;  %v4516_v3 = vmax.f32 %v1104_v50, %v1105_v46  ;;  %v6886_v9 = vunpack.c.l.bf16 %v6885_v35  ;;  %v6890_v50 = vld [vmem:[#allocation64_spill] sm:$0xff] }
 0x113   :  { %v1137_v33 = vrot.slane %v1136_v29, 4  ;;  %v1145_v51 = vmax.f32 %v1143_v37, %v1144_v44  ;;  %v6888_v59 = vunpack.c.l.bf16 %v6887_v53  ;;  %v1114_v36 = vrot.slane %v1113_v62, 1 }
 0x114   :  { %6884 = vst [vmem:[#allocation29_spill] sm:$0xff] %v4516_v3  ;;  %v1152_v43 = vsel %vm520_vm0, %v6886_v9, -inf  ;;  %v1122_v38 = vmax.f32 %v1120_v22, %v1121_v27  ;;  %v1130_v6 = vrot.slane %v1129_v32, 2  ;;  %v6889_v41 = vunpack.c.h.bf16 %v6885_v35  ;;  %v6893_v27 = vld [vmem:[#allocation65_spill] sm:$0xff] }
 0x115   :  { %v1153_v61 = vsel %vm522_vm1, %v6888_v59, -inf  ;;  %v1138_v34 = vmax.f32 %v1136_v29, %v1137_v33  ;;  %v1146_v57 = vrot.slane %v1145_v51, 4  ;;  %v6891_v11 = vunpack.c.l.bf16 %v6890_v50 }
 0x116   :  { %v1154_v45 = vmax.f32 %v1152_v43, %v1153_v61  ;;  %v1161_v25 = vsel %vm520_vm0, %v6889_v41, -inf  ;;  %v4530_v37 = vmax.f32 %v1113_v62, %v1114_v36  ;;  %v1123_v44 = vrot.slane %v1122_v38, 1  ;;  %v6896_v41 = vld [vmem:[#allocation66_spill] sm:$0xff] }
 0x117   :  { %v1162_v46 = vsel %vm522_vm1, %v6891_v11, -inf  ;;  %v1131_v9 = vmax.f32 %v1129_v32, %v1130_v6  ;;  %v1139_v53 = vrot.slane %v1138_v34, 2  ;;  %v1147_v59 = vmax.f32 %v1145_v51, %v1146_v57 }
 0x118   :  { %6892 = vst [vmem:[#allocation30_spill] sm:$0xff] %v4530_v37  ;;  %v1155_v3 = vrot.slane %v1154_v45, 4  ;;  %v1163_v22 = vmax.f32 %v1161_v25, %v1162_v46  ;;  %v6894_v29 = vunpack.c.l.bf16 %v6893_v27  ;;  %v4535_v43 = vmax.f32 %v1122_v38, %v1123_v44  ;;  %v6900_v46 = vld [vmem:[#allocation67_spill] sm:$0xff] }
 0x119   :  { %v1132_v35 = vrot.slane %v1131_v9, 1  ;;  %v1140_v61 = vmax.f32 %v1138_v34, %v1139_v53  ;;  %v6897_v50 = vunpack.c.l.bf16 %v6896_v41  ;;  %v1148_v62 = vrot.slane %v1147_v59, 2 }
 0x11a   :  { %v1170_v33 = vsel %vm520_vm0, %v6894_v29, -inf  ;;  %6895 = vst [vmem:[#allocation31_spill] sm:$0xff] %v4535_v43  ;;  %v1156_v36 = vmax.f32 %v1154_v45, %v1155_v3  ;;  %v1164_v37 = vrot.slane %v1163_v22, 4  ;;  %v6899_v57 = vunpack.c.h.bf16 %v6893_v27  ;;  %v6903_v45 = vld [vmem:[#allocation68_spill] sm:$0xff] }
 0x11b   :  { %v1171_v11 = vsel %vm522_vm1, %v6897_v50, -inf  ;;  %v4540_v6 = vmax.f32 %v1131_v9, %v1132_v35  ;;  %v1141_v51 = vrot.slane %v1140_v61, 1  ;;  %v6901_v38 = vunpack.c.l.bf16 %v6900_v46  ;;  %v6905_v35 = vld [vmem:[#allocation69_spill] sm:$0xff] }
 0x11c   :  { %v1172_v32 = vmax.f32 %v1170_v33, %v1171_v11  ;;  %v1179_v25 = vsel %vm520_vm0, %v6899_v57, -inf  ;;  %v1149_v34 = vmax.f32 %v1147_v59, %v1148_v62  ;;  %v1157_v53 = vrot.slane %v1156_v36, 2 }
 0x11d   :  { %6898 = vst [vmem:[#allocation32_spill] sm:$0xff] %v4540_v6  ;;  %v1180_v44 = vsel %vm522_vm1, %v6901_v38, -inf  ;;  %v1165_v29 = vmax.f32 %v1163_v22, %v1164_v37  ;;  %v4548_v50 = vmax.f32 %v1140_v61, %v1141_v51  ;;  %v6904_v33 = vunpack.c.l.bf16 %v6903_v45  ;;  %v6908_v61 = vld [vmem:[#allocation70_spill] sm:$0xff] }
 0x11e   :  { %v1173_v41 = vrot.slane %v1172_v32, 4  ;;  %v1181_v3 = vmax.f32 %v1179_v25, %v1180_v44  ;;  %v6906_v11 = vunpack.c.l.bf16 %v6905_v35  ;;  %v1150_v57 = vrot.slane %v1149_v34, 1 }
 0x11f   :  { %6902 = vst [vmem:[#allocation33_spill] sm:$0xff] %v4548_v50  ;;  %v1188_v9 = vsel %vm520_vm0, %v6904_v33, -inf  ;;  %v1158_v6 = vmax.f32 %v1156_v36, %v1157_v53  ;;  %v1166_v46 = vrot.slane %v1165_v29, 2  ;;  %v6907_v37 = vunpack.c.h.bf16 %v6903_v45  ;;  %v6911_v53 = vld [vmem:[#allocation71_spill] sm:$0xff] }
 0x120   :  { %v1189_v27 = vsel %vm522_vm1, %v6906_v11, -inf  ;;  %v1174_v43 = vmax.f32 %v1172_v32, %v1173_v41  ;;  %v1182_v38 = vrot.slane %v1181_v3, 4  ;;  %v6909_v62 = vunpack.c.l.bf16 %v6908_v61 }
 0x121   :  { %v1190_v59 = vmax.f32 %v1188_v9, %v1189_v27  ;;  %v1197_v22 = vsel %vm520_vm0, %v6907_v37, -inf  ;;  %v4562_v25 = vmax.f32 %v1149_v34, %v1150_v57  ;;  %v1159_v44 = vrot.slane %v1158_v6, 1  ;;  %v6914_v37 = vld [vmem:[#allocation72_spill] sm:$0xff] }
 0x122   :  { %v1198_v51 = vsel %vm522_vm1, %v6909_v62, -inf  ;;  %v1167_v33 = vmax.f32 %v1165_v29, %v1166_v46  ;;  %v1175_v35 = vrot.slane %v1174_v43, 2  ;;  %v1183_v11 = vmax.f32 %v1181_v3, %v1182_v38 }
 0x123   :  { %6910 = vst [vmem:[#allocation34_spill] sm:$0xff] %v4562_v25  ;;  %v1191_v50 = vrot.slane %v1190_v59, 4  ;;  %v1199_v36 = vmax.f32 %v1197_v22, %v1198_v51  ;;  %v6912_v32 = vunpack.c.l.bf16 %v6911_v53  ;;  %v4567_v9 = vmax.f32 %v1158_v6, %v1159_v44  ;;  %v6918_v51 = vld [vmem:[#allocation73_spill] sm:$0xff] }
 0x124   :  { %v1168_v45 = vrot.slane %v1167_v33, 1  ;;  %v1176_v27 = vmax.f32 %v1174_v43, %v1175_v35  ;;  %v6915_v61 = vunpack.c.l.bf16 %v6914_v37  ;;  %v1184_v34 = vrot.slane %v1183_v11, 2 }
 0x125   :  { %v1206_v41 = vsel %vm520_vm0, %v6912_v32, -inf  ;;  %6913 = vst [vmem:[#allocation35_spill] sm:$0xff] %v4567_v9  ;;  %v1192_v57 = vmax.f32 %v1190_v59, %v1191_v50  ;;  %v1200_v25 = vrot.slane %v1199_v36, 4  ;;  %v6917_v38 = vunpack.c.h.bf16 %v6911_v53  ;;  %v6921_v59 = vld [vmem:[#allocation74_spill] sm:$0xff] }
 0x126   :  { %v1207_v62 = vsel %vm522_vm1, %v6915_v61, -inf  ;;  %v4572_v46 = vmax.f32 %v1167_v33, %v1168_v45  ;;  %v1177_v3 = vrot.slane %v1176_v27, 1  ;;  %v6919_v6 = vunpack.c.l.bf16 %v6918_v51  ;;  %v6923_v45 = vld [vmem:[#allocation75_spill] sm:$0xff] }
 0x127   :  { %v1208_v29 = vmax.f32 %v1206_v41, %v1207_v62  ;;  %v1215_v22 = vsel %vm520_vm0, %v6917_v38, -inf  ;;  %v1185_v43 = vmax.f32 %v1183_v11, %v1184_v34  ;;  %v1193_v35 = vrot.slane %v1192_v57, 2 }
 0x128   :  { %6916 = vst [vmem:[#allocation36_spill] sm:$0xff] %v4572_v46  ;;  %v1216_v44 = vsel %vm522_vm1, %v6919_v6, -inf  ;;  %v1201_v32 = vmax.f32 %v1199_v36, %v1200_v25  ;;  %v4580_v61 = vmax.f32 %v1176_v27, %v1177_v3  ;;  %v6922_v41 = vunpack.c.l.bf16 %v6921_v59  ;;  %v6926_v27 = vld [vmem:[#allocation76_spill] sm:$0xff] }
 0x129   :  { %v1209_v37 = vrot.slane %v1208_v29, 4  ;;  %v1217_v50 = vmax.f32 %v1215_v22, %v1216_v44  ;;  %v6924_v62 = vunpack.c.l.bf16 %v6923_v45  ;;  %v1186_v38 = vrot.slane %v1185_v43, 1 }
 0x12a   :  { %6920 = vst [vmem:[#allocation37_spill] sm:$0xff] %v4580_v61  ;;  %v1224_v33 = vsel %vm520_vm0, %v6922_v41, -inf  ;;  %v1194_v46 = vmax.f32 %v1192_v57, %v1193_v35  ;;  %v1202_v51 = vrot.slane %v1201_v32, 2  ;;  %v6925_v25 = vunpack.c.h.bf16 %v6921_v59  ;;  %v6929_v35 = vld [vmem:[#allocation77_spill] sm:$0xff] }
 0x12b   :  { %v1225_v53 = vsel %vm522_vm1, %v6924_v62, -inf  ;;  %v1210_v9 = vmax.f32 %v1208_v29, %v1209_v37  ;;  %v1218_v6 = vrot.slane %v1217_v50, 4  ;;  %v6927_v34 = vunpack.c.l.bf16 %v6926_v27 }
 0x12c   :  { %v1226_v11 = vmax.f32 %v1224_v33, %v1225_v53  ;;  %v1233_v36 = vsel %vm520_vm0, %v6925_v25, -inf  ;;  %v4594_v22 = vmax.f32 %v1185_v43, %v1186_v38  ;;  %v1195_v44 = vrot.slane %v1194_v46, 1  ;;  %v6932_v25 = vld [vmem:[#allocation78_spill] sm:$0xff] }
 0x12d   :  { %v1234_v3 = vsel %vm522_vm1, %v6927_v34, -inf  ;;  %v1203_v41 = vmax.f32 %v1201_v32, %v1202_v51  ;;  %v1211_v45 = vrot.slane %v1210_v9, 2  ;;  %v1219_v62 = vmax.f32 %v1217_v50, %v1218_v6 }
 0x12e   :  { %6928 = vst [vmem:[#allocation38_spill] sm:$0xff] %v4594_v22  ;;  %v1227_v61 = vrot.slane %v1226_v11, 4  ;;  %v1235_v57 = vmax.f32 %v1233_v36, %v1234_v3  ;;  %v6930_v29 = vunpack.c.l.bf16 %v6929_v35  ;;  %v4599_v33 = vmax.f32 %v1194_v46, %v1195_v44  ;;  %v6936_v3 = vld [vmem:[#allocation79_spill] sm:$0xff] }
 0x12f   :  { %v1204_v59 = vrot.slane %v1203_v41, 1  ;;  %v1212_v53 = vmax.f32 %v1210_v9, %v1211_v45  ;;  %v6933_v27 = vunpack.c.l.bf16 %v6932_v25  ;;  %v1220_v43 = vrot.slane %v1219_v62, 2 }
 0x130   :  { %v1242_v37 = vsel %vm520_vm0, %v6930_v29, -inf  ;;  %6931 = vst [vmem:[#allocation39_spill] sm:$0xff] %v4599_v33  ;;  %v1228_v38 = vmax.f32 %v1226_v11, %v1227_v61  ;;  %v1236_v22 = vrot.slane %v1235_v57, 4  ;;  %v6935_v6 = vunpack.c.h.bf16 %v6929_v35  ;;  %v6939_v11 = vld [vmem:[#allocation80_spill] sm:$0xff] }
 0x131   :  { %v1243_v34 = vsel %vm522_vm1, %v6933_v27, -inf  ;;  %v4604_v51 = vmax.f32 %v1203_v41, %v1204_v59  ;;  %v1213_v50 = vrot.slane %v1212_v53, 1  ;;  %v6937_v46 = vunpack.c.l.bf16 %v6936_v3  ;;  %v6941_v59 = vld [vmem:[#allocation81_spill] sm:$0xff] }
 0x132   :  { %v1244_v32 = vmax.f32 %v1242_v37, %v1243_v34  ;;  %v1251_v36 = vsel %vm520_vm0, %v6935_v6, -inf  ;;  %v1221_v9 = vmax.f32 %v1219_v62, %v1220_v43  ;;  %v1229_v45 = vrot.slane %v1228_v38, 2 }
 0x133   :  { %6934 = vst [vmem:[#allocation40_spill] sm:$0xff] %v4604_v51  ;;  %v1252_v44 = vsel %vm522_vm1, %v6937_v46, -inf  ;;  %v1237_v29 = vmax.f32 %v1235_v57, %v1236_v22  ;;  %v4612_v27 = vmax.f32 %v1212_v53, %v1213_v50  ;;  %v6940_v37 = vunpack.c.l.bf16 %v6939_v11  ;;  %v6944_v53 = vld [vmem:[#allocation82_spill] sm:$0xff] }
 0x134   :  { %v1245_v25 = vrot.slane %v1244_v32, 4  ;;  %v1253_v61 = vmax.f32 %v1251_v36, %v1252_v44  ;;  %v6942_v34 = vunpack.c.l.bf16 %v6941_v59  ;;  %v1222_v6 = vrot.slane %v1221_v9, 1 }
 0x135   :  { %6938 = vst [vmem:[#allocation41_spill] sm:$0xff] %v4612_v27  ;;  %v1260_v41 = vsel %vm520_vm0, %v6940_v37, -inf  ;;  %v1230_v51 = vmax.f32 %v1228_v38, %v1229_v45  ;;  %v1238_v3 = vrot.slane %v1237_v29, 2  ;;  %v6943_v22 = vunpack.c.h.bf16 %v6939_v11  ;;  %v6947_v45 = vld [vmem:[#allocation83_spill] sm:$0xff] }
 0x136   :  { %v1261_v35 = vsel %vm522_vm1, %v6942_v34, -inf  ;;  %v1246_v33 = vmax.f32 %v1244_v32, %v1245_v25  ;;  %v1254_v46 = vrot.slane %v1253_v61, 4  ;;  %v6945_v43 = vunpack.c.l.bf16 %v6944_v53 }
 0x137   :  { %v1262_v62 = vmax.f32 %v1260_v41, %v1261_v35  ;;  %v1269_v57 = vsel %vm520_vm0, %v6943_v22, -inf  ;;  %v4626_v36 = vmax.f32 %v1221_v9, %v1222_v6  ;;  %v1231_v44 = vrot.slane %v1230_v51, 1  ;;  %v6950_v22 = vld [vmem:[#allocation84_spill] sm:$0xff] }
 0x138   :  { %v1270_v50 = vsel %vm522_vm1, %v6945_v43, -inf  ;;  %v1239_v37 = vmax.f32 %v1237_v29, %v1238_v3  ;;  %v1247_v59 = vrot.slane %v1246_v33, 2  ;;  %v1255_v34 = vmax.f32 %v1253_v61, %v1254_v46 }
 0x139   :  { %6946 = vst [vmem:[#allocation42_spill] sm:$0xff] %v4626_v36  ;;  %v1263_v27 = vrot.slane %v1262_v62, 4  ;;  %v1271_v38 = vmax.f32 %v1269_v57, %v1270_v50  ;;  %v6948_v32 = vunpack.c.l.bf16 %v6947_v45  ;;  %v4631_v41 = vmax.f32 %v1230_v51, %v1231_v44  ;;  %v6954_v50 = vld [vmem:[#allocation85_spill] sm:$0xff] }
 0x13a   :  { %v1240_v11 = vrot.slane %v1239_v37, 1  ;;  %v1248_v35 = vmax.f32 %v1246_v33, %v1247_v59  ;;  %v6951_v53 = vunpack.c.l.bf16 %v6950_v22  ;;  %v1256_v9 = vrot.slane %v1255_v34, 2 }
 0x13b   :  { %v1278_v25 = vsel %vm520_vm0, %v6948_v32, -inf  ;;  %6949 = vst [vmem:[#allocation43_spill] sm:$0xff] %v4631_v41  ;;  %v1264_v6 = vmax.f32 %v1262_v62, %v1263_v27  ;;  %v1272_v36 = vrot.slane %v1271_v38, 4  ;;  %v6953_v46 = vunpack.c.h.bf16 %v6947_v45  ;;  %v6957_v62 = vld [vmem:[#allocation86_spill] sm:$0xff] }
 0x13c   :  { %v1279_v43 = vsel %vm522_vm1, %v6951_v53, -inf  ;;  %v4636_v3 = vmax.f32 %v1239_v37, %v1240_v11  ;;  %v1249_v61 = vrot.slane %v1248_v35, 1  ;;  %v6955_v51 = vunpack.c.l.bf16 %v6954_v50  ;;  %v6959_v11 = vld [vmem:[#allocation87_spill] sm:$0xff] }
 0x13d   :  { %v1280_v29 = vmax.f32 %v1278_v25, %v1279_v43  ;;  %v1287_v57 = vsel %vm520_vm0, %v6953_v46, -inf  ;;  %v1257_v33 = vmax.f32 %v1255_v34, %v1256_v9  ;;  %v1265_v59 = vrot.slane %v1264_v6, 2 }
 0x13e   :  { %6952 = vst [vmem:[#allocation44_spill] sm:$0xff] %v4636_v3  ;;  %v1288_v44 = vsel %vm522_vm1, %v6955_v51, -inf  ;;  %v1273_v32 = vmax.f32 %v1271_v38, %v1272_v36  ;;  %v4644_v53 = vmax.f32 %v1248_v35, %v1249_v61  ;;  %v6958_v25 = vunpack.c.l.bf16 %v6957_v62  ;;  %v6962_v35 = vld [vmem:[#allocation88_spill] sm:$0xff] }
 0x13f   :  { %v1281_v22 = vrot.slane %v1280_v29, 4  ;;  %v1289_v27 = vmax.f32 %v1287_v57, %v1288_v44  ;;  %v6960_v43 = vunpack.c.l.bf16 %v6959_v11  ;;  %v1258_v46 = vrot.slane %v1257_v33, 1 }
 0x140   :  { %6956 = vst [vmem:[#allocation45_spill] sm:$0xff] %v4644_v53  ;;  %v1296_v37 = vsel %vm520_vm0, %v6958_v25, -inf  ;;  %v1266_v3 = vmax.f32 %v1264_v6, %v1265_v59  ;;  %v1274_v50 = vrot.slane %v1273_v32, 2  ;;  %v6961_v36 = vunpack.c.h.bf16 %v6957_v62  ;;  %v6965_v59 = vld [vmem:[#allocation89_spill] sm:$0xff] }
 0x141   :  { %v1297_v45 = vsel %vm522_vm1, %v6960_v43, -inf  ;;  %v1282_v41 = vmax.f32 %v1280_v29, %v1281_v22  ;;  %v1290_v51 = vrot.slane %v1289_v27, 4  ;;  %v6963_v9 = vunpack.c.l.bf16 %v6962_v35 }
 0x142   :  { %v1298_v34 = vmax.f32 %v1296_v37, %v1297_v45  ;;  %v1305_v38 = vsel %vm520_vm0, %v6961_v36, -inf  ;;  %v4658_v57 = vmax.f32 %v1257_v33, %v1258_v46  ;;  %v1267_v44 = vrot.slane %v1266_v3, 1  ;;  %v6968_v36 = vld [vmem:[#allocation90_spill] sm:$0xff] }
 0x143   :  { %v1306_v61 = vsel %vm522_vm1, %v6963_v9, -inf  ;;  %v1275_v25 = vmax.f32 %v1273_v32, %v1274_v50  ;;  %v1283_v11 = vrot.slane %v1282_v41, 2  ;;  %v1291_v43 = vmax.f32 %v1289_v27, %v1290_v51 }
 0x144   :  { %6964 = vst [vmem:[#allocation46_spill] sm:$0xff] %v4658_v57  ;;  %v1299_v53 = vrot.slane %v1298_v34, 4  ;;  %v1307_v6 = vmax.f32 %v1305_v38, %v1306_v61  ;;  %v6966_v29 = vunpack.c.l.bf16 %v6965_v59  ;;  %v4663_v37 = vmax.f32 %v1266_v3, %v1267_v44  ;;  %v6972_v61 = vld [vmem:[#allocation91_spill] sm:$0xff] }
 0x145   :  { %v1276_v62 = vrot.slane %v1275_v25, 1  ;;  %v1284_v45 = vmax.f32 %v1282_v41, %v1283_v11  ;;  %v6969_v35 = vunpack.c.l.bf16 %v6968_v36  ;;  %v1292_v33 = vrot.slane %v1291_v43, 2 }
 0x146   :  { %v1314_v22 = vsel %vm520_vm0, %v6966_v29, -inf  ;;  %6967 = vst [vmem:[#allocation47_spill] sm:$0xff] %v4663_v37  ;;  %v1300_v46 = vmax.f32 %v1298_v34, %v1299_v53  ;;  %v1308_v57 = vrot.slane %v1307_v6, 4  ;;  %v6971_v51 = vunpack.c.h.bf16 %v6965_v59  ;;  %v6975_v34 = vld [vmem:[#allocation92_spill] sm:$0xff] }
 0x147   :  { %v1315_v9 = vsel %vm522_vm1, %v6969_v35, -inf  ;;  %v4668_v50 = vmax.f32 %v1275_v25, %v1276_v62  ;;  %v1285_v27 = vrot.slane %v1284_v45, 1  ;;  %v6973_v3 = vunpack.c.l.bf16 %v6972_v61  ;;  %v6977_v62 = vld [vmem:[#allocation93_spill] sm:$0xff] }
 0x148   :  { %v1316_v32 = vmax.f32 %v1314_v22, %v1315_v9  ;;  %v1323_v38 = vsel %vm520_vm0, %v6971_v51, -inf  ;;  %v1293_v41 = vmax.f32 %v1291_v43, %v1292_v33  ;;  %v1301_v11 = vrot.slane %v1300_v46, 2 }
 0x149   :  { %6970 = vst [vmem:[#allocation48_spill] sm:$0xff] %v4668_v50  ;;  %v1324_v44 = vsel %vm522_vm1, %v6973_v3, -inf  ;;  %v1309_v29 = vmax.f32 %v1307_v6, %v1308_v57  ;;  %v4676_v35 = vmax.f32 %v1284_v45, %v1285_v27  ;;  %v6976_v22 = vunpack.c.l.bf16 %v6975_v34  ;;  %v6980_v45 = vld [vmem:[#allocation94_spill] sm:$0xff] }
 0x14a   :  { %v1317_v36 = vrot.slane %v1316_v32, 4  ;;  %v1325_v53 = vmax.f32 %v1323_v38, %v1324_v44  ;;  %v6978_v9 = vunpack.c.l.bf16 %v6977_v62  ;;  %v1294_v51 = vrot.slane %v1293_v41, 1 }
 0x14b   :  { %6974 = vst [vmem:[#allocation49_spill] sm:$0xff] %v4676_v35  ;;  %v1332_v25 = vsel %vm520_vm0, %v6976_v22, -inf  ;;  %v1302_v50 = vmax.f32 %v1300_v46, %v1301_v11  ;;  %v1310_v61 = vrot.slane %v1309_v29, 2  ;;  %v6979_v57 = vunpack.c.h.bf16 %v6975_v34  ;;  %v6983_v11 = vld [vmem:[#allocation95_spill] sm:$0xff] }
 0x14c   :  { %v1333_v59 = vsel %vm522_vm1, %v6978_v9, -inf  ;;  %v1318_v37 = vmax.f32 %v1316_v32, %v1317_v36  ;;  %v1326_v3 = vrot.slane %v1325_v53, 4  ;;  %v6981_v33 = vunpack.c.l.bf16 %v6980_v45 }
 0x14d   :  { %v1334_v43 = vmax.f32 %v1332_v25, %v1333_v59  ;;  %v1341_v6 = vsel %vm520_vm0, %v6979_v57, -inf  ;;  %v4690_v38 = vmax.f32 %v1293_v41, %v1294_v51  ;;  %v1303_v44 = vrot.slane %v1302_v50, 1  ;;  %v6986_v57 = vld [vmem:[#allocation96_spill] sm:$0xff] }
 0x14e   :  { %v1342_v27 = vsel %vm522_vm1, %v6981_v33, -inf  ;;  %v1311_v22 = vmax.f32 %v1309_v29, %v1310_v61  ;;  %v1319_v62 = vrot.slane %v1318_v37, 2  ;;  %v1327_v9 = vmax.f32 %v1325_v53, %v1326_v3 }
 0x14f   :  { %6982 = vst [vmem:[#allocation50_spill] sm:$0xff] %v4690_v38  ;;  %v1335_v35 = vrot.slane %v1334_v43, 4  ;;  %v1343_v46 = vmax.f32 %v1341_v6, %v1342_v27  ;;  %v6984_v32 = vunpack.c.l.bf16 %v6983_v11  ;;  %v4695_v25 = vmax.f32 %v1302_v50, %v1303_v44  ;;  %v6990_v27 = vld [vmem:[#allocation97_spill] sm:$0xff] }
 0x150   :  { %v1312_v34 = vrot.slane %v1311_v22, 1  ;;  %v1320_v59 = vmax.f32 %v1318_v37, %v1319_v62  ;;  %v6987_v45 = vunpack.c.l.bf16 %v6986_v57  ;;  %v1328_v41 = vrot.slane %v1327_v9, 2 }
 0x151   :  { %v1350_v36 = vsel %vm520_vm0, %v6984_v32, -inf  ;;  %6985 = vst [vmem:[#allocation51_spill] sm:$0xff] %v4695_v25  ;;  %v1336_v51 = vmax.f32 %v1334_v43, %v1335_v35  ;;  %v1344_v38 = vrot.slane %v1343_v46, 4  ;;  %v6989_v3 = vunpack.c.h.bf16 %v6983_v11  ;;  %v6993_v43 = vld [vmem:[#allocation98_spill] sm:$0xff] }
 0x152   :  { %v1351_v33 = vsel %vm522_vm1, %v6987_v45, -inf  ;;  %v4700_v61 = vmax.f32 %v1311_v22, %v1312_v34  ;;  %v1321_v53 = vrot.slane %v1320_v59, 1  ;;  %v6991_v50 = vunpack.c.l.bf16 %v6990_v27  ;;  %v6995_v34 = vld [vmem:[#allocation99_spill] sm:$0xff] }
 0x153   :  { %v1352_v29 = vmax.f32 %v1350_v36, %v1351_v33  ;;  %v1359_v6 = vsel %vm520_vm0, %v6989_v3, -inf  ;;  %v1329_v37 = vmax.f32 %v1327_v9, %v1328_v41  ;;  %v1337_v62 = vrot.slane %v1336_v51, 2 }
 0x154   :  { %6988 = vst [vmem:[#allocation52_spill] sm:$0xff] %v4700_v61  ;;  %v1360_v44 = vsel %vm522_vm1, %v6991_v50, -inf  ;;  %v1345_v32 = vmax.f32 %v1343_v46, %v1344_v38  ;;  %v4708_v45 = vmax.f32 %v1320_v59, %v1321_v53  ;;  %v6994_v36 = vunpack.c.l.bf16 %v6993_v43  ;;  %v6998_v59 = vld [vmem:[#allocation100_spill] sm:$0xff] }
 0x155   :  { %v1353_v57 = vrot.slane %v1352_v29, 4  ;;  %v1361_v35 = vmax.f32 %v1359_v6, %v1360_v44  ;;  %v6996_v33 = vunpack.c.l.bf16 %v6995_v34  ;;  %v1330_v3 = vrot.slane %v1329_v37, 1 }
 0x156   :  { %6992 = vst [vmem:[#allocation53_spill] sm:$0xff] %v4708_v45  ;;  %v1368_v22 = vsel %vm520_vm0, %v6994_v36, -inf  ;;  %v1338_v61 = vmax.f32 %v1336_v51, %v1337_v62  ;;  %v1346_v27 = vrot.slane %v1345_v32, 2  ;;  %v6997_v38 = vunpack.c.h.bf16 %v6993_v43  ;;  %v7001_v62 = vld [vmem:[#allocation101_spill] sm:$0xff] }
 0x157   :  { %v1369_v11 = vsel %vm522_vm1, %v6996_v33, -inf  ;;  %v1354_v25 = vmax.f32 %v1352_v29, %v1353_v57  ;;  %v1362_v50 = vrot.slane %v1361_v35, 4  ;;  %v6999_v41 = vunpack.c.l.bf16 %v6998_v59 }
 0x158   :  { %v1370_v9 = vmax.f32 %v1368_v22, %v1369_v11  ;;  %v1377_v46 = vsel %vm520_vm0, %v6997_v38, -inf  ;;  %v4722_v6 = vmax.f32 %v1329_v37, %v1330_v3  ;;  %v1339_v44 = vrot.slane %v1338_v61, 1  ;;  %v7004_v38 = vld [vmem:[#allocation102_spill] sm:$0xff] }
 0x159   :  { %v1378_v53 = vsel %vm522_vm1, %v6999_v41, -inf  ;;  %v1347_v36 = vmax.f32 %v1345_v32, %v1346_v27  ;;  %v1355_v34 = vrot.slane %v1354_v25, 2  ;;  %v1363_v33 = vmax.f32 %v1361_v35, %v1362_v50 }
 0x15a   :  { %7000 = vst [vmem:[#allocation54_spill] sm:$0xff] %v4722_v6  ;;  %v1371_v45 = vrot.slane %v1370_v9, 4  ;;  %v1379_v51 = vmax.f32 %v1377_v46, %v1378_v53  ;;  %v7002_v29 = vunpack.c.l.bf16 %v7001_v62  ;;  %v4727_v22 = vmax.f32 %v1338_v61, %v1339_v44  ;;  %v7008_v53 = vld [vmem:[#allocation103_spill] sm:$0xff] }
 0x15b   :  { %v1348_v43 = vrot.slane %v1347_v36, 1  ;;  %v1356_v11 = vmax.f32 %v1354_v25, %v1355_v34  ;;  %v7005_v59 = vunpack.c.l.bf16 %v7004_v38  ;;  %v1364_v37 = vrot.slane %v1363_v33, 2 }
 0x15c   :  { %v1386_v57 = vsel %vm520_vm0, %v7002_v29, -inf  ;;  %7003 = vst [vmem:[#allocation55_spill] sm:$0xff] %v4727_v22  ;;  %v1372_v3 = vmax.f32 %v1370_v9, %v1371_v45  ;;  %v1380_v6 = vrot.slane %v1379_v51, 4  ;;  %v7007_v50 = vunpack.c.h.bf16 %v7001_v62  ;;  %v7011_v9 = vld [vmem:[#allocation104_spill] sm:$0xff] }
 0x15d   :  { %v1387_v41 = vsel %vm522_vm1, %v7005_v59, -inf  ;;  %v4732_v27 = vmax.f32 %v1347_v36, %v1348_v43  ;;  %v1357_v35 = vrot.slane %v1356_v11, 1  ;;  %v7009_v61 = vunpack.c.l.bf16 %v7008_v53  ;;  %v7013_v43 = vld [vmem:[#allocation105_spill] sm:$0xff] }
 0x15e   :  { %v1388_v32 = vmax.f32 %v1386_v57, %v1387_v41  ;;  %v1395_v46 = vsel %vm520_vm0, %v7007_v50, -inf  ;;  %v1365_v25 = vmax.f32 %v1363_v33, %v1364_v37  ;;  %v1373_v34 = vrot.slane %v1372_v3, 2 }
 0x15f   :  { %7006 = vst [vmem:[#allocation56_spill] sm:$0xff] %v4732_v27  ;;  %v1396_v44 = vsel %vm522_vm1, %v7009_v61, -inf  ;;  %v1381_v29 = vmax.f32 %v1379_v51, %v1380_v6  ;;  %v4740_v59 = vmax.f32 %v1356_v11, %v1357_v35  ;;  %v7012_v57 = vunpack.c.l.bf16 %v7011_v9  ;;  %v7016_v11 = vld [vmem:[#allocation106_spill] sm:$0xff] }
 0x160   :  { %v1389_v38 = vrot.slane %v1388_v32, 4  ;;  %v1397_v45 = vmax.f32 %v1395_v46, %v1396_v44  ;;  %v7014_v41 = vunpack.c.l.bf16 %v7013_v43  ;;  %v1366_v50 = vrot.slane %v1365_v25, 1 }
 0x161   :  { %7010 = vst [vmem:[#allocation57_spill] sm:$0xff] %v4740_v59  ;;  %v1404_v36 = vsel %vm520_vm0, %v7012_v57, -inf  ;;  %v1374_v27 = vmax.f32 %v1372_v3, %v1373_v34  ;;  %v1382_v53 = vrot.slane %v1381_v29, 2  ;;  %v7015_v6 = vunpack.c.h.bf16 %v7011_v9  ;;  %v7019_v34 = vld [vmem:[#allocation107_spill] sm:$0xff] }
 0x162   :  { %v1405_v62 = vsel %vm522_vm1, %v7014_v41, -inf  ;;  %v1390_v22 = vmax.f32 %v1388_v32, %v1389_v38  ;;  %v1398_v61 = vrot.slane %v1397_v45, 4  ;;  %v7017_v37 = vunpack.c.l.bf16 %v7016_v11 }
 0x163   :  { %v1406_v33 = vmax.f32 %v1404_v36, %v1405_v62  ;;  %v1413_v51 = vsel %vm520_vm0, %v7015_v6, -inf  ;;  %v4754_v46 = vmax.f32 %v1365_v25, %v1366_v50  ;;  %v1375_v44 = vrot.slane %v1374_v27, 1  ;;  %v7022_v6 = vld [vmem:[#allocation108_spill] sm:$0xff] }
 0x164   :  { %v1414_v35 = vsel %vm522_vm1, %v7017_v37, -inf  ;;  %v1383_v57 = vmax.f32 %v1381_v29, %v1382_v53  ;;  %v1391_v43 = vrot.slane %v1390_v22, 2  ;;  %v1399_v41 = vmax.f32 %v1397_v45, %v1398_v61 }
 0x165   :  { %7018 = vst [vmem:[#allocation58_spill] sm:$0xff] %v4754_v46  ;;  %v1407_v59 = vrot.slane %v1406_v33, 4  ;;  %v1415_v3 = vmax.f32 %v1413_v51, %v1414_v35  ;;  %v7020_v32 = vunpack.c.l.bf16 %v7019_v34  ;;  %v4759_v36 = vmax.f32 %v1374_v27, %v1375_v44  ;;  %v7026_v35 = vld [vmem:[#allocation109_spill] sm:$0xff] }
 0x166   :  { %v1384_v9 = vrot.slane %v1383_v57, 1  ;;  %v1392_v62 = vmax.f32 %v1390_v22, %v1391_v43  ;;  %v7023_v11 = vunpack.c.l.bf16 %v7022_v6  ;;  %v1400_v25 = vrot.slane %v1399_v41, 2 }
 0x167   :  { %v1422_v38 = vsel %vm520_vm0, %v7020_v32, -inf  ;;  %7021 = vst [vmem:[#allocation59_spill] sm:$0xff] %v4759_v36  ;;  %v1408_v50 = vmax.f32 %v1406_v33, %v1407_v59  ;;  %v1416_v46 = vrot.slane %v1415_v3, 4  ;;  %v7025_v61 = vunpack.c.h.bf16 %v7019_v34  ;;  %v7029_v33 = vld [vmem:[#allocation110_spill] sm:$0xff] }
 0x168   :  { %v1423_v37 = vsel %vm522_vm1, %v7023_v11, -inf  ;;  %v4764_v53 = vmax.f32 %v1383_v57, %v1384_v9  ;;  %v1393_v45 = vrot.slane %v1392_v62, 1  ;;  %v7027_v27 = vunpack.c.l.bf16 %v7026_v35  ;;  %v7031_v9 = vld [vmem:[#allocation111_spill] sm:$0xff] }
 0x169   :  { %v1424_v29 = vmax.f32 %v1422_v38, %v1423_v37  ;;  %v1431_v51 = vsel %vm520_vm0, %v7025_v61, -inf  ;;  %v1401_v22 = vmax.f32 %v1399_v41, %v1400_v25  ;;  %v1409_v43 = vrot.slane %v1408_v50, 2 }
 0x16a   :  { %7024 = vst [vmem:[#allocation60_spill] sm:$0xff] %v4764_v53  ;;  %v1432_v44 = vsel %vm522_vm1, %v7027_v27, -inf  ;;  %v1417_v32 = vmax.f32 %v1415_v3, %v1416_v46  ;;  %v4772_v11 = vmax.f32 %v1392_v62, %v1393_v45  ;;  %v7030_v38 = vunpack.c.l.bf16 %v7029_v33  ;;  %v7034_v62 = vld [vmem:[#allocation112_spill] sm:$0xff] }
 0x16b   :  { %v1425_v6 = vrot.slane %v1424_v29, 4  ;;  %v1433_v59 = vmax.f32 %v1431_v51, %v1432_v44  ;;  %v7032_v37 = vunpack.c.l.bf16 %v7031_v9  ;;  %v1402_v61 = vrot.slane %v1401_v22, 1 }
 0x16c   :  { %7028 = vst [vmem:[#allocation61_spill] sm:$0xff] %v4772_v11  ;;  %v1440_v57 = vsel %vm520_vm0, %v7030_v38, -inf  ;;  %v1410_v53 = vmax.f32 %v1408_v50, %v1409_v43  ;;  %v1418_v35 = vrot.slane %v1417_v32, 2  ;;  %v7033_v46 = vunpack.c.h.bf16 %v7029_v33  ;;  %v7037_v43 = vld [vmem:[#allocation113_spill] sm:$0xff] }
 0x16d   :  { %v1441_v34 = vsel %vm522_vm1, %v7032_v37, -inf  ;;  %v1426_v36 = vmax.f32 %v1424_v29, %v1425_v6  ;;  %v1434_v27 = vrot.slane %v1433_v59, 4  ;;  %v7035_v25 = vunpack.c.l.bf16 %v7034_v62 }
 0x16e   :  { %v1442_v41 = vmax.f32 %v1440_v57, %v1441_v34  ;;  %v1449_v3 = vsel %vm520_vm0, %v7033_v46, -inf  ;;  %v4786_v51 = vmax.f32 %v1401_v22, %v1402_v61  ;;  %v1411_v44 = vrot.slane %v1410_v53, 1  ;;  %v7040_v46 = vld [vmem:[#allocation114_spill] sm:$0xff] }
 0x16f   :  { %v1450_v45 = vsel %vm522_vm1, %v7035_v25, -inf  ;;  %v1419_v38 = vmax.f32 %v1417_v32, %v1418_v35  ;;  %v1427_v9 = vrot.slane %v1426_v36, 2  ;;  %v1435_v37 = vmax.f32 %v1433_v59, %v1434_v27 }
 0x170   :  { %7036 = vst [vmem:[#allocation62_spill] sm:$0xff] %v4786_v51  ;;  %v1443_v11 = vrot.slane %v1442_v41, 4  ;;  %v1451_v50 = vmax.f32 %v1449_v3, %v1450_v45  ;;  %v7038_v29 = vunpack.c.l.bf16 %v7037_v43  ;;  %v4791_v57 = vmax.f32 %v1410_v53, %v1411_v44  ;;  %v7044_v45 = vld [vmem:[#allocation115_spill] sm:$0xff] }
 0x171   :  { %v1420_v33 = vrot.slane %v1419_v38, 1  ;;  %v1428_v34 = vmax.f32 %v1426_v36, %v1427_v9  ;;  %v7041_v62 = vunpack.c.l.bf16 %v7040_v46  ;;  %v1436_v22 = vrot.slane %v1435_v37, 2 }
 0x172   :  { %v1458_v6 = vsel %vm520_vm0, %v7038_v29, -inf  ;;  %7039 = vst [vmem:[#allocation63_spill] sm:$0xff] %v4791_v57  ;;  %v1444_v61 = vmax.f32 %v1442_v41, %v1443_v11  ;;  %v1452_v51 = vrot.slane %v1451_v50, 4  ;;  %v7043_v27 = vunpack.c.h.bf16 %v7037_v43  ;;  %v7047_v41 = vld [vmem:[#allocation116_spill] sm:$0xff] }
 0x173   :  { %v1459_v25 = vsel %vm522_vm1, %v7041_v62, -inf  ;;  %v4796_v35 = vmax.f32 %v1419_v38, %v1420_v33  ;;  %v1429_v59 = vrot.slane %v1428_v34, 1  ;;  %v7045_v53 = vunpack.c.l.bf16 %v7044_v45  ;;  %v7049_v33 = vld [vmem:[#allocation117_spill] sm:$0xff] }
 0x174   :  { %v1460_v32 = vmax.f32 %v1458_v6, %v1459_v25  ;;  %v1467_v3 = vsel %vm520_vm0, %v7043_v27, -inf  ;;  %v1437_v36 = vmax.f32 %v1435_v37, %v1436_v22  ;;  %v1445_v9 = vrot.slane %v1444_v61, 2 }
 0x175   :  { %7042 = vst [vmem:[#allocation64_spill] sm:$0xff] %v4796_v35  ;;  %v1468_v44 = vsel %vm522_vm1, %v7045_v53, -inf  ;;  %v1453_v29 = vmax.f32 %v1451_v50, %v1452_v51  ;;  %v4804_v62 = vmax.f32 %v1428_v34, %v1429_v59  ;;  %v7048_v6 = vunpack.c.l.bf16 %v7047_v41  ;;  %v7052_v34 = vld [vmem:[#allocation118_spill] sm:$0xff] }
 0x176   :  { %v1461_v46 = vrot.slane %v1460_v32, 4  ;;  %v1469_v11 = vmax.f32 %v1467_v3, %v1468_v44  ;;  %v7050_v25 = vunpack.c.l.bf16 %v7049_v33  ;;  %v1438_v27 = vrot.slane %v1437_v36, 1 }
 0x177   :  { %7046 = vst [vmem:[#allocation65_spill] sm:$0xff] %v4804_v62  ;;  %v1476_v38 = vsel %vm520_vm0, %v7048_v6, -inf  ;;  %v1446_v35 = vmax.f32 %v1444_v61, %v1445_v9  ;;  %v1454_v45 = vrot.slane %v1453_v29, 2  ;;  %v7051_v51 = vunpack.c.h.bf16 %v7047_v41  ;;  %v7055_v9 = vld [vmem:[#allocation119_spill] sm:$0xff] }
 0x178   :  { %v1477_v43 = vsel %vm522_vm1, %v7050_v25, -inf  ;;  %v1462_v57 = vmax.f32 %v1460_v32, %v1461_v46  ;;  %v1470_v53 = vrot.slane %v1469_v11, 4  ;;  %v7053_v22 = vunpack.c.l.bf16 %v7052_v34 }
 0x179   :  { %v1478_v37 = vmax.f32 %v1476_v38, %v1477_v43  ;;  %v1485_v50 = vsel %vm520_vm0, %v7051_v51, -inf  ;;  %v4818_v3 = vmax.f32 %v1437_v36, %v1438_v27  ;;  %v1447_v44 = vrot.slane %v1446_v35, 1  ;;  %v7058_v51 = vld [vmem:[#allocation120_spill] sm:$0xff] }
 0x17a   :  { %v1486_v59 = vsel %vm522_vm1, %v7053_v22, -inf  ;;  %v1455_v6 = vmax.f32 %v1453_v29, %v1454_v45  ;;  %v1463_v33 = vrot.slane %v1462_v57, 2  ;;  %v1471_v25 = vmax.f32 %v1469_v11, %v1470_v53 }
 0x17b   :  { %7054 = vst [vmem:[#allocation66_spill] sm:$0xff] %v4818_v3  ;;  %v1479_v62 = vrot.slane %v1478_v37, 4  ;;  %v1487_v61 = vmax.f32 %v1485_v50, %v1486_v59  ;;  %v7056_v32 = vunpack.c.l.bf16 %v7055_v9  ;;  %v4823_v38 = vmax.f32 %v1446_v35, %v1447_v44  ;;  %v7062_v59 = vld [vmem:[#allocation121_spill] sm:$0xff] }
 0x17c   :  { %v1456_v41 = vrot.slane %v1455_v6, 1  ;;  %v1464_v43 = vmax.f32 %v1462_v57, %v1463_v33  ;;  %v7059_v34 = vunpack.c.l.bf16 %v7058_v51  ;;  %v1472_v36 = vrot.slane %v1471_v25, 2 }
 0x17d   :  { %v1494_v46 = vsel %vm520_vm0, %v7056_v32, -inf  ;;  %7057 = vst [vmem:[#allocation67_spill] sm:$0xff] %v4823_v38  ;;  %v1480_v27 = vmax.f32 %v1478_v37, %v1479_v62  ;;  %v1488_v3 = vrot.slane %v1487_v61, 4  ;;  %v7061_v53 = vunpack.c.h.bf16 %v7055_v9  ;;  %v7065_v37 = vld [vmem:[#allocation122_spill] sm:$0xff] }
 0x17e   :  { %v1495_v22 = vsel %vm522_vm1, %v7059_v34, -inf  ;;  %v4828_v45 = vmax.f32 %v1455_v6, %v1456_v41  ;;  %v1465_v11 = vrot.slane %v1464_v43, 1  ;;  %v7063_v35 = vunpack.c.l.bf16 %v7062_v59  ;;  %v7067_v41 = vld [vmem:[#allocation123_spill] sm:$0xff] }
 0x17f   :  { %v1496_v29 = vmax.f32 %v1494_v46, %v1495_v22  ;;  %v1503_v50 = vsel %vm520_vm0, %v7061_v53, -inf  ;;  %v1473_v57 = vmax.f32 %v1471_v25, %v1472_v36  ;;  %v1481_v33 = vrot.slane %v1480_v27, 2 }
 0x180   :  { %7060 = vst [vmem:[#allocation68_spill] sm:$0xff] %v4828_v45  ;;  %v1504_v44 = vsel %vm522_vm1, %v7063_v35, -inf  ;;  %v1489_v32 = vmax.f32 %v1487_v61, %v1488_v3  ;;  %v4836_v34 = vmax.f32 %v1464_v43, %v1465_v11  ;;  %v7066_v46 = vunpack.c.l.bf16 %v7065_v37  ;;  %v7070_v43 = vld [vmem:[#allocation124_spill] sm:$0xff] }
 0x181   :  { %v1497_v51 = vrot.slane %v1496_v29, 4  ;;  %v1505_v62 = vmax.f32 %v1503_v50, %v1504_v44  ;;  %v7068_v22 = vunpack.c.l.bf16 %v7067_v41  ;;  %v1474_v53 = vrot.slane %v1473_v57, 1 }
 0x182   :  { %7064 = vst [vmem:[#allocation69_spill] sm:$0xff] %v4836_v34  ;;  %v1512_v6 = vsel %vm520_vm0, %v7066_v46, -inf  ;;  %v1482_v45 = vmax.f32 %v1480_v27, %v1481_v33  ;;  %v1490_v59 = vrot.slane %v1489_v32, 2  ;;  %v7069_v3 = vunpack.c.h.bf16 %v7065_v37  ;;  %v7073_v33 = vld [vmem:[#allocation125_spill] sm:$0xff] }
 0x183   :  { %v1513_v9 = vsel %vm522_vm1, %v7068_v22, -inf  ;;  %v1498_v38 = vmax.f32 %v1496_v29, %v1497_v51  ;;  %v1506_v35 = vrot.slane %v1505_v62, 4  ;;  %v7071_v36 = vunpack.c.l.bf16 %v7070_v43 }
 0x184   :  { %v1514_v25 = vmax.f32 %v1512_v6, %v1513_v9  ;;  %v1521_v61 = vsel %vm520_vm0, %v7069_v3, -inf  ;;  %v4850_v50 = vmax.f32 %v1473_v57, %v1474_v53  ;;  %v1483_v44 = vrot.slane %v1482_v45, 1  ;;  %v7076_v3 = vld [vmem:[#allocation126_spill] sm:$0xff] }
 0x185   :  { %v1522_v11 = vsel %vm522_vm1, %v7071_v36, -inf  ;;  %v1491_v46 = vmax.f32 %v1489_v32, %v1490_v59  ;;  %v1499_v41 = vrot.slane %v1498_v38, 2  ;;  %v1507_v22 = vmax.f32 %v1505_v62, %v1506_v35 }
 0x186   :  { %7072 = vst [vmem:[#allocation70_spill] sm:$0xff] %v4850_v50  ;;  %v1515_v34 = vrot.slane %v1514_v25, 4  ;;  %v1523_v27 = vmax.f32 %v1521_v61, %v1522_v11  ;;  %v7074_v29 = vunpack.c.l.bf16 %v7073_v33  ;;  %v4855_v6 = vmax.f32 %v1482_v45, %v1483_v44  ;;  %v7080_v11 = vld [vmem:[#allocation127_spill] sm:$0xff] }
 0x187   :  { %v1492_v37 = vrot.slane %v1491_v46, 1  ;;  %v1500_v9 = vmax.f32 %v1498_v38, %v1499_v41  ;;  %v7077_v43 = vunpack.c.l.bf16 %v7076_v3  ;;  %v1508_v57 = vrot.slane %v1507_v22, 2 }
 0x188   :  { %v1530_v51 = vsel %vm520_vm0, %v7074_v29, -inf  ;;  %7075 = vst [vmem:[#allocation71_spill] sm:$0xff] %v4855_v6  ;;  %v1516_v53 = vmax.f32 %v1514_v25, %v1515_v34  ;;  %v1524_v50 = vrot.slane %v1523_v27, 4  ;;  %v7079_v35 = vunpack.c.h.bf16 %v7073_v33  ;;  %v7083_v25 = vld [vmem:[#allocation128_spill] sm:$0xff] }
 0x189   :  { %v1531_v36 = vsel %vm522_vm1, %v7077_v43, -inf  ;;  %v4860_v59 = vmax.f32 %v1491_v46, %v1492_v37  ;;  %v1501_v62 = vrot.slane %v1500_v9, 1  ;;  %v7081_v45 = vunpack.c.l.bf16 %v7080_v11  ;;  %v7085_v37 = vld [vmem:[#allocation129_spill] sm:$0xff] }
 0x18a   :  { %v1532_v32 = vmax.f32 %v1530_v51, %v1531_v36  ;;  %v1539_v61 = vsel %vm520_vm0, %v7079_v35, -inf  ;;  %v1509_v38 = vmax.f32 %v1507_v22, %v1508_v57  ;;  %v1517_v41 = vrot.slane %v1516_v53, 2 }
 0x18b   :  { %7078 = vst [vmem:[#allocation72_spill] sm:$0xff] %v4860_v59  ;;  %v1540_v44 = vsel %vm522_vm1, %v7081_v45, -inf  ;;  %v1525_v29 = vmax.f32 %v1523_v27, %v1524_v50  ;;  %v4868_v43 = vmax.f32 %v1500_v9, %v1501_v62  ;;  %v7084_v51 = vunpack.c.l.bf16 %v7083_v25  ;;  %v7088_v9 = vld [vmem:[#allocation130_spill] sm:$0xff] }
 0x18c   :  { %v1533_v3 = vrot.slane %v1532_v32, 4  ;;  %v1541_v34 = vmax.f32 %v1539_v61, %v1540_v44  ;;  %v7086_v36 = vunpack.c.l.bf16 %v7085_v37  ;;  %v1510_v35 = vrot.slane %v1509_v38, 1 }
 0x18d   :  { %7082 = vst [vmem:[#allocation73_spill] sm:$0xff] %v4868_v43  ;;  %v1548_v46 = vsel %vm520_vm0, %v7084_v51, -inf  ;;  %v1518_v59 = vmax.f32 %v1516_v53, %v1517_v41  ;;  %v1526_v11 = vrot.slane %v1525_v29, 2  ;;  %v7087_v50 = vunpack.c.h.bf16 %v7083_v25  ;;  %v7091_v41 = vld [vmem:[#allocation131_spill] sm:$0xff] }
 0x18e   :  { %v1549_v33 = vsel %vm522_vm1, %v7086_v36, -inf  ;;  %v1534_v6 = vmax.f32 %v1532_v32, %v1533_v3  ;;  %v1542_v45 = vrot.slane %v1541_v34, 4  ;;  %v7089_v57 = vunpack.c.l.bf16 %v7088_v9 }
 0x18f   :  { %v1550_v22 = vmax.f32 %v1548_v46, %v1549_v33  ;;  %v1557_v27 = vsel %vm520_vm0, %v7087_v50, -inf  ;;  %v4882_v61 = vmax.f32 %v1509_v38, %v1510_v35  ;;  %v1519_v44 = vrot.slane %v1518_v59, 1  ;;  %v7094_v50 = vld [vmem:[#allocation132_spill] sm:$0xff] }
 0x190   :  { %v1558_v62 = vsel %vm522_vm1, %v7089_v57, -inf  ;;  %v1527_v51 = vmax.f32 %v1525_v29, %v1526_v11  ;;  %v1535_v37 = vrot.slane %v1534_v6, 2  ;;  %v1543_v36 = vmax.f32 %v1541_v34, %v1542_v45 }
 0x191   :  { %7090 = vst [vmem:[#allocation74_spill] sm:$0xff] %v4882_v61  ;;  %v1551_v43 = vrot.slane %v1550_v22, 4  ;;  %v1559_v53 = vmax.f32 %v1557_v27, %v1558_v62  ;;  %v7092_v32 = vunpack.c.l.bf16 %v7091_v41  ;;  %v4887_v46 = vmax.f32 %v1518_v59, %v1519_v44  ;;  %v7098_v62 = vld [vmem:[#allocation133_spill] sm:$0xff] }
 0x192   :  { %v1528_v25 = vrot.slane %v1527_v51, 1  ;;  %v1536_v33 = vmax.f32 %v1534_v6, %v1535_v37  ;;  %v7095_v9 = vunpack.c.l.bf16 %v7094_v50  ;;  %v1544_v38 = vrot.slane %v1543_v36, 2 }
 0x193   :  { %v1566_v3 = vsel %vm520_vm0, %v7092_v32, -inf  ;;  %7093 = vst [vmem:[#allocation75_spill] sm:$0xff] %v4887_v46  ;;  %v1552_v35 = vmax.f32 %v1550_v22, %v1551_v43  ;;  %v1560_v61 = vrot.slane %v1559_v53, 4  ;;  %v7097_v45 = vunpack.c.h.bf16 %v7091_v41  ;;  %v7101_v22 = vld [vmem:[#allocation134_spill] sm:$0xff] }
 0x194   :  { %v1567_v57 = vsel %vm522_vm1, %v7095_v9, -inf  ;;  %v4892_v11 = vmax.f32 %v1527_v51, %v1528_v25  ;;  %v1537_v34 = vrot.slane %v1536_v33, 1  ;;  %v7099_v59 = vunpack.c.l.bf16 %v7098_v62  ;;  %v7103_v25 = vld [vmem:[#allocation135_spill] sm:$0xff] }
 0x195   :  { %v1568_v29 = vmax.f32 %v1566_v3, %v1567_v57  ;;  %v1575_v27 = vsel %vm520_vm0, %v7097_v45, -inf  ;;  %v1545_v6 = vmax.f32 %v1543_v36, %v1544_v38  ;;  %v1553_v37 = vrot.slane %v1552_v35, 2 }
 0x196   :  { %7096 = vst [vmem:[#allocation76_spill] sm:$0xff] %v4892_v11  ;;  %v1576_v44 = vsel %vm522_vm1, %v7099_v59, -inf  ;;  %v1561_v32 = vmax.f32 %v1559_v53, %v1560_v61  ;;  %v4900_v9 = vmax.f32 %v1536_v33, %v1537_v34  ;;  %v7102_v3 = vunpack.c.l.bf16 %v7101_v22  ;;  %v7106_v33 = vld [vmem:[#allocation136_spill] sm:$0xff] }
 0x197   :  { %v1569_v50 = vrot.slane %v1568_v29, 4  ;;  %v1577_v43 = vmax.f32 %v1575_v27, %v1576_v44  ;;  %v7104_v57 = vunpack.c.l.bf16 %v7103_v25  ;;  %v1546_v45 = vrot.slane %v1545_v6, 1 }
 0x198   :  { %7100 = vst [vmem:[#allocation77_spill] sm:$0xff] %v4900_v9  ;;  %v1584_v51 = vsel %vm520_vm0, %v7102_v3, -inf  ;;  %v1554_v11 = vmax.f32 %v1552_v35, %v1553_v37  ;;  %v1562_v62 = vrot.slane %v1561_v32, 2  ;;  %v7105_v61 = vunpack.c.h.bf16 %v7101_v22  ;;  %v7109_v37 = vld [vmem:[#allocation137_spill] sm:$0xff] }
 0x199   :  { %v1585_v41 = vsel %vm522_vm1, %v7104_v57, -inf  ;;  %v1570_v46 = vmax.f32 %v1568_v29, %v1569_v50  ;;  %v1578_v59 = vrot.slane %v1577_v43, 4  ;;  %v7107_v38 = vunpack.c.l.bf16 %v7106_v33 }
 0x19a   :  { %v1586_v36 = vmax.f32 %v1584_v51, %v1585_v41  ;;  %v1593_v53 = vsel %vm520_vm0, %v7105_v61, -inf  ;;  %v4914_v27 = vmax.f32 %v1545_v6, %v1546_v45  ;;  %v1555_v44 = vrot.slane %v1554_v11, 1  ;;  %v7112_v61 = vld [vmem:[#allocation138_spill] sm:$0xff] }
 0x19b   :  { %v1594_v34 = vsel %vm522_vm1, %v7107_v38, -inf  ;;  %v1563_v3 = vmax.f32 %v1561_v32, %v1562_v62  ;;  %v1571_v25 = vrot.slane %v1570_v46, 2  ;;  %v1579_v57 = vmax.f32 %v1577_v43, %v1578_v59 }
 0x19c   :  { %7108 = vst [vmem:[#allocation78_spill] sm:$0xff] %v4914_v27  ;;  %v1587_v9 = vrot.slane %v1586_v36, 4  ;;  %v1595_v35 = vmax.f32 %v1593_v53, %v1594_v34  ;;  %v7110_v29 = vunpack.c.l.bf16 %v7109_v37  ;;  %v4919_v51 = vmax.f32 %v1554_v11, %v1555_v44  ;;  %v7116_v34 = vld [vmem:[#allocation139_spill] sm:$0xff] }
 0x19d   :  { %v1564_v22 = vrot.slane %v1563_v3, 1  ;;  %v1572_v41 = vmax.f32 %v1570_v46, %v1571_v25  ;;  %v7113_v33 = vunpack.c.l.bf16 %v7112_v61  ;;  %v1580_v6 = vrot.slane %v1579_v57, 2 }
 0x19e   :  { %v1602_v50 = vsel %vm520_vm0, %v7110_v29, -inf  ;;  %7111 = vst [vmem:[#allocation79_spill] sm:$0xff] %v4919_v51  ;;  %v1588_v45 = vmax.f32 %v1586_v36, %v1587_v9  ;;  %v1596_v27 = vrot.slane %v1595_v35, 4  ;;  %v7115_v59 = vunpack.c.h.bf16 %v7109_v37  ;;  %v7119_v36 = vld [vmem:[#allocation140_spill] sm:$0xff] }
 0x19f   :  { %v1603_v38 = vsel %vm522_vm1, %v7113_v33, -inf  ;;  %v4924_v62 = vmax.f32 %v1563_v3, %v1564_v22  ;;  %v1573_v43 = vrot.slane %v1572_v41, 1  ;;  %v7117_v11 = vunpack.c.l.bf16 %v7116_v34  ;;  %v7121_v22 = vld [vmem:[#allocation141_spill] sm:$0xff] }
 0x1a0   :  { %v1604_v32 = vmax.f32 %v1602_v50, %v1603_v38  ;;  %v1611_v53 = vsel %vm520_vm0, %v7115_v59, -inf  ;;  %v1581_v46 = vmax.f32 %v1579_v57, %v1580_v6  ;;  %v1589_v25 = vrot.slane %v1588_v45, 2 }
 0x1a1   :  { %7114 = vst [vmem:[#allocation80_spill] sm:$0xff] %v4924_v62  ;;  %v1612_v44 = vsel %vm522_vm1, %v7117_v11, -inf  ;;  %v1597_v29 = vmax.f32 %v1595_v35, %v1596_v27  ;;  %v4932_v33 = vmax.f32 %v1572_v41, %v1573_v43  ;;  %v7120_v50 = vunpack.c.l.bf16 %v7119_v36  ;;  %v7124_v41 = vld [vmem:[#allocation142_spill] sm:$0xff] }
 0x1a2   :  { %v1605_v61 = vrot.slane %v1604_v32, 4  ;;  %v1613_v9 = vmax.f32 %v1611_v53, %v1612_v44  ;;  %v7122_v38 = vunpack.c.l.bf16 %v7121_v22  ;;  %v1582_v59 = vrot.slane %v1581_v46, 1 }
 0x1a3   :  { %7118 = vst [vmem:[#allocation81_spill] sm:$0xff] %v4932_v33  ;;  %v1620_v3 = vsel %vm520_vm0, %v7120_v50, -inf  ;;  %v1590_v62 = vmax.f32 %v1588_v45, %v1589_v25  ;;  %v1598_v34 = vrot.slane %v1597_v29, 2  ;;  %v7123_v27 = vunpack.c.h.bf16 %v7119_v36  ;;  %v7127_v25 = vld [vmem:[#allocation143_spill] sm:$0xff] }
 0x1a4   :  { %v1621_v37 = vsel %vm522_vm1, %v7122_v38, -inf  ;;  %v1606_v51 = vmax.f32 %v1604_v32, %v1605_v61  ;;  %v1614_v11 = vrot.slane %v1613_v9, 4  ;;  %v7125_v6 = vunpack.c.l.bf16 %v7124_v41 }
 0x1a5   :  { %v1622_v57 = vmax.f32 %v1620_v3, %v1621_v37  ;;  %v1629_v35 = vsel %vm520_vm0, %v7123_v27, -inf  ;;  %v4946_v53 = vmax.f32 %v1581_v46, %v1582_v59  ;;  %v1591_v44 = vrot.slane %v1590_v62, 1  ;;  %v7130_v27 = vld [vmem:[#allocation144_spill] sm:$0xff] }
 0x1a6   :  { %v1630_v43 = vsel %vm522_vm1, %v7125_v6, -inf  ;;  %v1599_v50 = vmax.f32 %v1597_v29, %v1598_v34  ;;  %v1607_v22 = vrot.slane %v1606_v51, 2  ;;  %v1615_v38 = vmax.f32 %v1613_v9, %v1614_v11 }
 0x1a7   :  { %7126 = vst [vmem:[#allocation82_spill] sm:$0xff] %v4946_v53  ;;  %v1623_v33 = vrot.slane %v1622_v57, 4  ;;  %v1631_v45 = vmax.f32 %v1629_v35, %v1630_v43  ;;  %v7128_v32 = vunpack.c.l.bf16 %v7127_v25  ;;  %v4951_v3 = vmax.f32 %v1590_v62, %v1591_v44  ;;  %v7134_v43 = vld [vmem:[#allocation145_spill] sm:$0xff] }
 0x1a8   :  { %v1600_v36 = vrot.slane %v1599_v50, 1  ;;  %v1608_v37 = vmax.f32 %v1606_v51, %v1607_v22  ;;  %v7131_v41 = vunpack.c.l.bf16 %v7130_v27  ;;  %v1616_v46 = vrot.slane %v1615_v38, 2 }
 0x1a9   :  { %v1638_v61 = vsel %vm520_vm0, %v7128_v32, -inf  ;;  %7129 = vst [vmem:[#allocation83_spill] sm:$0xff] %v4951_v3  ;;  %v1624_v59 = vmax.f32 %v1622_v57, %v1623_v33  ;;  %v1632_v53 = vrot.slane %v1631_v45, 4  ;;  %v7133_v11 = vunpack.c.h.bf16 %v7127_v25  ;;  %v7137_v57 = vld [vmem:[#allocation146_spill] sm:$0xff] }
 0x1aa   :  { %v1639_v6 = vsel %vm522_vm1, %v7131_v41, -inf  ;;  %v4956_v34 = vmax.f32 %v1599_v50, %v1600_v36  ;;  %v1609_v9 = vrot.slane %v1608_v37, 1  ;;  %v7135_v62 = vunpack.c.l.bf16 %v7134_v43  ;;  %v7139_v36 = vld [vmem:[#allocation147_spill] sm:$0xff] }
 0x1ab   :  { %v1640_v29 = vmax.f32 %v1638_v61, %v1639_v6  ;;  %v1647_v35 = vsel %vm520_vm0, %v7133_v11, -inf  ;;  %v1617_v51 = vmax.f32 %v1615_v38, %v1616_v46  ;;  %v1625_v22 = vrot.slane %v1624_v59, 2 }
 0x1ac   :  { %7132 = vst [vmem:[#allocation84_spill] sm:$0xff] %v4956_v34  ;;  %v1648_v44 = vsel %vm522_vm1, %v7135_v62, -inf  ;;  %v1633_v32 = vmax.f32 %v1631_v45, %v1632_v53  ;;  %v4964_v41 = vmax.f32 %v1608_v37, %v1609_v9  ;;  %v7138_v61 = vunpack.c.l.bf16 %v7137_v57  ;;  %v7142_v37 = vld [vmem:[#allocation148_spill] sm:$0xff] }
 0x1ad   :  { %v1641_v27 = vrot.slane %v1640_v29, 4  ;;  %v1649_v33 = vmax.f32 %v1647_v35, %v1648_v44  ;;  %v7140_v6 = vunpack.c.l.bf16 %v7139_v36  ;;  %v1618_v11 = vrot.slane %v1617_v51, 1 }
 0x1ae   :  { %7136 = vst [vmem:[#allocation85_spill] sm:$0xff] %v4964_v41  ;;  %v1656_v50 = vsel %vm520_vm0, %v7138_v61, -inf  ;;  %v1626_v34 = vmax.f32 %v1624_v59, %v1625_v22  ;;  %v1634_v43 = vrot.slane %v1633_v32, 2  ;;  %v7141_v53 = vunpack.c.h.bf16 %v7137_v57 }
 0x1af   :  { %v1657_v25 = vsel %vm522_vm1, %v7140_v6, -inf  ;;  %v1642_v3 = vmax.f32 %v1640_v29, %v1641_v27  ;;  %v1650_v62 = vrot.slane %v1649_v33, 4  ;;  %v7143_v46 = vunpack.c.l.bf16 %v7142_v37  ;;  %v7222_v29 = vld [vmem:[#allocation78_spill] sm:$0xff]  ;;  %v7225_v37 = vld [vmem:[#allocation81_spill] sm:$0xff] }
 0x1b0   :  { %v1658_v38 = vmax.f32 %v1656_v50, %v1657_v25  ;;  %v1665_v45 = vsel %vm520_vm0, %v7141_v53, -inf  ;;  %v4978_v35 = vmax.f32 %v1617_v51, %v1618_v11  ;;  %v1627_v44 = vrot.slane %v1626_v34, 1 }
 0x1b1   :  { %v1666_v9 = vsel %vm522_vm1, %v7143_v46, -inf  ;;  %v1635_v61 = vmax.f32 %v1633_v32, %v1634_v43  ;;  %v1643_v36 = vrot.slane %v1642_v3, 2  ;;  %v1651_v6 = vmax.f32 %v1649_v33, %v1650_v62  ;;  %v7223_v46 = vld [vmem:[#allocation79_spill] sm:$0xff] }
 0x1b2   :  { %7144 = vst [vmem:[#allocation86_spill] sm:$0xff] %v4978_v35  ;;  %v1659_v41 = vrot.slane %v1658_v38, 4  ;;  %v1667_v59 = vmax.f32 %v1665_v45, %v1666_v9  ;;  %v4982_v22 = vmax.f32 %v1626_v34, %v1627_v44  ;;  %v7150_v9 = vld [vmem:[#allocation6_spill] sm:$0xff]  ;;  %v7227_v43 = vld [vmem:[#allocation83_spill] sm:$0xff]  ;;  %vm2318_vm4 = vcmask 1043459  }
 0x1b3   :  { %v1636_v27 = vrot.slane %v1635_v61, 1  ;;  %v1644_v57 = vmax.f32 %v1642_v3, %v1643_v36  ;;  %v1652_v25 = vrot.slane %v1651_v6, 2  ;;  %v7226_v34 = vld [vmem:[#allocation82_spill] sm:$0xff]  ;;  %v7228_v32 = vld [vmem:[#allocation84_spill] sm:$0xff]  ;;  %vm2320_vm5 = vcmask 1044484  }
 0x1b4   :  { %v1660_v53 = vmax.f32 %v1658_v38, %v1659_v41  ;;  %v1668_v51 = vrot.slane %v1667_v59, 4  ;;  %v7224_v38 = vld [vmem:[#allocation80_spill] sm:$0xff]  ;;  %vm2322_vm6 = vcmask 1045509   ;;  %vm2324_vm7 = vcmask 1046534  }
 0x1b5   :  { %v4988_v11 = vmax.f32 %v1635_v61, %v1636_v27  ;;  %v1645_v33 = vrot.slane %v1644_v57, 1  ;;  %v1653_v62 = vmax.f32 %v1651_v6, %v1652_v25  ;;  %v7148_v6 = vld [vmem:[#allocation4_spill] sm:$0xff]  ;;  %v7229_v50 = vld [vmem:[#allocation85_spill] sm:$0xff]  ;;  %v7277_v27 = vld [vmem:[#allocation7_spill] sm:$0xff]  ;;  %vm2326_vm8 = vcmask 1047559  }
 0x1b6   :  { %v1661_v3 = vrot.slane %v1660_v53, 2  ;;  %v1669_v45 = vmax.f32 %v1667_v59, %v1668_v51  ;;  %v7233_v59 = vpack.c.bf16 %v4022_v42, %v4022_v42  ;;  %v7237_v42 = vpack.c.bf16 %v4069_v23, %v4069_v23 }
 0x1b7   :  { %v4996_v41 = vmax.f32 %v1644_v57, %v1645_v33  ;;  %v1654_v44 = vrot.slane %v1653_v62, 1  ;;  %v7147_v57 = vld [vmem:[#allocation3_spill] sm:$0xff]  ;;  %v7241_v23 = vpack.c.bf16 %v4092_v0, %v4092_v0  ;;  %v7245_v0 = vpack.c.bf16 %v4127_v28, %v4127_v28 }
 0x1b8   :  { %v1662_v61 = vmax.f32 %v1660_v53, %v1661_v3  ;;  %v1670_v36 = vrot.slane %v1669_v45, 2  ;;  %v7149_v3 = vld [vmem:[#allocation5_spill] sm:$0xff]  ;;  %v7249_v28 = vpack.c.bf16 %v4159_v55, %v4159_v55  ;;  %v7253_v55 = vpack.c.bf16 %v4191_v12, %v4191_v12 }
 0x1b9   :  { %v5014_v51 = vmax.f32 %v1653_v62, %v1654_v44  ;;  %v7232_v44 = vpack.c.bf16 %v4020_v48, %v4020_v48  ;;  %v7236_v48 = vpack.c.bf16 %v4055_v19, %v4055_v19  ;;  %v7240_v19 = vpack.c.bf16 %v4090_v24, %v4090_v24 }
 0x1ba   :  { %v1663_v33 = vrot.slane %v1662_v61, 1  ;;  %v1671_v53 = vmax.f32 %v1669_v45, %v1670_v36  ;;  %v7146_v45 = vld [vmem:[#allocation2_spill] sm:$0xff]  ;;  %v7244_v24 = vpack.c.bf16 %v4113_v21, %v4113_v21  ;;  %v7248_v21 = vpack.c.bf16 %v4151_v16, %v4151_v16 }
 0x1bb   :  { %v5261_v36 = vunpack.c.l.b16 %v7232_v44  ;;  %v5281_v44 = vunpack.c.l.b16 %v7236_v48  ;;  %v5301_v48 = vunpack.c.l.b16 %v7240_v19  ;;  %v7252_v16 = vpack.c.bf16 %v4183_v30, %v4183_v30 }
 0x1bc   :  { %v5026_v25 = vmax.f32 %v1662_v61, %v1663_v33  ;;  %v1672_v62 = vrot.slane %v1671_v53, 1  ;;  %v7230_v61 = vpack.c.bf16 %v4016_v20, %v4016_v20  ;;  %v7234_v20 = vpack.c.bf16 %v4030_v13, %v4030_v13 }
 0x1bd   :  { %v7238_v13 = vpack.c.bf16 %v4077_v31, %v4077_v31  ;;  %v7242_v31 = vpack.c.bf16 %v4094_v40, %v4094_v40  ;;  %v5321_v19 = vunpack.c.l.b16 %v7244_v24  ;;  %v7246_v40 = vpack.c.bf16 %v4141_v8, %v4141_v8 }
 0x1be   :  { %7145 = vst [vmem:[#allocation87_spill] sm:$0xff] %v5026_v25  ;;  %v5040_v33 = vmax.f32 %v1671_v53, %v1672_v62  ;;  %v5251_v35 = vunpack.c.l.b16 %v7230_v61  ;;  %v7231_v62 = vpack.c.bf16 %v4018_v15, %v4018_v15  ;;  %v5266_v25 = vunpack.c.l.b16 %v7233_v59 }
 0x1bf   :  { %v5271_v61 = vunpack.c.l.b16 %v7234_v20  ;;  %v7235_v15 = vpack.c.bf16 %v4032_v1, %v4032_v1  ;;  %v5286_v59 = vunpack.c.l.b16 %v7237_v42  ;;  %v5291_v20 = vunpack.c.l.b16 %v7238_v13 }
 0x1c0   :  { %v5256_v53 = vunpack.c.l.b16 %v7231_v62  ;;  %v7239_v1 = vpack.c.bf16 %v4082_v18, %v4082_v18  ;;  %v5306_v42 = vunpack.c.l.b16 %v7241_v23  ;;  %v5311_v13 = vunpack.c.l.b16 %v7242_v31 }
 0x1c1   :  { %v5276_v62 = vunpack.c.l.b16 %v7235_v15  ;;  %v7243_v18 = vpack.c.bf16 %v4108_v52, %v4108_v52  ;;  %v5326_v23 = vunpack.c.l.b16 %v7245_v0  ;;  %v5331_v31 = vunpack.c.l.b16 %v7246_v40 }
 0x1c2   :  { %v5296_v15 = vunpack.c.l.b16 %v7239_v1  ;;  %v7247_v52 = vpack.c.bf16 %v4146_v47, %v4146_v47  ;;  %v5341_v24 = vunpack.c.l.b16 %v7248_v21  ;;  %v5346_v0 = vunpack.c.l.b16 %v7249_v28 }
 0x1c3   :  { %v5316_v1 = vunpack.c.l.b16 %v7243_v18  ;;  %v7250_v8 = vpack.c.bf16 %v4167_v7, %v4167_v7  ;;  %v7251_v47 = vpack.c.bf16 %v4175_v2, %v4175_v2  ;;  %v5361_v21 = vunpack.c.l.b16 %v7252_v16 }
 0x1c4   :  { %v5336_v18 = vunpack.c.l.b16 %v7247_v52  ;;  %v5366_v28 = vunpack.c.l.b16 %v7253_v55  ;;  %v7254_v7 = vpack.c.bf16 %v4205_v58, %v4205_v58  ;;  %v7255_v2 = vpack.c.bf16 %v4210_v26, %v4210_v26 }
 0x1c5   :  { %v5351_v40 = vunpack.c.l.b16 %v7250_v8  ;;  %v5356_v52 = vunpack.c.l.b16 %v7251_v47  ;;  %v7256_v30 = vpack.c.bf16 %v4215_v5, %v4215_v5  ;;  %v7257_v12 = vpack.c.bf16 %v4226_v39, %v4226_v39 }
 0x1c6   :  { %v5371_v8 = vunpack.c.l.b16 %v7254_v7  ;;  %v5376_v47 = vunpack.c.l.b16 %v7255_v2  ;;  %v7258_v58 = vpack.c.bf16 %v4231_v10, %v4231_v10  ;;  %v7259_v26 = vpack.c.bf16 %v4236_v63, %v4236_v63 }
 0x1c7   :  { %v5381_v16 = vunpack.c.l.b16 %v7256_v30  ;;  %v5386_v55 = vunpack.c.l.b16 %v7257_v12  ;;  %v7260_v5 = vpack.c.bf16 %v4244_v54, %v4244_v54  ;;  %v7261_v39 = vpack.c.bf16 %v4252_v60, %v4252_v60 }
 0x1c8   :  { %v5391_v7 = vunpack.c.l.b16 %v7258_v58  ;;  %v5396_v2 = vunpack.c.l.b16 %v7259_v26  ;;  %v7262_v10 = vpack.c.bf16 %v4260_v56, %v4260_v56  ;;  %v7263_v63 = vpack.c.bf16 %v4274_v17, %v4274_v17 }
 0x1c9   :  { %v5401_v30 = vunpack.c.l.b16 %v7260_v5  ;;  %v5406_v12 = vunpack.c.l.b16 %v7261_v39  ;;  %v7264_v54 = vpack.c.bf16 %v4279_v4, %v4279_v4  ;;  %v7265_v60 = vpack.c.bf16 %v4284_v14, %v4284_v14 }
 0x1ca   :  { %v5411_v58 = vunpack.c.l.b16 %v7262_v10  ;;  %v5416_v26 = vunpack.c.l.b16 %v7263_v63  ;;  %v7267_v56 = vpack.c.bf16 %v4298_v49, %v4298_v49  ;;  %v7269_v17 = vpack.c.bf16 %v7146_v45, %v7146_v45 }
 0x1cb   :  { %v5421_v5 = vunpack.c.l.b16 %v7264_v54  ;;  %v5426_v39 = vunpack.c.l.b16 %v7265_v60  ;;  %v7271_v4 = vpack.c.bf16 %v7147_v57, %v7147_v57  ;;  %v7273_v14 = vpack.c.bf16 %v7148_v6, %v7148_v6 }
 0x1cc   :  { %v5431_v10 = vunpack.c.l.b16 %v7267_v56  ;;  %v5436_v63 = vunpack.c.l.b16 %v7269_v17  ;;  %v7275_v49 = vpack.c.bf16 %v7149_v3, %v7149_v3  ;;  %v7276_v45 = vpack.c.bf16 %v7150_v9, %v7150_v9 }
 0x1cd   :  { %7266 = vst [vmem:[#allocation88_spill] sm:$0xff] %v5426_v39  ;;  %v5441_v54 = vunpack.c.l.b16 %v7271_v4  ;;  %v5446_v60 = vunpack.c.l.b16 %v7273_v14  ;;  %v7278_v57 = vpack.c.bf16 %v7277_v27, %v7277_v27  ;;  %v7309_v39 = vld [vmem:[#allocation18_spill] sm:$0xff]  ;;  %vm2465_vm9 = vcmask 519168  }
 0x1ce   :  { %7268 = vst [vmem:[#allocation89_spill] sm:$0xff] %v5431_v10  ;;  %7270 = vst [vmem:[#allocation90_spill] sm:$0xff] %v5436_v63  ;;  %v5451_v56 = vunpack.c.l.b16 %v7275_v49  ;;  %v5456_v17 = vunpack.c.l.b16 %v7276_v45  ;;  %v7286_v63 = vld [vmem:[#allocation10_spill] sm:$0xff]  ;;  %v7289_v10 = vld [vmem:[#allocation11_spill] sm:$0xff] }
 0x1cf   :  { %7272 = vst [vmem:[#allocation91_spill] sm:$0xff] %v5441_v54  ;;  %7274 = vst [vmem:[#allocation92_spill] sm:$0xff] %v5446_v60  ;;  %v5461_v4 = vunpack.c.l.b16 %v7278_v57  ;;  %v7280_v54 = vld [vmem:[#allocation8_spill] sm:$0xff]  ;;  %v7283_v60 = vld [vmem:[#allocation9_spill] sm:$0xff]  ;;  %v7287_v9 = vpack.c.bf16 %v7286_v63, %v7286_v63  ;;  %v7290_v27 = vpack.c.bf16 %v7289_v10, %v7289_v10 }
 0x1d0   :  { %v7281_v6 = vpack.c.bf16 %v7280_v54, %v7280_v54  ;;  %v7284_v3 = vpack.c.bf16 %v7283_v60, %v7283_v60 }
 0x1d1   :  { %7279 = vst [vmem:[#allocation93_spill] sm:$0xff] %v5461_v4  ;;  %v5476_v45 = vunpack.c.l.b16 %v7287_v9  ;;  %v5481_v57 = vunpack.c.l.b16 %v7290_v27  ;;  %v7292_v4 = vld [vmem:[#allocation12_spill] sm:$0xff] }
 0x1d2   :  { %v5466_v14 = vunpack.c.l.b16 %v7281_v6  ;;  %v5471_v49 = vunpack.c.l.b16 %v7284_v3  ;;  %v7293_v54 = vpack.c.bf16 %v7292_v4, %v7292_v4 }
 0x1d3   :  { %7288 = vst [vmem:[#allocation96_spill] sm:$0xff] %v5476_v45  ;;  %7291 = vst [vmem:[#allocation97_spill] sm:$0xff] %v5481_v57  ;;  %v7300_v45 = vld [vmem:[#allocation15_spill] sm:$0xff]  ;;  %v7303_v57 = vld [vmem:[#allocation16_spill] sm:$0xff] }
 0x1d4   :  { %7282 = vst [vmem:[#allocation94_spill] sm:$0xff] %v5466_v14  ;;  %7285 = vst [vmem:[#allocation95_spill] sm:$0xff] %v5471_v49  ;;  %v5486_v6 = vunpack.c.l.b16 %v7293_v54  ;;  %v7295_v14 = vld [vmem:[#allocation13_spill] sm:$0xff]  ;;  %v7297_v49 = vld [vmem:[#allocation14_spill] sm:$0xff]  ;;  %v7301_v10 = vpack.c.bf16 %v7300_v45, %v7300_v45  ;;  %v7304_v4 = vpack.c.bf16 %v7303_v57, %v7303_v57 }
 0x1d5   :  { %v7296_v60 = vpack.c.bf16 %v7295_v14, %v7295_v14  ;;  %v7298_v63 = vpack.c.bf16 %v7297_v49, %v7297_v49  ;;  %v7310_v49 = vpack.c.bf16 %v7309_v39, %v7309_v39 }
 0x1d6   :  { %7294 = vst [vmem:[#allocation98_spill] sm:$0xff] %v5486_v6  ;;  %v5501_v27 = vunpack.c.l.b16 %v7301_v10  ;;  %v5506_v54 = vunpack.c.l.b16 %v7304_v4  ;;  %v7306_v6 = vld [vmem:[#allocation17_spill] sm:$0xff] }
 0x1d7   :  { %v5491_v3 = vunpack.c.l.b16 %v7296_v60  ;;  %v5496_v9 = vunpack.c.l.b16 %v7298_v63  ;;  %v7307_v14 = vpack.c.bf16 %v7306_v6, %v7306_v6  ;;  %v5516_v63 = vunpack.c.l.b16 %v7310_v49 }
 0x1d8   :  { %7302 = vst [vmem:[#allocation100_spill] sm:$0xff] %v5501_v27  ;;  %7305 = vst [vmem:[#allocation101_spill] sm:$0xff] %v5506_v54  ;;  %v7315_v27 = vld [vmem:[#allocation20_spill] sm:$0xff]  ;;  %v7318_v54 = vld [vmem:[#allocation21_spill] sm:$0xff] }
 0x1d9   :  { %7299 = vst [vmem:[#allocation99_spill] sm:$0xff] %v5496_v9  ;;  %v5511_v60 = vunpack.c.l.b16 %v7307_v14  ;;  %7311 = vst [vmem:[#allocation103_spill] sm:$0xff] %v5516_v63  ;;  %v7312_v9 = vld [vmem:[#allocation19_spill] sm:$0xff]  ;;  %v7316_v57 = vpack.c.bf16 %v7315_v27, %v7315_v27  ;;  %v7319_v6 = vpack.c.bf16 %v7318_v54, %v7318_v54 }
 0x1da   :  { %v7313_v45 = vpack.c.bf16 %v7312_v9, %v7312_v9  ;;  %v7324_v63 = vld [vmem:[#allocation23_spill] sm:$0xff] }
 0x1db   :  { %7308 = vst [vmem:[#allocation102_spill] sm:$0xff] %v5511_v60  ;;  %v5526_v4 = vunpack.c.l.b16 %v7316_v57  ;;  %v5531_v14 = vunpack.c.l.b16 %v7319_v6  ;;  %v7321_v60 = vld [vmem:[#allocation22_spill] sm:$0xff]  ;;  %v7325_v9 = vpack.c.bf16 %v7324_v63, %v7324_v63 }
 0x1dc   :  { %v5521_v10 = vunpack.c.l.b16 %v7313_v45  ;;  %v7322_v39 = vpack.c.bf16 %v7321_v60, %v7321_v60 }
 0x1dd   :  { %7317 = vst [vmem:[#allocation105_spill] sm:$0xff] %v5526_v4  ;;  %7320 = vst [vmem:[#allocation106_spill] sm:$0xff] %v5531_v14  ;;  %v5541_v45 = vunpack.c.l.b16 %v7325_v9  ;;  %v7330_v4 = vld [vmem:[#allocation25_spill] sm:$0xff]  ;;  %v7333_v14 = vld [vmem:[#allocation26_spill] sm:$0xff] }
 0x1de   :  { %7314 = vst [vmem:[#allocation104_spill] sm:$0xff] %v5521_v10  ;;  %v5536_v49 = vunpack.c.l.b16 %v7322_v39  ;;  %v7327_v10 = vld [vmem:[#allocation24_spill] sm:$0xff]  ;;  %v7331_v54 = vpack.c.bf16 %v7330_v4, %v7330_v4  ;;  %v7334_v60 = vpack.c.bf16 %v7333_v14, %v7333_v14 }
 0x1df   :  { %7326 = vst [vmem:[#allocation108_spill] sm:$0xff] %v5541_v45  ;;  %v7328_v27 = vpack.c.bf16 %v7327_v10, %v7327_v10  ;;  %v7339_v45 = vld [vmem:[#allocation28_spill] sm:$0xff] }
 0x1e0   :  { %7323 = vst [vmem:[#allocation107_spill] sm:$0xff] %v5536_v49  ;;  %v5551_v6 = vunpack.c.l.b16 %v7331_v54  ;;  %v5556_v39 = vunpack.c.l.b16 %v7334_v60  ;;  %v7336_v49 = vld [vmem:[#allocation27_spill] sm:$0xff]  ;;  %v7340_v10 = vpack.c.bf16 %v7339_v45, %v7339_v45 }
 0x1e1   :  { %v5546_v57 = vunpack.c.l.b16 %v7328_v27  ;;  %v7337_v63 = vpack.c.bf16 %v7336_v49, %v7336_v49 }
 0x1e2   :  { %7332 = vst [vmem:[#allocation110_spill] sm:$0xff] %v5551_v6  ;;  %7335 = vst [vmem:[#allocation111_spill] sm:$0xff] %v5556_v39  ;;  %v5566_v27 = vunpack.c.l.b16 %v7340_v10  ;;  %v7345_v6 = vld [vmem:[#allocation30_spill] sm:$0xff]  ;;  %v7348_v39 = vld [vmem:[#allocation31_spill] sm:$0xff] }
 0x1e3   :  { %7329 = vst [vmem:[#allocation109_spill] sm:$0xff] %v5546_v57  ;;  %v5561_v9 = vunpack.c.l.b16 %v7337_v63  ;;  %v7342_v57 = vld [vmem:[#allocation29_spill] sm:$0xff]  ;;  %v7346_v14 = vpack.c.bf16 %v7345_v6, %v7345_v6  ;;  %v7349_v49 = vpack.c.bf16 %v7348_v39, %v7348_v39 }
 0x1e4   :  { %7341 = vst [vmem:[#allocation113_spill] sm:$0xff] %v5566_v27  ;;  %v7343_v4 = vpack.c.bf16 %v7342_v57, %v7342_v57  ;;  %v7354_v27 = vld [vmem:[#allocation33_spill] sm:$0xff] }
 0x1e5   :  { %7338 = vst [vmem:[#allocation112_spill] sm:$0xff] %v5561_v9  ;;  %v5576_v60 = vunpack.c.l.b16 %v7346_v14  ;;  %v5581_v63 = vunpack.c.l.b16 %v7349_v49  ;;  %v7351_v9 = vld [vmem:[#allocation32_spill] sm:$0xff]  ;;  %v7355_v57 = vpack.c.bf16 %v7354_v27, %v7354_v27 }
 0x1e6   :  { %v5571_v54 = vunpack.c.l.b16 %v7343_v4  ;;  %v7352_v45 = vpack.c.bf16 %v7351_v9, %v7351_v9 }
 0x1e7   :  { %7347 = vst [vmem:[#allocation115_spill] sm:$0xff] %v5576_v60  ;;  %7350 = vst [vmem:[#allocation116_spill] sm:$0xff] %v5581_v63  ;;  %v5591_v4 = vunpack.c.l.b16 %v7355_v57  ;;  %v7360_v60 = vld [vmem:[#allocation35_spill] sm:$0xff]  ;;  %v7363_v63 = vld [vmem:[#allocation36_spill] sm:$0xff] }
 0x1e8   :  { %7344 = vst [vmem:[#allocation114_spill] sm:$0xff] %v5571_v54  ;;  %v5586_v10 = vunpack.c.l.b16 %v7352_v45  ;;  %v7357_v54 = vld [vmem:[#allocation34_spill] sm:$0xff]  ;;  %v7361_v39 = vpack.c.bf16 %v7360_v60, %v7360_v60  ;;  %v7364_v9 = vpack.c.bf16 %v7363_v63, %v7363_v63 }
 0x1e9   :  { %7356 = vst [vmem:[#allocation118_spill] sm:$0xff] %v5591_v4  ;;  %v7358_v6 = vpack.c.bf16 %v7357_v54, %v7357_v54  ;;  %v7369_v4 = vld [vmem:[#allocation38_spill] sm:$0xff] }
 0x1ea   :  { %7353 = vst [vmem:[#allocation117_spill] sm:$0xff] %v5586_v10  ;;  %v5601_v49 = vunpack.c.l.b16 %v7361_v39  ;;  %v5606_v45 = vunpack.c.l.b16 %v7364_v9  ;;  %v7366_v10 = vld [vmem:[#allocation37_spill] sm:$0xff]  ;;  %v7370_v54 = vpack.c.bf16 %v7369_v4, %v7369_v4 }
 0x1eb   :  { %v5596_v14 = vunpack.c.l.b16 %v7358_v6  ;;  %v7367_v27 = vpack.c.bf16 %v7366_v10, %v7366_v10 }
 0x1ec   :  { %7362 = vst [vmem:[#allocation120_spill] sm:$0xff] %v5601_v49  ;;  %7365 = vst [vmem:[#allocation121_spill] sm:$0xff] %v5606_v45  ;;  %v5616_v6 = vunpack.c.l.b16 %v7370_v54  ;;  %v7375_v49 = vld [vmem:[#allocation40_spill] sm:$0xff]  ;;  %v7378_v45 = vld [vmem:[#allocation41_spill] sm:$0xff] }
 0x1ed   :  { %7359 = vst [vmem:[#allocation119_spill] sm:$0xff] %v5596_v14  ;;  %v5611_v57 = vunpack.c.l.b16 %v7367_v27  ;;  %v7372_v14 = vld [vmem:[#allocation39_spill] sm:$0xff]  ;;  %v7376_v63 = vpack.c.bf16 %v7375_v49, %v7375_v49  ;;  %v7379_v10 = vpack.c.bf16 %v7378_v45, %v7378_v45 }
 0x1ee   :  { %7371 = vst [vmem:[#allocation123_spill] sm:$0xff] %v5616_v6  ;;  %v7373_v60 = vpack.c.bf16 %v7372_v14, %v7372_v14  ;;  %v7384_v6 = vld [vmem:[#allocation43_spill] sm:$0xff] }
 0x1ef   :  { %7368 = vst [vmem:[#allocation122_spill] sm:$0xff] %v5611_v57  ;;  %v5626_v9 = vunpack.c.l.b16 %v7376_v63  ;;  %v5631_v27 = vunpack.c.l.b16 %v7379_v10  ;;  %v7381_v57 = vld [vmem:[#allocation42_spill] sm:$0xff]  ;;  %v7385_v14 = vpack.c.bf16 %v7384_v6, %v7384_v6 }
 0x1f0   :  { %v5621_v39 = vunpack.c.l.b16 %v7373_v60  ;;  %v7382_v4 = vpack.c.bf16 %v7381_v57, %v7381_v57 }
 0x1f1   :  { %7377 = vst [vmem:[#allocation125_spill] sm:$0xff] %v5626_v9  ;;  %7380 = vst [vmem:[#allocation126_spill] sm:$0xff] %v5631_v27  ;;  %v5641_v60 = vunpack.c.l.b16 %v7385_v14  ;;  %v7390_v9 = vld [vmem:[#allocation45_spill] sm:$0xff]  ;;  %v7393_v27 = vld [vmem:[#allocation46_spill] sm:$0xff] }
 0x1f2   :  { %7374 = vst [vmem:[#allocation124_spill] sm:$0xff] %v5621_v39  ;;  %v5636_v54 = vunpack.c.l.b16 %v7382_v4  ;;  %v7387_v39 = vld [vmem:[#allocation44_spill] sm:$0xff]  ;;  %v7391_v45 = vpack.c.bf16 %v7390_v9, %v7390_v9  ;;  %v7394_v57 = vpack.c.bf16 %v7393_v27, %v7393_v27 }
 0x1f3   :  { %7386 = vst [vmem:[#allocation128_spill] sm:$0xff] %v5641_v60  ;;  %v7388_v49 = vpack.c.bf16 %v7387_v39, %v7387_v39  ;;  %v7399_v60 = vld [vmem:[#allocation48_spill] sm:$0xff] }
 0x1f4   :  { %7383 = vst [vmem:[#allocation127_spill] sm:$0xff] %v5636_v54  ;;  %v5651_v10 = vunpack.c.l.b16 %v7391_v45  ;;  %v5656_v4 = vunpack.c.l.b16 %v7394_v57  ;;  %v7396_v54 = vld [vmem:[#allocation47_spill] sm:$0xff]  ;;  %v7400_v39 = vpack.c.bf16 %v7399_v60, %v7399_v60 }
 0x1f5   :  { %v5646_v63 = vunpack.c.l.b16 %v7388_v49  ;;  %v7397_v6 = vpack.c.bf16 %v7396_v54, %v7396_v54 }
 0x1f6   :  { %7392 = vst [vmem:[#allocation130_spill] sm:$0xff] %v5651_v10  ;;  %7395 = vst [vmem:[#allocation131_spill] sm:$0xff] %v5656_v4  ;;  %v5666_v49 = vunpack.c.l.b16 %v7400_v39  ;;  %v7405_v10 = vld [vmem:[#allocation50_spill] sm:$0xff]  ;;  %v7408_v4 = vld [vmem:[#allocation51_spill] sm:$0xff] }
 0x1f7   :  { %7389 = vst [vmem:[#allocation129_spill] sm:$0xff] %v5646_v63  ;;  %v5661_v14 = vunpack.c.l.b16 %v7397_v6  ;;  %v7402_v63 = vld [vmem:[#allocation49_spill] sm:$0xff]  ;;  %v7406_v27 = vpack.c.bf16 %v7405_v10, %v7405_v10  ;;  %v7409_v54 = vpack.c.bf16 %v7408_v4, %v7408_v4 }
 0x1f8   :  { %7401 = vst [vmem:[#allocation133_spill] sm:$0xff] %v5666_v49  ;;  %v7403_v9 = vpack.c.bf16 %v7402_v63, %v7402_v63  ;;  %v7414_v49 = vld [vmem:[#allocation53_spill] sm:$0xff] }
 0x1f9   :  { %7398 = vst [vmem:[#allocation132_spill] sm:$0xff] %v5661_v14  ;;  %v5676_v57 = vunpack.c.l.b16 %v7406_v27  ;;  %v5681_v6 = vunpack.c.l.b16 %v7409_v54  ;;  %v7411_v14 = vld [vmem:[#allocation52_spill] sm:$0xff]  ;;  %v7415_v63 = vpack.c.bf16 %v7414_v49, %v7414_v49 }
 0x1fa   :  { %v5671_v45 = vunpack.c.l.b16 %v7403_v9  ;;  %v7412_v60 = vpack.c.bf16 %v7411_v14, %v7411_v14 }
 0x1fb   :  { %7407 = vst [vmem:[#allocation135_spill] sm:$0xff] %v5676_v57  ;;  %7410 = vst [vmem:[#allocation136_spill] sm:$0xff] %v5681_v6  ;;  %v5691_v9 = vunpack.c.l.b16 %v7415_v63  ;;  %v7420_v57 = vld [vmem:[#allocation55_spill] sm:$0xff]  ;;  %v7423_v6 = vld [vmem:[#allocation56_spill] sm:$0xff] }
 0x1fc   :  { %7404 = vst [vmem:[#allocation134_spill] sm:$0xff] %v5671_v45  ;;  %v5686_v39 = vunpack.c.l.b16 %v7412_v60  ;;  %v7417_v45 = vld [vmem:[#allocation54_spill] sm:$0xff]  ;;  %v7421_v4 = vpack.c.bf16 %v7420_v57, %v7420_v57  ;;  %v7424_v14 = vpack.c.bf16 %v7423_v6, %v7423_v6 }
 0x1fd   :  { %7416 = vst [vmem:[#allocation138_spill] sm:$0xff] %v5691_v9  ;;  %v7418_v10 = vpack.c.bf16 %v7417_v45, %v7417_v45  ;;  %v7429_v9 = vld [vmem:[#allocation58_spill] sm:$0xff] }
 0x1fe   :  { %7413 = vst [vmem:[#allocation137_spill] sm:$0xff] %v5686_v39  ;;  %v5701_v54 = vunpack.c.l.b16 %v7421_v4  ;;  %v5706_v60 = vunpack.c.l.b16 %v7424_v14  ;;  %v7426_v39 = vld [vmem:[#allocation57_spill] sm:$0xff]  ;;  %v7430_v45 = vpack.c.bf16 %v7429_v9, %v7429_v9 }
 0x1ff   :  { %v5696_v27 = vunpack.c.l.b16 %v7418_v10  ;;  %v7427_v49 = vpack.c.bf16 %v7426_v39, %v7426_v39 }
 0x200   :  { %7422 = vst [vmem:[#allocation140_spill] sm:$0xff] %v5701_v54  ;;  %7425 = vst [vmem:[#allocation141_spill] sm:$0xff] %v5706_v60  ;;  %v5716_v10 = vunpack.c.l.b16 %v7430_v45  ;;  %v7435_v54 = vld [vmem:[#allocation60_spill] sm:$0xff]  ;;  %v7438_v60 = vld [vmem:[#allocation61_spill] sm:$0xff] }
 0x201   :  { %7419 = vst [vmem:[#allocation139_spill] sm:$0xff] %v5696_v27  ;;  %v5711_v63 = vunpack.c.l.b16 %v7427_v49  ;;  %v7432_v27 = vld [vmem:[#allocation59_spill] sm:$0xff]  ;;  %v7436_v6 = vpack.c.bf16 %v7435_v54, %v7435_v54  ;;  %v7439_v39 = vpack.c.bf16 %v7438_v60, %v7438_v60 }
 0x202   :  { %7431 = vst [vmem:[#allocation143_spill] sm:$0xff] %v5716_v10  ;;  %v7433_v57 = vpack.c.bf16 %v7432_v27, %v7432_v27  ;;  %v7444_v10 = vld [vmem:[#allocation63_spill] sm:$0xff] }
 0x203   :  { %7428 = vst [vmem:[#allocation142_spill] sm:$0xff] %v5711_v63  ;;  %v5726_v14 = vunpack.c.l.b16 %v7436_v6  ;;  %v5731_v49 = vunpack.c.l.b16 %v7439_v39  ;;  %v7441_v63 = vld [vmem:[#allocation62_spill] sm:$0xff]  ;;  %v7445_v27 = vpack.c.bf16 %v7444_v10, %v7444_v10 }
 0x204   :  { %v5721_v4 = vunpack.c.l.b16 %v7433_v57  ;;  %v7442_v9 = vpack.c.bf16 %v7441_v63, %v7441_v63 }
 0x205   :  { %7437 = vst [vmem:[#allocation145_spill] sm:$0xff] %v5726_v14  ;;  %7440 = vst [vmem:[#allocation146_spill] sm:$0xff] %v5731_v49  ;;  %v5741_v57 = vunpack.c.l.b16 %v7445_v27  ;;  %v7450_v14 = vld [vmem:[#allocation65_spill] sm:$0xff]  ;;  %v7453_v49 = vld [vmem:[#allocation66_spill] sm:$0xff] }
 0x206   :  { %7434 = vst [vmem:[#allocation144_spill] sm:$0xff] %v5721_v4  ;;  %v5736_v45 = vunpack.c.l.b16 %v7442_v9  ;;  %v7447_v4 = vld [vmem:[#allocation64_spill] sm:$0xff]  ;;  %v7451_v60 = vpack.c.bf16 %v7450_v14, %v7450_v14  ;;  %v7454_v63 = vpack.c.bf16 %v7453_v49, %v7453_v49 }
 0x207   :  { %7446 = vst [vmem:[#allocation148_spill] sm:$0xff] %v5741_v57  ;;  %v7448_v54 = vpack.c.bf16 %v7447_v4, %v7447_v4  ;;  %v7459_v57 = vld [vmem:[#allocation68_spill] sm:$0xff] }
 0x208   :  { %7443 = vst [vmem:[#allocation147_spill] sm:$0xff] %v5736_v45  ;;  %v5751_v39 = vunpack.c.l.b16 %v7451_v60  ;;  %v5756_v9 = vunpack.c.l.b16 %v7454_v63  ;;  %v7456_v45 = vld [vmem:[#allocation67_spill] sm:$0xff]  ;;  %v7460_v4 = vpack.c.bf16 %v7459_v57, %v7459_v57 }
 0x209   :  { %v5746_v6 = vunpack.c.l.b16 %v7448_v54  ;;  %v7457_v10 = vpack.c.bf16 %v7456_v45, %v7456_v45 }
 0x20a   :  { %7452 = vst [vmem:[#allocation3_spill] sm:$0xff] %v5751_v39  ;;  %7455 = vst [vmem:[#allocation4_spill] sm:$0xff] %v5756_v9  ;;  %v5766_v54 = vunpack.c.l.b16 %v7460_v4  ;;  %v7465_v39 = vld [vmem:[#allocation70_spill] sm:$0xff]  ;;  %v7468_v9 = vld [vmem:[#allocation71_spill] sm:$0xff] }
 0x20b   :  { %7449 = vst [vmem:[#allocation2_spill] sm:$0xff] %v5746_v6  ;;  %v5761_v27 = vunpack.c.l.b16 %v7457_v10  ;;  %v7462_v6 = vld [vmem:[#allocation69_spill] sm:$0xff]  ;;  %v7466_v49 = vpack.c.bf16 %v7465_v39, %v7465_v39  ;;  %v7469_v45 = vpack.c.bf16 %v7468_v9, %v7468_v9 }
 0x20c   :  { %7461 = vst [vmem:[#allocation6_spill] sm:$0xff] %v5766_v54  ;;  %v7463_v14 = vpack.c.bf16 %v7462_v6, %v7462_v6  ;;  %v7474_v54 = vld [vmem:[#allocation73_spill] sm:$0xff] }
 0x20d   :  { %7458 = vst [vmem:[#allocation5_spill] sm:$0xff] %v5761_v27  ;;  %v5776_v63 = vunpack.c.l.b16 %v7466_v49  ;;  %v5781_v10 = vunpack.c.l.b16 %v7469_v45  ;;  %v7471_v27 = vld [vmem:[#allocation72_spill] sm:$0xff]  ;;  %v7475_v6 = vpack.c.bf16 %v7474_v54, %v7474_v54 }
 0x20e   :  { %v5771_v60 = vunpack.c.l.b16 %v7463_v14  ;;  %v7472_v57 = vpack.c.bf16 %v7471_v27, %v7471_v27 }
 0x20f   :  { %7467 = vst [vmem:[#allocation79_spill] sm:$0xff] %v5776_v63  ;;  %7470 = vst [vmem:[#allocation80_spill] sm:$0xff] %v5781_v10  ;;  %v5791_v14 = vunpack.c.l.b16 %v7475_v6  ;;  %v7478_v63 = vld [vmem:[#allocation75_spill] sm:$0xff]  ;;  %v7480_v10 = vld [vmem:[#allocation76_spill] sm:$0xff] }
 0x210   :  { %7464 = vst [vmem:[#allocation78_spill] sm:$0xff] %v5771_v60  ;;  %v5786_v4 = vunpack.c.l.b16 %v7472_v57  ;;  %v7476_v60 = vld [vmem:[#allocation74_spill] sm:$0xff]  ;;  %v7479_v9 = vpack.c.bf16 %v7478_v63, %v7478_v63  ;;  %v7481_v27 = vpack.c.bf16 %v7480_v10, %v7480_v10  ;;  %v7486_v63 = vpack.c.bf16 %v7223_v46, %v7223_v46 }
 0x211   :  { %v7477_v39 = vpack.c.bf16 %v7476_v60, %v7476_v60  ;;  %v7485_v60 = vpack.c.bf16 %v7222_v29, %v7222_v29  ;;  %v7487_v10 = vpack.c.bf16 %v7224_v38, %v7224_v38  ;;  %v7489_v29 = vpack.c.bf16 %v7226_v34, %v7226_v34 }
 0x212   :  { %7473 = vst [vmem:[#allocation81_spill] sm:$0xff] %v5786_v4  ;;  %v5801_v45 = vunpack.c.l.b16 %v7479_v9  ;;  %v5806_v57 = vunpack.c.l.b16 %v7481_v27  ;;  %v7483_v4 = vld [vmem:[#allocation77_spill] sm:$0xff]  ;;  %v5821_v9 = vunpack.c.l.b16 %v7486_v63  ;;  %v7490_v46 = vpack.c.bf16 %v7227_v43, %v7227_v43 }
 0x213   :  { %v5796_v49 = vunpack.c.l.b16 %v7477_v39  ;;  %v7484_v54 = vpack.c.bf16 %v7483_v4, %v7483_v4  ;;  %v5816_v39 = vunpack.c.l.b16 %v7485_v60  ;;  %v5826_v27 = vunpack.c.l.b16 %v7487_v10 }
 0x214   :  { %7482 = vst [vmem:[#allocation82_spill] sm:$0xff] %v5806_v57  ;;  %v7488_v4 = vpack.c.bf16 %v7225_v37, %v7225_v37  ;;  %v5836_v60 = vunpack.c.l.b16 %v7489_v29  ;;  %v5841_v63 = vunpack.c.l.b16 %v7490_v46  ;;  %v7491_v38 = vpack.c.bf16 %v7228_v32, %v7228_v32  ;;  %v7494_v57 = vld [vmem:[#allocation86_spill] sm:$0xff] }
 0x215   :  { %v5811_v6 = vunpack.c.l.b16 %v7484_v54  ;;  %v7493_v37 = vpack.c.bf16 %v7229_v50, %v7229_v50  ;;  %v7495_v34 = vpack.c.bf16 %v7494_v57, %v7494_v57  ;;  %v7496_v43 = vpack.c.bf16 %v4982_v22, %v4982_v22 }
 0x216   :  { %v5831_v54 = vunpack.c.l.b16 %v7488_v4  ;;  %v5846_v10 = vunpack.c.l.b16 %v7491_v38  ;;  %v7497_v32 = vpack.c.bf16 %v4988_v11, %v4988_v11  ;;  %v7498_v50 = vpack.c.bf16 %v4996_v41, %v4996_v41 }
 0x217   :  { %v5851_v4 = vunpack.c.l.b16 %v7493_v37  ;;  %v5856_v29 = vunpack.c.l.b16 %v7495_v34  ;;  %v5861_v46 = vunpack.c.l.b16 %v7496_v43  ;;  %v7499_v57 = vpack.c.bf16 %v5014_v51, %v5014_v51 }
 0x218   :  { %7492 = vst [vmem:[#allocation83_spill] sm:$0xff] %v5846_v10  ;;  %v5866_v38 = vunpack.c.l.b16 %v7497_v32  ;;  %v5871_v37 = vunpack.c.l.b16 %v7498_v50  ;;  %v7500_v10 = vld [vmem:[#allocation87_spill] sm:$0xff]  ;;  %v7502_v11 = vpack.c.bf16 %v5040_v33, %v5040_v33  ;;  %v2315_v41 = vsel %vm2314_vm2, %v5256_v53, %v5251_v35 }
 0x219   :  { %v5876_v34 = vunpack.c.l.b16 %v7499_v57  ;;  %v7501_v22 = vpack.c.bf16 %v7500_v10, %v7500_v10  ;;  %v2317_v51 = vsel %vm2316_vm3, %v5261_v36, %v2315_v41  ;;  %v2328_v33 = vsel %vm2314_vm2, %v5296_v15, %v5291_v20 }
 0x21a   :  { %v5886_v32 = vunpack.c.l.b16 %v7502_v11  ;;  %v2335_v10 = vsel %vm2314_vm2, %v5336_v18, %v5331_v31  ;;  %v2342_v50 = vsel %vm2314_vm2, %v5376_v47, %v5371_v8  ;;  %v2319_v35 = vsel %vm2318_vm4, %v5266_v25, %v2317_v51  ;;  %v7509_v11 = vld [vmem:[#allocation108_spill] sm:$0xff] }
 0x21b   :  { %v5881_v43 = vunpack.c.l.b16 %v7501_v22  ;;  %v2329_v53 = vsel %vm2316_vm3, %v5301_v48, %v2328_v33  ;;  %v2336_v36 = vsel %vm2316_vm3, %v5341_v24, %v2335_v10  ;;  %v2343_v20 = vsel %vm2316_vm3, %v5381_v16, %v2342_v50  ;;  %v7507_v22 = vld [vmem:[#allocation93_spill] sm:$0xff] }
 0x21c   :  { %v2321_v15 = vsel %vm2320_vm5, %v5271_v61, %v2319_v35  ;;  %v2330_v31 = vsel %vm2318_vm4, %v5306_v42, %v2329_v53  ;;  %v2337_v18 = vsel %vm2318_vm4, %v5346_v0, %v2336_v36  ;;  %v2344_v25 = vsel %vm2318_vm4, %v5386_v55, %v2343_v20  ;;  %v7503_v55 = vld [vmem:[#allocation99_spill] sm:$0xff]  ;;  %v7512_v33 = vld [vmem:[#allocation101_spill] sm:$0xff]  ;;  %v7514_v53 = vld [vmem:[#allocation90_spill] sm:$0xff] }
 0x21d   :  { %v2323_v48 = vsel %vm2322_vm6, %v5276_v62, %v2321_v15  ;;  %v2331_v24 = vsel %vm2320_vm5, %v5311_v13, %v2330_v31  ;;  %v2338_v8 = vsel %vm2320_vm5, %v5351_v40, %v2337_v18  ;;  %v2345_v61 = vsel %vm2320_vm5, %v5391_v7, %v2344_v25  ;;  %v7504_v7 = vld [vmem:[#allocation106_spill] sm:$0xff]  ;;  %v7513_v50 = vld [vmem:[#allocation109_spill] sm:$0xff]  ;;  %v7515_v20 = vld [vmem:[#allocation95_spill] sm:$0xff] }
 0x21e   :  { %v2325_v42 = vsel %vm2324_vm7, %v5281_v44, %v2323_v48  ;;  %v2332_v0 = vsel %vm2322_vm6, %v5316_v1, %v2331_v24  ;;  %v2339_v47 = vsel %vm2322_vm6, %v5356_v52, %v2338_v8  ;;  %v2346_v62 = vsel %vm2322_vm6, %v5396_v2, %v2345_v61  ;;  %v7505_v2 = vld [vmem:[#allocation107_spill] sm:$0xff]  ;;  %v7516_v31 = vld [vmem:[#allocation102_spill] sm:$0xff]  ;;  %v7519_v61 = vld [vmem:[#allocation96_spill] sm:$0xff] }
 0x21f   :  { %v5936_v13 = vsel %vm2326_vm8, %v5286_v59, %v2325_v42  ;;  %v2333_v40 = vsel %vm2324_vm7, %v5321_v19, %v2332_v0  ;;  %v2340_v16 = vsel %vm2324_vm7, %v5361_v21, %v2339_v47  ;;  %v2347_v44 = vsel %vm2324_vm7, %v5401_v30, %v2346_v62  ;;  %v7517_v25 = vld [vmem:[#allocation110_spill] sm:$0xff]  ;;  %v7518_v24 = vld [vmem:[#allocation91_spill] sm:$0xff] }
 0x220   :  { %v5946_v1 = vsel %vm2326_vm8, %v5326_v23, %v2333_v40  ;;  %v5950_v52 = vsel %vm2326_vm8, %v5366_v28, %v2340_v16  ;;  %v5954_v59 = vsel %vm2326_vm8, %v5406_v12, %v2347_v44  ;;  %v2349_v19 = vsel %vm2314_vm2, %v5416_v26, %v5411_v58  ;;  %v7506_v12 = vld [vmem:[#allocation88_spill] sm:$0xff]  ;;  %v7520_v0 = vld [vmem:[#allocation103_spill] sm:$0xff] }
 0x221   :  { %v2350_v21 = vsel %vm2316_vm3, %v5421_v5, %v2349_v19  ;;  %v2356_v23 = vsel %vm2314_vm2, %v5456_v17, %v5451_v56  ;;  %v2363_v28 = vsel %vm2314_vm2, %v7503_v55, %v5491_v3  ;;  %v2370_v30 = vsel %vm2314_vm2, %v7505_v2, %v7504_v7  ;;  %v7508_v26 = vld [vmem:[#allocation100_spill] sm:$0xff]  ;;  %v7510_v17 = vld [vmem:[#allocation89_spill] sm:$0xff]  ;;  %v7511_v3 = vld [vmem:[#allocation94_spill] sm:$0xff] }
 0x222   :  { %v2351_v57 = vsel %vm2318_vm4, %v7506_v12, %v2350_v21  ;;  %v2357_v58 = vsel %vm2316_vm3, %v7507_v22, %v2356_v23  ;;  %v2364_v5 = vsel %vm2316_vm3, %v7508_v26, %v2363_v28  ;;  %v2371_v56 = vsel %vm2316_vm3, %v7509_v11, %v2370_v30  ;;  %v7521_v62 = vld [vmem:[#allocation111_spill] sm:$0xff]  ;;  %v7522_v16 = vld [vmem:[#allocation92_spill] sm:$0xff]  ;;  %v7523_v19 = vld [vmem:[#allocation97_spill] sm:$0xff] }
 0x223   :  { %v2352_v41 = vsel %vm2320_vm5, %v7510_v17, %v2351_v57  ;;  %v2358_v51 = vsel %vm2318_vm4, %v7511_v3, %v2357_v58  ;;  %v2365_v10 = vsel %vm2318_vm4, %v7512_v33, %v2364_v5  ;;  %v2372_v35 = vsel %vm2318_vm4, %v7513_v50, %v2371_v56  ;;  %v7524_v23 = vld [vmem:[#allocation104_spill] sm:$0xff]  ;;  %v7526_v2 = vld [vmem:[#allocation98_spill] sm:$0xff]  ;;  %v7527_v12 = vld [vmem:[#allocation105_spill] sm:$0xff] }
 0x224   :  { %v2353_v36 = vsel %vm2322_vm6, %v7514_v53, %v2352_v41  ;;  %v2359_v15 = vsel %vm2320_vm5, %v7515_v20, %v2358_v51  ;;  %v2366_v18 = vsel %vm2320_vm5, %v7516_v31, %v2365_v10  ;;  %v2373_v48 = vsel %vm2320_vm5, %v7517_v25, %v2372_v35  ;;  %v7525_v28 = vld [vmem:[#allocation112_spill] sm:$0xff]  ;;  %v7528_v22 = vld [vmem:[#allocation113_spill] sm:$0xff]  ;;  %v7529_v26 = vld [vmem:[#allocation114_spill] sm:$0xff] }
 0x225   :  { %v2354_v8 = vsel %vm2324_vm7, %v7518_v24, %v2353_v36  ;;  %v2360_v42 = vsel %vm2322_vm6, %v7519_v61, %v2359_v15  ;;  %v2367_v47 = vsel %vm2322_vm6, %v7520_v0, %v2366_v18  ;;  %v2374_v40 = vsel %vm2322_vm6, %v7521_v62, %v2373_v48  ;;  %v7530_v5 = vld [vmem:[#allocation115_spill] sm:$0xff]  ;;  %v7531_v56 = vld [vmem:[#allocation116_spill] sm:$0xff]  ;;  %v7532_v41 = vld [vmem:[#allocation122_spill] sm:$0xff] }
 0x226   :  { %v6004_v44 = vsel %vm2326_vm8, %v7522_v16, %v2354_v8  ;;  %v2361_v21 = vsel %vm2324_vm7, %v7523_v19, %v2360_v42  ;;  %v2368_v55 = vsel %vm2324_vm7, %v7524_v23, %v2367_v47  ;;  %v2375_v7 = vsel %vm2324_vm7, %v7525_v28, %v2374_v40  ;;  %v7533_v3 = vld [vmem:[#allocation123_spill] sm:$0xff]  ;;  %v7534_v33 = vld [vmem:[#allocation130_spill] sm:$0xff]  ;;  %v7538_v20 = vld [vmem:[#allocation117_spill] sm:$0xff] }
 0x227   :  { %v6014_v30 = vsel %vm2326_vm8, %v7526_v2, %v2361_v21  ;;  %v6018_v57 = vsel %vm2326_vm8, %v7527_v12, %v2368_v55  ;;  %v6022_v58 = vsel %vm2326_vm8, %v7528_v22, %v2375_v7  ;;  %v2377_v11 = vsel %vm2314_vm2, %v7530_v5, %v7529_v26  ;;  %v7535_v10 = vld [vmem:[#allocation131_spill] sm:$0xff]  ;;  %v7536_v35 = vld [vmem:[#allocation138_spill] sm:$0xff]  ;;  %v7539_v31 = vld [vmem:[#allocation124_spill] sm:$0xff] }
 0x228   :  { %v2378_v17 = vsel %vm2316_vm3, %v7531_v56, %v2377_v11  ;;  %v2384_v51 = vsel %vm2314_vm2, %v7533_v3, %v7532_v41  ;;  %v2391_v50 = vsel %vm2314_vm2, %v7535_v10, %v7534_v33  ;;  %v7537_v53 = vld [vmem:[#allocation139_spill] sm:$0xff]  ;;  %v7540_v25 = vld [vmem:[#allocation132_spill] sm:$0xff]  ;;  %v7542_v61 = vld [vmem:[#allocation118_spill] sm:$0xff] }
 0x229   :  { %v2398_v36 = vsel %vm2314_vm2, %v7537_v53, %v7536_v35  ;;  %v2379_v15 = vsel %vm2318_vm4, %v7538_v20, %v2378_v17  ;;  %v2385_v18 = vsel %vm2316_vm3, %v7539_v31, %v2384_v51  ;;  %v2392_v48 = vsel %vm2316_vm3, %v7540_v25, %v2391_v50  ;;  %v7541_v24 = vld [vmem:[#allocation140_spill] sm:$0xff]  ;;  %v7543_v0 = vld [vmem:[#allocation125_spill] sm:$0xff]  ;;  %v7546_v21 = vld [vmem:[#allocation119_spill] sm:$0xff] }
 0x22a   :  { %v2399_v8 = vsel %vm2316_vm3, %v7541_v24, %v2398_v36  ;;  %v2380_v42 = vsel %vm2320_vm5, %v7542_v61, %v2379_v15  ;;  %v2386_v47 = vsel %vm2318_vm4, %v7543_v0, %v2385_v18  ;;  %v7544_v62 = vld [vmem:[#allocation133_spill] sm:$0xff]  ;;  %v7547_v55 = vld [vmem:[#allocation126_spill] sm:$0xff]  ;;  %v7550_v26 = vld [vmem:[#allocation120_spill] sm:$0xff] }
 0x22b   :  { %v2393_v40 = vsel %vm2318_vm4, %v7544_v62, %v2392_v48  ;;  %v7545_v16 = vld [vmem:[#allocation141_spill] sm:$0xff]  ;;  %v2381_v23 = vsel %vm2322_vm6, %v7546_v21, %v2380_v42  ;;  %v2387_v28 = vsel %vm2320_vm5, %v7547_v55, %v2386_v47  ;;  %v7548_v7 = vld [vmem:[#allocation134_spill] sm:$0xff]  ;;  %v7551_v11 = vld [vmem:[#allocation127_spill] sm:$0xff]  ;;  %v2419_v21 = vsel %vm2314_vm2, %v5816_v39, %v5811_v6 }
 0x22c   :  { %v2400_v19 = vsel %vm2318_vm4, %v7545_v16, %v2399_v8  ;;  %v2394_v2 = vsel %vm2320_vm5, %v7548_v7, %v2393_v40  ;;  %v7549_v12 = vld [vmem:[#allocation142_spill] sm:$0xff]  ;;  %v2382_v5 = vsel %vm2324_vm7, %v7550_v26, %v2381_v23  ;;  %v2388_v56 = vsel %vm2322_vm6, %v7551_v11, %v2387_v28  ;;  %v7552_v17 = vld [vmem:[#allocation135_spill] sm:$0xff]  ;;  %v7554_v33 = vld [vmem:[#allocation121_spill] sm:$0xff] }
 0x22d   :  { %v2401_v22 = vsel %vm2320_vm5, %v7549_v12, %v2400_v19  ;;  %v2395_v41 = vsel %vm2322_vm6, %v7552_v17, %v2394_v2  ;;  %v7553_v3 = vld [vmem:[#allocation143_spill] sm:$0xff]  ;;  %v2383_v10 = vsel %vm2326_vm8, %v7554_v33, %v2382_v5  ;;  %v7555_v50 = vld [vmem:[#allocation128_spill] sm:$0xff]  ;;  %v7558_v31 = vld [vmem:[#allocation129_spill] sm:$0xff]  ;;  %v2426_v23 = vsel %vm2314_vm2, %v5856_v29, %v5851_v4 }
 0x22e   :  { %v2402_v51 = vsel %vm2322_vm6, %v7553_v3, %v2401_v22  ;;  %v2389_v35 = vsel %vm2324_vm7, %v7555_v50, %v2388_v56  ;;  %v7556_v53 = vld [vmem:[#allocation136_spill] sm:$0xff]  ;;  %v7559_v25 = vld [vmem:[#allocation137_spill] sm:$0xff]  ;;  %v7561_v61 = vld [vmem:[#allocation146_spill] sm:$0xff]  ;;  %v2420_v12 = vsel %vm2316_vm3, %v5821_v9, %v2419_v21  ;;  %v2427_v22 = vsel %vm2316_vm3, %v5861_v46, %v2426_v23 }
 0x22f   :  { %v2396_v36 = vsel %vm2324_vm7, %v7556_v53, %v2395_v41  ;;  %v7557_v20 = vld [vmem:[#allocation144_spill] sm:$0xff]  ;;  %v2390_v18 = vsel %vm2326_vm8, %v7558_v31, %v2389_v35  ;;  %v7560_v24 = vld [vmem:[#allocation145_spill] sm:$0xff]  ;;  %v7562_v42 = vld [vmem:[#allocation147_spill] sm:$0xff]  ;;  %v2421_v4 = vsel %vm2318_vm4, %v5826_v27, %v2420_v12  ;;  %v2428_v29 = vsel %vm2318_vm4, %v5866_v38, %v2427_v22 }
 0x230   :  { %v2403_v15 = vsel %vm2324_vm7, %v7557_v20, %v2402_v51  ;;  %v2397_v48 = vsel %vm2326_vm8, %v7559_v25, %v2396_v36  ;;  %v2405_v0 = vsel %vm2314_vm2, %v7562_v42, %v7561_v61  ;;  %v7563_v47 = vld [vmem:[#allocation148_spill] sm:$0xff]  ;;  %v7564_v40 = vld [vmem:[#allocation78_spill] sm:$0xff]  ;;  %v7565_v16 = vld [vmem:[#allocation79_spill] sm:$0xff]  ;;  %v2422_v46 = vsel %vm2320_vm5, %v5831_v54, %v2421_v4 }
 0x231   :  { %v2404_v8 = vsel %vm2326_vm8, %v7560_v24, %v2403_v15  ;;  %v2406_v62 = vsel %vm2316_vm3, %v7563_v47, %v2405_v0  ;;  %v2412_v19 = vsel %vm2314_vm2, %v7565_v16, %v7564_v40  ;;  %v7566_v55 = vld [vmem:[#allocation2_spill] sm:$0xff]  ;;  %v7567_v7 = vld [vmem:[#allocation80_spill] sm:$0xff]  ;;  %v7568_v26 = vld [vmem:[#allocation3_spill] sm:$0xff]  ;;  %v2429_v17 = vsel %vm2320_vm5, %v5871_v37, %v2428_v29 }
 0x232   :  { %v2407_v28 = vsel %vm2318_vm4, %v7566_v55, %v2406_v62  ;;  %v2413_v2 = vsel %vm2316_vm3, %v7567_v7, %v2412_v19  ;;  %v7569_v6 = vld [vmem:[#allocation81_spill] sm:$0xff]  ;;  %v7570_v11 = vld [vmem:[#allocation4_spill] sm:$0xff]  ;;  %v2423_v38 = vsel %vm2322_vm6, %v5836_v60, %v2422_v46  ;;  %v2430_v51 = vsel %vm2322_vm6, %v5876_v34, %v2429_v17  ;;  %v7572_v33 = vld [vmem:[#allocation6_spill] sm:$0xff] }
 0x233   :  { %v2408_v5 = vsel %vm2320_vm5, %v7568_v26, %v2407_v28  ;;  %v2414_v39 = vsel %vm2318_vm4, %v7569_v6, %v2413_v2  ;;  %v7571_v41 = vld [vmem:[#allocation5_spill] sm:$0xff]  ;;  %v2424_v37 = vsel %vm2324_vm7, %v5841_v63, %v2423_v38  ;;  %v2431_v50 = vsel %vm2324_vm7, %v5881_v43, %v2430_v51  ;;  %v7573_v35 = vld [vmem:[#allocation82_spill] sm:$0xff]  ;;  %v7574_v53 = vld [vmem:[#allocation83_spill] sm:$0xff] }
 0x234   :  { %v2409_v56 = vsel %vm2322_vm6, %v7570_v11, %v2408_v5  ;;  %v2415_v9 = vsel %vm2320_vm5, %v5791_v14, %v2414_v39  ;;  %v2425_v60 = vsel %vm2326_vm8, %v7574_v53, %v2424_v37  ;;  %v2432_v34 = vsel %vm2326_vm8, %v5886_v32, %v2431_v50 }
 0x235   :  { %v2410_v3 = vsel %vm2324_vm7, %v7571_v41, %v2409_v56  ;;  %v2416_v27 = vsel %vm2322_vm6, %v5796_v49, %v2415_v9  ;;  %v2433_v36 = vpack.c.b16 %v5936_v13, %v5936_v13  ;;  %v2435_v63 = vpack.c.b16 %v5950_v52, %v5950_v52 }
 0x236   :  { %v2411_v14 = vsel %vm2326_vm8, %v7572_v33, %v2410_v3  ;;  %v2417_v54 = vsel %vm2324_vm7, %v5801_v45, %v2416_v27  ;;  %v2434_v45 = vpack.c.b16 %v5946_v1, %v5946_v1  ;;  %v2436_v43 = vpack.c.b16 %v5954_v59, %v5954_v59 }
 0x237   :  { %v2418_v49 = vsel %vm2326_vm8, %v7573_v35, %v2417_v54  ;;  %v2437_v20 = vpack.c.b16 %v6004_v44, %v6004_v44  ;;  %v2438_v15 = vpack.c.b16 %v6014_v30, %v6014_v30  ;;  %v2439_v32 = vpack.c.b16 %v6018_v57, %v6018_v57  ;;  %2466 = vst.msk [vmem:[%s6225_s1] sm:$0xf] %vm2465_vm9, %v2433_v36 }
 0x238   :  { %v2440_v13 = vpack.c.b16 %v6022_v58, %v6022_v58  ;;  %v2441_v31 = vpack.c.b16 %v2383_v10, %v2383_v10  ;;  %v2442_v1 = vpack.c.b16 %v2390_v18, %v2390_v18  ;;  %v2443_v25 = vpack.c.b16 %v2397_v48, %v2397_v48  ;;  %2467 = vst.msk [vmem:[%s6225_s1 + $0x4] sm:$0xf] %vm2465_vm9, %v2434_v45 }
 0x239   :  { %v2444_v24 = vpack.c.b16 %v2404_v8, %v2404_v8  ;;  %v2445_v52 = vpack.c.b16 %v2411_v14, %v2411_v14  ;;  %v2446_v61 = vpack.c.b16 %v2418_v49, %v2418_v49  ;;  %v2447_v42 = vpack.c.b16 %v2425_v60, %v2425_v60  ;;  %2468 = vst.msk [vmem:[%s6225_s1 + $0x8] sm:$0xf] %vm2465_vm9, %v2435_v63 }
 0x23a   :  { %v2448_v59 = vpack.c.b16 %v2432_v34, %v2432_v34  ;;  %2469 = vst.msk [vmem:[%s6225_s1 + $0xc] sm:$0xf] %vm2465_vm9, %v2436_v43  ;;  %2470 = vst.msk [vmem:[%s6225_s1 + $0x10] sm:$0xf] %vm2465_vm9, %v2437_v20 }
 0x23b   :  { %2471 = vst.msk [vmem:[%s6225_s1 + $0x14] sm:$0xf] %vm2465_vm9, %v2438_v15  ;;  %2472 = vst.msk [vmem:[%s6225_s1 + $0x18] sm:$0xf] %vm2465_vm9, %v2439_v32 }
 0x23c   :  { %2473 = vst.msk [vmem:[%s6225_s1 + $0x1c] sm:$0xf] %vm2465_vm9, %v2440_v13  ;;  %2474 = vst.msk [vmem:[%s6225_s1 + $0x20] sm:$0xf] %vm2465_vm9, %v2441_v31 }
 0x23d   :  { %2475 = vst.msk [vmem:[%s6225_s1 + $0x24] sm:$0xf] %vm2465_vm9, %v2442_v1  ;;  %2476 = vst.msk [vmem:[%s6225_s1 + $0x28] sm:$0xf] %vm2465_vm9, %v2443_v25 }
 0x23e   :  { %2477 = vst.msk [vmem:[%s6225_s1 + $0x2c] sm:$0xf] %vm2465_vm9, %v2444_v24  ;;  %2478 = vst.msk [vmem:[%s6225_s1 + $0x30] sm:$0xf] %vm2465_vm9, %v2445_v52 }
 0x23f   :  { %2479 = vst.msk [vmem:[%s6225_s1 + $0x34] sm:$0xf] %vm2465_vm9, %v2446_v61  ;;  %2480 = vst.msk [vmem:[%s6225_s1 + $0x38] sm:$0xf] %vm2465_vm9, %v2447_v42 }
 0x240   :  { %2481 = vst.msk [vmem:[%s6225_s1 + $0x3c] sm:$0xf] %vm2465_vm9, %v2448_v59 }

// kernel: densenet_forward.16
= control target key start
LH: loop header
LB: loop body
LE: loop exit
PB: predicated region body
PF: predicated region fallthrough
CT: control target
= control target key end

     0   :  { %s895_s1 = inlined_call_operand.vmem [shape: bf16[128,128], index: 1, kind: input, shape index: {}]   ;;  %s896_s0 = inlined_call_operand.vmem [shape: bf16[128,128], index: 0, kind: input, shape index: {}]   ;;  %s897_s2 = inlined_call_operand.vmem [shape: f32[1,128], index: 2, kind: input, shape index: {}]   ;;  %s898_s3 = inlined_call_operand.vmem [shape: f32[1,128], index: 3, kind: input, shape index: {}]   ;;  %s899_s4 = inlined_call_operand.vmem [shape: f32[1,128], index: 4, kind: input, shape index: {}]   ;;  %s900_s5 = inlined_call_operand.vmem [shape: f32[1,128], index: 5, kind: input, shape index: {}]   ;;  %s901_s6 = inlined_call_operand.vmem [shape: bf16[128,128], index: 6, kind: output, shape index: {}]  }
   0x1   :  { %v714_v0 = vld [vmem:[%s895_s1] sm:$0xff]   ;;  %v715_v1 = vld [vmem:[%s895_s1 + $0x8] sm:$0xff]   ;;  %v716_v2 = vld [vmem:[%s895_s1 + $0x10] sm:$0xff]  }
   0x2   :  { %666 = vmatprep.subr.bf16.mxu0 %v714_v0  ;;  %698 = vmatprep.subr.bf16.mxu1 %v714_v0  ;;  %v717_v3 = vld [vmem:[%s895_s1 + $0x18] sm:$0xff]   ;;  %v565_v4 = vld [vmem:[%s896_s0] sm:$0xff]   ;;  %v636_v9 = vld [vmem:[%s896_s0 + $0x8] sm:$0xff]  }
   0x3   :  { %667 = vmatpush3.bf16.msra.mxu0 %v714_v0  ;;  %706 = vmatpush3.bf16.msra.mxu1 %v714_v0  ;;  %v775_v5 = vld [vmem:[%s897_s2] ss:$0 sm:$0xff]  ;;  %v566_v6 = vunpack.c.l.bf16 %v565_v4  ;;  %v567_v7 = vunpack.c.h.bf16 %v565_v4  ;;  %v640_v13 = vld [vmem:[%s896_s0 + $0x28] sm:$0xff]   ;;  %v637_v16 = vld [vmem:[%s896_s0 + $0x10] sm:$0xff]   ;;  %v570_v20 = vunpack.c.l.bf16 %v636_v9  ;;  %v571_v21 = vunpack.c.h.bf16 %v636_v9 }
   0x4   :  { %668 = vmatprep.subr.bf16.mxu0 %v715_v1  ;;  %699 = vmatprep.subr.bf16.mxu1 %v715_v1  ;;  %v639_v8 = vld [vmem:[%s896_s0 + $0x20] sm:$0xff]   ;;  %v586_v24 = vunpack.c.l.bf16 %v640_v13  ;;  %v587_v25 = vunpack.c.h.bf16 %v640_v13  ;;  %v574_v28 = vunpack.c.l.bf16 %v637_v16  ;;  %v641_v31 = vld [vmem:[%s896_s0 + $0x30] sm:$0xff]   ;;  %v719_v32 = vld [vmem:[%s895_s1 + $0x28] sm:$0xff]   ;;  %v575_v40 = vunpack.c.h.bf16 %v637_v16 }
   0x5   :  { %v786_v10 = vld [vmem:[%s898_s3] ss:$0 sm:$0xff]  ;;  %v582_v11 = vunpack.c.l.bf16 %v639_v8  ;;  %v583_v12 = vunpack.c.h.bf16 %v639_v8  ;;  %v83_v14 = vmul.f32 %v566_v6, %v775_v5  ;;  %v84_v15 = vmul.f32 %v567_v7, %v775_v5  ;;  %v638_v44 = vld [vmem:[%s896_s0 + $0x18] sm:$0xff]   ;;  %v720_v48 = vld [vmem:[%s895_s1 + $0x30] sm:$0xff]  }
   0x6   :  { %v718_v17 = vld [vmem:[%s895_s1 + $0x20] sm:$0xff]   ;;  %v85_v35 = vmul.f32 %v570_v20, %v775_v5  ;;  %v86_v36 = vmul.f32 %v571_v21, %v775_v5  ;;  %v93_v38 = vmul.f32 %v586_v24, %v775_v5  ;;  %v94_v39 = vmul.f32 %v587_v25, %v775_v5  ;;  %v642_v47 = vld [vmem:[%s896_s0 + $0x38] sm:$0xff]  }
   0x7   :  { %669 = vmatpush3.bf16.msra.mxu0 %v715_v1  ;;  %707 = vmatpush3.bf16.msra.mxu1 %v715_v1  ;;  %v91_v18 = vmul.f32 %v582_v11, %v775_v5  ;;  %v92_v19 = vmul.f32 %v583_v12, %v775_v5  ;;  %v106_v22 = vadd.f32 %v786_v10, %v83_v14  ;;  %v590_v43 = vunpack.c.l.bf16 %v641_v31  ;;  %v721_v63 = vld [vmem:[%s895_s1 + $0x38] sm:$0xff]  }
   0x8   :  { %670 = vmatprep.subr.bf16.mxu0 %v716_v2  ;;  %700 = vmatprep.subr.bf16.mxu1 %v716_v2  ;;  %v107_v23 = vadd.f32 %v786_v10, %v84_v15  ;;  %v87_v42 = vmul.f32 %v574_v28, %v775_v5  ;;  %v88_v45 = vmul.f32 %v575_v40, %v775_v5  ;;  %v591_v46 = vunpack.c.h.bf16 %v641_v31  ;;  %v853_v28 = vld [vmem:[%s900_s5] ss:$0 sm:$0xff] }
   0x9   :  { %v114_v26 = vadd.f32 %v786_v10, %v91_v18  ;;  %v115_v27 = vadd.f32 %v786_v10, %v92_v19  ;;  %v122_v29 = vmax.f32 %v106_v22, 0.0  ;;  %v108_v49 = vadd.f32 %v786_v10, %v85_v35 }
   0xa   :  { %v123_v30 = vmax.f32 %v107_v23, 0.0  ;;  %v109_v50 = vadd.f32 %v786_v10, %v86_v36  ;;  %v95_v51 = vmul.f32 %v590_v43, %v775_v5  ;;  %v116_v52 = vadd.f32 %v786_v10, %v93_v38 }
   0xb   :  { %671 = vmatpush3.bf16.msra.mxu0 %v716_v2  ;;  %708 = vmatpush3.bf16.msra.mxu1 %v716_v2  ;;  %v130_v33 = vmax.f32 %v114_v26, 0.0  ;;  %v131_v34 = vmax.f32 %v115_v27, 0.0  ;;  %v117_v53 = vadd.f32 %v786_v10, %v94_v39  ;;  %v96_v54 = vmul.f32 %v591_v46, %v775_v5 }
   0xc   :  { %672 = vmatprep.subr.bf16.mxu0 %v717_v3  ;;  %701 = vmatprep.subr.bf16.mxu1 %v717_v3  ;;  %v138_v37 = vpack.c.bf16 %v123_v30, %v122_v29  ;;  %v578_v55 = vunpack.c.l.bf16 %v638_v44  ;;  %v110_v56 = vadd.f32 %v786_v10, %v87_v42  ;;  %v579_v57 = vunpack.c.h.bf16 %v638_v44 }
   0xd   :  { %v142_v41 = vpack.c.bf16 %v131_v34, %v130_v33  ;;  %v594_v58 = vunpack.c.l.bf16 %v642_v47  ;;  %v595_v59 = vunpack.c.h.bf16 %v642_v47  ;;  %v111_v60 = vadd.f32 %v786_v10, %v88_v45 }
   0xe   :  { %682 = vmatprep.mubr.bf16.mxu0 %v138_v37  ;;  %v118_v61 = vadd.f32 %v786_v10, %v95_v51  ;;  %v119_v62 = vadd.f32 %v786_v10, %v96_v54  ;;  %v124_v0 = vmax.f32 %v108_v49, 0.0  ;;  %v125_v1 = vmax.f32 %v109_v50, 0.0 }
   0xf   :  { %673 = vmatpush3.bf16.msra.mxu0 %v717_v3  ;;  %709 = vmatpush3.bf16.msra.mxu1 %v717_v3  ;;  %v132_v2 = vmax.f32 %v116_v52, 0.0  ;;  %v133_v3 = vmax.f32 %v117_v53, 0.0  ;;  %v89_v4 = vmul.f32 %v578_v55, %v775_v5  ;;  %v90_v6 = vmul.f32 %v579_v57, %v775_v5 }
  0x10   :  { %674 = vmatprep.subr.bf16.mxu0 %v718_v17  ;;  %702 = vmatprep.subr.bf16.mxu1 %v718_v17  ;;  %v97_v7 = vmul.f32 %v594_v58, %v775_v5  ;;  %v98_v8 = vmul.f32 %v595_v59, %v775_v5  ;;  %v126_v9 = vmax.f32 %v110_v56, 0.0  ;;  %v127_v11 = vmax.f32 %v111_v60, 0.0 }
  0x11   :  { %690 = vmatprep.mubr.bf16.mxu1 %v142_v41  ;;  %v134_v12 = vmax.f32 %v118_v61, 0.0  ;;  %v135_v13 = vmax.f32 %v119_v62, 0.0  ;;  %v139_v14 = vpack.c.bf16 %v125_v1, %v124_v0  ;;  %v143_v15 = vpack.c.bf16 %v133_v3, %v132_v2 }
  0x12   :  { %v112_v16 = vadd.f32 %v786_v10, %v89_v4  ;;  %v120_v18 = vadd.f32 %v786_v10, %v97_v7  ;;  %v121_v19 = vadd.f32 %v786_v10, %v98_v8  ;;  %v140_v5 = vpack.c.bf16 %v127_v11, %v126_v9 }
  0x13   :  { %675 = vmatpush3.bf16.msra.mxu0 %v718_v17  ;;  %710 = vmatpush3.bf16.msra.mxu1 %v718_v17  ;;  %v113_v17 = vadd.f32 %v786_v10, %v90_v6  ;;  %v144_v20 = vpack.c.bf16 %v135_v13, %v134_v12  ;;  %v530_v10 = vld [vmem:[%s899_s4] ss:$0 sm:$0xff] }
  0x14   :  { %676 = vmatprep.subr.bf16.mxu0 %v719_v32  ;;  %703 = vmatprep.subr.bf16.mxu1 %v719_v32  ;;  %v128_v21 = vmax.f32 %v112_v16, 0.0  ;;  %v136_v23 = vmax.f32 %v120_v18, 0.0  ;;  %v137_v24 = vmax.f32 %v121_v19, 0.0 }
  0x15   :  { %v129_v22 = vmax.f32 %v113_v17, 0.0 }
  0x16   :  { %v145_v26 = vpack.c.bf16 %v137_v24, %v136_v23 }
  0x17   :  { %677 = vmatpush3.bf16.msra.mxu0 %v719_v32  ;;  %711 = vmatpush3.bf16.msra.mxu1 %v719_v32  ;;  %v141_v25 = vpack.c.bf16 %v129_v22, %v128_v21 }
  0x18   :  { %678 = vmatprep.subr.bf16.mxu0 %v720_v48  ;;  %704 = vmatprep.subr.bf16.mxu1 %v720_v48 }
  0x1b   :  { %679 = vmatpush3.bf16.msra.mxu0 %v720_v48  ;;  %712 = vmatpush3.bf16.msra.mxu1 %v720_v48 }
  0x1c   :  { %680 = vmatprep.subr.bf16.mxu0 %v721_v63  ;;  %705 = vmatprep.subr.bf16.mxu1 %v721_v63 }
  0x1f   :  { %681 = vmatpush3.bf16.msra.mxu0 %v721_v63  ;;  %713 = vmatpush3.bf16.msra.mxu1 %v721_v63 }
  0x22   :  { %683 = vmatmul.mubr.bf16.vlgmr.msra.gmra.mrb[0].mxu0 %v139_v14  ;;  %691 = vmatmul.mubr.bf16.vlgmr.msra.gmra.mrb[0].mxu1 %v143_v15 }
  0x23   :  { %686 = vmatprep.mubr.bf16.mxu0 %v140_v5  ;;  %694 = vmatprep.mubr.bf16.mxu1 %v144_v20 }
  0x2a   :  { %687 = vmatmul.mubr.bf16.gmra.mrb[4].mxu0 %v141_v25  ;;  %695 = vmatmul.mubr.bf16.gmra.mrb[4].mxu1 %v145_v26 }
  0xf5   :  { %v684_v27 = vpop.f32.mrb[0].mxu0  ;;  %v692_v29 = vpop.f32.mrb[0].mxu1 }
  0xf6   :  { %v383_v30 = vmul.f32 %v684_v27, %v530_v10  ;;  %v391_v31 = vmul.f32 %v692_v29, %v530_v10  ;;  %v260_v32 = vpop.f32.mrb[1].mxu0  ;;  %v292_v33 = vpop.f32.mrb[1].mxu1 }
  0xf7   :  { %v381_v34 = vmul.f32 %v530_v10, %v260_v32  ;;  %v389_v35 = vmul.f32 %v530_v10, %v292_v33  ;;  %v685_v36 = vpop.f32.mrb[2].mxu0  ;;  %v693_v37 = vpop.f32.mrb[2].mxu1 }
  0xf8   :  { %v406_v38 = vadd.f32 %v853_v28, %v383_v30  ;;  %v414_v39 = vadd.f32 %v853_v28, %v391_v31  ;;  %v384_v40 = vmul.f32 %v685_v36, %v530_v10  ;;  %v392_v41 = vmul.f32 %v693_v37, %v530_v10  ;;  %v263_v42 = vpop.f32.mrb[3].mxu0  ;;  %v295_v43 = vpop.f32.mrb[3].mxu1 }
  0xf9   :  { %v404_v44 = vadd.f32 %v853_v28, %v381_v34  ;;  %v412_v45 = vadd.f32 %v853_v28, %v389_v35  ;;  %v382_v46 = vmul.f32 %v530_v10, %v263_v42  ;;  %v390_v47 = vmul.f32 %v530_v10, %v295_v43 }
  0xfa   :  { %v407_v48 = vadd.f32 %v853_v28, %v384_v40  ;;  %v415_v49 = vadd.f32 %v853_v28, %v392_v41  ;;  %v422_v52 = vmax.f32 %v406_v38, 0.0  ;;  %v430_v53 = vmax.f32 %v414_v39, 0.0 }
  0xfb   :  { %v405_v50 = vadd.f32 %v853_v28, %v382_v46  ;;  %v413_v51 = vadd.f32 %v853_v28, %v390_v47  ;;  %v420_v56 = vmax.f32 %v404_v44, 0.0  ;;  %v428_v57 = vmax.f32 %v412_v45, 0.0 }
  0xfc   :  { %v423_v54 = vmax.f32 %v407_v48, 0.0  ;;  %v431_v55 = vmax.f32 %v415_v49, 0.0 }
  0xfd   :  { %v421_v58 = vmax.f32 %v405_v50, 0.0  ;;  %v429_v59 = vmax.f32 %v413_v51, 0.0  ;;  %v688_v60 = vpop.f32.mrb[4].mxu0  ;;  %v696_v61 = vpop.f32.mrb[4].mxu1 }
  0xfe   :  { %v604_v62 = vpack.c.bf16 %v423_v54, %v422_v52  ;;  %v624_v63 = vpack.c.bf16 %v431_v55, %v430_v53  ;;  %v387_v0 = vmul.f32 %v688_v60, %v530_v10  ;;  %v395_v1 = vmul.f32 %v696_v61, %v530_v10  ;;  %v276_v2 = vpop.f32.mrb[5].mxu0  ;;  %v308_v3 = vpop.f32.mrb[5].mxu1 }
  0xff   :  { %v599_v4 = vpack.c.bf16 %v421_v58, %v420_v56  ;;  %v619_v6 = vpack.c.bf16 %v429_v59, %v428_v57  ;;  %v385_v7 = vmul.f32 %v530_v10, %v276_v2  ;;  %v393_v8 = vmul.f32 %v530_v10, %v308_v3  ;;  %v689_v9 = vpop.f32.mrb[6].mxu0  ;;  %v697_v11 = vpop.f32.mrb[6].mxu1 }
 0x100   :  { %643 = vst [vmem:[%s901_s6 + $0x8] sm:$0xff] %v604_v62   ;;  %647 = vst [vmem:[%s901_s6 + $0x28] sm:$0xff] %v624_v63   ;;  %v410_v12 = vadd.f32 %v853_v28, %v387_v0  ;;  %v418_v13 = vadd.f32 %v853_v28, %v395_v1  ;;  %v388_v14 = vmul.f32 %v689_v9, %v530_v10  ;;  %v279_v16 = vpop.f32.mrb[7].mxu0  ;;  %v311_v17 = vpop.f32.mrb[7].mxu1 }
 0x101   :  { %v396_v15 = vmul.f32 %v697_v11, %v530_v10  ;;  %600 = vst [vmem:[%s901_s6] sm:$0xff] %v599_v4   ;;  %646 = vst [vmem:[%s901_s6 + $0x20] sm:$0xff] %v619_v6   ;;  %v408_v18 = vadd.f32 %v853_v28, %v385_v7  ;;  %v416_v19 = vadd.f32 %v853_v28, %v393_v8 }
 0x102   :  { %v386_v5 = vmul.f32 %v530_v10, %v279_v16  ;;  %v394_v20 = vmul.f32 %v530_v10, %v311_v17  ;;  %v411_v21 = vadd.f32 %v853_v28, %v388_v14  ;;  %v426_v25 = vmax.f32 %v410_v12, 0.0 }
 0x103   :  { %v419_v22 = vadd.f32 %v853_v28, %v396_v15  ;;  %v434_v26 = vmax.f32 %v418_v13, 0.0  ;;  %v424_v30 = vmax.f32 %v408_v18, 0.0  ;;  %v432_v31 = vmax.f32 %v416_v19, 0.0 }
 0x104   :  { %v409_v23 = vadd.f32 %v853_v28, %v386_v5  ;;  %v417_v24 = vadd.f32 %v853_v28, %v394_v20  ;;  %v427_v27 = vmax.f32 %v411_v21, 0.0 }
 0x105   :  { %v435_v29 = vmax.f32 %v419_v22, 0.0 }
 0x106   :  { %v425_v32 = vmax.f32 %v409_v23, 0.0  ;;  %v433_v33 = vmax.f32 %v417_v24, 0.0  ;;  %v614_v34 = vpack.c.bf16 %v427_v27, %v426_v25 }
 0x107   :  { %v634_v35 = vpack.c.bf16 %v435_v29, %v434_v26 }
 0x108   :  { %v609_v36 = vpack.c.bf16 %v425_v32, %v424_v30  ;;  %v629_v10 = vpack.c.bf16 %v433_v33, %v432_v31  ;;  %645 = vst [vmem:[%s901_s6 + $0x18] sm:$0xff] %v614_v34  }
 0x109   :  { %649 = vst [vmem:[%s901_s6 + $0x38] sm:$0xff] %v634_v35  }
 0x10a   :  { %644 = vst [vmem:[%s901_s6 + $0x10] sm:$0xff] %v609_v36   ;;  %648 = vst [vmem:[%s901_s6 + $0x30] sm:$0xff] %v629_v10  }

// kernel: densenet_forward.17
= control target key start
LH: loop header
LB: loop body
LE: loop exit
PB: predicated region body
PF: predicated region fallthrough
CT: control target
= control target key end

     0   :  { %s1239_s1 = inlined_call_operand.vmem [shape: bf16[384,128], index: 1, kind: input, shape index: {}]   ;;  %s1240_s2 = inlined_call_operand.vmem [shape: f32[1,384], index: 2, kind: input, shape index: {}]   ;;  %s1241_s3 = inlined_call_operand.vmem [shape: f32[1,384], index: 3, kind: input, shape index: {}]   ;;  %s1242_s4 = inlined_call_operand.vmem [shape: f32[1,128], index: 4, kind: input, shape index: {}]   ;;  %s1243_s5 = inlined_call_operand.vmem [shape: f32[1,128], index: 5, kind: input, shape index: {}]   ;;  %s1244_s0 = inlined_call_operand.vmem [shape: bf16[128,384], index: 0, kind: input, shape index: {}]   ;;  %s1245_s6 = inlined_call_operand.vmem [shape: bf16[128,128], index: 6, kind: output, shape index: {}]  }
   0x1   :  { %v980_v0 = vld [vmem:[%s1239_s1 + $0x40] sm:$0xff]   ;;  %v983_v3 = vld [vmem:[%s1239_s1 + $0x48] sm:$0xff]   ;;  %v986_v6 = vld [vmem:[%s1239_s1 + $0x50] sm:$0xff]  }
   0x2   :  { %v981_v1 = vld [vmem:[%s1239_s1] sm:$0xff]   ;;  %868 = vmatprep.subr.bf16.mxu0 %v980_v0  ;;  %v984_v4 = vld [vmem:[%s1239_s1 + $0x8] sm:$0xff]   ;;  %v987_v7 = vld [vmem:[%s1239_s1 + $0x10] sm:$0xff]  }
   0x3   :  { %v982_v2 = vld [vmem:[%s1239_s1 + $0x80] sm:$0xff]   ;;  %869 = vmatpush3.bf16.msra.mxu0 %v981_v1  ;;  %v985_v5 = vld [vmem:[%s1239_s1 + $0x88] sm:$0xff]   ;;  %v988_v8 = vld [vmem:[%s1239_s1 + $0x90] sm:$0xff]  }
   0x4   :  { %948 = vmatprep.subr.bf16.mxu1 %v982_v2  ;;  %870 = vmatprep.subr.bf16.mxu0 %v983_v3  ;;  %v989_v9 = vld [vmem:[%s1239_s1 + $0x58] sm:$0xff]   ;;  %v992_v12 = vld [vmem:[%s1239_s1 + $0x60] sm:$0xff]   ;;  %v995_v15 = vld [vmem:[%s1239_s1 + $0x68] sm:$0xff]  }
   0x5   :  { %949 = vmatpush3.bf16.msra.mxu1 %v982_v2  ;;  %v990_v10 = vld [vmem:[%s1239_s1 + $0x18] sm:$0xff]   ;;  %v994_v13 = vld [vmem:[%s1239_s1 + $0xa0] sm:$0xff]   ;;  %v997_v16 = vld [vmem:[%s1239_s1 + $0xa8] sm:$0xff]  }
   0x6   :  { %950 = vmatprep.subr.bf16.mxu1 %v985_v5  ;;  %v991_v11 = vld [vmem:[%s1239_s1 + $0x98] sm:$0xff]   ;;  %v993_v14 = vld [vmem:[%s1239_s1 + $0x20] sm:$0xff]   ;;  %v996_v17 = vld [vmem:[%s1239_s1 + $0x28] sm:$0xff]  }
   0x7   :  { %871 = vmatpush3.bf16.msra.mxu0 %v984_v4  ;;  %v998_v18 = vld [vmem:[%s1239_s1 + $0x70] sm:$0xff]   ;;  %v1001_v21 = vld [vmem:[%s1239_s1 + $0x78] sm:$0xff]   ;;  %v1004_v26 = vld [vmem:[%s1244_s0] ss:$12 sps:$4 sm:$0xff]  }
   0x8   :  { %872 = vmatprep.subr.bf16.mxu0 %v986_v6  ;;  %v999_v19 = vld [vmem:[%s1239_s1 + $0x30] sm:$0xff]   ;;  %v1003_v22 = vld [vmem:[%s1239_s1 + $0xb8] sm:$0xff]   ;;  %v1008_v28 = vld [vmem:[%s1244_s0 + $0x20] ss:$12 sps:$4 sm:$0xff]  }
   0x9   :  { %951 = vmatpush3.bf16.msra.mxu1 %v985_v5  ;;  %v1000_v20 = vld [vmem:[%s1239_s1 + $0xb0] sm:$0xff]   ;;  %v1002_v25 = vld [vmem:[%s1239_s1 + $0x38] sm:$0xff]   ;;  %v1024_v36 = vld [vmem:[%s1244_s0 + $0x80] ss:$12 sps:$4 sm:$0xff]  }
   0xa   :  { %952 = vmatprep.subr.bf16.mxu1 %v988_v8  ;;  %v1006_v23 = vld [vmem:[%s1244_s0 + $0x4] ss:$12 sps:$4 sm:$0xff]   ;;  %v1007_v24 = vld [vmem:[%s1244_s0 + $0x8] ss:$12 sps:$4 sm:$0xff]   ;;  %v1017_v35 = vld [vmem:[%s1244_s0 + $0x4c] ss:$12 sps:$4 sm:$0xff]  }
   0xb   :  { %873 = vmatpush3.bf16.msra.mxu0 %v987_v7  ;;  %444 = vmatprep.mubr.bf16.mxu0 %v1006_v23  ;;  %v1009_v27 = vld [vmem:[%s1244_s0 + $0x1c] ss:$12 sps:$4 sm:$0xff]   ;;  %v1015_v29 = vld [vmem:[%s1244_s0 + $0x38] ss:$12 sps:$4 sm:$0xff]   ;;  %v1012_v31 = vld [vmem:[%s1244_s0 + $0x34] ss:$12 sps:$4 sm:$0xff]  }
   0xc   :  { %874 = vmatprep.subr.bf16.mxu0 %v989_v9  ;;  %964 = vmatprep.mubr.bf16.mxu1 %v1007_v24  ;;  %v1011_v30 = vld [vmem:[%s1244_s0 + $0x18] ss:$12 sps:$4 sm:$0xff]   ;;  %v1016_v32 = vld [vmem:[%s1244_s0 + $0x50] ss:$12 sps:$4 sm:$0xff]   ;;  %v1023_v33 = vld [vmem:[%s1244_s0 + $0x68] ss:$12 sps:$4 sm:$0xff]  }
   0xd   :  { %953 = vmatpush3.bf16.msra.mxu1 %v988_v8  ;;  %v1014_v34 = vld [vmem:[%s1244_s0 + $0x30] ss:$12 sps:$4 sm:$0xff]   ;;  %v1031_v37 = vld [vmem:[%s1244_s0 + $0x98] ss:$12 sps:$4 sm:$0xff]   ;;  %v1019_v38 = vld [vmem:[%s1244_s0 + $0x48] ss:$12 sps:$4 sm:$0xff]  }
   0xe   :  { %954 = vmatprep.subr.bf16.mxu1 %v991_v11  ;;  %v1020_v39 = vld [vmem:[%s1244_s0 + $0x64] ss:$12 sps:$4 sm:$0xff]   ;;  %v1022_v41 = vld [vmem:[%s1244_s0 + $0x60] ss:$12 sps:$4 sm:$0xff]   ;;  %v1025_v42 = vld [vmem:[%s1244_s0 + $0x7c] ss:$12 sps:$4 sm:$0xff]  }
   0xf   :  { %875 = vmatpush3.bf16.msra.mxu0 %v990_v10  ;;  %v1032_v40 = vld [vmem:[%s1244_s0 + $0xb0] ss:$12 sps:$4 sm:$0xff]   ;;  %v1027_v43 = vld [vmem:[%s1244_s0 + $0x78] ss:$12 sps:$4 sm:$0xff]   ;;  %v1028_v44 = vld [vmem:[%s1244_s0 + $0x94] ss:$12 sps:$4 sm:$0xff]  }
  0x10   :  { %876 = vmatprep.subr.bf16.mxu0 %v992_v12  ;;  %v1030_v45 = vld [vmem:[%s1244_s0 + $0x90] ss:$12 sps:$4 sm:$0xff]   ;;  %v1033_v46 = vld [vmem:[%s1244_s0 + $0xac] ss:$12 sps:$4 sm:$0xff]   ;;  %v1035_v47 = vld [vmem:[%s1244_s0 + $0xa8] ss:$12 sps:$4 sm:$0xff]  }
  0x11   :  { %955 = vmatpush3.bf16.msra.mxu1 %v991_v11 }
  0x12   :  { %956 = vmatprep.subr.bf16.mxu1 %v994_v13 }
  0x13   :  { %877 = vmatpush3.bf16.msra.mxu0 %v993_v14 }
  0x14   :  { %878 = vmatprep.subr.bf16.mxu0 %v995_v15 }
  0x15   :  { %957 = vmatpush3.bf16.msra.mxu1 %v994_v13 }
  0x16   :  { %958 = vmatprep.subr.bf16.mxu1 %v997_v16 }
  0x17   :  { %879 = vmatpush3.bf16.msra.mxu0 %v996_v17 }
  0x18   :  { %880 = vmatprep.subr.bf16.mxu0 %v998_v18 }
  0x19   :  { %959 = vmatpush3.bf16.msra.mxu1 %v997_v16 }
  0x1a   :  { %960 = vmatprep.subr.bf16.mxu1 %v1000_v20 }
  0x1b   :  { %881 = vmatpush3.bf16.msra.mxu0 %v999_v19 }
  0x1c   :  { %882 = vmatprep.subr.bf16.mxu0 %v1001_v21 }
  0x1d   :  { %961 = vmatpush3.bf16.msra.mxu1 %v1000_v20 }
  0x1e   :  { %962 = vmatprep.subr.bf16.mxu1 %v1003_v22 }
  0x1f   :  { %883 = vmatpush3.bf16.msra.mxu0 %v1002_v25 }
  0x21   :  { %963 = vmatpush3.bf16.msra.mxu1 %v1003_v22 }
  0x22   :  { %445 = vmatmul.mubr.bf16.vlgmr.msra.gmra.mrb[0].mxu0 %v1004_v26 }
  0x23   :  { %452 = vmatprep.mubr.bf16.mxu0 %v1009_v27 }
  0x24   :  { %965 = vmatmul.mubr.bf16.vlgmr.msra.gmra.mrb[0].mxu1 %v1008_v28 }
  0x25   :  { %968 = vmatprep.mubr.bf16.mxu1 %v1015_v29 }
  0x2a   :  { %453 = vmatmul.mubr.bf16.gmra.mrb[4].mxu0 %v1011_v30 }
  0x2b   :  { %460 = vmatprep.mubr.bf16.mxu0 %v1012_v31 }
  0x2c   :  { %969 = vmatmul.mubr.bf16.gmra.mrb[4].mxu1 %v1016_v32 }
  0x2d   :  { %972 = vmatprep.mubr.bf16.mxu1 %v1023_v33 }
  0x32   :  { %461 = vmatmul.mubr.bf16.gmra.mrb[8].mxu0 %v1014_v34 }
  0x33   :  { %468 = vmatprep.mubr.bf16.mxu0 %v1017_v35 }
  0x34   :  { %973 = vmatmul.mubr.bf16.gmra.mrb[8].mxu1 %v1024_v36 }
  0x35   :  { %976 = vmatprep.mubr.bf16.mxu1 %v1031_v37 }
  0x3a   :  { %469 = vmatmul.mubr.bf16.gmra.mrb[12].mxu0 %v1019_v38 }
  0x3b   :  { %476 = vmatprep.mubr.bf16.mxu0 %v1020_v39 }
  0x3c   :  { %977 = vmatmul.mubr.bf16.gmra.mrb[12].mxu1 %v1032_v40 }
  0x42   :  { %477 = vmatmul.mubr.bf16.gmra.mrb[16].mxu0 %v1022_v41 }
  0x43   :  { %484 = vmatprep.mubr.bf16.mxu0 %v1025_v42 }
  0x4a   :  { %485 = vmatmul.mubr.bf16.gmra.mrb[20].mxu0 %v1027_v43 }
  0x4b   :  { %492 = vmatprep.mubr.bf16.mxu0 %v1028_v44 }
  0x52   :  { %493 = vmatmul.mubr.bf16.gmra.mrb[24].mxu0 %v1030_v45 }
  0x53   :  { %500 = vmatprep.mubr.bf16.mxu0 %v1033_v46 }
  0x5a   :  { %501 = vmatmul.mubr.bf16.gmra.mrb[28].mxu0 %v1035_v47 }
  0xf5   :  { %v884_v48 = vpop.f32.mrb[0].mxu0 }
  0xf6   :  { %v885_v49 = vpop.f32.mrb[1].mxu0 }
  0xf7   :  { %v886_v50 = vadd.f32 %v885_v49, %v884_v48  ;;  %v887_v51 = vpop.f32.mrb[2].mxu0  ;;  %v966_v52 = vpop.f32.mrb[0].mxu1 }
  0xf8   :  { %v888_v53 = vpop.f32.mrb[3].mxu0  ;;  %v543_v54 = vpop.f32.mrb[1].mxu1 }
  0xf9   :  { %v889_v55 = vadd.f32 %v888_v53, %v887_v51  ;;  %v544_v56 = vadd.f32 %v886_v50, %v543_v54  ;;  %v967_v57 = vpop.f32.mrb[2].mxu1 }
  0xfa   :  { %v546_v58 = vpop.f32.mrb[3].mxu1 }
  0xfb   :  { %v547_v59 = vadd.f32 %v889_v55, %v546_v58 }
  0xfd   :  { %v824_v60 = vpack.c.bf16 %v547_v59, %v544_v56  ;;  %v890_v61 = vpop.f32.mrb[4].mxu0 }
  0xfe   :  { %v891_v62 = vpop.f32.mrb[5].mxu0 }
  0xff   :  { %825 = vst [vmem:[%s1245_s6] sm:$0xff] %v824_v60   ;;  %v892_v63 = vadd.f32 %v891_v62, %v890_v61  ;;  %v893_v0 = vpop.f32.mrb[6].mxu0  ;;  %v970_v1 = vpop.f32.mrb[4].mxu1 }
 0x100   :  { %v894_v2 = vpop.f32.mrb[7].mxu0  ;;  %v559_v3 = vpop.f32.mrb[5].mxu1 }
 0x101   :  { %v552_v4 = vadd.f32 %v966_v52, %v892_v63  ;;  %v895_v5 = vadd.f32 %v894_v2, %v893_v0  ;;  %v971_v6 = vpop.f32.mrb[6].mxu1 }
 0x102   :  { %v562_v7 = vpop.f32.mrb[7].mxu1 }
 0x103   :  { %v555_v8 = vadd.f32 %v967_v57, %v895_v5 }
 0x105   :  { %v829_v9 = vpack.c.bf16 %v555_v8, %v552_v4  ;;  %v896_v10 = vpop.f32.mrb[8].mxu0 }
 0x106   :  { %v897_v11 = vpop.f32.mrb[9].mxu0 }
 0x107   :  { %861 = vst [vmem:[%s1245_s6 + $0x8] sm:$0xff] %v829_v9   ;;  %v898_v12 = vadd.f32 %v897_v11, %v896_v10  ;;  %v899_v13 = vpop.f32.mrb[10].mxu0  ;;  %v974_v14 = vpop.f32.mrb[8].mxu1 }
 0x108   :  { %v900_v15 = vpop.f32.mrb[11].mxu0  ;;  %v575_v16 = vpop.f32.mrb[9].mxu1 }
 0x109   :  { %v901_v17 = vadd.f32 %v900_v15, %v899_v13  ;;  %v560_v18 = vadd.f32 %v898_v12, %v559_v3  ;;  %v975_v19 = vpop.f32.mrb[10].mxu1 }
 0x10a   :  { %v578_v20 = vpop.f32.mrb[11].mxu1 }
 0x10b   :  { %v563_v21 = vadd.f32 %v901_v17, %v562_v7 }
 0x10d   :  { %v834_v22 = vpack.c.bf16 %v563_v21, %v560_v18  ;;  %v902_v23 = vpop.f32.mrb[12].mxu0 }
 0x10e   :  { %v903_v24 = vpop.f32.mrb[13].mxu0 }
 0x10f   :  { %862 = vst [vmem:[%s1245_s6 + $0x10] sm:$0xff] %v834_v22   ;;  %v904_v25 = vadd.f32 %v903_v24, %v902_v23  ;;  %v905_v26 = vpop.f32.mrb[14].mxu0  ;;  %v978_v27 = vpop.f32.mrb[12].mxu1 }
 0x110   :  { %v906_v28 = vpop.f32.mrb[15].mxu0  ;;  %v591_v29 = vpop.f32.mrb[13].mxu1 }
 0x111   :  { %v568_v30 = vadd.f32 %v970_v1, %v904_v25  ;;  %v907_v31 = vadd.f32 %v906_v28, %v905_v26  ;;  %v979_v32 = vpop.f32.mrb[14].mxu1 }
 0x112   :  { %v594_v33 = vpop.f32.mrb[15].mxu1 }
 0x113   :  { %v571_v34 = vadd.f32 %v971_v6, %v907_v31 }
 0x115   :  { %v839_v35 = vpack.c.bf16 %v571_v34, %v568_v30  ;;  %v908_v36 = vpop.f32.mrb[16].mxu0 }
 0x116   :  { %v909_v37 = vpop.f32.mrb[17].mxu0 }
 0x117   :  { %863 = vst [vmem:[%s1245_s6 + $0x18] sm:$0xff] %v839_v35   ;;  %v910_v38 = vadd.f32 %v909_v37, %v908_v36  ;;  %v911_v39 = vpop.f32.mrb[18].mxu0 }
 0x118   :  { %v912_v40 = vpop.f32.mrb[19].mxu0 }
 0x119   :  { %v913_v41 = vadd.f32 %v912_v40, %v911_v39  ;;  %v576_v42 = vadd.f32 %v910_v38, %v575_v16 }
 0x11b   :  { %v579_v43 = vadd.f32 %v913_v41, %v578_v20 }
 0x11d   :  { %v844_v44 = vpack.c.bf16 %v579_v43, %v576_v42  ;;  %v914_v45 = vpop.f32.mrb[20].mxu0 }
 0x11e   :  { %v915_v46 = vpop.f32.mrb[21].mxu0 }
 0x11f   :  { %864 = vst [vmem:[%s1245_s6 + $0x20] sm:$0xff] %v844_v44   ;;  %v916_v47 = vadd.f32 %v915_v46, %v914_v45  ;;  %v917_v48 = vpop.f32.mrb[22].mxu0 }
 0x120   :  { %v918_v49 = vpop.f32.mrb[23].mxu0 }
 0x121   :  { %v584_v50 = vadd.f32 %v974_v14, %v916_v47  ;;  %v919_v51 = vadd.f32 %v918_v49, %v917_v48 }
 0x123   :  { %v587_v52 = vadd.f32 %v975_v19, %v919_v51 }
 0x125   :  { %v849_v53 = vpack.c.bf16 %v587_v52, %v584_v50  ;;  %v920_v54 = vpop.f32.mrb[24].mxu0 }
 0x126   :  { %v921_v55 = vpop.f32.mrb[25].mxu0 }
 0x127   :  { %865 = vst [vmem:[%s1245_s6 + $0x28] sm:$0xff] %v849_v53   ;;  %v922_v56 = vadd.f32 %v921_v55, %v920_v54  ;;  %v923_v57 = vpop.f32.mrb[26].mxu0 }
 0x128   :  { %v924_v58 = vpop.f32.mrb[27].mxu0 }
 0x129   :  { %v925_v59 = vadd.f32 %v924_v58, %v923_v57  ;;  %v592_v60 = vadd.f32 %v922_v56, %v591_v29 }
 0x12b   :  { %v595_v61 = vadd.f32 %v925_v59, %v594_v33 }
 0x12d   :  { %v854_v62 = vpack.c.bf16 %v595_v61, %v592_v60  ;;  %v926_v63 = vpop.f32.mrb[28].mxu0 }
 0x12e   :  { %v927_v0 = vpop.f32.mrb[29].mxu0 }
 0x12f   :  { %866 = vst [vmem:[%s1245_s6 + $0x30] sm:$0xff] %v854_v62   ;;  %v928_v1 = vadd.f32 %v927_v0, %v926_v63  ;;  %v929_v2 = vpop.f32.mrb[30].mxu0 }
 0x130   :  { %v930_v3 = vpop.f32.mrb[31].mxu0 }
 0x131   :  { %v600_v4 = vadd.f32 %v978_v27, %v928_v1  ;;  %v931_v5 = vadd.f32 %v930_v3, %v929_v2 }
 0x133   :  { %v603_v6 = vadd.f32 %v979_v32, %v931_v5 }
 0x135   :  { %v859_v7 = vpack.c.bf16 %v603_v6, %v600_v4 }
 0x137   :  { %867 = vst [vmem:[%s1245_s6 + $0x38] sm:$0xff] %v859_v7  }

// kernel: densenet_forward.20
= control target key start
LH: loop header
LB: loop body
LE: loop exit
PB: predicated region body
PF: predicated region fallthrough
CT: control target
= control target key end

     0   :  { %s807_s1 = inlined_call_operand.vmem [shape: bf16[128,128], index: 1, kind: input, shape index: {}]   ;;  %s808_s4 = inlined_call_operand.vmem [shape: f32[1,128], index: 4, kind: input, shape index: {}]   ;;  %s809_s5 = inlined_call_operand.vmem [shape: f32[1,128], index: 5, kind: input, shape index: {}]   ;;  %s810_s0 = inlined_call_operand.vmem [shape: bf16[128,128], index: 0, kind: input, shape index: {}]   ;;  %s811_s2 = inlined_call_operand.vmem [shape: f32[1,128], index: 2, kind: input, shape index: {}]   ;;  %s812_s3 = inlined_call_operand.vmem [shape: f32[1,128], index: 3, kind: input, shape index: {}]   ;;  %s813_s6 = inlined_call_operand.vmem [shape: bf16[128,128], index: 6, kind: output, shape index: {}]  }
   0x1   :  { %v650_v0 = vld [vmem:[%s807_s1] sm:$0xff]   ;;  %v651_v1 = vld [vmem:[%s807_s1 + $0x8] sm:$0xff]   ;;  %v652_v2 = vld [vmem:[%s807_s1 + $0x10] sm:$0xff]  }
   0x2   :  { %602 = vmatprep.subr.bf16.mxu0 %v650_v0  ;;  %634 = vmatprep.subr.bf16.mxu1 %v650_v0  ;;  %v653_v3 = vld [vmem:[%s807_s1 + $0x18] sm:$0xff]   ;;  %v501_v4 = vld [vmem:[%s810_s0] sm:$0xff]   ;;  %v572_v9 = vld [vmem:[%s810_s0 + $0x8] sm:$0xff]  }
   0x3   :  { %603 = vmatpush3.bf16.msra.mxu0 %v650_v0  ;;  %642 = vmatpush3.bf16.msra.mxu1 %v650_v0  ;;  %v711_v5 = vld [vmem:[%s811_s2] ss:$0 sm:$0xff]  ;;  %v502_v6 = vunpack.c.l.bf16 %v501_v4  ;;  %v503_v7 = vunpack.c.h.bf16 %v501_v4  ;;  %v576_v13 = vld [vmem:[%s810_s0 + $0x28] sm:$0xff]   ;;  %v573_v16 = vld [vmem:[%s810_s0 + $0x10] sm:$0xff]   ;;  %v506_v20 = vunpack.c.l.bf16 %v572_v9  ;;  %v507_v21 = vunpack.c.h.bf16 %v572_v9 }
   0x4   :  { %604 = vmatprep.subr.bf16.mxu0 %v651_v1  ;;  %635 = vmatprep.subr.bf16.mxu1 %v651_v1  ;;  %v575_v8 = vld [vmem:[%s810_s0 + $0x20] sm:$0xff]   ;;  %v522_v24 = vunpack.c.l.bf16 %v576_v13  ;;  %v523_v25 = vunpack.c.h.bf16 %v576_v13  ;;  %v510_v28 = vunpack.c.l.bf16 %v573_v16  ;;  %v577_v31 = vld [vmem:[%s810_s0 + $0x30] sm:$0xff]   ;;  %v655_v32 = vld [vmem:[%s807_s1 + $0x28] sm:$0xff]   ;;  %v511_v40 = vunpack.c.h.bf16 %v573_v16 }
   0x5   :  { %v722_v10 = vld [vmem:[%s812_s3] ss:$0 sm:$0xff]  ;;  %v518_v11 = vunpack.c.l.bf16 %v575_v8  ;;  %v519_v12 = vunpack.c.h.bf16 %v575_v8  ;;  %v83_v14 = vmul.f32 %v502_v6, %v711_v5  ;;  %v84_v15 = vmul.f32 %v503_v7, %v711_v5  ;;  %v574_v44 = vld [vmem:[%s810_s0 + $0x18] sm:$0xff]   ;;  %v656_v48 = vld [vmem:[%s807_s1 + $0x30] sm:$0xff]  }
   0x6   :  { %v654_v17 = vld [vmem:[%s807_s1 + $0x20] sm:$0xff]   ;;  %v85_v35 = vmul.f32 %v506_v20, %v711_v5  ;;  %v86_v36 = vmul.f32 %v507_v21, %v711_v5  ;;  %v93_v38 = vmul.f32 %v522_v24, %v711_v5  ;;  %v94_v39 = vmul.f32 %v523_v25, %v711_v5  ;;  %v578_v47 = vld [vmem:[%s810_s0 + $0x38] sm:$0xff]  }
   0x7   :  { %605 = vmatpush3.bf16.msra.mxu0 %v651_v1  ;;  %643 = vmatpush3.bf16.msra.mxu1 %v651_v1  ;;  %v91_v18 = vmul.f32 %v518_v11, %v711_v5  ;;  %v92_v19 = vmul.f32 %v519_v12, %v711_v5  ;;  %v106_v22 = vadd.f32 %v722_v10, %v83_v14  ;;  %v526_v43 = vunpack.c.l.bf16 %v577_v31  ;;  %v657_v63 = vld [vmem:[%s807_s1 + $0x38] sm:$0xff]  }
   0x8   :  { %606 = vmatprep.subr.bf16.mxu0 %v652_v2  ;;  %636 = vmatprep.subr.bf16.mxu1 %v652_v2  ;;  %v107_v23 = vadd.f32 %v722_v10, %v84_v15  ;;  %v87_v42 = vmul.f32 %v510_v28, %v711_v5  ;;  %v88_v45 = vmul.f32 %v511_v40, %v711_v5  ;;  %v527_v46 = vunpack.c.h.bf16 %v577_v31 }
   0x9   :  { %v114_v26 = vadd.f32 %v722_v10, %v91_v18  ;;  %v115_v27 = vadd.f32 %v722_v10, %v92_v19  ;;  %v122_v29 = vmax.f32 %v106_v22, 0.0  ;;  %v108_v49 = vadd.f32 %v722_v10, %v85_v35 }
   0xa   :  { %v123_v30 = vmax.f32 %v107_v23, 0.0  ;;  %v109_v50 = vadd.f32 %v722_v10, %v86_v36  ;;  %v95_v51 = vmul.f32 %v526_v43, %v711_v5  ;;  %v116_v52 = vadd.f32 %v722_v10, %v93_v38 }
   0xb   :  { %607 = vmatpush3.bf16.msra.mxu0 %v652_v2  ;;  %644 = vmatpush3.bf16.msra.mxu1 %v652_v2  ;;  %v130_v33 = vmax.f32 %v114_v26, 0.0  ;;  %v131_v34 = vmax.f32 %v115_v27, 0.0  ;;  %v117_v53 = vadd.f32 %v722_v10, %v94_v39  ;;  %v96_v54 = vmul.f32 %v527_v46, %v711_v5 }
   0xc   :  { %608 = vmatprep.subr.bf16.mxu0 %v653_v3  ;;  %637 = vmatprep.subr.bf16.mxu1 %v653_v3  ;;  %v138_v37 = vpack.c.bf16 %v123_v30, %v122_v29  ;;  %v514_v55 = vunpack.c.l.bf16 %v574_v44  ;;  %v110_v56 = vadd.f32 %v722_v10, %v87_v42  ;;  %v515_v57 = vunpack.c.h.bf16 %v574_v44 }
   0xd   :  { %v142_v41 = vpack.c.bf16 %v131_v34, %v130_v33  ;;  %v530_v58 = vunpack.c.l.bf16 %v578_v47  ;;  %v531_v59 = vunpack.c.h.bf16 %v578_v47  ;;  %v111_v60 = vadd.f32 %v722_v10, %v88_v45 }
   0xe   :  { %618 = vmatprep.mubr.bf16.mxu0 %v138_v37  ;;  %v118_v61 = vadd.f32 %v722_v10, %v95_v51  ;;  %v119_v62 = vadd.f32 %v722_v10, %v96_v54  ;;  %v124_v0 = vmax.f32 %v108_v49, 0.0  ;;  %v125_v1 = vmax.f32 %v109_v50, 0.0 }
   0xf   :  { %609 = vmatpush3.bf16.msra.mxu0 %v653_v3  ;;  %645 = vmatpush3.bf16.msra.mxu1 %v653_v3  ;;  %v132_v2 = vmax.f32 %v116_v52, 0.0  ;;  %v133_v3 = vmax.f32 %v117_v53, 0.0  ;;  %v89_v4 = vmul.f32 %v514_v55, %v711_v5  ;;  %v90_v6 = vmul.f32 %v515_v57, %v711_v5 }
  0x10   :  { %610 = vmatprep.subr.bf16.mxu0 %v654_v17  ;;  %638 = vmatprep.subr.bf16.mxu1 %v654_v17  ;;  %v97_v7 = vmul.f32 %v530_v58, %v711_v5  ;;  %v98_v8 = vmul.f32 %v531_v59, %v711_v5  ;;  %v126_v9 = vmax.f32 %v110_v56, 0.0  ;;  %v127_v11 = vmax.f32 %v111_v60, 0.0 }
  0x11   :  { %626 = vmatprep.mubr.bf16.mxu1 %v142_v41  ;;  %v134_v12 = vmax.f32 %v118_v61, 0.0  ;;  %v135_v13 = vmax.f32 %v119_v62, 0.0  ;;  %v139_v14 = vpack.c.bf16 %v125_v1, %v124_v0  ;;  %v143_v15 = vpack.c.bf16 %v133_v3, %v132_v2 }
  0x12   :  { %v112_v16 = vadd.f32 %v722_v10, %v89_v4  ;;  %v120_v18 = vadd.f32 %v722_v10, %v97_v7  ;;  %v121_v19 = vadd.f32 %v722_v10, %v98_v8  ;;  %v140_v5 = vpack.c.bf16 %v127_v11, %v126_v9 }
  0x13   :  { %611 = vmatpush3.bf16.msra.mxu0 %v654_v17  ;;  %646 = vmatpush3.bf16.msra.mxu1 %v654_v17  ;;  %v113_v17 = vadd.f32 %v722_v10, %v90_v6  ;;  %v144_v20 = vpack.c.bf16 %v135_v13, %v134_v12 }
  0x14   :  { %612 = vmatprep.subr.bf16.mxu0 %v655_v32  ;;  %639 = vmatprep.subr.bf16.mxu1 %v655_v32  ;;  %v128_v21 = vmax.f32 %v112_v16, 0.0  ;;  %v136_v23 = vmax.f32 %v120_v18, 0.0  ;;  %v137_v24 = vmax.f32 %v121_v19, 0.0 }
  0x15   :  { %v129_v22 = vmax.f32 %v113_v17, 0.0 }
  0x16   :  { %v145_v26 = vpack.c.bf16 %v137_v24, %v136_v23 }
  0x17   :  { %613 = vmatpush3.bf16.msra.mxu0 %v655_v32  ;;  %647 = vmatpush3.bf16.msra.mxu1 %v655_v32  ;;  %v141_v25 = vpack.c.bf16 %v129_v22, %v128_v21 }
  0x18   :  { %614 = vmatprep.subr.bf16.mxu0 %v656_v48  ;;  %640 = vmatprep.subr.bf16.mxu1 %v656_v48 }
  0x1b   :  { %615 = vmatpush3.bf16.msra.mxu0 %v656_v48  ;;  %648 = vmatpush3.bf16.msra.mxu1 %v656_v48 }
  0x1c   :  { %616 = vmatprep.subr.bf16.mxu0 %v657_v63  ;;  %641 = vmatprep.subr.bf16.mxu1 %v657_v63 }
  0x1f   :  { %617 = vmatpush3.bf16.msra.mxu0 %v657_v63  ;;  %649 = vmatpush3.bf16.msra.mxu1 %v657_v63 }
  0x22   :  { %619 = vmatmul.mubr.bf16.vlgmr.msra.gmra.mrb[0].mxu0 %v139_v14  ;;  %627 = vmatmul.mubr.bf16.vlgmr.msra.gmra.mrb[0].mxu1 %v143_v15 }
  0x23   :  { %622 = vmatprep.mubr.bf16.mxu0 %v140_v5  ;;  %630 = vmatprep.mubr.bf16.mxu1 %v144_v20 }
  0x2a   :  { %623 = vmatmul.mubr.bf16.gmra.mrb[4].mxu0 %v141_v25  ;;  %631 = vmatmul.mubr.bf16.gmra.mrb[4].mxu1 %v145_v26 }
  0xf5   :  { %v620_v27 = vpop.f32.mrb[0].mxu0  ;;  %v628_v28 = vpop.f32.mrb[0].mxu1 }
  0xf6   :  { %v260_v29 = vpop.f32.mrb[1].mxu0  ;;  %v292_v10 = vpop.f32.mrb[1].mxu1 }
  0xf7   :  { %v621_v30 = vpop.f32.mrb[2].mxu0  ;;  %v629_v31 = vpop.f32.mrb[2].mxu1 }
  0xf8   :  { %v540_v32 = vpack.c.bf16 %v621_v30, %v620_v27  ;;  %v560_v33 = vpack.c.bf16 %v629_v31, %v628_v28  ;;  %v263_v34 = vpop.f32.mrb[3].mxu0  ;;  %v295_v35 = vpop.f32.mrb[3].mxu1 }
  0xf9   :  { %v535_v36 = vpack.c.bf16 %v263_v34, %v260_v29  ;;  %v555_v37 = vpack.c.bf16 %v295_v35, %v292_v10 }
  0xfa   :  { %579 = vst [vmem:[%s813_s6 + $0x8] sm:$0xff] %v540_v32   ;;  %583 = vst [vmem:[%s813_s6 + $0x28] sm:$0xff] %v560_v33  }
  0xfb   :  { %536 = vst [vmem:[%s813_s6] sm:$0xff] %v535_v36   ;;  %582 = vst [vmem:[%s813_s6 + $0x20] sm:$0xff] %v555_v37  }
  0xfd   :  { %v624_v38 = vpop.f32.mrb[4].mxu0  ;;  %v632_v39 = vpop.f32.mrb[4].mxu1 }
  0xfe   :  { %v276_v40 = vpop.f32.mrb[5].mxu0  ;;  %v308_v41 = vpop.f32.mrb[5].mxu1 }
  0xff   :  { %v625_v42 = vpop.f32.mrb[6].mxu0  ;;  %v633_v43 = vpop.f32.mrb[6].mxu1 }
 0x100   :  { %v550_v44 = vpack.c.bf16 %v625_v42, %v624_v38  ;;  %v570_v45 = vpack.c.bf16 %v633_v43, %v632_v39  ;;  %v279_v46 = vpop.f32.mrb[7].mxu0  ;;  %v311_v47 = vpop.f32.mrb[7].mxu1 }
 0x101   :  { %v545_v48 = vpack.c.bf16 %v279_v46, %v276_v40  ;;  %v565_v49 = vpack.c.bf16 %v311_v47, %v308_v41 }
 0x102   :  { %581 = vst [vmem:[%s813_s6 + $0x18] sm:$0xff] %v550_v44   ;;  %585 = vst [vmem:[%s813_s6 + $0x38] sm:$0xff] %v570_v45  }
 0x103   :  { %580 = vst [vmem:[%s813_s6 + $0x10] sm:$0xff] %v545_v48   ;;  %584 = vst [vmem:[%s813_s6 + $0x30] sm:$0xff] %v565_v49  }

// kernel: densenet_forward.21
= control target key start
LH: loop header
LB: loop body
LE: loop exit
PB: predicated region body
PF: predicated region fallthrough
CT: control target
= control target key end

     0   :  { %vm72_vm0 = vcmask 322560   ;;  %vm490_vm1 = vcmask 1041409   ;;  %vm492_vm2 = vcmask 1042434   ;;  %vm494_vm3 = vcmask 1043459   ;;  %s1131_s0 = inlined_call_operand.vmem [shape: bf16[32,4,40], index: 0, kind: input, shape index: {}]   ;;  %s1132_s1 = inlined_call_operand.vmem [shape: bf16[32,40], index: 1, kind: output, shape index: {}]  }
   0x1   :  { %v618_v0 = vld [vmem:[%s1131_s0] sm:$0x3]  ;;  %v623_v1 = vld [vmem:[%s1131_s0 + $0x2] sm:$0x3]  ;;  %v628_v2 = vld [vmem:[%s1131_s0 + $0x4] sm:$0x3] }
   0x2   :  { %v633_v3 = vld [vmem:[%s1131_s0 + $0x6] sm:$0x3]  ;;  %v638_v4 = vld [vmem:[%s1131_s0 + $0x8] sm:$0x3]  ;;  %v643_v5 = vld [vmem:[%s1131_s0 + $0xa] sm:$0x3]  ;;  %v40_v12 = vunpack.c.l.bf16 %v618_v0  ;;  %v41_v13 = vunpack.c.l.bf16 %v623_v1  ;;  %v42_v14 = vunpack.c.l.bf16 %v628_v2 }
   0x3   :  { %v648_v6 = vld [vmem:[%s1131_s0 + $0xc] sm:$0x3]  ;;  %v653_v7 = vld [vmem:[%s1131_s0 + $0xe] sm:$0x3]  ;;  %v658_v8 = vld [vmem:[%s1131_s0 + $0x10] sm:$0x3]  ;;  %v43_v18 = vunpack.c.l.bf16 %v633_v3  ;;  %v44_v19 = vunpack.c.l.bf16 %v638_v4  ;;  %v45_v20 = vunpack.c.l.bf16 %v643_v5 }
   0x4   :  { %v663_v9 = vld [vmem:[%s1131_s0 + $0x12] sm:$0x3]  ;;  %v668_v10 = vld [vmem:[%s1131_s0 + $0x14] sm:$0x3]  ;;  %v673_v11 = vld [vmem:[%s1131_s0 + $0x16] sm:$0x3]  ;;  %v46_v21 = vunpack.c.l.bf16 %v648_v6  ;;  %v47_v25 = vunpack.c.l.bf16 %v653_v7  ;;  %v48_v26 = vunpack.c.l.bf16 %v658_v8 }
   0x5   :  { %v681_v15 = vld [vmem:[%s1131_s0 + $0x18] sm:$0x3]  ;;  %v686_v16 = vld [vmem:[%s1131_s0 + $0x1a] sm:$0x3]  ;;  %v691_v17 = vld [vmem:[%s1131_s0 + $0x1c] sm:$0x3]  ;;  %v49_v27 = vunpack.c.l.bf16 %v663_v9  ;;  %v50_v28 = vunpack.c.l.bf16 %v668_v10  ;;  %v51_v32 = vunpack.c.l.bf16 %v673_v11 }
   0x6   :  { %v700_v22 = vld [vmem:[%s1131_s0 + $0x1e] sm:$0x3]  ;;  %v705_v23 = vld [vmem:[%s1131_s0 + $0x20] sm:$0x3]  ;;  %v710_v24 = vld [vmem:[%s1131_s0 + $0x22] sm:$0x3]  ;;  %v52_v33 = vunpack.c.l.bf16 %v681_v15  ;;  %v53_v34 = vunpack.c.l.bf16 %v686_v16  ;;  %v54_v35 = vunpack.c.l.bf16 %v691_v17 }
   0x7   :  { %v719_v29 = vld [vmem:[%s1131_s0 + $0x24] sm:$0x3]  ;;  %v724_v30 = vld [vmem:[%s1131_s0 + $0x26] sm:$0x3]  ;;  %v729_v31 = vld [vmem:[%s1131_s0 + $0x28] sm:$0x3] }
   0x8   :  { %v738_v36 = vld [vmem:[%s1131_s0 + $0x2a] sm:$0x3]  ;;  %v743_v37 = vld [vmem:[%s1131_s0 + $0x2c] sm:$0x3]  ;;  %v748_v38 = vld [vmem:[%s1131_s0 + $0x2e] sm:$0x3] }
   0x9   :  { %v757_v43 = vld [vmem:[%s1131_s0 + $0x30] sm:$0x3]  ;;  %v762_v44 = vld [vmem:[%s1131_s0 + $0x32] sm:$0x3]  ;;  %v767_v45 = vld [vmem:[%s1131_s0 + $0x34] sm:$0x3] }
   0xa   :  { %v776_v50 = vld [vmem:[%s1131_s0 + $0x36] sm:$0x3]  ;;  %v781_v51 = vld [vmem:[%s1131_s0 + $0x38] sm:$0x3]  ;;  %v786_v52 = vld [vmem:[%s1131_s0 + $0x3a] sm:$0x3] }
   0xb   :  { %v795_v57 = vld [vmem:[%s1131_s0 + $0x3c] sm:$0x3]  ;;  %v800_v58 = vld [vmem:[%s1131_s0 + $0x3e] sm:$0x3]  ;;  %v73_v62 = vsel %vm72_vm0, %v40_v12, 0.0  ;;  %v80_v2 = vsel %vm72_vm0, %v41_v13, 0.0 }
   0xc   :  { %v74_v1 = vrot.slane %v73_v62, 4  ;;  %v81_v3 = vrot.slane %v80_v2, 4  ;;  %v87_v4 = vsel %vm72_vm0, %v42_v14, 0.0  ;;  %v94_v5 = vsel %vm72_vm0, %v43_v18, 0.0 }
   0xd   :  { %v101_v6 = vsel %vm72_vm0, %v44_v19, 0.0  ;;  %v88_v60 = vrot.slane %v87_v4, 4  ;;  %v95_v59 = vrot.slane %v94_v5, 4  ;;  %v108_v12 = vsel %vm72_vm0, %v45_v20, 0.0 }
   0xe   :  { %v75_v7 = vadd.f32 %v74_v1, %v73_v62  ;;  %v102_v61 = vrot.slane %v101_v6, 4  ;;  %v82_v56 = vadd.f32 %v81_v3, %v80_v2  ;;  %v115_v63 = vsel %vm72_vm0, %v46_v21, 0.0 }
   0xf   :  { %v122_v0 = vsel %vm72_vm0, %v47_v25, 0.0  ;;  %v89_v13 = vadd.f32 %v88_v60, %v87_v4  ;;  %v96_v54 = vadd.f32 %v95_v59, %v94_v5  ;;  %v109_v49 = vrot.slane %v108_v12, 4 }
  0x10   :  { %v76_v55 = vrot.slane %v75_v7, 2  ;;  %v103_v53 = vadd.f32 %v102_v61, %v101_v6  ;;  %v83_v14 = vrot.slane %v82_v56, 2  ;;  %v116_v18 = vrot.slane %v115_v63, 4 }
  0x11   :  { %v123_v48 = vrot.slane %v122_v0, 4  ;;  %v90_v62 = vrot.slane %v89_v13, 2  ;;  %v97_v1 = vrot.slane %v96_v54, 2  ;;  %v110_v2 = vadd.f32 %v109_v49, %v108_v12 }
  0x12   :  { %v77_v19 = vadd.f32 %v76_v55, %v75_v7  ;;  %v104_v47 = vrot.slane %v103_v53, 2  ;;  %v84_v46 = vadd.f32 %v83_v14, %v82_v56  ;;  %v117_v3 = vadd.f32 %v116_v18, %v115_v63 }
  0x13   :  { %v124_v20 = vadd.f32 %v123_v48, %v122_v0  ;;  %v91_v21 = vadd.f32 %v90_v62, %v89_v13  ;;  %v98_v41 = vadd.f32 %v97_v1, %v96_v54  ;;  %v111_v60 = vrot.slane %v110_v2, 2 }
  0x14   :  { %v78_v42 = vrot.slane %v77_v19, 1  ;;  %v105_v25 = vadd.f32 %v104_v47, %v103_v53  ;;  %v85_v40 = vrot.slane %v84_v46, 1  ;;  %v118_v59 = vrot.slane %v117_v3, 2 }
  0x15   :  { %v125_v61 = vrot.slane %v124_v20, 2  ;;  %v92_v5 = vrot.slane %v91_v21, 1  ;;  %v99_v6 = vrot.slane %v98_v41, 1  ;;  %v112_v39 = vadd.f32 %v111_v60, %v110_v2 }
  0x16   :  { %v815_v4 = vadd.f32 %v78_v42, %v77_v19  ;;  %v106_v55 = vrot.slane %v105_v25, 1  ;;  %v817_v7 = vadd.f32 %v85_v40, %v84_v46  ;;  %v119_v56 = vadd.f32 %v118_v59, %v117_v3 }
  0x17   :  { %v126_v49 = vadd.f32 %v125_v61, %v124_v20  ;;  %v819_v63 = vadd.f32 %v92_v5, %v91_v21  ;;  %v821_v48 = vadd.f32 %v99_v6, %v98_v41  ;;  %v129_v47 = vsel %vm72_vm0, %v48_v26, 0.0 }
  0x18   :  { %v823_v54 = vadd.f32 %v106_v55, %v105_v25  ;;  %v113_v42 = vrot.slane %v112_v39, 1  ;;  %v120_v53 = vrot.slane %v119_v56, 1  ;;  %v130_v12 = vrot.slane %v129_v47, 4 }
  0x19   :  { %v127_v0 = vrot.slane %v126_v49, 1  ;;  %v136_v40 = vsel %vm72_vm0, %v49_v27, 0.0  ;;  %v143_v46 = vsel %vm72_vm0, %v50_v28, 0.0  ;;  %v150_v41 = vsel %vm72_vm0, %v51_v32, 0.0 }
  0x1a   :  { %v157_v8 = vsel %vm72_vm0, %v52_v33, 0.0  ;;  %v840_v26 = vadd.f32 %v113_v42, %v112_v39  ;;  %v842_v13 = vadd.f32 %v120_v53, %v119_v56  ;;  %v131_v9 = vadd.f32 %v130_v12, %v129_v47 }
  0x1b   :  { %v844_v14 = vadd.f32 %v127_v0, %v126_v49  ;;  %v137_v27 = vrot.slane %v136_v40, 4  ;;  %v144_v18 = vrot.slane %v143_v46, 4  ;;  %v151_v10 = vrot.slane %v150_v41, 4 }
  0x1c   :  { %v158_v19 = vrot.slane %v157_v8, 4  ;;  %v132_v28 = vrot.slane %v131_v9, 2  ;;  %v164_v11 = vsel %vm72_vm0, %v53_v34, 0.0  ;;  %v171_v15 = vsel %vm72_vm0, %v54_v35, 0.0 }
  0x1d   :  { %v1133_v32 = vunpack.c.l.bf16 %v700_v22  ;;  %v138_v39 = vadd.f32 %v137_v27, %v136_v40  ;;  %v145_v62 = vadd.f32 %v144_v18, %v143_v46  ;;  %v152_v1 = vadd.f32 %v151_v10, %v150_v41 }
  0x1e   :  { %v159_v2 = vadd.f32 %v158_v19, %v157_v8  ;;  %v133_v3 = vadd.f32 %v132_v28, %v131_v9  ;;  %v165_v20 = vrot.slane %v164_v11, 4  ;;  %v172_v21 = vrot.slane %v171_v15, 4 }
  0x1f   :  { %v178_v33 = vsel %vm72_vm0, %v1133_v32, 0.0  ;;  %v139_v60 = vrot.slane %v138_v39, 2  ;;  %v146_v16 = vrot.slane %v145_v62, 2  ;;  %v153_v59 = vrot.slane %v152_v1, 2 }
  0x20   :  { %v179_v25 = vrot.slane %v178_v33, 4  ;;  %v160_v34 = vrot.slane %v159_v2, 2  ;;  %v134_v61 = vrot.slane %v133_v3, 1  ;;  %v166_v17 = vadd.f32 %v165_v20, %v164_v11 }
  0x21   :  { %v173_v5 = vadd.f32 %v172_v21, %v171_v15  ;;  %v140_v6 = vadd.f32 %v139_v60, %v138_v39  ;;  %v147_v22 = vadd.f32 %v146_v16, %v145_v62  ;;  %v154_v55 = vadd.f32 %v153_v59, %v152_v1 }
  0x22   :  { %v180_v35 = vadd.f32 %v179_v25, %v178_v33  ;;  %v161_v56 = vadd.f32 %v160_v34, %v159_v2  ;;  %v855_v49 = vadd.f32 %v134_v61, %v133_v3  ;;  %v167_v47 = vrot.slane %v166_v17, 2 }
  0x23   :  { %v174_v42 = vrot.slane %v173_v5, 2  ;;  %v141_v0 = vrot.slane %v140_v6, 1  ;;  %v148_v12 = vrot.slane %v147_v22, 1  ;;  %v155_v40 = vrot.slane %v154_v55, 1 }
  0x24   :  { %v181_v53 = vrot.slane %v180_v35, 2  ;;  %v162_v46 = vrot.slane %v161_v56, 1  ;;  %v168_v41 = vadd.f32 %v167_v47, %v166_v17  ;;  %v1134_v27 = vunpack.c.l.bf16 %v705_v23 }
  0x25   :  { %v175_v8 = vadd.f32 %v174_v42, %v173_v5  ;;  %v860_v10 = vadd.f32 %v141_v0, %v140_v6  ;;  %v862_v19 = vadd.f32 %v148_v12, %v147_v22  ;;  %v864_v28 = vadd.f32 %v155_v40, %v154_v55 }
  0x26   :  { %v182_v9 = vadd.f32 %v181_v53, %v180_v35  ;;  %v185_v18 = vsel %vm72_vm0, %v1134_v27, 0.0  ;;  %v866_v11 = vadd.f32 %v162_v46, %v161_v56  ;;  %v169_v15 = vrot.slane %v168_v41, 1 }
  0x27   :  { %v176_v32 = vrot.slane %v175_v8, 1  ;;  %v186_v39 = vrot.slane %v185_v18, 4  ;;  %v1135_v62 = vunpack.c.l.bf16 %v710_v24  ;;  %v1136_v23 = vunpack.c.l.bf16 %v719_v29 }
  0x28   :  { %v183_v33 = vrot.slane %v182_v9, 1  ;;  %v1137_v3 = vunpack.c.l.bf16 %v724_v30  ;;  %v1138_v21 = vunpack.c.l.bf16 %v729_v31  ;;  %v880_v60 = vadd.f32 %v169_v15, %v168_v41 }
  0x29   :  { %v192_v1 = vsel %vm72_vm0, %v1135_v62, 0.0  ;;  %v199_v2 = vsel %vm72_vm0, %v1136_v23, 0.0  ;;  %v882_v16 = vadd.f32 %v176_v32, %v175_v8  ;;  %v187_v24 = vadd.f32 %v186_v39, %v185_v18 }
  0x2a   :  { %v206_v20 = vsel %vm72_vm0, %v1137_v3, 0.0  ;;  %v213_v25 = vsel %vm72_vm0, %v1138_v21, 0.0  ;;  %v884_v59 = vadd.f32 %v183_v33, %v182_v9  ;;  %v193_v34 = vrot.slane %v192_v1, 4 }
  0x2b   :  { %v200_v61 = vrot.slane %v199_v2, 4  ;;  %v207_v29 = vrot.slane %v206_v20, 4  ;;  %v214_v17 = vrot.slane %v213_v25, 4  ;;  %v188_v5 = vrot.slane %v187_v24, 2 }
  0x2c   :  { %v1139_v30 = vunpack.c.l.bf16 %v738_v36  ;;  %v1140_v31 = vunpack.c.l.bf16 %v743_v37  ;;  %v1141_v22 = vunpack.c.l.bf16 %v748_v38  ;;  %v194_v56 = vadd.f32 %v193_v34, %v192_v1 }
  0x2d   :  { %v201_v47 = vadd.f32 %v200_v61, %v199_v2  ;;  %v208_v42 = vadd.f32 %v207_v29, %v206_v20  ;;  %v215_v53 = vadd.f32 %v214_v17, %v213_v25  ;;  %v189_v0 = vadd.f32 %v188_v5, %v187_v24 }
  0x2e   :  { %v220_v35 = vsel %vm72_vm0, %v1139_v30, 0.0  ;;  %v227_v6 = vsel %vm72_vm0, %v1140_v31, 0.0  ;;  %v234_v55 = vsel %vm72_vm0, %v1141_v22, 0.0  ;;  %v195_v41 = vrot.slane %v194_v56, 2 }
  0x2f   :  { %v221_v12 = vrot.slane %v220_v35, 4  ;;  %v228_v40 = vrot.slane %v227_v6, 4  ;;  %v235_v46 = vrot.slane %v234_v55, 4  ;;  %v202_v36 = vrot.slane %v201_v47, 2 }
  0x30   :  { %v209_v8 = vrot.slane %v208_v42, 2  ;;  %v216_v9 = vrot.slane %v215_v53, 2  ;;  %v190_v27 = vrot.slane %v189_v0, 1  ;;  %v196_v32 = vadd.f32 %v195_v41, %v194_v56 }
  0x31   :  { %v222_v37 = vadd.f32 %v221_v12, %v220_v35  ;;  %v229_v18 = vadd.f32 %v228_v40, %v227_v6  ;;  %v236_v15 = vadd.f32 %v235_v46, %v234_v55  ;;  %v203_v38 = vadd.f32 %v202_v36, %v201_v47 }
  0x32   :  { %v210_v33 = vadd.f32 %v209_v8, %v208_v42  ;;  %v217_v39 = vadd.f32 %v216_v9, %v215_v53  ;;  %v895_v62 = vadd.f32 %v190_v27, %v189_v0  ;;  %v197_v3 = vrot.slane %v196_v32, 1 }
  0x33   :  { %v223_v1 = vrot.slane %v222_v37, 2  ;;  %v230_v23 = vrot.slane %v229_v18, 2  ;;  %v237_v2 = vrot.slane %v236_v15, 2  ;;  %v204_v20 = vrot.slane %v203_v38, 1 }
  0x34   :  { %v211_v21 = vrot.slane %v210_v33, 1  ;;  %v218_v25 = vrot.slane %v217_v39, 1  ;;  %v1142_v29 = vunpack.c.l.bf16 %v757_v43  ;;  %v900_v5 = vadd.f32 %v197_v3, %v196_v32 }
  0x35   :  { %v224_v24 = vadd.f32 %v223_v1, %v222_v37  ;;  %v231_v34 = vadd.f32 %v230_v23, %v229_v18  ;;  %v238_v61 = vadd.f32 %v237_v2, %v236_v15  ;;  %v902_v30 = vadd.f32 %v204_v20, %v203_v38 }
  0x36   :  { %v241_v17 = vsel %vm72_vm0, %v1142_v29, 0.0  ;;  %v904_v35 = vadd.f32 %v211_v21, %v210_v33  ;;  %v906_v31 = vadd.f32 %v218_v25, %v217_v39  ;;  %v1143_v47 = vunpack.c.l.bf16 %v762_v44 }
  0x37   :  { %v225_v6 = vrot.slane %v224_v24, 1  ;;  %v232_v22 = vrot.slane %v231_v34, 1  ;;  %v239_v55 = vrot.slane %v238_v61, 1  ;;  %v242_v56 = vrot.slane %v241_v17, 4 }
  0x38   :  { %v248_v42 = vsel %vm72_vm0, %v1143_v47, 0.0  ;;  %v1144_v43 = vunpack.c.l.bf16 %v767_v45  ;;  %v1145_v0 = vunpack.c.l.bf16 %v776_v50  ;;  %v1146_v40 = vunpack.c.l.bf16 %v781_v51 }
  0x39   :  { %v920_v41 = vadd.f32 %v225_v6, %v224_v24  ;;  %v922_v36 = vadd.f32 %v232_v22, %v231_v34  ;;  %v924_v8 = vadd.f32 %v239_v55, %v238_v61  ;;  %v243_v44 = vadd.f32 %v242_v56, %v241_v17 }
  0x3a   :  { %v255_v53 = vsel %vm72_vm0, %v1144_v43, 0.0  ;;  %v262_v12 = vsel %vm72_vm0, %v1145_v0, 0.0  ;;  %v269_v46 = vsel %vm72_vm0, %v1146_v40, 0.0  ;;  %v249_v9 = vrot.slane %v248_v42, 4 }
  0x3b   :  { %v256_v27 = vrot.slane %v255_v53, 4  ;;  %v263_v45 = vrot.slane %v262_v12, 4  ;;  %v270_v37 = vrot.slane %v269_v46, 4  ;;  %v244_v18 = vrot.slane %v243_v44, 2 }
  0x3c   :  { %v1147_v50 = vunpack.c.l.bf16 %v786_v52  ;;  %v1148_v51 = vunpack.c.l.bf16 %v795_v57  ;;  %v1149_v38 = vunpack.c.l.bf16 %v800_v58  ;;  %v250_v39 = vadd.f32 %v249_v9, %v248_v42 }
  0x3d   :  { %v257_v1 = vadd.f32 %v256_v27, %v255_v53  ;;  %v264_v23 = vadd.f32 %v263_v45, %v262_v12  ;;  %v271_v2 = vadd.f32 %v270_v37, %v269_v46  ;;  %v245_v3 = vadd.f32 %v244_v18, %v243_v44 }
  0x3e   :  { %v276_v15 = vsel %vm72_vm0, %v1147_v50, 0.0  ;;  %v283_v32 = vsel %vm72_vm0, %v1148_v51, 0.0  ;;  %v290_v33 = vsel %vm72_vm0, %v1149_v38, 0.0  ;;  %v251_v24 = vrot.slane %v250_v39, 2 }
  0x3f   :  { %v277_v20 = vrot.slane %v276_v15, 4  ;;  %v284_v21 = vrot.slane %v283_v32, 4  ;;  %v291_v25 = vrot.slane %v290_v33, 4  ;;  %v258_v52 = vrot.slane %v257_v1, 2 }
  0x40   :  { %v265_v34 = vrot.slane %v264_v23, 2  ;;  %v272_v61 = vrot.slane %v271_v2, 2  ;;  %v246_v29 = vrot.slane %v245_v3, 1  ;;  %v252_v22 = vadd.f32 %v251_v24, %v250_v39 }
  0x41   :  { %v278_v57 = vadd.f32 %v277_v20, %v276_v15  ;;  %v285_v17 = vadd.f32 %v284_v21, %v283_v32  ;;  %v292_v6 = vadd.f32 %v291_v25, %v290_v33  ;;  %v259_v58 = vadd.f32 %v258_v52, %v257_v1 }
  0x42   :  { %v266_v55 = vadd.f32 %v265_v34, %v264_v23  ;;  %v273_v56 = vadd.f32 %v272_v61, %v271_v2  ;;  %v247_v47 = vadd.f32 %v246_v29, %v245_v3  ;;  %v253_v0 = vrot.slane %v252_v22, 1 }
  0x43   :  { %v279_v42 = vrot.slane %v278_v57, 2  ;;  %v286_v43 = vrot.slane %v285_v17, 2  ;;  %v293_v53 = vrot.slane %v292_v6, 2  ;;  %v260_v12 = vrot.slane %v259_v58, 1 }
  0x44   :  { %v267_v40 = vrot.slane %v266_v55, 1  ;;  %v274_v46 = vrot.slane %v273_v56, 1  ;;  %v936_v45 = vmul.f32 0.25, %v815_v4  ;;  %v254_v37 = vadd.f32 %v253_v0, %v252_v22 }
  0x45   :  { %v280_v44 = vadd.f32 %v279_v42, %v278_v57  ;;  %v287_v9 = vadd.f32 %v286_v43, %v285_v17  ;;  %v294_v27 = vadd.f32 %v293_v53, %v292_v6  ;;  %v261_v18 = vadd.f32 %v260_v12, %v259_v58 }
  0x46   :  { %v268_v50 = vadd.f32 %v267_v40, %v266_v55  ;;  %v275_v15 = vadd.f32 %v274_v46, %v273_v56  ;;  %v939_v33 = vmul.f32 0.25, %v817_v7  ;;  %v942_v39 = vmul.f32 0.25, %v819_v63 }
  0x47   :  { %v281_v51 = vrot.slane %v280_v44, 1  ;;  %v288_v32 = vrot.slane %v287_v9, 1  ;;  %v295_v38 = vrot.slane %v294_v27, 1  ;;  %v945_v1 = vmul.f32 0.25, %v821_v48 }
  0x48   :  { %v948_v23 = vmul.f32 0.25, %v823_v54  ;;  %v951_v4 = vmul.f32 0.25, %v840_v26  ;;  %v954_v21 = vmul.f32 0.25, %v842_v13  ;;  %v957_v7 = vmul.f32 0.25, %v844_v14 }
  0x49   :  { %v282_v2 = vadd.f32 %v281_v51, %v280_v44  ;;  %v289_v3 = vadd.f32 %v288_v32, %v287_v9  ;;  %v296_v20 = vadd.f32 %v295_v38, %v294_v27  ;;  %v960_v63 = vmul.f32 0.25, %v855_v49 }
  0x4a   :  { %v963_v48 = vmul.f32 0.25, %v860_v10  ;;  %v966_v54 = vmul.f32 0.25, %v862_v19  ;;  %v969_v26 = vmul.f32 0.25, %v864_v28  ;;  %v972_v25 = vmul.f32 0.25, %v866_v11 }
  0x4b   :  { %v975_v13 = vmul.f32 0.25, %v880_v60  ;;  %v978_v14 = vmul.f32 0.25, %v882_v16  ;;  %v981_v49 = vmul.f32 0.25, %v884_v59  ;;  %v984_v10 = vmul.f32 0.25, %v895_v62 }
  0x4c   :  { %v987_v19 = vmul.f32 0.25, %v900_v5  ;;  %v990_v28 = vmul.f32 0.25, %v902_v30  ;;  %v993_v11 = vmul.f32 0.25, %v904_v35  ;;  %v996_v60 = vmul.f32 0.25, %v906_v31 }
  0x4d   :  { %v999_v16 = vmul.f32 0.25, %v920_v41  ;;  %v1002_v59 = vmul.f32 0.25, %v922_v36  ;;  %v1005_v62 = vmul.f32 0.25, %v924_v8  ;;  %v1007_v5 = vmul.f32 0.25, %v247_v47 }
  0x4e   :  { %v1009_v24 = vmul.f32 0.25, %v254_v37  ;;  %v1011_v30 = vmul.f32 0.25, %v261_v18  ;;  %v1013_v35 = vmul.f32 0.25, %v268_v50  ;;  %v1015_v52 = vmul.f32 0.25, %v275_v15 }
  0x4f   :  { %v1017_v31 = vmul.f32 0.25, %v282_v2  ;;  %v1019_v41 = vmul.f32 0.25, %v289_v3  ;;  %v1021_v34 = vmul.f32 0.25, %v296_v20  ;;  %v573_v36 = vpack.c.bf16 %v936_v45, %v936_v45 }
  0x50   :  { %v574_v8 = vpack.c.bf16 %v939_v33, %v939_v33  ;;  %v575_v61 = vpack.c.bf16 %v942_v39, %v942_v39  ;;  %v576_v29 = vpack.c.bf16 %v945_v1, %v945_v1  ;;  %v577_v57 = vpack.c.bf16 %v948_v23, %v948_v23 }
  0x51   :  { %v578_v17 = vpack.c.bf16 %v951_v4, %v951_v4  ;;  %v579_v6 = vpack.c.bf16 %v954_v21, %v954_v21  ;;  %v580_v22 = vpack.c.bf16 %v957_v7, %v957_v7  ;;  %v581_v58 = vpack.c.bf16 %v960_v63, %v960_v63 }
  0x52   :  { %v582_v55 = vpack.c.bf16 %v963_v48, %v963_v48  ;;  %v583_v56 = vpack.c.bf16 %v966_v54, %v966_v54  ;;  %v584_v47 = vpack.c.bf16 %v969_v26, %v969_v26  ;;  %v585_v42 = vpack.c.bf16 %v972_v25, %v972_v25 }
  0x53   :  { %v586_v43 = vpack.c.bf16 %v975_v13, %v975_v13  ;;  %v587_v53 = vpack.c.bf16 %v978_v14, %v978_v14  ;;  %v588_v0 = vpack.c.bf16 %v981_v49, %v981_v49  ;;  %v589_v12 = vpack.c.bf16 %v984_v10, %v984_v10 }
  0x54   :  { %v590_v40 = vpack.c.bf16 %v987_v19, %v987_v19  ;;  %v591_v46 = vpack.c.bf16 %v990_v28, %v990_v28  ;;  %v592_v44 = vpack.c.bf16 %v993_v11, %v993_v11  ;;  %v593_v9 = vpack.c.bf16 %v996_v60, %v996_v60 }
  0x55   :  { %v594_v27 = vpack.c.bf16 %v999_v16, %v999_v16  ;;  %v595_v45 = vpack.c.bf16 %v1002_v59, %v1002_v59  ;;  %v596_v37 = vpack.c.bf16 %v1005_v62, %v1005_v62  ;;  %v597_v18 = vpack.c.bf16 %v1007_v5, %v1007_v5 }
  0x56   :  { %v598_v50 = vpack.c.bf16 %v1009_v24, %v1009_v24  ;;  %v599_v15 = vpack.c.bf16 %v1011_v30, %v1011_v30  ;;  %v600_v51 = vpack.c.bf16 %v1013_v35, %v1013_v35  ;;  %v601_v32 = vpack.c.bf16 %v1015_v52, %v1015_v52 }
  0x57   :  { %v602_v38 = vpack.c.bf16 %v1017_v31, %v1017_v31  ;;  %v603_v33 = vpack.c.bf16 %v1019_v41, %v1019_v41  ;;  %v604_v39 = vpack.c.bf16 %v1021_v34, %v1021_v34  ;;  %v458_v1 = vunpack.c.l.b16 %v573_v36 }
  0x58   :  { %v459_v23 = vunpack.c.l.b16 %v574_v8  ;;  %v460_v4 = vunpack.c.l.b16 %v575_v61  ;;  %v461_v2 = vunpack.c.l.b16 %v576_v29  ;;  %v462_v3 = vunpack.c.l.b16 %v577_v57 }
  0x59   :  { %v463_v20 = vunpack.c.l.b16 %v578_v17  ;;  %v464_v21 = vunpack.c.l.b16 %v579_v6  ;;  %v465_v7 = vunpack.c.l.b16 %v580_v22  ;;  %v466_v63 = vunpack.c.l.b16 %v581_v58 }
  0x5a   :  { %v467_v48 = vunpack.c.l.b16 %v582_v55  ;;  %v468_v54 = vunpack.c.l.b16 %v583_v56  ;;  %v469_v26 = vunpack.c.l.b16 %v584_v47  ;;  %v470_v25 = vunpack.c.l.b16 %v585_v42 }
  0x5b   :  { %v471_v13 = vunpack.c.l.b16 %v586_v43  ;;  %v472_v14 = vunpack.c.l.b16 %v587_v53  ;;  %v473_v49 = vunpack.c.l.b16 %v588_v0  ;;  %v474_v10 = vunpack.c.l.b16 %v589_v12 }
  0x5c   :  { %v475_v19 = vunpack.c.l.b16 %v590_v40  ;;  %v476_v28 = vunpack.c.l.b16 %v591_v46  ;;  %v477_v11 = vunpack.c.l.b16 %v592_v44  ;;  %v478_v60 = vunpack.c.l.b16 %v593_v9 }
  0x5d   :  { %v479_v16 = vunpack.c.l.b16 %v594_v27  ;;  %v480_v59 = vunpack.c.l.b16 %v595_v45  ;;  %v481_v62 = vunpack.c.l.b16 %v596_v37  ;;  %v482_v5 = vunpack.c.l.b16 %v597_v18 }
  0x5e   :  { %v483_v24 = vunpack.c.l.b16 %v598_v50  ;;  %v484_v30 = vunpack.c.l.b16 %v599_v15  ;;  %v485_v35 = vunpack.c.l.b16 %v600_v51  ;;  %v486_v52 = vunpack.c.l.b16 %v601_v32 }
  0x5f   :  { %v487_v31 = vunpack.c.l.b16 %v602_v38  ;;  %v488_v41 = vunpack.c.l.b16 %v603_v33  ;;  %v489_v34 = vunpack.c.l.b16 %v604_v39  ;;  %v491_v36 = vsel %vm490_vm1, %v459_v23, %v458_v1 }
  0x60   :  { %vm496_vm4 = vcmask 1044484   ;;  %vm498_vm5 = vcmask 1045509   ;;  %v493_v8 = vsel %vm492_vm2, %v460_v4, %v491_v36  ;;  %vm500_vm6 = vcmask 1046534  }
  0x61   :  { %vm502_vm7 = vcmask 1047559   ;;  %v504_v61 = vsel %vm490_vm1, %v467_v48, %v466_v63  ;;  %v495_v29 = vsel %vm494_vm3, %v461_v2, %v493_v8  ;;  %v511_v17 = vsel %vm490_vm1, %v475_v19, %v474_v10 }
  0x62   :  { %v505_v57 = vsel %vm492_vm2, %v468_v54, %v504_v61  ;;  %v518_v6 = vsel %vm490_vm1, %v483_v24, %v482_v5  ;;  %v497_v22 = vsel %vm496_vm4, %v462_v3, %v495_v29  ;;  %v512_v55 = vsel %vm492_vm2, %v476_v28, %v511_v17 }
  0x63   :  { %v506_v58 = vsel %vm494_vm3, %v469_v26, %v505_v57  ;;  %v519_v56 = vsel %vm492_vm2, %v484_v30, %v518_v6  ;;  %v499_v47 = vsel %vm498_vm5, %v463_v20, %v497_v22  ;;  %v513_v43 = vsel %vm494_vm3, %v477_v11, %v512_v55 }
  0x64   :  { %v507_v42 = vsel %vm496_vm4, %v470_v25, %v506_v58  ;;  %v520_v53 = vsel %vm494_vm3, %v485_v35, %v519_v56  ;;  %v501_v0 = vsel %vm500_vm6, %v464_v21, %v499_v47  ;;  %v514_v40 = vsel %vm496_vm4, %v478_v60, %v513_v43 }
  0x65   :  { %v508_v12 = vsel %vm498_vm5, %v471_v13, %v507_v42  ;;  %v521_v46 = vsel %vm496_vm4, %v486_v52, %v520_v53  ;;  %v503_v44 = vsel %vm502_vm7, %v465_v7, %v501_v0  ;;  %v515_v27 = vsel %vm498_vm5, %v479_v16, %v514_v40 }
  0x66   :  { %v509_v9 = vsel %vm500_vm6, %v472_v14, %v508_v12  ;;  %v522_v45 = vsel %vm498_vm5, %v487_v31, %v521_v46  ;;  %v516_v18 = vsel %vm500_vm6, %v480_v59, %v515_v27  ;;  %v525_v15 = vpack.c.b16 %v503_v44, %v503_v44 }
  0x67   :  { %v510_v37 = vsel %vm502_vm7, %v473_v49, %v509_v9  ;;  %v523_v50 = vsel %vm500_vm6, %v488_v41, %v522_v45  ;;  %v517_v51 = vsel %vm502_vm7, %v481_v62, %v516_v18 }
  0x68   :  { %v524_v32 = vsel %vm502_vm7, %v489_v34, %v523_v50  ;;  %v526_v38 = vpack.c.b16 %v510_v37, %v510_v37  ;;  %v527_v33 = vpack.c.b16 %v517_v51, %v517_v51  ;;  %533 = vst.msk [vmem:[%s1132_s1] sm:$0xf] %vm72_vm0, %v525_v15 }
  0x69   :  { %v528_v39 = vpack.c.b16 %v524_v32, %v524_v32 }
  0x6a   :  { %534 = vst.msk [vmem:[%s1132_s1 + $0x4] sm:$0xf] %vm72_vm0, %v526_v38  ;;  %535 = vst.msk [vmem:[%s1132_s1 + $0x8] sm:$0xf] %vm72_vm0, %v527_v33 }
  0x6b   :  { %536 = vst.msk [vmem:[%s1132_s1 + $0xc] sm:$0xf] %vm72_vm0, %v528_v39 }

// kernel: densenet_forward.22
= control target key start
LH: loop header
LB: loop body
LE: loop exit
PB: predicated region body
PF: predicated region fallthrough
CT: control target
= control target key end

     0   :  { %s411_s1 = inlined_call_operand.vmem [shape: bf16[128,128], index: 1, kind: input, shape index: {}]   ;;  %s412_s0 = inlined_call_operand.vmem [shape: bf16[32,128], index: 0, kind: input, shape index: {}]   ;;  %s413_s2 = inlined_call_operand.vmem [shape: f32[1,128], index: 2, kind: input, shape index: {}]   ;;  %s414_s3 = inlined_call_operand.vmem [shape: f32[1,128], index: 3, kind: input, shape index: {}]   ;;  %s415_s4 = inlined_call_operand.vmem [shape: f32[1,128], index: 4, kind: input, shape index: {}]   ;;  %s416_s5 = inlined_call_operand.vmem [shape: f32[1,128], index: 5, kind: input, shape index: {}]   ;;  %s417_s6 = inlined_call_operand.vmem [shape: bf16[32,128], index: 6, kind: output, shape index: {}]  }
   0x1   :  { %v320_v0 = vld [vmem:[%s411_s1] sm:$0xff]   ;;  %v321_v1 = vld [vmem:[%s411_s1 + $0x8] sm:$0xff]   ;;  %v322_v2 = vld [vmem:[%s411_s1 + $0x10] sm:$0xff]  }
   0x2   :  { %300 = vmatprep.subr.bf16.mxu0 %v320_v0  ;;  %v323_v3 = vld [vmem:[%s411_s1 + $0x18] sm:$0xff]   ;;  %v271_v4 = vld [vmem:[%s412_s0] sm:$0xff]   ;;  %v288_v9 = vld [vmem:[%s412_s0 + $0x8] sm:$0xff]  }
   0x3   :  { %301 = vmatpush3.bf16.msra.mxu0 %v320_v0  ;;  %v250_v5 = vld [vmem:[%s413_s2] ss:$0 sm:$0xff]  ;;  %v272_v6 = vunpack.c.l.bf16 %v271_v4  ;;  %v273_v7 = vunpack.c.h.bf16 %v271_v4  ;;  %v276_v15 = vunpack.c.l.bf16 %v288_v9  ;;  %v277_v16 = vunpack.c.h.bf16 %v288_v9  ;;  %v325_v19 = vld [vmem:[%s411_s1 + $0x28] sm:$0xff]   ;;  %v326_v23 = vld [vmem:[%s411_s1 + $0x30] sm:$0xff]  }
   0x4   :  { %302 = vmatprep.subr.bf16.mxu0 %v321_v1  ;;  %v251_v8 = vld [vmem:[%s414_s3] ss:$0 sm:$0xff]  ;;  %v327_v26 = vld [vmem:[%s411_s1 + $0x38] sm:$0xff]  }
   0x5   :  { %v47_v10 = vmul.f32 %v272_v6, %v250_v5  ;;  %v48_v11 = vmul.f32 %v273_v7, %v250_v5  ;;  %v324_v12 = vld [vmem:[%s411_s1 + $0x20] sm:$0xff]   ;;  %v49_v21 = vmul.f32 %v276_v15, %v250_v5  ;;  %v50_v22 = vmul.f32 %v277_v16, %v250_v5 }
   0x6   :  { %v260_v30 = vld [vmem:[%s415_s4] ss:$0 sm:$0xff] }
   0x7   :  { %303 = vmatpush3.bf16.msra.mxu0 %v321_v1  ;;  %v58_v13 = vadd.f32 %v251_v8, %v47_v10  ;;  %v59_v14 = vadd.f32 %v251_v8, %v48_v11  ;;  %v60_v24 = vadd.f32 %v251_v8, %v49_v21  ;;  %v61_v25 = vadd.f32 %v251_v8, %v50_v22  ;;  %v261_v32 = vld [vmem:[%s416_s5] ss:$0 sm:$0xff] }
   0x8   :  { %304 = vmatprep.subr.bf16.mxu0 %v322_v2 }
   0x9   :  { %v62_v17 = vmax.f32 %v58_v13, 0.0  ;;  %v63_v18 = vmax.f32 %v59_v14, 0.0  ;;  %v64_v27 = vmax.f32 %v60_v24, 0.0  ;;  %v65_v28 = vmax.f32 %v61_v25, 0.0 }
   0xb   :  { %305 = vmatpush3.bf16.msra.mxu0 %v322_v2  ;;  %v66_v20 = vpack.c.bf16 %v63_v18, %v62_v17  ;;  %v67_v29 = vpack.c.bf16 %v65_v28, %v64_v27 }
   0xc   :  { %306 = vmatprep.subr.bf16.mxu0 %v323_v3 }
   0xd   :  { %316 = vmatprep.mubr.bf16.mxu0 %v66_v20 }
   0xf   :  { %307 = vmatpush3.bf16.msra.mxu0 %v323_v3 }
  0x10   :  { %308 = vmatprep.subr.bf16.mxu0 %v324_v12 }
  0x13   :  { %309 = vmatpush3.bf16.msra.mxu0 %v324_v12 }
  0x14   :  { %310 = vmatprep.subr.bf16.mxu0 %v325_v19 }
  0x17   :  { %311 = vmatpush3.bf16.msra.mxu0 %v325_v19 }
  0x18   :  { %312 = vmatprep.subr.bf16.mxu0 %v326_v23 }
  0x1b   :  { %313 = vmatpush3.bf16.msra.mxu0 %v326_v23 }
  0x1c   :  { %314 = vmatprep.subr.bf16.mxu0 %v327_v26 }
  0x1f   :  { %315 = vmatpush3.bf16.msra.mxu0 %v327_v26 }
  0x22   :  { %317 = vmatmul.mubr.bf16.vlgmr.msra.gmra.mrb[0].mxu0 %v67_v29 }
  0xf5   :  { %v318_v31 = vpop.f32.mrb[0].mxu0 }
  0xf6   :  { %v209_v33 = vmul.f32 %v318_v31, %v260_v30  ;;  %v170_v34 = vpop.f32.mrb[1].mxu0 }
  0xf7   :  { %v207_v35 = vmul.f32 %v260_v30, %v170_v34  ;;  %v319_v36 = vpop.f32.mrb[2].mxu0 }
  0xf8   :  { %v220_v37 = vadd.f32 %v261_v32, %v209_v33  ;;  %v210_v38 = vmul.f32 %v319_v36, %v260_v30  ;;  %v173_v39 = vpop.f32.mrb[3].mxu0 }
  0xf9   :  { %v218_v40 = vadd.f32 %v261_v32, %v207_v35  ;;  %v208_v41 = vmul.f32 %v260_v30, %v173_v39 }
  0xfa   :  { %v221_v42 = vadd.f32 %v261_v32, %v210_v38  ;;  %v224_v44 = vmax.f32 %v220_v37, 0.0 }
  0xfb   :  { %v219_v43 = vadd.f32 %v261_v32, %v208_v41  ;;  %v222_v46 = vmax.f32 %v218_v40, 0.0 }
  0xfc   :  { %v225_v45 = vmax.f32 %v221_v42, 0.0 }
  0xfd   :  { %v223_v47 = vmax.f32 %v219_v43, 0.0 }
  0xfe   :  { %v286_v48 = vpack.c.bf16 %v225_v45, %v224_v44 }
  0xff   :  { %v281_v49 = vpack.c.bf16 %v223_v47, %v222_v46 }
 0x100   :  { %289 = vst [vmem:[%s417_s6 + $0x8] sm:$0xff] %v286_v48  }
 0x101   :  { %282 = vst [vmem:[%s417_s6] sm:$0xff] %v281_v49  }

// kernel: densenet_forward.23
= control target key start
LH: loop header
LB: loop body
LE: loop exit
PB: predicated region body
PF: predicated region fallthrough
CT: control target
= control target key end

     0   :  { %s675_s1 = inlined_call_operand.vmem [shape: bf16[384,128], index: 1, kind: input, shape index: {}]   ;;  %s676_s2 = inlined_call_operand.vmem [shape: f32[1,384], index: 2, kind: input, shape index: {}]   ;;  %s677_s3 = inlined_call_operand.vmem [shape: f32[1,384], index: 3, kind: input, shape index: {}]   ;;  %s678_s4 = inlined_call_operand.vmem [shape: f32[1,128], index: 4, kind: input, shape index: {}]   ;;  %s679_s5 = inlined_call_operand.vmem [shape: f32[1,128], index: 5, kind: input, shape index: {}]   ;;  %s680_s0 = inlined_call_operand.vmem [shape: bf16[32,384], index: 0, kind: input, shape index: {}]   ;;  %s681_s6 = inlined_call_operand.vmem [shape: bf16[32,128], index: 6, kind: output, shape index: {}]  }
   0x1   :  { %v512_v0 = vld [vmem:[%s675_s1 + $0x40] sm:$0xff]   ;;  %v515_v3 = vld [vmem:[%s675_s1 + $0x48] sm:$0xff]   ;;  %v518_v6 = vld [vmem:[%s675_s1 + $0x50] sm:$0xff]  }
   0x2   :  { %v513_v1 = vld [vmem:[%s675_s1] sm:$0xff]   ;;  %454 = vmatprep.subr.bf16.mxu0 %v512_v0  ;;  %v516_v4 = vld [vmem:[%s675_s1 + $0x8] sm:$0xff]   ;;  %v519_v7 = vld [vmem:[%s675_s1 + $0x10] sm:$0xff]  }
   0x3   :  { %v514_v2 = vld [vmem:[%s675_s1 + $0x80] sm:$0xff]   ;;  %455 = vmatpush3.bf16.msra.mxu0 %v513_v1  ;;  %v517_v5 = vld [vmem:[%s675_s1 + $0x88] sm:$0xff]   ;;  %v520_v8 = vld [vmem:[%s675_s1 + $0x90] sm:$0xff]  }
   0x4   :  { %492 = vmatprep.subr.bf16.mxu1 %v514_v2  ;;  %456 = vmatprep.subr.bf16.mxu0 %v515_v3  ;;  %v521_v9 = vld [vmem:[%s675_s1 + $0x58] sm:$0xff]   ;;  %v524_v12 = vld [vmem:[%s675_s1 + $0x60] sm:$0xff]   ;;  %v527_v15 = vld [vmem:[%s675_s1 + $0x68] sm:$0xff]  }
   0x5   :  { %493 = vmatpush3.bf16.msra.mxu1 %v514_v2  ;;  %v522_v10 = vld [vmem:[%s675_s1 + $0x18] sm:$0xff]   ;;  %v526_v13 = vld [vmem:[%s675_s1 + $0xa0] sm:$0xff]   ;;  %v529_v16 = vld [vmem:[%s675_s1 + $0xa8] sm:$0xff]  }
   0x6   :  { %494 = vmatprep.subr.bf16.mxu1 %v517_v5  ;;  %v523_v11 = vld [vmem:[%s675_s1 + $0x98] sm:$0xff]   ;;  %v525_v14 = vld [vmem:[%s675_s1 + $0x20] sm:$0xff]   ;;  %v528_v17 = vld [vmem:[%s675_s1 + $0x28] sm:$0xff]  }
   0x7   :  { %457 = vmatpush3.bf16.msra.mxu0 %v516_v4  ;;  %v530_v18 = vld [vmem:[%s675_s1 + $0x70] sm:$0xff]   ;;  %v533_v21 = vld [vmem:[%s675_s1 + $0x78] sm:$0xff]   ;;  %v536_v26 = vld [vmem:[%s680_s0] ss:$12 sps:$4 sm:$0xff]  }
   0x8   :  { %458 = vmatprep.subr.bf16.mxu0 %v518_v6  ;;  %v531_v19 = vld [vmem:[%s675_s1 + $0x30] sm:$0xff]   ;;  %v535_v22 = vld [vmem:[%s675_s1 + $0xb8] sm:$0xff]   ;;  %v540_v28 = vld [vmem:[%s680_s0 + $0x20] ss:$12 sps:$4 sm:$0xff]  }
   0x9   :  { %495 = vmatpush3.bf16.msra.mxu1 %v517_v5  ;;  %v532_v20 = vld [vmem:[%s675_s1 + $0xb0] sm:$0xff]   ;;  %v534_v25 = vld [vmem:[%s675_s1 + $0x38] sm:$0xff]  }
   0xa   :  { %496 = vmatprep.subr.bf16.mxu1 %v520_v8  ;;  %v538_v23 = vld [vmem:[%s680_s0 + $0x4] ss:$12 sps:$4 sm:$0xff]   ;;  %v539_v24 = vld [vmem:[%s680_s0 + $0x8] ss:$12 sps:$4 sm:$0xff]  }
   0xb   :  { %459 = vmatpush3.bf16.msra.mxu0 %v519_v7  ;;  %300 = vmatprep.mubr.bf16.mxu0 %v538_v23  ;;  %v541_v27 = vld [vmem:[%s680_s0 + $0x1c] ss:$12 sps:$4 sm:$0xff]   ;;  %v543_v29 = vld [vmem:[%s680_s0 + $0x18] ss:$12 sps:$4 sm:$0xff]  }
   0xc   :  { %460 = vmatprep.subr.bf16.mxu0 %v521_v9  ;;  %508 = vmatprep.mubr.bf16.mxu1 %v539_v24 }
   0xd   :  { %497 = vmatpush3.bf16.msra.mxu1 %v520_v8 }
   0xe   :  { %498 = vmatprep.subr.bf16.mxu1 %v523_v11 }
   0xf   :  { %461 = vmatpush3.bf16.msra.mxu0 %v522_v10 }
  0x10   :  { %462 = vmatprep.subr.bf16.mxu0 %v524_v12 }
  0x11   :  { %499 = vmatpush3.bf16.msra.mxu1 %v523_v11 }
  0x12   :  { %500 = vmatprep.subr.bf16.mxu1 %v526_v13 }
  0x13   :  { %463 = vmatpush3.bf16.msra.mxu0 %v525_v14 }
  0x14   :  { %464 = vmatprep.subr.bf16.mxu0 %v527_v15 }
  0x15   :  { %501 = vmatpush3.bf16.msra.mxu1 %v526_v13 }
  0x16   :  { %502 = vmatprep.subr.bf16.mxu1 %v529_v16 }
  0x17   :  { %465 = vmatpush3.bf16.msra.mxu0 %v528_v17 }
  0x18   :  { %466 = vmatprep.subr.bf16.mxu0 %v530_v18 }
  0x19   :  { %503 = vmatpush3.bf16.msra.mxu1 %v529_v16 }
  0x1a   :  { %504 = vmatprep.subr.bf16.mxu1 %v532_v20 }
  0x1b   :  { %467 = vmatpush3.bf16.msra.mxu0 %v531_v19 }
  0x1c   :  { %468 = vmatprep.subr.bf16.mxu0 %v533_v21 }
  0x1d   :  { %505 = vmatpush3.bf16.msra.mxu1 %v532_v20 }
  0x1e   :  { %506 = vmatprep.subr.bf16.mxu1 %v535_v22 }
  0x1f   :  { %469 = vmatpush3.bf16.msra.mxu0 %v534_v25 }
  0x21   :  { %507 = vmatpush3.bf16.msra.mxu1 %v535_v22 }
  0x22   :  { %301 = vmatmul.mubr.bf16.vlgmr.msra.gmra.mrb[0].mxu0 %v536_v26 }
  0x23   :  { %308 = vmatprep.mubr.bf16.mxu0 %v541_v27 }
  0x24   :  { %509 = vmatmul.mubr.bf16.vlgmr.msra.gmra.mrb[0].mxu1 %v540_v28 }
  0x2a   :  { %309 = vmatmul.mubr.bf16.gmra.mrb[4].mxu0 %v543_v29 }
  0xf5   :  { %v470_v30 = vpop.f32.mrb[0].mxu0 }
  0xf6   :  { %v471_v31 = vpop.f32.mrb[1].mxu0 }
  0xf7   :  { %v472_v32 = vadd.f32 %v471_v31, %v470_v30  ;;  %v473_v33 = vpop.f32.mrb[2].mxu0  ;;  %v510_v34 = vpop.f32.mrb[0].mxu1 }
  0xf8   :  { %v474_v35 = vpop.f32.mrb[3].mxu0  ;;  %v351_v36 = vpop.f32.mrb[1].mxu1 }
  0xf9   :  { %v475_v37 = vadd.f32 %v474_v35, %v473_v33  ;;  %v352_v38 = vadd.f32 %v472_v32, %v351_v36  ;;  %v511_v39 = vpop.f32.mrb[2].mxu1 }
  0xfa   :  { %v354_v40 = vpop.f32.mrb[3].mxu1 }
  0xfb   :  { %v355_v41 = vadd.f32 %v475_v37, %v354_v40 }
  0xfd   :  { %v446_v42 = vpack.c.bf16 %v355_v41, %v352_v38  ;;  %v476_v43 = vpop.f32.mrb[4].mxu0 }
  0xfe   :  { %v477_v44 = vpop.f32.mrb[5].mxu0 }
  0xff   :  { %447 = vst [vmem:[%s681_s6] sm:$0xff] %v446_v42   ;;  %v478_v45 = vadd.f32 %v477_v44, %v476_v43  ;;  %v479_v46 = vpop.f32.mrb[6].mxu0 }
 0x100   :  { %v480_v47 = vpop.f32.mrb[7].mxu0 }
 0x101   :  { %v360_v48 = vadd.f32 %v510_v34, %v478_v45  ;;  %v481_v49 = vadd.f32 %v480_v47, %v479_v46 }
 0x103   :  { %v363_v50 = vadd.f32 %v511_v39, %v481_v49 }
 0x105   :  { %v451_v51 = vpack.c.bf16 %v363_v50, %v360_v48 }
 0x107   :  { %453 = vst [vmem:[%s681_s6 + $0x8] sm:$0xff] %v451_v51  }

// kernel: densenet_forward.26
= control target key start
LH: loop header
LB: loop body
LE: loop exit
PB: predicated region body
PF: predicated region fallthrough
CT: control target
= control target key end

     0   :  { %s358_s17 = smov 0   ;;  %s385_s0 = inlined_call_operand.vmem [shape: bf16[2,16,56], index: 0, kind: input, shape index: {}]   ;;  %s386_s1 = inlined_call_operand.vmem [shape: f32[1,56], index: 1, kind: input, shape index: {}]   ;;  %s387_s2 = inlined_call_operand.vmem [shape: f32[1,56], index: 2, kind: input, shape index: {}]   ;;  %s388_s3 = inlined_call_operand.<no memory space> [shape: f32[1], index: 3, kind: input, shape index: {}]   ;;  %s389_s4 = inlined_call_operand.vmem [shape: f32[2,1,56], index: 4, kind: output, shape index: {}]  }
   0x1   :  { %9 = sst [smem:[#allocation2]] %s388_s3 }
   0x2 LB: > { %s292_s18 = sadd.s32 4294967295, %s328_s17   ;;  %p296_p0 = scmp.ge.s32.totalorder %s328_s17, 1  ;;  %s328_s17 = sphi %s358_s17, %s15_s17  }
   0x3   : > { %p163_p1 = scmp.lt.s32.totalorder %s328_s17, 3 }
   0x5   : > { %p164_p2 = pnand %p296_p0, %p163_p1 }
   0x6   : > { %p187_p3 = scmp.lt.s32.totalorder (!%p164_p2), %s292_s18, 1  ;;  %v299_v1 = vld [vmem:[%s386_s1] ss:$0 sm:$0xff] (!%p164_p2)  ;;  %vm223_vm0 = vcmask (!%p164_p2), 457728   ;;  %s237_s26 = sld [smem:[#allocation2]] (!%p164_p2)  ;;  %vm243_vm1 = vcmask (!%p164_p2), 450560  }
   0x7   : > { %167 = sbr.rel (%p164_p2) target bundleno = 76 (0x4c), region = 36  ;;  %v300_v4 = vld [vmem:[%s387_s2] ss:$0 sm:$0xff] (!%p164_p2) }
   0xc   : > { %v238_v24 = vstv (!%p164_p2), %s237_s26 }
   0xd   : > { %316 = vrcp.f32 (!%p164_p2), %v238_v24 }
   0xe   : > { %s391_s18 = smov (!%p187_p3, %s292_s18), 1 }
   0xf   : > { %s303_s3 = sshll.u32 %s391_s18, 3  ;;  %s194_s29 = scalar_lea.vmem %s389_s4, %s391_s18 }
  0x10   : > { %s191_s21 = scalar_lea.vmem %s385_s0, %s303_s3 }
  0x11   : > { %v305_v0 = vld [vmem:[%s191_s21] sm:$0xff]  }
  0x12   : > { %v306_v2 = vunpack.c.l.bf16 %v305_v0  ;;  %v307_v3 = vunpack.c.h.bf16 %v305_v0 }
  0x14   : > { %v206_v5 = vmul.f32 %v306_v2, %v299_v1  ;;  %v207_v6 = vmul.f32 %v307_v3, %v299_v1 }
  0x16   : > { %v215_v7 = vadd.f32 %v300_v4, %v206_v5  ;;  %v216_v8 = vadd.f32 %v300_v4, %v207_v6 }
  0x17   : > { %v317_v26 = vpop.eup %316 }
  0x18   : > { %v217_v9 = vmax.f32 %v215_v7, 1e-06  ;;  %v218_v10 = vmax.f32 %v216_v8, 1e-06 }
  0x1a   : > { %v219_v11 = vmul.f32 %v217_v9, %v217_v9  ;;  %v220_v12 = vmul.f32 %v218_v10, %v218_v10 }
  0x1c   : > { %v221_v13 = vmul.f32 %v219_v11, %v217_v9  ;;  %v222_v14 = vmul.f32 %v220_v12, %v218_v10 }
  0x1e   : > { %v224_v15 = vsel %vm223_vm0, %v221_v13, 0.0  ;;  %v225_v16 = vsel %vm223_vm0, %v222_v14, 0.0 }
  0x1f   : > { %v226_v17 = vadd.f32 %v225_v16, %v224_v15 }
  0x21   : > { %v227_v18 = vrot.slane %v226_v17, 4 }
  0x23   : > { %v228_v19 = vadd.f32 %v227_v18, %v226_v17 }
  0x25   : > { %v229_v20 = vrot.slane %v228_v19, 2 }
  0x27   : > { %v230_v21 = vadd.f32 %v229_v20, %v228_v19 }
  0x29   : > { %v231_v22 = vrot.slane %v230_v21, 1 }
  0x2b   : > { %v232_v23 = vadd.f32 %v231_v22, %v230_v21 }
  0x2d   : > { %v234_v25 = vmul.f32 0.0625, %v232_v23 }
  0x2f   : > { %318 = vlog2.f32 %v234_v25 }
  0x39   : > { %v319_v27 = vpop.eup %318 }
  0x3a   : > { %v236_v28 = vmul.f32 0.6931472, %v319_v27 }
  0x3c   : > { %v240_v29 = vmul.f32 %v317_v26, %v236_v28 }
  0x3e   : > { %v241_v30 = vmul.f32 1.442695, %v240_v29 }
  0x40   : > { %320 = vpow2.f32 %v241_v30 }
  0x4a   : > { %v321_v31 = vpop.eup %320 }
  0x4b   : > { %244 = vst.msk [vmem:[%s194_s29] sm:$0x1] %vm243_vm1, %v321_v31 }
  0x4c PF: > { %s15_s17 = sadd.s32 1, %s328_s17  }
  0x4d   : > { %p12_p4 = scmp.ge.s32.totalorder %s15_s17, 4  }
  0x4f   :  { %14 = sbr.rel (!%p12_p4) target bundleno = 2 (0x2), region = 66 }

// kernel: densenet_forward.27
= control target key start
LH: loop header
LB: loop body
LE: loop exit
PB: predicated region body
PF: predicated region fallthrough
CT: control target
= control target key end

     0   :  { %v229_v0 = vmov 0.0   ;;  %vm230_vm0 = vmmov 0   ;;  %s305_s2 = inlined_call_operand.vmem [shape: f32[1,128], index: 2, kind: input, shape index: {}]   ;;  %s306_s3 = inlined_call_operand.vmem [shape: f32[1,128], index: 3, kind: input, shape index: {}]   ;;  %s307_s1 = inlined_call_operand.vmem [shape: bf16[128,128], index: 1, kind: input, shape index: {}]   ;;  %s308_s0 = inlined_call_operand.vmem [shape: bf16[16,128], index: 0, kind: input, shape index: {}]   ;;  %s309_s4 = inlined_call_operand.vmem [shape: f32[1,128], index: 4, kind: input, shape index: {}]   ;;  %s310_s5 = inlined_call_operand.vmem [shape: f32[1,128], index: 5, kind: input, shape index: {}]   ;;  %s311_s6 = inlined_call_operand.vmem [shape: f32[16,128], index: 6, kind: output, shape index: {}]  }
   0x1   :  { %198 = vmatprep.subr.bf16.mxu0 %v229_v0  ;;  %v220_v1 = vld [vmem:[%s307_s1] sm:$0xff]   ;;  %214 = vmatprep.mubr.msk.bf16.mxu0 %vm230_vm0, %v229_v0  ;;  %v221_v2 = vld [vmem:[%s307_s1 + $0x8] sm:$0xff]   ;;  %v222_v3 = vld [vmem:[%s307_s1 + $0x10] sm:$0xff]  }
   0x2   :  { %199 = vmatpush3.bf16.msra.mxu0 %v220_v1  ;;  %v223_v4 = vld [vmem:[%s307_s1 + $0x18] sm:$0xff]   ;;  %v224_v5 = vld [vmem:[%s307_s1 + $0x20] sm:$0xff]   ;;  %v225_v6 = vld [vmem:[%s307_s1 + $0x28] sm:$0xff]  }
   0x3   :  { %200 = vmatprep.subr.bf16.mxu0 %v229_v0  ;;  %v226_v7 = vld [vmem:[%s307_s1 + $0x30] sm:$0xff]   ;;  %v227_v8 = vld [vmem:[%s307_s1 + $0x38] sm:$0xff]   ;;  %v228_v9 = vld [vmem:[%s308_s0] sm:$0xff]  }
   0x4   :  { %v187_v10 = vld [vmem:[%s309_s4] ss:$0 sm:$0xff] }
   0x5   :  { %v188_v12 = vld [vmem:[%s310_s5] ss:$0 sm:$0xff] }
   0x6   :  { %201 = vmatpush3.bf16.msra.mxu0 %v221_v2 }
   0x7   :  { %202 = vmatprep.subr.bf16.mxu0 %v229_v0 }
   0xa   :  { %203 = vmatpush3.bf16.msra.mxu0 %v222_v3 }
   0xb   :  { %204 = vmatprep.subr.bf16.mxu0 %v229_v0 }
   0xe   :  { %205 = vmatpush3.bf16.msra.mxu0 %v223_v4 }
   0xf   :  { %206 = vmatprep.subr.bf16.mxu0 %v229_v0 }
  0x12   :  { %207 = vmatpush3.bf16.msra.mxu0 %v224_v5 }
  0x13   :  { %208 = vmatprep.subr.bf16.mxu0 %v229_v0 }
  0x16   :  { %209 = vmatpush3.bf16.msra.mxu0 %v225_v6 }
  0x17   :  { %210 = vmatprep.subr.bf16.mxu0 %v229_v0 }
  0x1a   :  { %211 = vmatpush3.bf16.msra.mxu0 %v226_v7 }
  0x1b   :  { %212 = vmatprep.subr.bf16.mxu0 %v229_v0 }
  0x1e   :  { %213 = vmatpush3.bf16.msra.mxu0 %v227_v8 }
  0x21   :  { %215 = vmatmul.mubr.bf16.vlgmr.msra.gmra.mrb[0].mxu0 %v228_v9 }
  0xf4   :  { %v138_v11 = vpop.f32.mrb[0].mxu0 }
  0xf5   :  { %v161_v13 = vmul.f32 %v187_v10, %v138_v11  ;;  %v216_v14 = vpop.f32.mrb[1].mxu0 }
  0xf6   :  { %v141_v15 = vpop.f32.mrb[2].mxu0 }
  0xf7   :  { %v170_v16 = vadd.f32 %v188_v12, %v161_v13  ;;  %v162_v17 = vmul.f32 %v187_v10, %v141_v15  ;;  %v217_v18 = vpop.f32.mrb[3].mxu0 }
  0xf9   :  { %172 = vst [vmem:[%s311_s6] sm:$0xff] %v170_v16  ;;  %v171_v19 = vadd.f32 %v188_v12, %v162_v17 }
  0xfb   :  { %173 = vst [vmem:[%s311_s6 + $0x8] sm:$0xff] %v171_v19 }

</bundles_post_ra>
